<compile_context>
chip_gen: v7x
topology: tpu7x:2x2x1
jax: 0.10.0
libtpu: 0.0.40
codegen_flags: <defaults>
</compile_context>

<pallas_src>
import jax
import jax.numpy as jnp
from jax import lax
from jax.experimental import pallas as pl
from jax.experimental.pallas import tpu as pltpu

H = 128           # hidden / embedding dim (stand-in for 1000)
V = 256           # vocab size (stand-in for args.tokenizer_maxvocab)
NUM_LAYERS = 4    # nn.LSTM(num_layers=4)
PAD_ID = 0        # pad_token_id for both tokenizers

VMEM_SPEC = pl.BlockSpec(memory_space=pltpu.MemorySpace.VMEM)


# ---------------------------------------------------------------------------
# Fused encoder+decoder LSTM stacks (all layers, one pallas_call).
# ---------------------------------------------------------------------------
def _lstm_encdec_kernel(src_ref, tgt_ref,
                        e_wih_ref, e_whh_ref, e_b_ref,
                        d_wih_ref, d_whh_ref, d_b_ref,
                        enc_y_ref, dec_y_ref,
                        h_st, c_st, xw_buf):
    # src_ref: (Ts, B, H)  tgt_ref: (Tt, B, H)   -- time-major inputs
    # *_wih_ref/*_whh_ref: (L, H, 4H) transposed weights, gate order [i,f,o,g]
    # *_b_ref: (L, 1, 4H) fused (b_ih + b_hh), same gate order
    # enc_y_ref: (Ts, B, H)  dec_y_ref: (Tt, B, H)  -- time-major outputs
    # h_st/c_st: VMEM (L, B, H) encoder final state handed to the decoder
    # xw_buf: VMEM (maxT, B, 4H) hoisted input-projection buffer
    B = src_ref.shape[1]
    Hh = src_ref.shape[2]
    L = e_wih_ref.shape[0]

    def run_stack(x0_ref, y_ref, wih_ref, whh_ref, b_ref, is_encoder):
        T = x0_ref.shape[0]
        for l in range(L):                         # static, L == 4
            in_ref = x0_ref if l == 0 else y_ref   # prev-layer output stays in VMEM
            # ---- hoisted input projection: one big MXU matmul, bias folded ----
            x_flat = in_ref[...].reshape(T * B, Hh)          # layout-preserving (B==8)
            xw = jnp.dot(x_flat, wih_ref[l],
                         preferred_element_type=jnp.float32) + b_ref[l]
            xw_buf[pl.ds(0, T)] = xw.reshape(T, B, 4 * Hh)

            # ---- initial state: zeros for encoder, encoder final for decoder ----
            if is_encoder:
                h0 = jnp.zeros((B, Hh), jnp.float32)
                c0 = jnp.zeros((B, Hh), jnp.float32)
            else:
                h0 = h_st[l]
                c0 = c_st[l]

            # ---- serial recurrence: state carried as loop values (vregs) ----
            def step(t, carry):
                h, c = carry
                gates = xw_buf[t] + jnp.dot(h, whh_ref[l],
                                            preferred_element_type=jnp.float32)
                # gate layout [i, f, o, g]: one sigmoid over 3H, one tanh over H
                sig = jax.nn.sigmoid(gates[:, 0:3 * Hh])
                i_g = sig[:, 0 * Hh:1 * Hh]
                f_g = sig[:, 1 * Hh:2 * Hh]
                o_g = sig[:, 2 * Hh:3 * Hh]
                g_g = jnp.tanh(gates[:, 3 * Hh:4 * Hh])
                c_new = f_g * c + i_g * g_g
                h_new = o_g * jnp.tanh(c_new)
                y_ref[t] = h_new                    # full (8,128) vreg store
                return (h_new, c_new)

            h_f, c_f = lax.fori_loop(0, T, step, (h0, c0))
            if is_encoder:                          # seed the decoder, once per layer
                h_st[l] = h_f
                c_st[l] = c_f
            # NOTE: nn.LSTM dropout(0.2) between layers is identity in eval mode.

    run_stack(src_ref, enc_y_ref, e_wih_ref, e_whh_ref, e_b_ref, True)
    run_stack(tgt_ref, dec_y_ref, d_wih_ref, d_whh_ref, d_b_ref, False)


def lstm_enc_dec(src_e_tm, tgt_e_tm, params):
    Ts, B, Hh = src_e_tm.shape
    Tt = tgt_e_tm.shape[0]
    Tmax = max(Ts, Tt)
    return pl.pallas_call(
        _lstm_encdec_kernel,
        out_shape=(jax.ShapeDtypeStruct((Ts, B, Hh), jnp.float32),
                   jax.ShapeDtypeStruct((Tt, B, Hh), jnp.float32)),
        in_specs=[VMEM_SPEC] * 8,
        out_specs=(VMEM_SPEC, VMEM_SPEC),
        scratch_shapes=[pltpu.VMEM((NUM_LAYERS, B, Hh), jnp.float32),
                        pltpu.VMEM((NUM_LAYERS, B, Hh), jnp.float32),
                        pltpu.VMEM((Tmax, B, 4 * Hh), jnp.float32)],
    )(src_e_tm, tgt_e_tm,
      params['enc_wih_t'], params['enc_whh_t'], params['enc_b'],
      params['dec_wih_t'], params['dec_whh_t'], params['dec_b'])


# ---------------------------------------------------------------------------
# Attention + attn_linear + tanh kernel (eye_linear == identity -> dropped).
# ---------------------------------------------------------------------------
def _attn_kernel(dec_ref, enc_ref, mask_ref, w1_ref, w2_ref, b_ref, act_ref):
    # dec_ref: (B, Tt, H)  enc_ref: (B, Ts, H)  mask_ref: (B, 1, Ts) of {0,1}
    # act_ref: (B*Tt, H)  flat (row = b*Tt + t) -> lane-dense lm_head input
    # TODO(synk): if share_eye/random_init config changes, reinstate eye_linear
    #             as a (B*T, H) @ (H, H) matmul on dec/enc before the scores.
    B, Tt, Hh = dec_ref.shape
    dec = dec_ref[...]
    enc = enc_ref[...]
    scores = jnp.einsum('bte,bse->bts', dec, enc,
                        preferred_element_type=jnp.float32)     # (B, Tt, Ts)
    # finite mask value: all-pad rows stay NaN-free (uniform softmax, unused)
    scores = jnp.where(mask_ref[...] == 0.0, -1e30, scores)
    m = jnp.max(scores, axis=-1, keepdims=True)
    e = jnp.exp(scores - m)
    denom = jnp.sum(e, axis=-1, keepdims=True)
    p = e * pl.reciprocal(denom, approx=True)                   # softmax(dim=-1)
    attn_value = jnp.einsum('bts,bse->bte', p, enc,
                            preferred_element_type=jnp.float32)  # (B, Tt, H)
    # attn_linear(cat([attn_value, dec], -1)) split into two flat 2-D matmuls
    av_flat = attn_value.reshape(B * Tt, Hh)
    dec_flat = dec.reshape(B * Tt, Hh)
    pre = (jnp.dot(av_flat, w1_ref[...], preferred_element_type=jnp.float32)
           + jnp.dot(dec_flat, w2_ref[...], preferred_element_type=jnp.float32)
           + b_ref[...])
    act_ref[...] = jnp.tanh(pre)


def attention_block(dec_bf, enc_bf, mask, params):
    B, Tt, Hh = dec_bf.shape
    return pl.pallas_call(
        _attn_kernel,
        out_shape=jax.ShapeDtypeStruct((B * Tt, Hh), jnp.float32),
        in_specs=[VMEM_SPEC] * 6,
        out_specs=VMEM_SPEC,
    )(dec_bf, enc_bf, mask,
      params['wattn1_t'], params['wattn2_t'], params['battn'])


# ---------------------------------------------------------------------------
# tgt_lm_head: vocab-tiled, lane-dense, vocab axis parallel across cores.
# ---------------------------------------------------------------------------
def _lm_head_kernel(act_ref, w_ref, b_ref, out_ref):
    out_ref[...] = (jnp.dot(act_ref[...], w_ref[...],
                            preferred_element_type=jnp.float32) + b_ref[...])


def lm_head(act, whead_t, bhead, *, tile_v=128):
    M, Hh = act.shape
    Vv = whead_t.shape[1]
    tv = min(tile_v, Vv)
    return pl.pallas_call(
        _lm_head_kernel,
        out_shape=jax.ShapeDtypeStruct((M, Vv), jnp.float32),
        grid=(pl.cdiv(Vv, tv),),
        in_specs=[pl.BlockSpec((M, Hh), lambda j: (0, 0)),
                  pl.BlockSpec((Hh, tv), lambda j: (0, j)),
                  pl.BlockSpec((1, tv), lambda j: (0, j))],
        out_specs=pl.BlockSpec((M, tv), lambda j: (0, j)),
        compiler_params=pltpu.CompilerParams(
            dimension_semantics=("parallel",)),
    )(act, whead_t, bhead)


# ---------------------------------------------------------------------------
# Parameters (deterministic synthetic init) and full forward.
# ---------------------------------------------------------------------------
def init_params(key):
    ks = jax.random.split(key, 8)
    scale = 1.0 / jnp.sqrt(jnp.float32(H))

    def u(k, shape):
        return jax.random.uniform(k, shape, jnp.float32, -scale, scale)

    # nn.Embedding with padding_idx -> pad row is zero
    src_emb = jax.random.normal(ks[0], (V, H), jnp.float32).at[PAD_ID].set(0.0)
    tgt_emb = jax.random.normal(ks[1], (V, H), jnp.float32).at[PAD_ID].set(0.0)

    # gate permutation: PyTorch layout [i, f, g, o]  ->  kernel layout [i, f, o, g]
    perm = jnp.concatenate([jnp.arange(0, 2 * H),
                            jnp.arange(3 * H, 4 * H),
                            jnp.arange(2 * H, 3 * H)])

    def lstm_params(k):
        kk = jax.random.split(k, NUM_LAYERS * 4)
        wih_l, whh_l, b_l = [], [], []
        for l in range(NUM_LAYERS):
            wih = u(kk[4 * l + 0], (4 * H, H))[perm]   # (4H, H), gates reordered
            whh = u(kk[4 * l + 1], (4 * H, H))[perm]
            bih = u(kk[4 * l + 2], (4 * H,))[perm]
            bhh = u(kk[4 * l + 3], (4 * H,))[perm]
            wih_l.append(wih.T)                        # (H, 4H)
            whh_l.append(whh.T)                        # (H, 4H)
            b_l.append((bih + bhh)[None, :])           # (1, 4H) fused bias
        return (jnp.stack(wih_l), jnp.stack(whh_l), jnp.stack(b_l))

    enc_wih_t, enc_whh_t, enc_b = lstm_params(ks[2])
    dec_wih_t, dec_whh_t, dec_b = lstm_params(ks[3])

    # eye_linear: share_eye + random_init=False -> identity, dropped from kernel.
    wattn = u(ks[4], (H, 2 * H))                # attn_linear: Linear(2H, H) weight (out,in)
    battn = u(ks[5], (H,))
    whead = u(ks[6], (V, H))                    # tgt_lm_head: Linear(H, V)
    bhead = u(ks[7], (V,))

    return dict(
        src_emb=src_emb, tgt_emb=tgt_emb,
        enc_wih_t=enc_wih_t, enc_whh_t=enc_whh_t, enc_b=enc_b,
        dec_wih_t=dec_wih_t, dec_whh_t=dec_whh_t, dec_b=dec_b,
        wattn1_t=wattn[:, :H].T,   # acts on attn_value
        wattn2_t=wattn[:, H:].T,   # acts on dec_out
        battn=battn[None, :],
        whead_t=whead.T,
        bhead=bhead[None, :],
    )


def attention_model_forward(params, src, tgt):
    B, Ts = src.shape
    Tt = tgt.shape[1]

    # Embedding gathers directly in time-major layout (no activation transpose).
    src_e = params['src_emb'][src.T]             # (Ts, B, H)
    tgt_e = params['tgt_emb'][tgt.T]             # (Tt, B, H)

    # Fused 4-layer encoder + 4-layer decoder LSTM (single pallas_call).
    enc_y, dec_y = lstm_enc_dec(src_e, tgt_e, params)       # time-major

    # Small layout fix-up for the batched attention einsums.
    # TODO(synk): at real sizes fold this into the attention kernel's layout.
    enc_bf = jnp.transpose(enc_y, (1, 0, 2))     # (B, Ts, H)
    dec_bf = jnp.transpose(dec_y, (1, 0, 2))     # (B, Tt, H)

    mask = jnp.where(src == PAD_ID, 0.0, 1.0).astype(jnp.float32)[:, None, :]

    act = attention_block(dec_bf, enc_bf, mask, params)     # (B*Tt, H)
    logits_flat = lm_head(act, params['whead_t'], params['bhead'])  # (B*Tt, V)
    return logits_flat.reshape(B, Tt, V)


# TODO(synk): generate / generate_beam_search (autoregressive + beam-search
#             host-side control flow) are not translated; forward() only.

if __name__ == "__main__":
    params = init_params(jax.random.PRNGKey(42))

    key = jax.random.PRNGKey(0)
    skey, tkey = jax.random.split(key)
    B, Ts, Tt = 8, 16, 8
    src = jax.random.randint(skey, (B, Ts), 1, V)   # non-pad tokens
    src = src.at[:, -4:].set(PAD_ID)                # trailing padding on src
    tgt = jax.random.randint(tkey, (B, Tt), 1, V)

    logits = attention_model_forward(params, src, tgt)
    logits = jax.block_until_ready(logits)

    assert logits.shape == (B, Tt, V), logits.shape
    assert bool(jnp.isfinite(logits).all())
    print("KERNEL_OK")
</pallas_src>

<mosaic_0001>
module attributes {stable_mosaic.version = 11 : i64} {
  func.func @_lstm_encdec_kernel(%arg0: memref<16x8x128xf32, #tpu.memory_space<vmem>>, %arg1: memref<8x8x128xf32, #tpu.memory_space<vmem>>, %arg2: memref<4x128x512xf32, #tpu.memory_space<vmem>>, %arg3: memref<4x128x512xf32, #tpu.memory_space<vmem>>, %arg4: memref<4x1x512xf32, #tpu.memory_space<vmem>>, %arg5: memref<4x128x512xf32, #tpu.memory_space<vmem>>, %arg6: memref<4x128x512xf32, #tpu.memory_space<vmem>>, %arg7: memref<4x1x512xf32, #tpu.memory_space<vmem>>, %arg8: memref<16x8x128xf32, #tpu.memory_space<vmem>>, %arg9: memref<8x8x128xf32, #tpu.memory_space<vmem>>, %arg10: memref<4x8x128xf32, #tpu.memory_space<vmem>>, %arg11: memref<4x8x128xf32, #tpu.memory_space<vmem>>, %arg12: memref<16x8x512xf32, #tpu.memory_space<vmem>>) attributes {dimension_semantics = [], scalar_prefetch = 0 : i64, scratch_operands = 3 : i64, tpu.core_type = #tpu.core_type<tc>} {
    %c0 = arith.constant 0 : index
    %c0_0 = arith.constant 0 : index
    %c0_1 = arith.constant 0 : index
    %0 = vector.load %arg0[%c0, %c0_0, %c0_1] : memref<16x8x128xf32, #tpu.memory_space<vmem>>, vector<16x8x128xf32>
    %1 = vector.shape_cast %0 : vector<16x8x128xf32> to vector<128x128xf32>
    %c0_2 = arith.constant 0 : index
    %c0_3 = arith.constant 0 : index
    %c0_4 = arith.constant 0 : index
    %2 = vector.load %arg2[%c0_2, %c0_3, %c0_4] : memref<4x128x512xf32, #tpu.memory_space<vmem>>, vector<1x128x512xf32>
    %3 = vector.shape_cast %2 : vector<1x128x512xf32> to vector<128x512xf32>
    %cst = arith.constant dense<0.000000e+00> : vector<128x512xf32>
    %4 = tpu.matmul %1, %3, %cst {dimension_numbers = #tpu.dot_dimension_numbers<[1], [0], [0], [1], [0, 0, 1, 1], [], []>} : vector<128x128xf32>, vector<128x512xf32>, vector<128x512xf32> -> vector<128x512xf32>
    %c0_5 = arith.constant 0 : index
    %c0_6 = arith.constant 0 : index
    %c0_7 = arith.constant 0 : index
    %5 = vector.load %arg4[%c0_5, %c0_6, %c0_7] : memref<4x1x512xf32, #tpu.memory_space<vmem>>, vector<1x1x512xf32>
    %6 = vector.shape_cast %5 : vector<1x1x512xf32> to vector<1x512xf32>
    %7 = vector.broadcast %6 : vector<1x512xf32> to vector<128x512xf32>
    %8 = arith.addf %4, %7 : vector<128x512xf32>
    %9 = vector.shape_cast %8 : vector<128x512xf32> to vector<16x8x512xf32>
    %c0_8 = arith.constant 0 : index
    %c0_9 = arith.constant 0 : index
    %c0_10 = arith.constant 0 : index
    %10 = vector.load %arg12[%c0_8, %c0_9, %c0_10] : memref<16x8x512xf32, #tpu.memory_space<vmem>>, vector<16x8x512xf32>
    tpu.vector_store %arg12[%c0_8, %c0_9, %c0_10], %9 {strides = array<i32>} : memref<16x8x512xf32, #tpu.memory_space<vmem>>, vector<16x8x512xf32>,
    %cst_11 = arith.constant 0.000000e+00 : f32
    %11 = vector.broadcast %cst_11 : f32 to vector<8x128xf32>
    %cst_12 = arith.constant 0.000000e+00 : f32
    %12 = vector.broadcast %cst_12 : f32 to vector<8x128xf32>
    %c0_i32 = arith.constant 0 : i32
    %c16_i32 = arith.constant 16 : i32
    %13 = arith.addi %c0_i32, %c16_i32 : i32
    %c1_i32 = arith.constant 1 : i32
    %14:2 = scf.for %arg13 = %c0_i32 to %13 step %c1_i32 iter_args(%arg14 = %11, %arg15 = %12) -> (vector<8x128xf32>, vector<8x128xf32>)  : i32 {
      %152 = arith.index_cast %arg13 : i32 to index
      %c0_183 = arith.constant 0 : index
      %c0_184 = arith.constant 0 : index
      %153 = vector.load %arg12[%152, %c0_183, %c0_184] : memref<16x8x512xf32, #tpu.memory_space<vmem>>, vector<1x8x512xf32>
      %154 = vector.shape_cast %153 : vector<1x8x512xf32> to vector<8x512xf32>
      %c0_185 = arith.constant 0 : index
      %c0_186 = arith.constant 0 : index
      %c0_187 = arith.constant 0 : index
      %155 = vector.load %arg3[%c0_185, %c0_186, %c0_187] : memref<4x128x512xf32, #tpu.memory_space<vmem>>, vector<1x128x512xf32>
      %156 = vector.shape_cast %155 : vector<1x128x512xf32> to vector<128x512xf32>
      %cst_188 = arith.constant dense<0.000000e+00> : vector<8x512xf32>
      %157 = tpu.matmul %arg14, %156, %cst_188 {dimension_numbers = #tpu.dot_dimension_numbers<[1], [0], [0], [1], [0, 0, 1, 1], [], []>} : vector<8x128xf32>, vector<128x512xf32>, vector<8x512xf32> -> vector<8x512xf32>
      %158 = arith.addf %154, %157 : vector<8x512xf32>
      %159 = vector.extract_strided_slice %158 {offsets = [0, 0], sizes = [8, 384], strides = [1, 1]} : vector<8x512xf32> to vector<8x384xf32>
      %160 = arith.negf %159 : vector<8x384xf32>
      %161 = math.exp %160 : vector<8x384xf32>
      %cst_189 = arith.constant 1.000000e+00 : f32
      %162 = vector.broadcast %cst_189 : f32 to vector<8x384xf32>
      %163 = arith.addf %162, %161 : vector<8x384xf32>
      %164 = arith.divf %162, %163 : vector<8x384xf32>
      %165 = vector.extract_strided_slice %164 {offsets = [0, 0], sizes = [8, 128], strides = [1, 1]} : vector<8x384xf32> to vector<8x128xf32>
      %166 = vector.extract_strided_slice %164 {offsets = [0, 128], sizes = [8, 128], strides = [1, 1]} : vector<8x384xf32> to vector<8x128xf32>
      %167 = vector.extract_strided_slice %164 {offsets = [0, 256], sizes = [8, 128], strides = [1, 1]} : vector<8x384xf32> to vector<8x128xf32>
      %168 = vector.extract_strided_slice %158 {offsets = [0, 384], sizes = [8, 128], strides = [1, 1]} : vector<8x512xf32> to vector<8x128xf32>
      %169 = math.tanh %168 : vector<8x128xf32>
      %170 = arith.mulf %166, %arg15 : vector<8x128xf32>
      %171 = arith.mulf %165, %169 : vector<8x128xf32>
      %172 = arith.addf %170, %171 : vector<8x128xf32>
      %173 = math.tanh %172 : vector<8x128xf32>
      %174 = arith.mulf %167, %173 : vector<8x128xf32>
      %175 = arith.index_cast %arg13 : i32 to index
      %c0_190 = arith.constant 0 : index
      %c0_191 = arith.constant 0 : index
      %176 = vector.load %arg8[%175, %c0_190, %c0_191] : memref<16x8x128xf32, #tpu.memory_space<vmem>>, vector<1x8x128xf32>
      %177 = vector.shape_cast %176 : vector<1x8x128xf32> to vector<8x128xf32>
      %178 = vector.shape_cast %174 : vector<8x128xf32> to vector<1x8x128xf32>
      tpu.vector_store %arg8[%175, %c0_190, %c0_191], %178 {strides = array<i32>} : memref<16x8x128xf32, #tpu.memory_space<vmem>>, vector<1x8x128xf32>,
      scf.yield %174, %172 : vector<8x128xf32>, vector<8x128xf32>
    }
    %c16_i32_13 = arith.constant 16 : i32
    %c0_14 = arith.constant 0 : index
    %c0_15 = arith.constant 0 : index
    %c0_16 = arith.constant 0 : index
    %15 = vector.load %arg10[%c0_14, %c0_15, %c0_16] : memref<4x8x128xf32, #tpu.memory_space<vmem>>, vector<1x8x128xf32>
    %16 = vector.shape_cast %15 : vector<1x8x128xf32> to vector<8x128xf32>
    %17 = vector.shape_cast %14#0 : vector<8x128xf32> to vector<1x8x128xf32>
    tpu.vector_store %arg10[%c0_14, %c0_15, %c0_16], %17 {strides = array<i32>} : memref<4x8x128xf32, #tpu.memory_space<vmem>>, vector<1x8x128xf32>,
    %c0_17 = arith.constant 0 : index
    %c0_18 = arith.constant 0 : index
    %c0_19 = arith.constant 0 : index
    %18 = vector.load %arg11[%c0_17, %c0_18, %c0_19] : memref<4x8x128xf32, #tpu.memory_space<vmem>>, vector<1x8x128xf32>
    %19 = vector.shape_cast %18 : vector<1x8x128xf32> to vector<8x128xf32>
    %20 = vector.shape_cast %14#1 : vector<8x128xf32> to vector<1x8x128xf32>
    tpu.vector_store %arg11[%c0_17, %c0_18, %c0_19], %20 {strides = array<i32>} : memref<4x8x128xf32, #tpu.memory_space<vmem>>, vector<1x8x128xf32>,
    %c0_20 = arith.constant 0 : index
    %c0_21 = arith.constant 0 : index
    %c0_22 = arith.constant 0 : index
    %21 = vector.load %arg8[%c0_20, %c0_21, %c0_22] : memref<16x8x128xf32, #tpu.memory_space<vmem>>, vector<16x8x128xf32>
    %22 = vector.shape_cast %21 : vector<16x8x128xf32> to vector<128x128xf32>
    %c1 = arith.constant 1 : index
    %c0_23 = arith.constant 0 : index
    %c0_24 = arith.constant 0 : index
    %23 = vector.load %arg2[%c1, %c0_23, %c0_24] : memref<4x128x512xf32, #tpu.memory_space<vmem>>, vector<1x128x512xf32>
    %24 = vector.shape_cast %23 : vector<1x128x512xf32> to vector<128x512xf32>
    %cst_25 = arith.constant dense<0.000000e+00> : vector<128x512xf32>
    %25 = tpu.matmul %22, %24, %cst_25 {dimension_numbers = #tpu.dot_dimension_numbers<[1], [0], [0], [1], [0, 0, 1, 1], [], []>} : vector<128x128xf32>, vector<128x512xf32>, vector<128x512xf32> -> vector<128x512xf32>
    %c1_26 = arith.constant 1 : index
    %c0_27 = arith.constant 0 : index
    %c0_28 = arith.constant 0 : index
    %26 = vector.load %arg4[%c1_26, %c0_27, %c0_28] : memref<4x1x512xf32, #tpu.memory_space<vmem>>, vector<1x1x512xf32>
    %27 = vector.shape_cast %26 : vector<1x1x512xf32> to vector<1x512xf32>
    %28 = vector.broadcast %27 : vector<1x512xf32> to vector<128x512xf32>
    %29 = arith.addf %25, %28 : vector<128x512xf32>
    %30 = vector.shape_cast %29 : vector<128x512xf32> to vector<16x8x512xf32>
    %c0_29 = arith.constant 0 : index
    %c0_30 = arith.constant 0 : index
    %c0_31 = arith.constant 0 : index
    %31 = vector.load %arg12[%c0_29, %c0_30, %c0_31] : memref<16x8x512xf32, #tpu.memory_space<vmem>>, vector<16x8x512xf32>
    tpu.vector_store %arg12[%c0_29, %c0_30, %c0_31], %30 {strides = array<i32>} : memref<16x8x512xf32, #tpu.memory_space<vmem>>, vector<16x8x512xf32>,
    %cst_32 = arith.constant 0.000000e+00 : f32
    %32 = vector.broadcast %cst_32 : f32 to vector<8x128xf32>
    %cst_33 = arith.constant 0.000000e+00 : f32
    %33 = vector.broadcast %cst_33 : f32 to vector<8x128xf32>
    %c0_i32_34 = arith.constant 0 : i32
    %c16_i32_35 = arith.constant 16 : i32
    %34 = arith.addi %c0_i32_34, %c16_i32_35 : i32
    %c1_i32_36 = arith.constant 1 : i32
    %35:2 = scf.for %arg13 = %c0_i32_34 to %34 step %c1_i32_36 iter_args(%arg14 = %32, %arg15 = %33) -> (vector<8x128xf32>, vector<8x128xf32>)  : i32 {
      %152 = arith.index_cast %arg13 : i32 to index
      %c0_183 = arith.constant 0 : index
      %c0_184 = arith.constant 0 : index
      %153 = vector.load %arg12[%152, %c0_183, %c0_184] : memref<16x8x512xf32, #tpu.memory_space<vmem>>, vector<1x8x512xf32>
      %154 = vector.shape_cast %153 : vector<1x8x512xf32> to vector<8x512xf32>
      %c1_185 = arith.constant 1 : index
      %c0_186 = arith.constant 0 : index
      %c0_187 = arith.constant 0 : index
      %155 = vector.load %arg3[%c1_185, %c0_186, %c0_187] : memref<4x128x512xf32, #tpu.memory_space<vmem>>, vector<1x128x512xf32>
      %156 = vector.shape_cast %155 : vector<1x128x512xf32> to vector<128x512xf32>
      %cst_188 = arith.constant dense<0.000000e+00> : vector<8x512xf32>
      %157 = tpu.matmul %arg14, %156, %cst_188 {dimension_numbers = #tpu.dot_dimension_numbers<[1], [0], [0], [1], [0, 0, 1, 1], [], []>} : vector<8x128xf32>, vector<128x512xf32>, vector<8x512xf32> -> vector<8x512xf32>
      %158 = arith.addf %154, %157 : vector<8x512xf32>
      %159 = vector.extract_strided_slice %158 {offsets = [0, 0], sizes = [8, 384], strides = [1, 1]} : vector<8x512xf32> to vector<8x384xf32>
      %160 = arith.negf %159 : vector<8x384xf32>
      %161 = math.exp %160 : vector<8x384xf32>
      %cst_189 = arith.constant 1.000000e+00 : f32
      %162 = vector.broadcast %cst_189 : f32 to vector<8x384xf32>
      %163 = arith.addf %162, %161 : vector<8x384xf32>
      %164 = arith.divf %162, %163 : vector<8x384xf32>
      %165 = vector.extract_strided_slice %164 {offsets = [0, 0], sizes = [8, 128], strides = [1, 1]} : vector<8x384xf32> to vector<8x128xf32>
      %166 = vector.extract_strided_slice %164 {offsets = [0, 128], sizes = [8, 128], strides = [1, 1]} : vector<8x384xf32> to vector<8x128xf32>
      %167 = vector.extract_strided_slice %164 {offsets = [0, 256], sizes = [8, 128], strides = [1, 1]} : vector<8x384xf32> to vector<8x128xf32>
      %168 = vector.extract_strided_slice %158 {offsets = [0, 384], sizes = [8, 128], strides = [1, 1]} : vector<8x512xf32> to vector<8x128xf32>
      %169 = math.tanh %168 : vector<8x128xf32>
      %170 = arith.mulf %166, %arg15 : vector<8x128xf32>
      %171 = arith.mulf %165, %169 : vector<8x128xf32>
      %172 = arith.addf %170, %171 : vector<8x128xf32>
      %173 = math.tanh %172 : vector<8x128xf32>
      %174 = arith.mulf %167, %173 : vector<8x128xf32>
      %175 = arith.index_cast %arg13 : i32 to index
      %c0_190 = arith.constant 0 : index
      %c0_191 = arith.constant 0 : index
      %176 = vector.load %arg8[%175, %c0_190, %c0_191] : memref<16x8x128xf32, #tpu.memory_space<vmem>>, vector<1x8x128xf32>
      %177 = vector.shape_cast %176 : vector<1x8x128xf32> to vector<8x128xf32>
      %178 = vector.shape_cast %174 : vector<8x128xf32> to vector<1x8x128xf32>
      tpu.vector_store %arg8[%175, %c0_190, %c0_191], %178 {strides = array<i32>} : memref<16x8x128xf32, #tpu.memory_space<vmem>>, vector<1x8x128xf32>,
      scf.yield %174, %172 : vector<8x128xf32>, vector<8x128xf32>
    }
    %c16_i32_37 = arith.constant 16 : i32
    %c1_38 = arith.constant 1 : index
    %c0_39 = arith.constant 0 : index
    %c0_40 = arith.constant 0 : index
    %36 = vector.load %arg10[%c1_38, %c0_39, %c0_40] : memref<4x8x128xf32, #tpu.memory_space<vmem>>, vector<1x8x128xf32>
    %37 = vector.shape_cast %36 : vector<1x8x128xf32> to vector<8x128xf32>
    %38 = vector.shape_cast %35#0 : vector<8x128xf32> to vector<1x8x128xf32>
    tpu.vector_store %arg10[%c1_38, %c0_39, %c0_40], %38 {strides = array<i32>} : memref<4x8x128xf32, #tpu.memory_space<vmem>>, vector<1x8x128xf32>,
    %c1_41 = arith.constant 1 : index
    %c0_42 = arith.constant 0 : index
    %c0_43 = arith.constant 0 : index
    %39 = vector.load %arg11[%c1_41, %c0_42, %c0_43] : memref<4x8x128xf32, #tpu.memory_space<vmem>>, vector<1x8x128xf32>
    %40 = vector.shape_cast %39 : vector<1x8x128xf32> to vector<8x128xf32>
    %41 = vector.shape_cast %35#1 : vector<8x128xf32> to vector<1x8x128xf32>
    tpu.vector_store %arg11[%c1_41, %c0_42, %c0_43], %41 {strides = array<i32>} : memref<4x8x128xf32, #tpu.memory_space<vmem>>, vector<1x8x128xf32>,
    %c0_44 = arith.constant 0 : index
    %c0_45 = arith.constant 0 : index
    %c0_46 = arith.constant 0 : index
    %42 = vector.load %arg8[%c0_44, %c0_45, %c0_46] : memref<16x8x128xf32, #tpu.memory_space<vmem>>, vector<16x8x128xf32>
    %43 = vector.shape_cast %42 : vector<16x8x128xf32> to vector<128x128xf32>
    %c2 = arith.constant 2 : index
    %c0_47 = arith.constant 0 : index
    %c0_48 = arith.constant 0 : index
    %44 = vector.load %arg2[%c2, %c0_47, %c0_48] : memref<4x128x512xf32, #tpu.memory_space<vmem>>, vector<1x128x512xf32>
    %45 = vector.shape_cast %44 : vector<1x128x512xf32> to vector<128x512xf32>
    %cst_49 = arith.constant dense<0.000000e+00> : vector<128x512xf32>
    %46 = tpu.matmul %43, %45, %cst_49 {dimension_numbers = #tpu.dot_dimension_numbers<[1], [0], [0], [1], [0, 0, 1, 1], [], []>} : vector<128x128xf32>, vector<128x512xf32>, vector<128x512xf32> -> vector<128x512xf32>
    %c2_50 = arith.constant 2 : index
    %c0_51 = arith.constant 0 : index
    %c0_52 = arith.constant 0 : index
    %47 = vector.load %arg4[%c2_50, %c0_51, %c0_52] : memref<4x1x512xf32, #tpu.memory_space<vmem>>, vector<1x1x512xf32>
    %48 = vector.shape_cast %47 : vector<1x1x512xf32> to vector<1x512xf32>
    %49 = vector.broadcast %48 : vector<1x512xf32> to vector<128x512xf32>
    %50 = arith.addf %46, %49 : vector<128x512xf32>
    %51 = vector.shape_cast %50 : vector<128x512xf32> to vector<16x8x512xf32>
    %c0_53 = arith.constant 0 : index
    %c0_54 = arith.constant 0 : index
    %c0_55 = arith.constant 0 : index
    %52 = vector.load %arg12[%c0_53, %c0_54, %c0_55] : memref<16x8x512xf32, #tpu.memory_space<vmem>>, vector<16x8x512xf32>
    tpu.vector_store %arg12[%c0_53, %c0_54, %c0_55], %51 {strides = array<i32>} : memref<16x8x512xf32, #tpu.memory_space<vmem>>, vector<16x8x512xf32>,
    %cst_56 = arith.constant 0.000000e+00 : f32
    %53 = vector.broadcast %cst_56 : f32 to vector<8x128xf32>
    %cst_57 = arith.constant 0.000000e+00 : f32
    %54 = vector.broadcast %cst_57 : f32 to vector<8x128xf32>
    %c0_i32_58 = arith.constant 0 : i32
    %c16_i32_59 = arith.constant 16 : i32
    %55 = arith.addi %c0_i32_58, %c16_i32_59 : i32
    %c1_i32_60 = arith.constant 1 : i32
    %56:2 = scf.for %arg13 = %c0_i32_58 to %55 step %c1_i32_60 iter_args(%arg14 = %53, %arg15 = %54) -> (vector<8x128xf32>, vector<8x128xf32>)  : i32 {
      %152 = arith.index_cast %arg13 : i32 to index
      %c0_183 = arith.constant 0 : index
      %c0_184 = arith.constant 0 : index
      %153 = vector.load %arg12[%152, %c0_183, %c0_184] : memref<16x8x512xf32, #tpu.memory_space<vmem>>, vector<1x8x512xf32>
      %154 = vector.shape_cast %153 : vector<1x8x512xf32> to vector<8x512xf32>
      %c2_185 = arith.constant 2 : index
      %c0_186 = arith.constant 0 : index
      %c0_187 = arith.constant 0 : index
      %155 = vector.load %arg3[%c2_185, %c0_186, %c0_187] : memref<4x128x512xf32, #tpu.memory_space<vmem>>, vector<1x128x512xf32>
      %156 = vector.shape_cast %155 : vector<1x128x512xf32> to vector<128x512xf32>
      %cst_188 = arith.constant dense<0.000000e+00> : vector<8x512xf32>
      %157 = tpu.matmul %arg14, %156, %cst_188 {dimension_numbers = #tpu.dot_dimension_numbers<[1], [0], [0], [1], [0, 0, 1, 1], [], []>} : vector<8x128xf32>, vector<128x512xf32>, vector<8x512xf32> -> vector<8x512xf32>
      %158 = arith.addf %154, %157 : vector<8x512xf32>
      %159 = vector.extract_strided_slice %158 {offsets = [0, 0], sizes = [8, 384], strides = [1, 1]} : vector<8x512xf32> to vector<8x384xf32>
      %160 = arith.negf %159 : vector<8x384xf32>
      %161 = math.exp %160 : vector<8x384xf32>
      %cst_189 = arith.constant 1.000000e+00 : f32
      %162 = vector.broadcast %cst_189 : f32 to vector<8x384xf32>
      %163 = arith.addf %162, %161 : vector<8x384xf32>
      %164 = arith.divf %162, %163 : vector<8x384xf32>
      %165 = vector.extract_strided_slice %164 {offsets = [0, 0], sizes = [8, 128], strides = [1, 1]} : vector<8x384xf32> to vector<8x128xf32>
      %166 = vector.extract_strided_slice %164 {offsets = [0, 128], sizes = [8, 128], strides = [1, 1]} : vector<8x384xf32> to vector<8x128xf32>
      %167 = vector.extract_strided_slice %164 {offsets = [0, 256], sizes = [8, 128], strides = [1, 1]} : vector<8x384xf32> to vector<8x128xf32>
      %168 = vector.extract_strided_slice %158 {offsets = [0, 384], sizes = [8, 128], strides = [1, 1]} : vector<8x512xf32> to vector<8x128xf32>
      %169 = math.tanh %168 : vector<8x128xf32>
      %170 = arith.mulf %166, %arg15 : vector<8x128xf32>
      %171 = arith.mulf %165, %169 : vector<8x128xf32>
      %172 = arith.addf %170, %171 : vector<8x128xf32>
      %173 = math.tanh %172 : vector<8x128xf32>
      %174 = arith.mulf %167, %173 : vector<8x128xf32>
      %175 = arith.index_cast %arg13 : i32 to index
      %c0_190 = arith.constant 0 : index
      %c0_191 = arith.constant 0 : index
      %176 = vector.load %arg8[%175, %c0_190, %c0_191] : memref<16x8x128xf32, #tpu.memory_space<vmem>>, vector<1x8x128xf32>
      %177 = vector.shape_cast %176 : vector<1x8x128xf32> to vector<8x128xf32>
      %178 = vector.shape_cast %174 : vector<8x128xf32> to vector<1x8x128xf32>
      tpu.vector_store %arg8[%175, %c0_190, %c0_191], %178 {strides = array<i32>} : memref<16x8x128xf32, #tpu.memory_space<vmem>>, vector<1x8x128xf32>,
      scf.yield %174, %172 : vector<8x128xf32>, vector<8x128xf32>
    }
    %c16_i32_61 = arith.constant 16 : i32
    %c2_62 = arith.constant 2 : index
    %c0_63 = arith.constant 0 : index
    %c0_64 = arith.constant 0 : index
    %57 = vector.load %arg10[%c2_62, %c0_63, %c0_64] : memref<4x8x128xf32, #tpu.memory_space<vmem>>, vector<1x8x128xf32>
    %58 = vector.shape_cast %57 : vector<1x8x128xf32> to vector<8x128xf32>
    %59 = vector.shape_cast %56#0 : vector<8x128xf32> to vector<1x8x128xf32>
    tpu.vector_store %arg10[%c2_62, %c0_63, %c0_64], %59 {strides = array<i32>} : memref<4x8x128xf32, #tpu.memory_space<vmem>>, vector<1x8x128xf32>,
    %c2_65 = arith.constant 2 : index
    %c0_66 = arith.constant 0 : index
    %c0_67 = arith.constant 0 : index
    %60 = vector.load %arg11[%c2_65, %c0_66, %c0_67] : memref<4x8x128xf32, #tpu.memory_space<vmem>>, vector<1x8x128xf32>
    %61 = vector.shape_cast %60 : vector<1x8x128xf32> to vector<8x128xf32>
    %62 = vector.shape_cast %56#1 : vector<8x128xf32> to vector<1x8x128xf32>
    tpu.vector_store %arg11[%c2_65, %c0_66, %c0_67], %62 {strides = array<i32>} : memref<4x8x128xf32, #tpu.memory_space<vmem>>, vector<1x8x128xf32>,
    %c0_68 = arith.constant 0 : index
    %c0_69 = arith.constant 0 : index
    %c0_70 = arith.constant 0 : index
    %63 = vector.load %arg8[%c0_68, %c0_69, %c0_70] : memref<16x8x128xf32, #tpu.memory_space<vmem>>, vector<16x8x128xf32>
    %64 = vector.shape_cast %63 : vector<16x8x128xf32> to vector<128x128xf32>
    %c3 = arith.constant 3 : index
    %c0_71 = arith.constant 0 : index
    %c0_72 = arith.constant 0 : index
    %65 = vector.load %arg2[%c3, %c0_71, %c0_72] : memref<4x128x512xf32, #tpu.memory_space<vmem>>, vector<1x128x512xf32>
    %66 = vector.shape_cast %65 : vector<1x128x512xf32> to vector<128x512xf32>
    %cst_73 = arith.constant dense<0.000000e+00> : vector<128x512xf32>
    %67 = tpu.matmul %64, %66, %cst_73 {dimension_numbers = #tpu.dot_dimension_numbers<[1], [0], [0], [1], [0, 0, 1, 1], [], []>} : vector<128x128xf32>, vector<128x512xf32>, vector<128x512xf32> -> vector<128x512xf32>
    %c3_74 = arith.constant 3 : index
    %c0_75 = arith.constant 0 : index
    %c0_76 = arith.constant 0 : index
    %68 = vector.load %arg4[%c3_74, %c0_75, %c0_76] : memref<4x1x512xf32, #tpu.memory_space<vmem>>, vector<1x1x512xf32>
    %69 = vector.shape_cast %68 : vector<1x1x512xf32> to vector<1x512xf32>
    %70 = vector.broadcast %69 : vector<1x512xf32> to vector<128x512xf32>
    %71 = arith.addf %67, %70 : vector<128x512xf32>
    %72 = vector.shape_cast %71 : vector<128x512xf32> to vector<16x8x512xf32>
    %c0_77 = arith.constant 0 : index
    %c0_78 = arith.constant 0 : index
    %c0_79 = arith.constant 0 : index
    %73 = vector.load %arg12[%c0_77, %c0_78, %c0_79] : memref<16x8x512xf32, #tpu.memory_space<vmem>>, vector<16x8x512xf32>
    tpu.vector_store %arg12[%c0_77, %c0_78, %c0_79], %72 {strides = array<i32>} : memref<16x8x512xf32, #tpu.memory_space<vmem>>, vector<16x8x512xf32>,
    %cst_80 = arith.constant 0.000000e+00 : f32
    %74 = vector.broadcast %cst_80 : f32 to vector<8x128xf32>
    %cst_81 = arith.constant 0.000000e+00 : f32
    %75 = vector.broadcast %cst_81 : f32 to vector<8x128xf32>
    %c0_i32_82 = arith.constant 0 : i32
    %c16_i32_83 = arith.constant 16 : i32
    %76 = arith.addi %c0_i32_82, %c16_i32_83 : i32
    %c1_i32_84 = arith.constant 1 : i32
    %77:2 = scf.for %arg13 = %c0_i32_82 to %76 step %c1_i32_84 iter_args(%arg14 = %74, %arg15 = %75) -> (vector<8x128xf32>, vector<8x128xf32>)  : i32 {
      %152 = arith.index_cast %arg13 : i32 to index
      %c0_183 = arith.constant 0 : index
      %c0_184 = arith.constant 0 : index
      %153 = vector.load %arg12[%152, %c0_183, %c0_184] : memref<16x8x512xf32, #tpu.memory_space<vmem>>, vector<1x8x512xf32>
      %154 = vector.shape_cast %153 : vector<1x8x512xf32> to vector<8x512xf32>
      %c3_185 = arith.constant 3 : index
      %c0_186 = arith.constant 0 : index
      %c0_187 = arith.constant 0 : index
      %155 = vector.load %arg3[%c3_185, %c0_186, %c0_187] : memref<4x128x512xf32, #tpu.memory_space<vmem>>, vector<1x128x512xf32>
      %156 = vector.shape_cast %155 : vector<1x128x512xf32> to vector<128x512xf32>
      %cst_188 = arith.constant dense<0.000000e+00> : vector<8x512xf32>
      %157 = tpu.matmul %arg14, %156, %cst_188 {dimension_numbers = #tpu.dot_dimension_numbers<[1], [0], [0], [1], [0, 0, 1, 1], [], []>} : vector<8x128xf32>, vector<128x512xf32>, vector<8x512xf32> -> vector<8x512xf32>
      %158 = arith.addf %154, %157 : vector<8x512xf32>
      %159 = vector.extract_strided_slice %158 {offsets = [0, 0], sizes = [8, 384], strides = [1, 1]} : vector<8x512xf32> to vector<8x384xf32>
      %160 = arith.negf %159 : vector<8x384xf32>
      %161 = math.exp %160 : vector<8x384xf32>
      %cst_189 = arith.constant 1.000000e+00 : f32
      %162 = vector.broadcast %cst_189 : f32 to vector<8x384xf32>
      %163 = arith.addf %162, %161 : vector<8x384xf32>
      %164 = arith.divf %162, %163 : vector<8x384xf32>
      %165 = vector.extract_strided_slice %164 {offsets = [0, 0], sizes = [8, 128], strides = [1, 1]} : vector<8x384xf32> to vector<8x128xf32>
      %166 = vector.extract_strided_slice %164 {offsets = [0, 128], sizes = [8, 128], strides = [1, 1]} : vector<8x384xf32> to vector<8x128xf32>
      %167 = vector.extract_strided_slice %164 {offsets = [0, 256], sizes = [8, 128], strides = [1, 1]} : vector<8x384xf32> to vector<8x128xf32>
      %168 = vector.extract_strided_slice %158 {offsets = [0, 384], sizes = [8, 128], strides = [1, 1]} : vector<8x512xf32> to vector<8x128xf32>
      %169 = math.tanh %168 : vector<8x128xf32>
      %170 = arith.mulf %166, %arg15 : vector<8x128xf32>
      %171 = arith.mulf %165, %169 : vector<8x128xf32>
      %172 = arith.addf %170, %171 : vector<8x128xf32>
      %173 = math.tanh %172 : vector<8x128xf32>
      %174 = arith.mulf %167, %173 : vector<8x128xf32>
      %175 = arith.index_cast %arg13 : i32 to index
      %c0_190 = arith.constant 0 : index
      %c0_191 = arith.constant 0 : index
      %176 = vector.load %arg8[%175, %c0_190, %c0_191] : memref<16x8x128xf32, #tpu.memory_space<vmem>>, vector<1x8x128xf32>
      %177 = vector.shape_cast %176 : vector<1x8x128xf32> to vector<8x128xf32>
      %178 = vector.shape_cast %174 : vector<8x128xf32> to vector<1x8x128xf32>
      tpu.vector_store %arg8[%175, %c0_190, %c0_191], %178 {strides = array<i32>} : memref<16x8x128xf32, #tpu.memory_space<vmem>>, vector<1x8x128xf32>,
      scf.yield %174, %172 : vector<8x128xf32>, vector<8x128xf32>
    }
    %c16_i32_85 = arith.constant 16 : i32
    %c3_86 = arith.constant 3 : index
    %c0_87 = arith.constant 0 : index
    %c0_88 = arith.constant 0 : index
    %78 = vector.load %arg10[%c3_86, %c0_87, %c0_88] : memref<4x8x128xf32, #tpu.memory_space<vmem>>, vector<1x8x128xf32>
    %79 = vector.shape_cast %78 : vector<1x8x128xf32> to vector<8x128xf32>
    %80 = vector.shape_cast %77#0 : vector<8x128xf32> to vector<1x8x128xf32>
    tpu.vector_store %arg10[%c3_86, %c0_87, %c0_88], %80 {strides = array<i32>} : memref<4x8x128xf32, #tpu.memory_space<vmem>>, vector<1x8x128xf32>,
    %c3_89 = arith.constant 3 : index
    %c0_90 = arith.constant 0 : index
    %c0_91 = arith.constant 0 : index
    %81 = vector.load %arg11[%c3_89, %c0_90, %c0_91] : memref<4x8x128xf32, #tpu.memory_space<vmem>>, vector<1x8x128xf32>
    %82 = vector.shape_cast %81 : vector<1x8x128xf32> to vector<8x128xf32>
    %83 = vector.shape_cast %77#1 : vector<8x128xf32> to vector<1x8x128xf32>
    tpu.vector_store %arg11[%c3_89, %c0_90, %c0_91], %83 {strides = array<i32>} : memref<4x8x128xf32, #tpu.memory_space<vmem>>, vector<1x8x128xf32>,
    %c0_92 = arith.constant 0 : index
    %c0_93 = arith.constant 0 : index
    %c0_94 = arith.constant 0 : index
    %84 = vector.load %arg1[%c0_92, %c0_93, %c0_94] : memref<8x8x128xf32, #tpu.memory_space<vmem>>, vector<8x8x128xf32>
    %85 = vector.shape_cast %84 : vector<8x8x128xf32> to vector<64x128xf32>
    %c0_95 = arith.constant 0 : index
    %c0_96 = arith.constant 0 : index
    %c0_97 = arith.constant 0 : index
    %86 = vector.load %arg5[%c0_95, %c0_96, %c0_97] : memref<4x128x512xf32, #tpu.memory_space<vmem>>, vector<1x128x512xf32>
    %87 = vector.shape_cast %86 : vector<1x128x512xf32> to vector<128x512xf32>
    %cst_98 = arith.constant dense<0.000000e+00> : vector<64x512xf32>
    %88 = tpu.matmul %85, %87, %cst_98 {dimension_numbers = #tpu.dot_dimension_numbers<[1], [0], [0], [1], [0, 0, 1, 1], [], []>} : vector<64x128xf32>, vector<128x512xf32>, vector<64x512xf32> -> vector<64x512xf32>
    %c0_99 = arith.constant 0 : index
    %c0_100 = arith.constant 0 : index
    %c0_101 = arith.constant 0 : index
    %89 = vector.load %arg7[%c0_99, %c0_100, %c0_101] : memref<4x1x512xf32, #tpu.memory_space<vmem>>, vector<1x1x512xf32>
    %90 = vector.shape_cast %89 : vector<1x1x512xf32> to vector<1x512xf32>
    %91 = vector.broadcast %90 : vector<1x512xf32> to vector<64x512xf32>
    %92 = arith.addf %88, %91 : vector<64x512xf32>
    %93 = vector.shape_cast %92 : vector<64x512xf32> to vector<8x8x512xf32>
    %c0_102 = arith.constant 0 : index
    %c0_103 = arith.constant 0 : index
    %c0_104 = arith.constant 0 : index
    %94 = vector.load %arg12[%c0_102, %c0_103, %c0_104] : memref<16x8x512xf32, #tpu.memory_space<vmem>>, vector<8x8x512xf32>
    tpu.vector_store %arg12[%c0_102, %c0_103, %c0_104], %93 {strides = array<i32>} : memref<16x8x512xf32, #tpu.memory_space<vmem>>, vector<8x8x512xf32>,
    %c0_105 = arith.constant 0 : index
    %c0_106 = arith.constant 0 : index
    %c0_107 = arith.constant 0 : index
    %95 = vector.load %arg10[%c0_105, %c0_106, %c0_107] : memref<4x8x128xf32, #tpu.memory_space<vmem>>, vector<1x8x128xf32>
    %96 = vector.shape_cast %95 : vector<1x8x128xf32> to vector<8x128xf32>
    %c0_108 = arith.constant 0 : index
    %c0_109 = arith.constant 0 : index
    %c0_110 = arith.constant 0 : index
    %97 = vector.load %arg11[%c0_108, %c0_109, %c0_110] : memref<4x8x128xf32, #tpu.memory_space<vmem>>, vector<1x8x128xf32>
    %98 = vector.shape_cast %97 : vector<1x8x128xf32> to vector<8x128xf32>
    %c0_i32_111 = arith.constant 0 : i32
    %c8_i32 = arith.constant 8 : i32
    %99 = arith.addi %c0_i32_111, %c8_i32 : i32
    %c1_i32_112 = arith.constant 1 : i32
    %100:2 = scf.for %arg13 = %c0_i32_111 to %99 step %c1_i32_112 iter_args(%arg14 = %96, %arg15 = %98) -> (vector<8x128xf32>, vector<8x128xf32>)  : i32 {
      %152 = arith.index_cast %arg13 : i32 to index
      %c0_183 = arith.constant 0 : index
      %c0_184 = arith.constant 0 : index
      %153 = vector.load %arg12[%152, %c0_183, %c0_184] : memref<16x8x512xf32, #tpu.memory_space<vmem>>, vector<1x8x512xf32>
      %154 = vector.shape_cast %153 : vector<1x8x512xf32> to vector<8x512xf32>
      %c0_185 = arith.constant 0 : index
      %c0_186 = arith.constant 0 : index
      %c0_187 = arith.constant 0 : index
      %155 = vector.load %arg6[%c0_185, %c0_186, %c0_187] : memref<4x128x512xf32, #tpu.memory_space<vmem>>, vector<1x128x512xf32>
      %156 = vector.shape_cast %155 : vector<1x128x512xf32> to vector<128x512xf32>
      %cst_188 = arith.constant dense<0.000000e+00> : vector<8x512xf32>
      %157 = tpu.matmul %arg14, %156, %cst_188 {dimension_numbers = #tpu.dot_dimension_numbers<[1], [0], [0], [1], [0, 0, 1, 1], [], []>} : vector<8x128xf32>, vector<128x512xf32>, vector<8x512xf32> -> vector<8x512xf32>
      %158 = arith.addf %154, %157 : vector<8x512xf32>
      %159 = vector.extract_strided_slice %158 {offsets = [0, 0], sizes = [8, 384], strides = [1, 1]} : vector<8x512xf32> to vector<8x384xf32>
      %160 = arith.negf %159 : vector<8x384xf32>
      %161 = math.exp %160 : vector<8x384xf32>
      %cst_189 = arith.constant 1.000000e+00 : f32
      %162 = vector.broadcast %cst_189 : f32 to vector<8x384xf32>
      %163 = arith.addf %162, %161 : vector<8x384xf32>
      %164 = arith.divf %162, %163 : vector<8x384xf32>
      %165 = vector.extract_strided_slice %164 {offsets = [0, 0], sizes = [8, 128], strides = [1, 1]} : vector<8x384xf32> to vector<8x128xf32>
      %166 = vector.extract_strided_slice %164 {offsets = [0, 128], sizes = [8, 128], strides = [1, 1]} : vector<8x384xf32> to vector<8x128xf32>
      %167 = vector.extract_strided_slice %164 {offsets = [0, 256], sizes = [8, 128], strides = [1, 1]} : vector<8x384xf32> to vector<8x128xf32>
      %168 = vector.extract_strided_slice %158 {offsets = [0, 384], sizes = [8, 128], strides = [1, 1]} : vector<8x512xf32> to vector<8x128xf32>
      %169 = math.tanh %168 : vector<8x128xf32>
      %170 = arith.mulf %166, %arg15 : vector<8x128xf32>
      %171 = arith.mulf %165, %169 : vector<8x128xf32>
      %172 = arith.addf %170, %171 : vector<8x128xf32>
      %173 = math.tanh %172 : vector<8x128xf32>
      %174 = arith.mulf %167, %173 : vector<8x128xf32>
      %175 = arith.index_cast %arg13 : i32 to index
      %c0_190 = arith.constant 0 : index
      %c0_191 = arith.constant 0 : index
      %176 = vector.load %arg9[%175, %c0_190, %c0_191] : memref<8x8x128xf32, #tpu.memory_space<vmem>>, vector<1x8x128xf32>
      %177 = vector.shape_cast %176 : vector<1x8x128xf32> to vector<8x128xf32>
      %178 = vector.shape_cast %174 : vector<8x128xf32> to vector<1x8x128xf32>
      tpu.vector_store %arg9[%175, %c0_190, %c0_191], %178 {strides = array<i32>} : memref<8x8x128xf32, #tpu.memory_space<vmem>>, vector<1x8x128xf32>,
      scf.yield %174, %172 : vector<8x128xf32>, vector<8x128xf32>
    }
    %c8_i32_113 = arith.constant 8 : i32
    %c0_114 = arith.constant 0 : index
    %c0_115 = arith.constant 0 : index
    %c0_116 = arith.constant 0 : index
    %101 = vector.load %arg9[%c0_114, %c0_115, %c0_116] : memref<8x8x128xf32, #tpu.memory_space<vmem>>, vector<8x8x128xf32>
    %102 = vector.shape_cast %101 : vector<8x8x128xf32> to vector<64x128xf32>
    %c1_117 = arith.constant 1 : index
    %c0_118 = arith.constant 0 : index
    %c0_119 = arith.constant 0 : index
    %103 = vector.load %arg5[%c1_117, %c0_118, %c0_119] : memref<4x128x512xf32, #tpu.memory_space<vmem>>, vector<1x128x512xf32>
    %104 = vector.shape_cast %103 : vector<1x128x512xf32> to vector<128x512xf32>
    %cst_120 = arith.constant dense<0.000000e+00> : vector<64x512xf32>
    %105 = tpu.matmul %102, %104, %cst_120 {dimension_numbers = #tpu.dot_dimension_numbers<[1], [0], [0], [1], [0, 0, 1, 1], [], []>} : vector<64x128xf32>, vector<128x512xf32>, vector<64x512xf32> -> vector<64x512xf32>
    %c1_121 = arith.constant 1 : index
    %c0_122 = arith.constant 0 : index
    %c0_123 = arith.constant 0 : index
    %106 = vector.load %arg7[%c1_121, %c0_122, %c0_123] : memref<4x1x512xf32, #tpu.memory_space<vmem>>, vector<1x1x512xf32>
    %107 = vector.shape_cast %106 : vector<1x1x512xf32> to vector<1x512xf32>
    %108 = vector.broadcast %107 : vector<1x512xf32> to vector<64x512xf32>
    %109 = arith.addf %105, %108 : vector<64x512xf32>
    %110 = vector.shape_cast %109 : vector<64x512xf32> to vector<8x8x512xf32>
    %c0_124 = arith.constant 0 : index
    %c0_125 = arith.constant 0 : index
    %c0_126 = arith.constant 0 : index
    %111 = vector.load %arg12[%c0_124, %c0_125, %c0_126] : memref<16x8x512xf32, #tpu.memory_space<vmem>>, vector<8x8x512xf32>
    tpu.vector_store %arg12[%c0_124, %c0_125, %c0_126], %110 {strides = array<i32>} : memref<16x8x512xf32, #tpu.memory_space<vmem>>, vector<8x8x512xf32>,
    %c1_127 = arith.constant 1 : index
    %c0_128 = arith.constant 0 : index
    %c0_129 = arith.constant 0 : index
    %112 = vector.load %arg10[%c1_127, %c0_128, %c0_129] : memref<4x8x128xf32, #tpu.memory_space<vmem>>, vector<1x8x128xf32>
    %113 = vector.shape_cast %112 : vector<1x8x128xf32> to vector<8x128xf32>
    %c1_130 = arith.constant 1 : index
    %c0_131 = arith.constant 0 : index
    %c0_132 = arith.constant 0 : index
    %114 = vector.load %arg11[%c1_130, %c0_131, %c0_132] : memref<4x8x128xf32, #tpu.memory_space<vmem>>, vector<1x8x128xf32>
    %115 = vector.shape_cast %114 : vector<1x8x128xf32> to vector<8x128xf32>
    %c0_i32_133 = arith.constant 0 : i32
    %c8_i32_134 = arith.constant 8 : i32
    %116 = arith.addi %c0_i32_133, %c8_i32_134 : i32
    %c1_i32_135 = arith.constant 1 : i32
    %117:2 = scf.for %arg13 = %c0_i32_133 to %116 step %c1_i32_135 iter_args(%arg14 = %113, %arg15 = %115) -> (vector<8x128xf32>, vector<8x128xf32>)  : i32 {
      %152 = arith.index_cast %arg13 : i32 to index
      %c0_183 = arith.constant 0 : index
      %c0_184 = arith.constant 0 : index
      %153 = vector.load %arg12[%152, %c0_183, %c0_184] : memref<16x8x512xf32, #tpu.memory_space<vmem>>, vector<1x8x512xf32>
      %154 = vector.shape_cast %153 : vector<1x8x512xf32> to vector<8x512xf32>
      %c1_185 = arith.constant 1 : index
      %c0_186 = arith.constant 0 : index
      %c0_187 = arith.constant 0 : index
      %155 = vector.load %arg6[%c1_185, %c0_186, %c0_187] : memref<4x128x512xf32, #tpu.memory_space<vmem>>, vector<1x128x512xf32>
      %156 = vector.shape_cast %155 : vector<1x128x512xf32> to vector<128x512xf32>
      %cst_188 = arith.constant dense<0.000000e+00> : vector<8x512xf32>
      %157 = tpu.matmul %arg14, %156, %cst_188 {dimension_numbers = #tpu.dot_dimension_numbers<[1], [0], [0], [1], [0, 0, 1, 1], [], []>} : vector<8x128xf32>, vector<128x512xf32>, vector<8x512xf32> -> vector<8x512xf32>
      %158 = arith.addf %154, %157 : vector<8x512xf32>
      %159 = vector.extract_strided_slice %158 {offsets = [0, 0], sizes = [8, 384], strides = [1, 1]} : vector<8x512xf32> to vector<8x384xf32>
      %160 = arith.negf %159 : vector<8x384xf32>
      %161 = math.exp %160 : vector<8x384xf32>
      %cst_189 = arith.constant 1.000000e+00 : f32
      %162 = vector.broadcast %cst_189 : f32 to vector<8x384xf32>
      %163 = arith.addf %162, %161 : vector<8x384xf32>
      %164 = arith.divf %162, %163 : vector<8x384xf32>
      %165 = vector.extract_strided_slice %164 {offsets = [0, 0], sizes = [8, 128], strides = [1, 1]} : vector<8x384xf32> to vector<8x128xf32>
      %166 = vector.extract_strided_slice %164 {offsets = [0, 128], sizes = [8, 128], strides = [1, 1]} : vector<8x384xf32> to vector<8x128xf32>
      %167 = vector.extract_strided_slice %164 {offsets = [0, 256], sizes = [8, 128], strides = [1, 1]} : vector<8x384xf32> to vector<8x128xf32>
      %168 = vector.extract_strided_slice %158 {offsets = [0, 384], sizes = [8, 128], strides = [1, 1]} : vector<8x512xf32> to vector<8x128xf32>
      %169 = math.tanh %168 : vector<8x128xf32>
      %170 = arith.mulf %166, %arg15 : vector<8x128xf32>
      %171 = arith.mulf %165, %169 : vector<8x128xf32>
      %172 = arith.addf %170, %171 : vector<8x128xf32>
      %173 = math.tanh %172 : vector<8x128xf32>
      %174 = arith.mulf %167, %173 : vector<8x128xf32>
      %175 = arith.index_cast %arg13 : i32 to index
      %c0_190 = arith.constant 0 : index
      %c0_191 = arith.constant 0 : index
      %176 = vector.load %arg9[%175, %c0_190, %c0_191] : memref<8x8x128xf32, #tpu.memory_space<vmem>>, vector<1x8x128xf32>
      %177 = vector.shape_cast %176 : vector<1x8x128xf32> to vector<8x128xf32>
      %178 = vector.shape_cast %174 : vector<8x128xf32> to vector<1x8x128xf32>
      tpu.vector_store %arg9[%175, %c0_190, %c0_191], %178 {strides = array<i32>} : memref<8x8x128xf32, #tpu.memory_space<vmem>>, vector<1x8x128xf32>,
      scf.yield %174, %172 : vector<8x128xf32>, vector<8x128xf32>
    }
    %c8_i32_136 = arith.constant 8 : i32
    %c0_137 = arith.constant 0 : index
    %c0_138 = arith.constant 0 : index
    %c0_139 = arith.constant 0 : index
    %118 = vector.load %arg9[%c0_137, %c0_138, %c0_139] : memref<8x8x128xf32, #tpu.memory_space<vmem>>, vector<8x8x128xf32>
    %119 = vector.shape_cast %118 : vector<8x8x128xf32> to vector<64x128xf32>
    %c2_140 = arith.constant 2 : index
    %c0_141 = arith.constant 0 : index
    %c0_142 = arith.constant 0 : index
    %120 = vector.load %arg5[%c2_140, %c0_141, %c0_142] : memref<4x128x512xf32, #tpu.memory_space<vmem>>, vector<1x128x512xf32>
    %121 = vector.shape_cast %120 : vector<1x128x512xf32> to vector<128x512xf32>
    %cst_143 = arith.constant dense<0.000000e+00> : vector<64x512xf32>
    %122 = tpu.matmul %119, %121, %cst_143 {dimension_numbers = #tpu.dot_dimension_numbers<[1], [0], [0], [1], [0, 0, 1, 1], [], []>} : vector<64x128xf32>, vector<128x512xf32>, vector<64x512xf32> -> vector<64x512xf32>
    %c2_144 = arith.constant 2 : index
    %c0_145 = arith.constant 0 : index
    %c0_146 = arith.constant 0 : index
    %123 = vector.load %arg7[%c2_144, %c0_145, %c0_146] : memref<4x1x512xf32, #tpu.memory_space<vmem>>, vector<1x1x512xf32>
    %124 = vector.shape_cast %123 : vector<1x1x512xf32> to vector<1x512xf32>
    %125 = vector.broadcast %124 : vector<1x512xf32> to vector<64x512xf32>
    %126 = arith.addf %122, %125 : vector<64x512xf32>
    %127 = vector.shape_cast %126 : vector<64x512xf32> to vector<8x8x512xf32>
    %c0_147 = arith.constant 0 : index
    %c0_148 = arith.constant 0 : index
    %c0_149 = arith.constant 0 : index
    %128 = vector.load %arg12[%c0_147, %c0_148, %c0_149] : memref<16x8x512xf32, #tpu.memory_space<vmem>>, vector<8x8x512xf32>
    tpu.vector_store %arg12[%c0_147, %c0_148, %c0_149], %127 {strides = array<i32>} : memref<16x8x512xf32, #tpu.memory_space<vmem>>, vector<8x8x512xf32>,
    %c2_150 = arith.constant 2 : index
    %c0_151 = arith.constant 0 : index
    %c0_152 = arith.constant 0 : index
    %129 = vector.load %arg10[%c2_150, %c0_151, %c0_152] : memref<4x8x128xf32, #tpu.memory_space<vmem>>, vector<1x8x128xf32>
    %130 = vector.shape_cast %129 : vector<1x8x128xf32> to vector<8x128xf32>
    %c2_153 = arith.constant 2 : index
    %c0_154 = arith.constant 0 : index
    %c0_155 = arith.constant 0 : index
    %131 = vector.load %arg11[%c2_153, %c0_154, %c0_155] : memref<4x8x128xf32, #tpu.memory_space<vmem>>, vector<1x8x128xf32>
    %132 = vector.shape_cast %131 : vector<1x8x128xf32> to vector<8x128xf32>
    %c0_i32_156 = arith.constant 0 : i32
    %c8_i32_157 = arith.constant 8 : i32
    %133 = arith.addi %c0_i32_156, %c8_i32_157 : i32
    %c1_i32_158 = arith.constant 1 : i32
    %134:2 = scf.for %arg13 = %c0_i32_156 to %133 step %c1_i32_158 iter_args(%arg14 = %130, %arg15 = %132) -> (vector<8x128xf32>, vector<8x128xf32>)  : i32 {
      %152 = arith.index_cast %arg13 : i32 to index
      %c0_183 = arith.constant 0 : index
      %c0_184 = arith.constant 0 : index
      %153 = vector.load %arg12[%152, %c0_183, %c0_184] : memref<16x8x512xf32, #tpu.memory_space<vmem>>, vector<1x8x512xf32>
      %154 = vector.shape_cast %153 : vector<1x8x512xf32> to vector<8x512xf32>
      %c2_185 = arith.constant 2 : index
      %c0_186 = arith.constant 0 : index
      %c0_187 = arith.constant 0 : index
      %155 = vector.load %arg6[%c2_185, %c0_186, %c0_187] : memref<4x128x512xf32, #tpu.memory_space<vmem>>, vector<1x128x512xf32>
      %156 = vector.shape_cast %155 : vector<1x128x512xf32> to vector<128x512xf32>
      %cst_188 = arith.constant dense<0.000000e+00> : vector<8x512xf32>
      %157 = tpu.matmul %arg14, %156, %cst_188 {dimension_numbers = #tpu.dot_dimension_numbers<[1], [0], [0], [1], [0, 0, 1, 1], [], []>} : vector<8x128xf32>, vector<128x512xf32>, vector<8x512xf32> -> vector<8x512xf32>
      %158 = arith.addf %154, %157 : vector<8x512xf32>
      %159 = vector.extract_strided_slice %158 {offsets = [0, 0], sizes = [8, 384], strides = [1, 1]} : vector<8x512xf32> to vector<8x384xf32>
      %160 = arith.negf %159 : vector<8x384xf32>
      %161 = math.exp %160 : vector<8x384xf32>
      %cst_189 = arith.constant 1.000000e+00 : f32
      %162 = vector.broadcast %cst_189 : f32 to vector<8x384xf32>
      %163 = arith.addf %162, %161 : vector<8x384xf32>
      %164 = arith.divf %162, %163 : vector<8x384xf32>
      %165 = vector.extract_strided_slice %164 {offsets = [0, 0], sizes = [8, 128], strides = [1, 1]} : vector<8x384xf32> to vector<8x128xf32>
      %166 = vector.extract_strided_slice %164 {offsets = [0, 128], sizes = [8, 128], strides = [1, 1]} : vector<8x384xf32> to vector<8x128xf32>
      %167 = vector.extract_strided_slice %164 {offsets = [0, 256], sizes = [8, 128], strides = [1, 1]} : vector<8x384xf32> to vector<8x128xf32>
      %168 = vector.extract_strided_slice %158 {offsets = [0, 384], sizes = [8, 128], strides = [1, 1]} : vector<8x512xf32> to vector<8x128xf32>
      %169 = math.tanh %168 : vector<8x128xf32>
      %170 = arith.mulf %166, %arg15 : vector<8x128xf32>
      %171 = arith.mulf %165, %169 : vector<8x128xf32>
      %172 = arith.addf %170, %171 : vector<8x128xf32>
      %173 = math.tanh %172 : vector<8x128xf32>
      %174 = arith.mulf %167, %173 : vector<8x128xf32>
      %175 = arith.index_cast %arg13 : i32 to index
      %c0_190 = arith.constant 0 : index
      %c0_191 = arith.constant 0 : index
      %176 = vector.load %arg9[%175, %c0_190, %c0_191] : memref<8x8x128xf32, #tpu.memory_space<vmem>>, vector<1x8x128xf32>
      %177 = vector.shape_cast %176 : vector<1x8x128xf32> to vector<8x128xf32>
      %178 = vector.shape_cast %174 : vector<8x128xf32> to vector<1x8x128xf32>
      tpu.vector_store %arg9[%175, %c0_190, %c0_191], %178 {strides = array<i32>} : memref<8x8x128xf32, #tpu.memory_space<vmem>>, vector<1x8x128xf32>,
      scf.yield %174, %172 : vector<8x128xf32>, vector<8x128xf32>
    }
    %c8_i32_159 = arith.constant 8 : i32
    %c0_160 = arith.constant 0 : index
    %c0_161 = arith.constant 0 : index
    %c0_162 = arith.constant 0 : index
    %135 = vector.load %arg9[%c0_160, %c0_161, %c0_162] : memref<8x8x128xf32, #tpu.memory_space<vmem>>, vector<8x8x128xf32>
    %136 = vector.shape_cast %135 : vector<8x8x128xf32> to vector<64x128xf32>
    %c3_163 = arith.constant 3 : index
    %c0_164 = arith.constant 0 : index
    %c0_165 = arith.constant 0 : index
    %137 = vector.load %arg5[%c3_163, %c0_164, %c0_165] : memref<4x128x512xf32, #tpu.memory_space<vmem>>, vector<1x128x512xf32>
    %138 = vector.shape_cast %137 : vector<1x128x512xf32> to vector<128x512xf32>
    %cst_166 = arith.constant dense<0.000000e+00> : vector<64x512xf32>
    %139 = tpu.matmul %136, %138, %cst_166 {dimension_numbers = #tpu.dot_dimension_numbers<[1], [0], [0], [1], [0, 0, 1, 1], [], []>} : vector<64x128xf32>, vector<128x512xf32>, vector<64x512xf32> -> vector<64x512xf32>
    %c3_167 = arith.constant 3 : index
    %c0_168 = arith.constant 0 : index
    %c0_169 = arith.constant 0 : index
    %140 = vector.load %arg7[%c3_167, %c0_168, %c0_169] : memref<4x1x512xf32, #tpu.memory_space<vmem>>, vector<1x1x512xf32>
    %141 = vector.shape_cast %140 : vector<1x1x512xf32> to vector<1x512xf32>
    %142 = vector.broadcast %141 : vector<1x512xf32> to vector<64x512xf32>
    %143 = arith.addf %139, %142 : vector<64x512xf32>
    %144 = vector.shape_cast %143 : vector<64x512xf32> to vector<8x8x512xf32>
    %c0_170 = arith.constant 0 : index
    %c0_171 = arith.constant 0 : index
    %c0_172 = arith.constant 0 : index
    %145 = vector.load %arg12[%c0_170, %c0_171, %c0_172] : memref<16x8x512xf32, #tpu.memory_space<vmem>>, vector<8x8x512xf32>
    tpu.vector_store %arg12[%c0_170, %c0_171, %c0_172], %144 {strides = array<i32>} : memref<16x8x512xf32, #tpu.memory_space<vmem>>, vector<8x8x512xf32>,
    %c3_173 = arith.constant 3 : index
    %c0_174 = arith.constant 0 : index
    %c0_175 = arith.constant 0 : index
    %146 = vector.load %arg10[%c3_173, %c0_174, %c0_175] : memref<4x8x128xf32, #tpu.memory_space<vmem>>, vector<1x8x128xf32>
    %147 = vector.shape_cast %146 : vector<1x8x128xf32> to vector<8x128xf32>
    %c3_176 = arith.constant 3 : index
    %c0_177 = arith.constant 0 : index
    %c0_178 = arith.constant 0 : index
    %148 = vector.load %arg11[%c3_176, %c0_177, %c0_178] : memref<4x8x128xf32, #tpu.memory_space<vmem>>, vector<1x8x128xf32>
    %149 = vector.shape_cast %148 : vector<1x8x128xf32> to vector<8x128xf32>
    %c0_i32_179 = arith.constant 0 : i32
    %c8_i32_180 = arith.constant 8 : i32
    %150 = arith.addi %c0_i32_179, %c8_i32_180 : i32
    %c1_i32_181 = arith.constant 1 : i32
    %151:2 = scf.for %arg13 = %c0_i32_179 to %150 step %c1_i32_181 iter_args(%arg14 = %147, %arg15 = %149) -> (vector<8x128xf32>, vector<8x128xf32>)  : i32 {
      %152 = arith.index_cast %arg13 : i32 to index
      %c0_183 = arith.constant 0 : index
      %c0_184 = arith.constant 0 : index
      %153 = vector.load %arg12[%152, %c0_183, %c0_184] : memref<16x8x512xf32, #tpu.memory_space<vmem>>, vector<1x8x512xf32>
      %154 = vector.shape_cast %153 : vector<1x8x512xf32> to vector<8x512xf32>
      %c3_185 = arith.constant 3 : index
      %c0_186 = arith.constant 0 : index
      %c0_187 = arith.constant 0 : index
      %155 = vector.load %arg6[%c3_185, %c0_186, %c0_187] : memref<4x128x512xf32, #tpu.memory_space<vmem>>, vector<1x128x512xf32>
      %156 = vector.shape_cast %155 : vector<1x128x512xf32> to vector<128x512xf32>
      %cst_188 = arith.constant dense<0.000000e+00> : vector<8x512xf32>
      %157 = tpu.matmul %arg14, %156, %cst_188 {dimension_numbers = #tpu.dot_dimension_numbers<[1], [0], [0], [1], [0, 0, 1, 1], [], []>} : vector<8x128xf32>, vector<128x512xf32>, vector<8x512xf32> -> vector<8x512xf32>
      %158 = arith.addf %154, %157 : vector<8x512xf32>
      %159 = vector.extract_strided_slice %158 {offsets = [0, 0], sizes = [8, 384], strides = [1, 1]} : vector<8x512xf32> to vector<8x384xf32>
      %160 = arith.negf %159 : vector<8x384xf32>
      %161 = math.exp %160 : vector<8x384xf32>
      %cst_189 = arith.constant 1.000000e+00 : f32
      %162 = vector.broadcast %cst_189 : f32 to vector<8x384xf32>
      %163 = arith.addf %162, %161 : vector<8x384xf32>
      %164 = arith.divf %162, %163 : vector<8x384xf32>
      %165 = vector.extract_strided_slice %164 {offsets = [0, 0], sizes = [8, 128], strides = [1, 1]} : vector<8x384xf32> to vector<8x128xf32>
      %166 = vector.extract_strided_slice %164 {offsets = [0, 128], sizes = [8, 128], strides = [1, 1]} : vector<8x384xf32> to vector<8x128xf32>
      %167 = vector.extract_strided_slice %164 {offsets = [0, 256], sizes = [8, 128], strides = [1, 1]} : vector<8x384xf32> to vector<8x128xf32>
      %168 = vector.extract_strided_slice %158 {offsets = [0, 384], sizes = [8, 128], strides = [1, 1]} : vector<8x512xf32> to vector<8x128xf32>
      %169 = math.tanh %168 : vector<8x128xf32>
      %170 = arith.mulf %166, %arg15 : vector<8x128xf32>
      %171 = arith.mulf %165, %169 : vector<8x128xf32>
      %172 = arith.addf %170, %171 : vector<8x128xf32>
      %173 = math.tanh %172 : vector<8x128xf32>
      %174 = arith.mulf %167, %173 : vector<8x128xf32>
      %175 = arith.index_cast %arg13 : i32 to index
      %c0_190 = arith.constant 0 : index
      %c0_191 = arith.constant 0 : index
      %176 = vector.load %arg9[%175, %c0_190, %c0_191] : memref<8x8x128xf32, #tpu.memory_space<vmem>>, vector<1x8x128xf32>
      %177 = vector.shape_cast %176 : vector<1x8x128xf32> to vector<8x128xf32>
      %178 = vector.shape_cast %174 : vector<8x128xf32> to vector<1x8x128xf32>
      tpu.vector_store %arg9[%175, %c0_190, %c0_191], %178 {strides = array<i32>} : memref<8x8x128xf32, #tpu.memory_space<vmem>>, vector<1x8x128xf32>,
      scf.yield %174, %172 : vector<8x128xf32>, vector<8x128xf32>
    }
    %c8_i32_182 = arith.constant 8 : i32
    return
  }
}

</mosaic_0001>

<bundles_post_ra>
// kernel: tpu_custom_call.1
= control target key start
LH: loop header
LB: loop body
LE: loop exit
PB: predicated region body
PF: predicated region fallthrough
CT: control target
= control target key end

     0   :  { %15 = vsyncpa [#allocation6], 0  ;;  %s8674_s0 = inlined_call_operand.hbm [shape: f32[16,8,128], index: 0, kind: input, shape index: {}]   ;;  %s8675_s1 = inlined_call_operand.hbm [shape: f32[8,8,128], index: 1, kind: input, shape index: {}]   ;;  %s8676_s2 = inlined_call_operand.hbm [shape: f32[4,128,512], index: 2, kind: input, shape index: {}]   ;;  %s8677_s3 = inlined_call_operand.hbm [shape: f32[4,128,512], index: 3, kind: input, shape index: {}]   ;;  %s8678_s4 = inlined_call_operand.hbm [shape: f32[4,1,512], index: 4, kind: input, shape index: {}]   ;;  %s8679_s5 = inlined_call_operand.hbm [shape: f32[4,128,512], index: 5, kind: input, shape index: {}]   ;;  %s8680_s6 = inlined_call_operand.hbm [shape: f32[4,128,512], index: 6, kind: input, shape index: {}]   ;;  %s8681_s7 = inlined_call_operand.vmem [shape: f32[4,1,512], index: 7, kind: input, shape index: {}]   ;;  %s8682_s8 = inlined_call_operand.hbm [shape: f32[16,8,128], index: 8, kind: output, shape index: {0}]   ;;  %s8683_s9 = inlined_call_operand.hbm [shape: f32[8,8,128], index: 9, kind: output, shape index: {1}]  }
   0x1   :  { %16 = vsyncpa [#allocation9], 0 }
   0x2   :  { %17 = vsyncpa [#allocation12], 0 }
   0x3   :  { %18 = vsyncpa [#allocation15], 0 }
   0x4   :  { %19 = vsyncpa [#allocation7], 0 }
   0x5   :  { %20 = vsyncpa [#allocation19], 0  ;;  %s7529_s30 = smov [#allocation8]   ;;  %s7127_s13 = scalar_lea.hbm %s8675_s1, 1024 }
   0x6   :  { %s38_s10 = sshll.u32 %s7529_s30, 4  ;;  %p7128_p0 = scmp.ne.s32.totalorder %s8675_s1, %s7127_s13  ;;  %s39_s10 = int_to_ptr.vmem [resolvable:$true] %s38_s10 }
   0x7   :  { %p7131_p1 = scmp.lt.u32.totalorder %s7127_s13, %s8675_s1 }
   0x9   :  { %p7133_p2 = pnand %p7131_p1, %p7128_p0 }
   0xb   :  { %7136 = shalt.err (!%p7133_p2)
}
   0xc   :  { %s7137_s18 = scalar_lea.vmem %s39_s10, 1024  ;;  %p7142_p4 = scmp.lt.s32.totalorder %s39_s10, %s39_s10 }
   0xd   :  { %p7138_p3 = scmp.ne.s32.totalorder %s39_s10, %s7137_s18  ;;  %p7143_p5 = scmp.lt.s32.totalorder %s7137_s18, %s7137_s18 }
   0xf   :  { %p7144_p6 = por %p7143_p5, %p7142_p4 }
  0x11   :  { %p7145_p7 = pnand %p7144_p6, %p7138_p3 }
  0x13   :  { %7148 = shalt.err (!%p7145_p7)
}
  0x14   :  { %s7530_s19 = smov 128   ;;  %s7531_s20 = smov 8  }
  0x15   :  { %44 = dma.hbm_to_vmem [thread:$0]  %s8675_s1, 1024, %s39_s10, [#allocation9], %s7530_s19, %s7530_s19, %s7531_s20  }
  0x16   :  { %s7532_s23 = smov [#allocation11]   ;;  %s7533_s25 = smov [#allocation14]  }
  0x17   :  { %s62_s24 = sshll.u32 %s7532_s23, 4  ;;  %s86_s26 = sshll.u32 %s7533_s25, 4  ;;  %s63_s24 = int_to_ptr.vmem [resolvable:$true] %s62_s24  ;;  %s87_s26 = int_to_ptr.vmem [resolvable:$true] %s86_s26 }
  0x18   :  { %s7149_s29 = scalar_lea.hbm %s8677_s3, 32768 }
  0x19   :  { %p7150_p8 = scmp.ne.s32.totalorder %s8677_s3, %s7149_s29  ;;  %p7153_p9 = scmp.lt.u32.totalorder %s7149_s29, %s8677_s3 }
  0x1b   :  { %p7155_p10 = pnand %p7153_p9, %p7150_p8 }
  0x1d   :  { %7158 = shalt.err (!%p7155_p10)
}
  0x1e   :  { %s7159_s1 = scalar_lea.vmem %s63_s24, 32768  ;;  %p7164_p12 = scmp.lt.s32.totalorder %s63_s24, %s63_s24 }
  0x1f   :  { %p7160_p11 = scmp.ne.s32.totalorder %s63_s24, %s7159_s1  ;;  %p7165_p13 = scmp.lt.s32.totalorder %s7159_s1, %s7159_s1 }
  0x21   :  { %p7166_p0 = por %p7165_p13, %p7164_p12 }
  0x23   :  { %p7167_p1 = pnand %p7166_p0, %p7160_p11 }
  0x25   :  { %7170 = shalt.err (!%p7167_p1)
}
  0x26   :  { %s7534_s10 = smov 512   ;;  %s7535_s14 = smov 32  }
  0x27   :  { %68 = dma.hbm_to_vmem [thread:$0]  %s8677_s3, 32768, %s63_s24, [#allocation12], %s7534_s10, %s7534_s10, %s7535_s14  }
  0x28   :  { %s7171_s21 = scalar_lea.hbm %s8679_s5, 32768 }
  0x29   :  { %p7172_p2 = scmp.ne.s32.totalorder %s8679_s5, %s7171_s21  ;;  %p7175_p3 = scmp.lt.u32.totalorder %s7171_s21, %s8679_s5 }
  0x2b   :  { %p7177_p4 = pnand %p7175_p3, %p7172_p2 }
  0x2d   :  { %7180 = shalt.err (!%p7177_p4)
}
  0x2e   :  { %s7181_s28 = scalar_lea.vmem %s87_s26, 32768  ;;  %p7186_p6 = scmp.lt.s32.totalorder %s87_s26, %s87_s26 }
  0x2f   :  { %p7182_p5 = scmp.ne.s32.totalorder %s87_s26, %s7181_s28  ;;  %p7187_p7 = scmp.lt.s32.totalorder %s7181_s28, %s7181_s28 }
  0x31   :  { %p7188_p8 = por %p7187_p7, %p7186_p6 }
  0x33   :  { %p7189_p9 = pnand %p7188_p8, %p7182_p5 }
  0x35   :  { %7192 = shalt.err (!%p7189_p9)
}
  0x36   :  { %92 = dma.hbm_to_vmem [thread:$0]  %s8679_s5, 32768, %s87_s26, [#allocation15], %s7534_s10, %s7534_s10, %s7535_s14  }
  0x37   :  { %s7536_s29 = smov [#allocation5]   ;;  %s7537_s11 = smov [#allocation10]  }
  0x38   :  { %s26_s30 = sshll.u32 %s7536_s29, 4  ;;  %s50_s12 = sshll.u32 %s7537_s11, 4  ;;  %s27_s30 = int_to_ptr.vmem [resolvable:$true] %s26_s30  ;;  %s51_s12 = int_to_ptr.vmem [resolvable:$true] %s50_s12 }
  0x39   :  { %s7193_s15 = scalar_lea.hbm %s8674_s0, 2048 }
  0x3a   :  { %p7194_p10 = scmp.ne.s32.totalorder %s8674_s0, %s7193_s15  ;;  %p7197_p11 = scmp.lt.u32.totalorder %s7193_s15, %s8674_s0 }
  0x3c   :  { %p7199_p12 = pnand %p7197_p11, %p7194_p10 }
  0x3e   :  { %7202 = shalt.err (!%p7199_p12)
}
  0x3f   :  { %s7203_s5 = scalar_lea.vmem %s27_s30, 2048  ;;  %p7208_p0 = scmp.lt.s32.totalorder %s27_s30, %s27_s30 }
  0x40   :  { %p7204_p13 = scmp.ne.s32.totalorder %s27_s30, %s7203_s5  ;;  %p7209_p1 = scmp.lt.s32.totalorder %s7203_s5, %s7203_s5 }
  0x42   :  { %p7210_p2 = por %p7209_p1, %p7208_p0 }
  0x44   :  { %p7211_p3 = pnand %p7210_p2, %p7204_p13 }
  0x46   :  { %7214 = shalt.err (!%p7211_p3)
}
  0x47   :  { %32 = dma.hbm_to_vmem [thread:$0]  %s8674_s0, 2048, %s27_s30, [#allocation6], %s7530_s19, %s7530_s19, %s7531_s20  }
  0x48   :  { %s7215_s27 = scalar_lea.hbm %s8676_s2, 32768 }
  0x49   :  { %p7216_p4 = scmp.ne.s32.totalorder %s8676_s2, %s7215_s27  ;;  %p7219_p5 = scmp.lt.u32.totalorder %s7215_s27, %s8676_s2 }
  0x4b   :  { %p7221_p6 = pnand %p7219_p5, %p7216_p4 }
  0x4d   :  { %7224 = shalt.err (!%p7221_p6)
}
  0x4e   :  { %s7225_s11 = scalar_lea.vmem %s51_s12, 32768  ;;  %p7230_p8 = scmp.lt.s32.totalorder %s51_s12, %s51_s12 }
  0x4f   :  { %p7226_p7 = scmp.ne.s32.totalorder %s51_s12, %s7225_s11  ;;  %p7231_p9 = scmp.lt.s32.totalorder %s7225_s11, %s7225_s11 }
  0x51   :  { %p7232_p10 = por %p7231_p9, %p7230_p8 }
  0x53   :  { %p7233_p11 = pnand %p7232_p10, %p7226_p7 }
  0x55   :  { %7236 = shalt.err (!%p7233_p11)
}
  0x56   :  { %56 = dma.hbm_to_vmem [thread:$0]  %s8676_s2, 32768, %s51_s12, [#allocation9], %s7534_s10, %s7534_s10, %s7535_s14  }
  0x57   :  { %s7538_s13 = smov [#allocation13]   ;;  %s7237_s17 = scalar_lea.hbm %s8678_s4, 256 }
  0x58   :  { %s74_s1 = sshll.u32 %s7538_s13, 4  ;;  %p7238_p12 = scmp.ne.s32.totalorder %s8678_s4, %s7237_s17  ;;  %s75_s1 = int_to_ptr.vmem [resolvable:$true] %s74_s1 }
  0x59   :  { %p7241_p13 = scmp.lt.u32.totalorder %s7237_s17, %s8678_s4 }
  0x5b   :  { %p7243_p0 = pnand %p7241_p13, %p7238_p12 }
  0x5d   :  { %7246 = shalt.err (!%p7243_p0)
}
  0x5e   :  { %s7247_s22 = scalar_lea.vmem %s75_s1, 256  ;;  %p7252_p2 = scmp.lt.s32.totalorder %s75_s1, %s75_s1 }
  0x5f   :  { %p7248_p1 = scmp.ne.s32.totalorder %s75_s1, %s7247_s22  ;;  %p7253_p3 = scmp.lt.s32.totalorder %s7247_s22, %s7247_s22 }
  0x61   :  { %p7254_p4 = por %p7253_p3, %p7252_p2 }
  0x63   :  { %p7255_p5 = pnand %p7254_p4, %p7248_p1 }
  0x65   :  { %7258 = shalt.err (!%p7255_p5)
}
  0x66   :  { %s7539_s2 = smov 64   ;;  %s7540_s12 = smov 4  }
  0x67   :  { %80 = dma.hbm_to_vmem [thread:$0]  %s8678_s4, 256, %s75_s1, [#allocation12], %s7539_s2, %s7539_s2, %s7540_s12  }
  0x68   :  { %s7541_s27 = smov [#allocation16]   ;;  %s7259_s29 = scalar_lea.hbm %s8680_s6, 32768 }
  0x69   :  { %s98_s28 = sshll.u32 %s7541_s27, 4  ;;  %p7260_p6 = scmp.ne.s32.totalorder %s8680_s6, %s7259_s29  ;;  %s99_s28 = int_to_ptr.vmem [resolvable:$true] %s98_s28 }
  0x6a   :  { %p7263_p7 = scmp.lt.u32.totalorder %s7259_s29, %s8680_s6 }
  0x6c   :  { %p7265_p8 = pnand %p7263_p7, %p7260_p6 }
  0x6e   :  { %7268 = shalt.err (!%p7265_p8)
}
  0x6f   :  { %s7269_s15 = scalar_lea.vmem %s99_s28, 32768  ;;  %p7274_p10 = scmp.lt.s32.totalorder %s99_s28, %s99_s28 }
  0x70   :  { %p7270_p9 = scmp.ne.s32.totalorder %s99_s28, %s7269_s15  ;;  %p7275_p11 = scmp.lt.s32.totalorder %s7269_s15, %s7269_s15 }
  0x72   :  { %p7276_p12 = por %p7275_p11, %p7274_p10 }
  0x74   :  { %p7277_p13 = pnand %p7276_p12, %p7270_p9 }
  0x76   :  { %7280 = shalt.err (!%p7277_p13)
}
  0x77   :  { %104 = dma.hbm_to_vmem [thread:$0]  %s8680_s6, 32768, %s99_s28, [#allocation15], %s7534_s10, %s7534_s10, %s7535_s14  }
  0x78   :  { %7421 = dma.done.wait [#allocation6], 2048  }
  0x79   :  { %7422 = vsyncadd [#allocation6], 4294965248 }
  0x7a   :  { %7423 = dma.done.wait [#allocation9], 33792  }
  0x7b   :  { %7424 = vsyncadd [#allocation9], 4294933504 }
  0x7c   :  { %7425 = dma.done.wait [#allocation12], 33024  }
  0x7d   :  { %7426 = vsyncadd [#allocation12], 4294934272 }
  0x7e   :  { %7427 = dma.done.wait [#allocation15], 65536  }
  0x7f   :  { %7428 = vsyncadd [#allocation15], 4294901760  ;;  %v7542_v0 = vmov 0.0   ;;  %v145_v1 = vld [vmem:[#allocation10 + $0x8] sm:$0xff]  ;;  %v147_v3 = vld [vmem:[#allocation10 + $0x18] sm:$0xff]  ;;  %s7825_s6 = smov 0  }
  0x80   :  { %294 = vmatprep.mubr.f32.mxu0 %v7542_v0  ;;  %455 = vmatprep.mubr.f32.mxu1 %v7542_v0  ;;  %v149_v2 = vld [vmem:[#allocation10 + $0x28] sm:$0xff]  ;;  %v151_v5 = vld [vmem:[#allocation10 + $0x38] sm:$0xff]  ;;  %v144_v6 = vld [vmem:[#allocation10] sm:$0xff] }
  0x81   :  { %v5759_v4 = vpack.c.bf16 %v149_v2, %v145_v1  ;;  %v148_v7 = vld [vmem:[#allocation10 + $0x20] sm:$0xff]  ;;  %v5791_v8 = vpack.c.bf16 %v151_v5, %v147_v3  ;;  %v146_v10 = vld [vmem:[#allocation10 + $0x10] sm:$0xff]  ;;  %v153_v12 = vld [vmem:[#allocation10 + $0x48] sm:$0xff] }
  0x82   :  { %v5761_v9 = vpack.c.bf16 %v148_v7, %v144_v6  ;;  %v150_v11 = vld [vmem:[#allocation10 + $0x30] sm:$0xff]  ;;  %v157_v14 = vld [vmem:[#allocation10 + $0x68] sm:$0xff]  ;;  %v155_v15 = vld [vmem:[#allocation10 + $0x58] sm:$0xff] }
  0x83   :  { %5760 = vmatprep.subr.bf16.mxu0 %v5759_v4  ;;  %v5793_v13 = vpack.c.bf16 %v150_v11, %v146_v10  ;;  %v159_v16 = vld [vmem:[#allocation10 + $0x78] sm:$0xff]  ;;  %5792 = vmatprep.subr.bf16.mxu1 %v5791_v8  ;;  %v5763_v17 = vpack.c.bf16 %v157_v14, %v153_v12  ;;  %v152_v19 = vld [vmem:[#allocation10 + $0x40] sm:$0xff]  ;;  %v154_v21 = vld [vmem:[#allocation10 + $0x50] sm:$0xff] }
  0x84   :  { %5762 = vmatpush1.bf16.msra.mxu0 %v5761_v9  ;;  %v5795_v18 = vpack.c.bf16 %v159_v16, %v155_v15  ;;  %v156_v20 = vld [vmem:[#allocation10 + $0x60] sm:$0xff]  ;;  %v158_v23 = vld [vmem:[#allocation10 + $0x70] sm:$0xff]  ;;  %v161_v24 = vld [vmem:[#allocation10 + $0x88] sm:$0xff] }
  0x85   :  { %5794 = vmatpush1.bf16.msra.mxu1 %v5793_v13  ;;  %v5765_v22 = vpack.c.bf16 %v156_v20, %v152_v19  ;;  %v165_v25 = vld [vmem:[#allocation10 + $0xa8] sm:$0xff]  ;;  %5764 = vmatprep.subr.bf16.mxu0 %v5763_v17  ;;  %v5797_v26 = vpack.c.bf16 %v158_v23, %v154_v21  ;;  %v163_v28 = vld [vmem:[#allocation10 + $0x98] sm:$0xff]  ;;  %v160_v30 = vld [vmem:[#allocation10 + $0x80] sm:$0xff] }
  0x86   :  { %5796 = vmatprep.subr.bf16.mxu1 %v5795_v18  ;;  %v5767_v27 = vpack.c.bf16 %v165_v25, %v161_v24  ;;  %v167_v29 = vld [vmem:[#allocation10 + $0xb8] sm:$0xff]  ;;  %v164_v32 = vld [vmem:[#allocation10 + $0xa0] sm:$0xff]  ;;  %v162_v33 = vld [vmem:[#allocation10 + $0x90] sm:$0xff] }
  0x87   :  { %v5799_v31 = vpack.c.bf16 %v167_v29, %v163_v28  ;;  %v166_v34 = vld [vmem:[#allocation10 + $0xb0] sm:$0xff]  ;;  %v5769_v35 = vpack.c.bf16 %v164_v32, %v160_v30  ;;  %v169_v36 = vld [vmem:[#allocation10 + $0xc8] sm:$0xff]  ;;  %v171_v38 = vld [vmem:[#allocation10 + $0xd8] sm:$0xff] }
  0x88   :  { %5766 = vmatpush1.bf16.msra.mxu0 %v5765_v22  ;;  %v173_v37 = vld [vmem:[#allocation10 + $0xe8] sm:$0xff]  ;;  %v5801_v39 = vpack.c.bf16 %v166_v34, %v162_v33  ;;  %v175_v41 = vld [vmem:[#allocation10 + $0xf8] sm:$0xff]  ;;  %v168_v42 = vld [vmem:[#allocation10 + $0xc0] sm:$0xff] }
  0x89   :  { %5798 = vmatpush1.bf16.msra.mxu1 %v5797_v26  ;;  %5768 = vmatprep.subr.bf16.mxu0 %v5767_v27  ;;  %v5771_v40 = vpack.c.bf16 %v173_v37, %v169_v36  ;;  %v172_v43 = vld [vmem:[#allocation10 + $0xe0] sm:$0xff]  ;;  %v5803_v44 = vpack.c.bf16 %v175_v41, %v171_v38  ;;  %v170_v45 = vld [vmem:[#allocation10 + $0xd0] sm:$0xff]  ;;  %v177_v47 = vld [vmem:[#allocation10 + $0x108] sm:$0xff] }
  0x8a   :  { %5800 = vmatprep.subr.bf16.mxu1 %v5799_v31  ;;  %v174_v46 = vld [vmem:[#allocation10 + $0xf0] sm:$0xff]  ;;  %v181_v48 = vld [vmem:[#allocation10 + $0x128] sm:$0xff]  ;;  %v179_v49 = vld [vmem:[#allocation10 + $0x118] sm:$0xff]  ;;  %v5773_v51 = vpack.c.bf16 %v172_v43, %v168_v42 }
  0x8b   :  { %v183_v50 = vld [vmem:[#allocation10 + $0x138] sm:$0xff]  ;;  %v5805_v52 = vpack.c.bf16 %v174_v46, %v170_v45  ;;  %v5775_v53 = vpack.c.bf16 %v181_v48, %v177_v47  ;;  %v176_v54 = vld [vmem:[#allocation10 + $0x100] sm:$0xff]  ;;  %v178_v56 = vld [vmem:[#allocation10 + $0x110] sm:$0xff] }
  0x8c   :  { %5770 = vmatpush1.bf16.msra.mxu0 %v5769_v35  ;;  %v180_v55 = vld [vmem:[#allocation10 + $0x120] sm:$0xff]  ;;  %v5807_v57 = vpack.c.bf16 %v183_v50, %v179_v49  ;;  %v182_v58 = vld [vmem:[#allocation10 + $0x130] sm:$0xff]  ;;  %v185_v59 = vld [vmem:[#allocation10 + $0x148] sm:$0xff]  ;;  %v210_v50 = vlaneseq }
  0x8d   :  { %5802 = vmatpush1.bf16.msra.mxu1 %v5801_v39  ;;  %5772 = vmatprep.subr.bf16.mxu0 %v5771_v40  ;;  %v189_v60 = vld [vmem:[#allocation10 + $0x168] sm:$0xff]  ;;  %v187_v61 = vld [vmem:[#allocation10 + $0x158] sm:$0xff]  ;;  %v5777_v63 = vpack.c.bf16 %v180_v55, %v176_v54  ;;  %v5809_v1 = vpack.c.bf16 %v182_v58, %v178_v56  ;;  %v184_v3 = vld [vmem:[#allocation10 + $0x140] sm:$0xff] }
  0x8e   :  { %5804 = vmatprep.subr.bf16.mxu1 %v5803_v44  ;;  %v191_v62 = vld [vmem:[#allocation10 + $0x178] sm:$0xff]  ;;  %v5779_v2 = vpack.c.bf16 %v189_v60, %v185_v59  ;;  %v188_v4 = vld [vmem:[#allocation10 + $0x160] sm:$0xff]  ;;  %v186_v5 = vld [vmem:[#allocation10 + $0x150] sm:$0xff] }
  0x8f   :  { %v5811_v6 = vpack.c.bf16 %v191_v62, %v187_v61  ;;  %v190_v7 = vld [vmem:[#allocation10 + $0x170] sm:$0xff]  ;;  %v193_v8 = vld [vmem:[#allocation10 + $0x188] sm:$0xff]  ;;  %v195_v10 = vld [vmem:[#allocation10 + $0x198] sm:$0xff]  ;;  %v5781_v12 = vpack.c.bf16 %v188_v4, %v184_v3 }
  0x90   :  { %5774 = vmatpush1.bf16.msra.mxu0 %v5773_v51  ;;  %v197_v9 = vld [vmem:[#allocation10 + $0x1a8] sm:$0xff]  ;;  %v199_v11 = vld [vmem:[#allocation10 + $0x1b8] sm:$0xff]  ;;  %v5813_v13 = vpack.c.bf16 %v190_v7, %v186_v5  ;;  %v192_v15 = vld [vmem:[#allocation10 + $0x180] sm:$0xff]  ;;  %v211_v51 = vshrl.u32 %v210_v50, 7 }
  0x91   :  { %5806 = vmatpush1.bf16.msra.mxu1 %v5805_v52  ;;  %5776 = vmatprep.subr.bf16.mxu0 %v5775_v53  ;;  %v5783_v14 = vpack.c.bf16 %v197_v9, %v193_v8  ;;  %v196_v16 = vld [vmem:[#allocation10 + $0x1a0] sm:$0xff]  ;;  %v194_v17 = vld [vmem:[#allocation10 + $0x190] sm:$0xff]  ;;  %v5815_v18 = vpack.c.bf16 %v199_v11, %v195_v10  ;;  %v201_v20 = vld [vmem:[#allocation10 + $0x1c8] sm:$0xff] }
  0x92   :  { %5808 = vmatprep.subr.bf16.mxu1 %v5807_v57  ;;  %v198_v19 = vld [vmem:[#allocation10 + $0x1b0] sm:$0xff]  ;;  %v205_v21 = vld [vmem:[#allocation10 + $0x1e8] sm:$0xff]  ;;  %v203_v22 = vld [vmem:[#allocation10 + $0x1d8] sm:$0xff]  ;;  %v5785_v24 = vpack.c.bf16 %v196_v16, %v192_v15  ;;  %v7737_v52 = vsub.s32 0, %v211_v51  ;;  %v7739_v54 = vsub.s32 2, %v211_v51  ;;  %v7741_v55 = vsub.s32 1, %v211_v51 }
  0x93   :  { %v207_v23 = vld [vmem:[#allocation10 + $0x1f8] sm:$0xff]  ;;  %v5817_v25 = vpack.c.bf16 %v198_v19, %v194_v17  ;;  %v5787_v26 = vpack.c.bf16 %v205_v21, %v201_v20  ;;  %v200_v27 = vld [vmem:[#allocation10 + $0x1c0] sm:$0xff]  ;;  %v202_v30 = vld [vmem:[#allocation10 + $0x1d0] sm:$0xff]  ;;  %v7743_v56 = vsub.s32 3, %v211_v51 }
  0x94   :  { %5778 = vmatpush1.bf16.msra.mxu0 %v5777_v63  ;;  %v204_v28 = vld [vmem:[#allocation10 + $0x1e0] sm:$0xff]  ;;  %v5819_v29 = vpack.c.bf16 %v207_v23, %v203_v22  ;;  %v206_v31 = vld [vmem:[#allocation10 + $0x1f0] sm:$0xff]  ;;  %v129_v35 = vld [vmem:[#allocation5 + $0x8] sm:$0xff] }
  0x95   :  { %5810 = vmatpush1.bf16.msra.mxu1 %v5809_v1  ;;  %5780 = vmatprep.subr.bf16.mxu0 %v5779_v2  ;;  %v5789_v32 = vpack.c.bf16 %v204_v28, %v200_v27  ;;  %v5821_v33 = vpack.c.bf16 %v206_v31, %v202_v30  ;;  %v128_v34 = vld [vmem:[#allocation5] sm:$0xff]  ;;  %v130_v36 = vld [vmem:[#allocation5 + $0x10] sm:$0xff]  ;;  %v131_v37 = vld [vmem:[#allocation5 + $0x18] sm:$0xff] }
  0x96   :  { %5812 = vmatprep.subr.bf16.mxu1 %v5811_v6  ;;  %v132_v38 = vld [vmem:[#allocation5 + $0x20] sm:$0xff]  ;;  %v133_v39 = vld [vmem:[#allocation5 + $0x28] sm:$0xff]  ;;  %v134_v40 = vld [vmem:[#allocation5 + $0x30] sm:$0xff] }
  0x97   :  { %v135_v41 = vld [vmem:[#allocation5 + $0x38] sm:$0xff]  ;;  %v136_v42 = vld [vmem:[#allocation5 + $0x40] sm:$0xff]  ;;  %v137_v43 = vld [vmem:[#allocation5 + $0x48] sm:$0xff] }
  0x98   :  { %5782 = vmatpush1.bf16.msra.mxu0 %v5781_v12  ;;  %v138_v44 = vld [vmem:[#allocation5 + $0x50] sm:$0xff]  ;;  %v139_v45 = vld [vmem:[#allocation5 + $0x58] sm:$0xff]  ;;  %v140_v46 = vld [vmem:[#allocation5 + $0x60] sm:$0xff] }
  0x99   :  { %5814 = vmatpush1.bf16.msra.mxu1 %v5813_v13  ;;  %5784 = vmatprep.subr.bf16.mxu0 %v5783_v14  ;;  %v141_v47 = vld [vmem:[#allocation5 + $0x68] sm:$0xff]  ;;  %v142_v48 = vld [vmem:[#allocation5 + $0x70] sm:$0xff]  ;;  %v143_v49 = vld [vmem:[#allocation5 + $0x78] sm:$0xff] }
  0x9a   :  { %5816 = vmatprep.subr.bf16.mxu1 %v5815_v18  ;;  %v208_v53 = vld [vmem:[#allocation13] sm:$0xf] }
  0x9b   :  { %v7746_v57 = vrot.slane %v208_v53, %v7737_v52  ;;  %v7749_v58 = vrot.slane %v208_v53, %v7739_v54  ;;  %v7752_v59 = vrot.slane %v208_v53, %v7741_v55  ;;  %v7755_v60 = vrot.slane %v208_v53, %v7743_v56 }
  0x9c   :  { %5786 = vmatpush1.bf16.msra.mxu0 %v5785_v24 }
  0x9d   :  { %5818 = vmatpush1.bf16.msra.mxu1 %v5817_v25  ;;  %5788 = vmatprep.subr.bf16.mxu0 %v5787_v26 }
  0x9e   :  { %5820 = vmatprep.subr.bf16.mxu1 %v5819_v29 }
  0xa0   :  { %5790 = vmatpush1.bf16.msra.mxu0 %v5789_v32 }
  0xa1   :  { %5822 = vmatpush1.bf16.msra.mxu1 %v5821_v33 }
  0xa3   :  { %295 = vmatmul.mubr.f32.vlgmr.msra.gmra.mrb[0].mxu0 %v128_v34 }
  0xa4   :  { %456 = vmatmul.mubr.f32.vlgmr.msra.gmra.mrb[0].mxu1 %v128_v34  ;;  %300 = vmatprep.mubr.f32.mxu0 %v7542_v0 }
  0xa5   :  { %461 = vmatprep.mubr.f32.mxu1 %v7542_v0 }
  0xa7   :  { %301 = vmatmul.mubr.f32.gmra.mrb[2].mxu0 %v129_v35 }
  0xa8   :  { %462 = vmatmul.mubr.f32.gmra.mrb[2].mxu1 %v129_v35  ;;  %306 = vmatprep.mubr.f32.mxu0 %v7542_v0 }
  0xa9   :  { %467 = vmatprep.mubr.f32.mxu1 %v7542_v0 }
  0xab   :  { %307 = vmatmul.mubr.f32.gmra.mrb[4].mxu0 %v130_v36 }
  0xac   :  { %468 = vmatmul.mubr.f32.gmra.mrb[4].mxu1 %v130_v36  ;;  %312 = vmatprep.mubr.f32.mxu0 %v7542_v0 }
  0xad   :  { %473 = vmatprep.mubr.f32.mxu1 %v7542_v0 }
  0xaf   :  { %313 = vmatmul.mubr.f32.gmra.mrb[6].mxu0 %v131_v37 }
  0xb0   :  { %474 = vmatmul.mubr.f32.gmra.mrb[6].mxu1 %v131_v37  ;;  %318 = vmatprep.mubr.f32.mxu0 %v7542_v0 }
  0xb1   :  { %479 = vmatprep.mubr.f32.mxu1 %v7542_v0 }
  0xb3   :  { %319 = vmatmul.mubr.f32.gmra.mrb[8].mxu0 %v132_v38 }
  0xb4   :  { %480 = vmatmul.mubr.f32.gmra.mrb[8].mxu1 %v132_v38  ;;  %324 = vmatprep.mubr.f32.mxu0 %v7542_v0 }
  0xb5   :  { %485 = vmatprep.mubr.f32.mxu1 %v7542_v0 }
  0xb7   :  { %325 = vmatmul.mubr.f32.gmra.mrb[10].mxu0 %v133_v39 }
  0xb8   :  { %486 = vmatmul.mubr.f32.gmra.mrb[10].mxu1 %v133_v39  ;;  %330 = vmatprep.mubr.f32.mxu0 %v7542_v0 }
  0xb9   :  { %491 = vmatprep.mubr.f32.mxu1 %v7542_v0 }
  0xbb   :  { %331 = vmatmul.mubr.f32.gmra.mrb[12].mxu0 %v134_v40 }
  0xbc   :  { %492 = vmatmul.mubr.f32.gmra.mrb[12].mxu1 %v134_v40  ;;  %336 = vmatprep.mubr.f32.mxu0 %v7542_v0 }
  0xbd   :  { %497 = vmatprep.mubr.f32.mxu1 %v7542_v0 }
  0xbf   :  { %337 = vmatmul.mubr.f32.gmra.mrb[14].mxu0 %v135_v41 }
  0xc0   :  { %498 = vmatmul.mubr.f32.gmra.mrb[14].mxu1 %v135_v41  ;;  %342 = vmatprep.mubr.f32.mxu0 %v7542_v0 }
  0xc1   :  { %503 = vmatprep.mubr.f32.mxu1 %v7542_v0 }
  0xc3   :  { %343 = vmatmul.mubr.f32.gmra.mrb[16].mxu0 %v136_v42 }
  0xc4   :  { %504 = vmatmul.mubr.f32.gmra.mrb[16].mxu1 %v136_v42  ;;  %348 = vmatprep.mubr.f32.mxu0 %v7542_v0 }
  0xc5   :  { %509 = vmatprep.mubr.f32.mxu1 %v7542_v0 }
  0xc7   :  { %349 = vmatmul.mubr.f32.gmra.mrb[18].mxu0 %v137_v43 }
  0xc8   :  { %510 = vmatmul.mubr.f32.gmra.mrb[18].mxu1 %v137_v43  ;;  %354 = vmatprep.mubr.f32.mxu0 %v7542_v0 }
  0xc9   :  { %515 = vmatprep.mubr.f32.mxu1 %v7542_v0 }
  0xcb   :  { %355 = vmatmul.mubr.f32.gmra.mrb[20].mxu0 %v138_v44 }
  0xcc   :  { %516 = vmatmul.mubr.f32.gmra.mrb[20].mxu1 %v138_v44  ;;  %360 = vmatprep.mubr.f32.mxu0 %v7542_v0 }
  0xcd   :  { %521 = vmatprep.mubr.f32.mxu1 %v7542_v0 }
  0xcf   :  { %361 = vmatmul.mubr.f32.gmra.mrb[22].mxu0 %v139_v45 }
  0xd0   :  { %522 = vmatmul.mubr.f32.gmra.mrb[22].mxu1 %v139_v45  ;;  %366 = vmatprep.mubr.f32.mxu0 %v7542_v0 }
  0xd1   :  { %527 = vmatprep.mubr.f32.mxu1 %v7542_v0 }
  0xd3   :  { %367 = vmatmul.mubr.f32.gmra.mrb[24].mxu0 %v140_v46 }
  0xd4   :  { %528 = vmatmul.mubr.f32.gmra.mrb[24].mxu1 %v140_v46  ;;  %372 = vmatprep.mubr.f32.mxu0 %v7542_v0 }
  0xd5   :  { %533 = vmatprep.mubr.f32.mxu1 %v7542_v0 }
  0xd7   :  { %373 = vmatmul.mubr.f32.gmra.mrb[26].mxu0 %v141_v47 }
  0xd8   :  { %534 = vmatmul.mubr.f32.gmra.mrb[26].mxu1 %v141_v47  ;;  %378 = vmatprep.mubr.f32.mxu0 %v7542_v0 }
  0xd9   :  { %539 = vmatprep.mubr.f32.mxu1 %v7542_v0 }
  0xdb   :  { %379 = vmatmul.mubr.f32.gmra.mrb[28].mxu0 %v142_v48 }
  0xdc   :  { %540 = vmatmul.mubr.f32.gmra.mrb[28].mxu1 %v142_v48  ;;  %384 = vmatprep.mubr.f32.mxu0 %v7542_v0 }
  0xdd   :  { %545 = vmatprep.mubr.f32.mxu1 %v7542_v0 }
  0xdf   :  { %385 = vmatmul.mubr.f32.gmra.mrb[30].mxu0 %v143_v49 }
  0xe0   :  { %546 = vmatmul.mubr.f32.gmra.mrb[30].mxu1 %v143_v49 }
 0x176   :  { %v296_v61 = vpop.f32.mrb[0].mxu0 }
 0x177   :  { %v297_v62 = vadd.f32 %v296_v61, %v7746_v57  ;;  %v457_v63 = vpop.f32.mrb[0].mxu1  ;;  %v298_v1 = vpop.f32.mrb[1].mxu0 }
 0x178   :  { %v458_v2 = vadd.f32 %v457_v63, %v7749_v58  ;;  %v299_v3 = vadd.f32 %v298_v1, %v7752_v59  ;;  %v459_v4 = vpop.f32.mrb[1].mxu1 }
 0x179   :  { %552 = vst [vmem:[#allocation4] sm:$0xff] %v297_v62  ;;  %v460_v5 = vadd.f32 %v459_v4, %v7755_v60 }
 0x17a   :  { %554 = vst [vmem:[#allocation4 + $0x10] sm:$0xff] %v458_v2  ;;  %553 = vst [vmem:[#allocation4 + $0x8] sm:$0xff] %v299_v3  ;;  %v302_v6 = vpop.f32.mrb[2].mxu0 }
 0x17b   :  { %555 = vst [vmem:[#allocation4 + $0x18] sm:$0xff] %v460_v5  ;;  %v303_v7 = vadd.f32 %v302_v6, %v7746_v57  ;;  %v463_v8 = vpop.f32.mrb[2].mxu1  ;;  %v304_v9 = vpop.f32.mrb[3].mxu0 }
 0x17c   :  { %v464_v10 = vadd.f32 %v463_v8, %v7749_v58  ;;  %v305_v11 = vadd.f32 %v304_v9, %v7752_v59  ;;  %v465_v12 = vpop.f32.mrb[3].mxu1 }
 0x17d   :  { %556 = vst [vmem:[#allocation4 + $0x20] sm:$0xff] %v303_v7  ;;  %v466_v13 = vadd.f32 %v465_v12, %v7755_v60 }
 0x17e   :  { %558 = vst [vmem:[#allocation4 + $0x30] sm:$0xff] %v464_v10  ;;  %557 = vst [vmem:[#allocation4 + $0x28] sm:$0xff] %v305_v11  ;;  %v308_v14 = vpop.f32.mrb[4].mxu0 }
 0x17f   :  { %559 = vst [vmem:[#allocation4 + $0x38] sm:$0xff] %v466_v13  ;;  %v309_v15 = vadd.f32 %v308_v14, %v7746_v57  ;;  %v469_v16 = vpop.f32.mrb[4].mxu1  ;;  %v310_v17 = vpop.f32.mrb[5].mxu0 }
 0x180   :  { %v470_v18 = vadd.f32 %v469_v16, %v7749_v58  ;;  %v311_v19 = vadd.f32 %v310_v17, %v7752_v59  ;;  %v471_v20 = vpop.f32.mrb[5].mxu1 }
 0x181   :  { %560 = vst [vmem:[#allocation4 + $0x40] sm:$0xff] %v309_v15  ;;  %v472_v21 = vadd.f32 %v471_v20, %v7755_v60 }
 0x182   :  { %562 = vst [vmem:[#allocation4 + $0x50] sm:$0xff] %v470_v18  ;;  %561 = vst [vmem:[#allocation4 + $0x48] sm:$0xff] %v311_v19  ;;  %v314_v22 = vpop.f32.mrb[6].mxu0 }
 0x183   :  { %563 = vst [vmem:[#allocation4 + $0x58] sm:$0xff] %v472_v21  ;;  %v315_v23 = vadd.f32 %v314_v22, %v7746_v57  ;;  %v475_v24 = vpop.f32.mrb[6].mxu1  ;;  %v316_v25 = vpop.f32.mrb[7].mxu0 }
 0x184   :  { %v476_v26 = vadd.f32 %v475_v24, %v7749_v58  ;;  %v317_v27 = vadd.f32 %v316_v25, %v7752_v59  ;;  %v477_v28 = vpop.f32.mrb[7].mxu1 }
 0x185   :  { %564 = vst [vmem:[#allocation4 + $0x60] sm:$0xff] %v315_v23  ;;  %v478_v29 = vadd.f32 %v477_v28, %v7755_v60 }
 0x186   :  { %566 = vst [vmem:[#allocation4 + $0x70] sm:$0xff] %v476_v26  ;;  %565 = vst [vmem:[#allocation4 + $0x68] sm:$0xff] %v317_v27  ;;  %v320_v30 = vpop.f32.mrb[8].mxu0 }
 0x187   :  { %567 = vst [vmem:[#allocation4 + $0x78] sm:$0xff] %v478_v29  ;;  %v321_v31 = vadd.f32 %v320_v30, %v7746_v57  ;;  %v481_v32 = vpop.f32.mrb[8].mxu1  ;;  %v322_v33 = vpop.f32.mrb[9].mxu0 }
 0x188   :  { %v482_v34 = vadd.f32 %v481_v32, %v7749_v58  ;;  %v323_v35 = vadd.f32 %v322_v33, %v7752_v59  ;;  %v483_v36 = vpop.f32.mrb[9].mxu1 }
 0x189   :  { %568 = vst [vmem:[#allocation4 + $0x80] sm:$0xff] %v321_v31  ;;  %v484_v37 = vadd.f32 %v483_v36, %v7755_v60 }
 0x18a   :  { %570 = vst [vmem:[#allocation4 + $0x90] sm:$0xff] %v482_v34  ;;  %569 = vst [vmem:[#allocation4 + $0x88] sm:$0xff] %v323_v35  ;;  %v326_v38 = vpop.f32.mrb[10].mxu0 }
 0x18b   :  { %571 = vst [vmem:[#allocation4 + $0x98] sm:$0xff] %v484_v37  ;;  %v327_v39 = vadd.f32 %v326_v38, %v7746_v57  ;;  %v487_v40 = vpop.f32.mrb[10].mxu1  ;;  %v328_v41 = vpop.f32.mrb[11].mxu0 }
 0x18c   :  { %v488_v42 = vadd.f32 %v487_v40, %v7749_v58  ;;  %v329_v43 = vadd.f32 %v328_v41, %v7752_v59  ;;  %v489_v44 = vpop.f32.mrb[11].mxu1 }
 0x18d   :  { %572 = vst [vmem:[#allocation4 + $0xa0] sm:$0xff] %v327_v39  ;;  %v490_v45 = vadd.f32 %v489_v44, %v7755_v60 }
 0x18e   :  { %574 = vst [vmem:[#allocation4 + $0xb0] sm:$0xff] %v488_v42  ;;  %573 = vst [vmem:[#allocation4 + $0xa8] sm:$0xff] %v329_v43  ;;  %v332_v46 = vpop.f32.mrb[12].mxu0 }
 0x18f   :  { %575 = vst [vmem:[#allocation4 + $0xb8] sm:$0xff] %v490_v45  ;;  %v333_v47 = vadd.f32 %v332_v46, %v7746_v57  ;;  %v493_v48 = vpop.f32.mrb[12].mxu1  ;;  %v334_v49 = vpop.f32.mrb[13].mxu0 }
 0x190   :  { %v494_v50 = vadd.f32 %v493_v48, %v7749_v58  ;;  %v335_v51 = vadd.f32 %v334_v49, %v7752_v59  ;;  %v495_v53 = vpop.f32.mrb[13].mxu1 }
 0x191   :  { %576 = vst [vmem:[#allocation4 + $0xc0] sm:$0xff] %v333_v47  ;;  %v496_v61 = vadd.f32 %v495_v53, %v7755_v60 }
 0x192   :  { %578 = vst [vmem:[#allocation4 + $0xd0] sm:$0xff] %v494_v50  ;;  %577 = vst [vmem:[#allocation4 + $0xc8] sm:$0xff] %v335_v51  ;;  %v338_v62 = vpop.f32.mrb[14].mxu0 }
 0x193   :  { %579 = vst [vmem:[#allocation4 + $0xd8] sm:$0xff] %v496_v61  ;;  %v339_v63 = vadd.f32 %v338_v62, %v7746_v57  ;;  %v499_v1 = vpop.f32.mrb[14].mxu1  ;;  %v340_v2 = vpop.f32.mrb[15].mxu0 }
 0x194   :  { %v500_v3 = vadd.f32 %v499_v1, %v7749_v58  ;;  %v341_v4 = vadd.f32 %v340_v2, %v7752_v59  ;;  %v501_v5 = vpop.f32.mrb[15].mxu1 }
 0x195   :  { %580 = vst [vmem:[#allocation4 + $0xe0] sm:$0xff] %v339_v63  ;;  %v502_v6 = vadd.f32 %v501_v5, %v7755_v60 }
 0x196   :  { %582 = vst [vmem:[#allocation4 + $0xf0] sm:$0xff] %v500_v3  ;;  %581 = vst [vmem:[#allocation4 + $0xe8] sm:$0xff] %v341_v4  ;;  %v344_v7 = vpop.f32.mrb[16].mxu0 }
 0x197   :  { %583 = vst [vmem:[#allocation4 + $0xf8] sm:$0xff] %v502_v6  ;;  %v345_v8 = vadd.f32 %v344_v7, %v7746_v57  ;;  %v505_v9 = vpop.f32.mrb[16].mxu1  ;;  %v346_v10 = vpop.f32.mrb[17].mxu0 }
 0x198   :  { %v506_v11 = vadd.f32 %v505_v9, %v7749_v58  ;;  %v347_v12 = vadd.f32 %v346_v10, %v7752_v59  ;;  %v507_v13 = vpop.f32.mrb[17].mxu1 }
 0x199   :  { %584 = vst [vmem:[#allocation4 + $0x100] sm:$0xff] %v345_v8  ;;  %v508_v14 = vadd.f32 %v507_v13, %v7755_v60 }
 0x19a   :  { %586 = vst [vmem:[#allocation4 + $0x110] sm:$0xff] %v506_v11  ;;  %585 = vst [vmem:[#allocation4 + $0x108] sm:$0xff] %v347_v12  ;;  %v350_v15 = vpop.f32.mrb[18].mxu0 }
 0x19b   :  { %587 = vst [vmem:[#allocation4 + $0x118] sm:$0xff] %v508_v14  ;;  %v351_v16 = vadd.f32 %v350_v15, %v7746_v57  ;;  %v511_v17 = vpop.f32.mrb[18].mxu1  ;;  %v352_v18 = vpop.f32.mrb[19].mxu0 }
 0x19c   :  { %v512_v19 = vadd.f32 %v511_v17, %v7749_v58  ;;  %v353_v20 = vadd.f32 %v352_v18, %v7752_v59  ;;  %v513_v21 = vpop.f32.mrb[19].mxu1  ;;  %v7823_v17 = vmov 0.0  }
 0x19d   :  { %588 = vst [vmem:[#allocation4 + $0x120] sm:$0xff] %v351_v16  ;;  %v514_v22 = vadd.f32 %v513_v21, %v7755_v60  ;;  %v7821_v16 = vmov 0.0  }
 0x19e   :  { %590 = vst [vmem:[#allocation4 + $0x130] sm:$0xff] %v512_v19  ;;  %589 = vst [vmem:[#allocation4 + $0x128] sm:$0xff] %v353_v20  ;;  %v356_v23 = vpop.f32.mrb[20].mxu0 }
 0x19f   :  { %591 = vst [vmem:[#allocation4 + $0x138] sm:$0xff] %v514_v22  ;;  %v357_v24 = vadd.f32 %v356_v23, %v7746_v57  ;;  %v517_v25 = vpop.f32.mrb[20].mxu1  ;;  %v358_v26 = vpop.f32.mrb[21].mxu0 }
 0x1a0   :  { %v518_v27 = vadd.f32 %v517_v25, %v7749_v58  ;;  %v359_v28 = vadd.f32 %v358_v26, %v7752_v59  ;;  %v519_v29 = vpop.f32.mrb[21].mxu1 }
 0x1a1   :  { %592 = vst [vmem:[#allocation4 + $0x140] sm:$0xff] %v357_v24  ;;  %v520_v30 = vadd.f32 %v519_v29, %v7755_v60 }
 0x1a2   :  { %594 = vst [vmem:[#allocation4 + $0x150] sm:$0xff] %v518_v27  ;;  %593 = vst [vmem:[#allocation4 + $0x148] sm:$0xff] %v359_v28  ;;  %v362_v31 = vpop.f32.mrb[22].mxu0 }
 0x1a3   :  { %595 = vst [vmem:[#allocation4 + $0x158] sm:$0xff] %v520_v30  ;;  %v363_v32 = vadd.f32 %v362_v31, %v7746_v57  ;;  %v523_v33 = vpop.f32.mrb[22].mxu1  ;;  %v364_v34 = vpop.f32.mrb[23].mxu0 }
 0x1a4   :  { %v524_v35 = vadd.f32 %v523_v33, %v7749_v58  ;;  %v365_v36 = vadd.f32 %v364_v34, %v7752_v59  ;;  %v525_v37 = vpop.f32.mrb[23].mxu1 }
 0x1a5   :  { %596 = vst [vmem:[#allocation4 + $0x160] sm:$0xff] %v363_v32  ;;  %v526_v38 = vadd.f32 %v525_v37, %v7755_v60 }
 0x1a6   :  { %598 = vst [vmem:[#allocation4 + $0x170] sm:$0xff] %v524_v35  ;;  %597 = vst [vmem:[#allocation4 + $0x168] sm:$0xff] %v365_v36  ;;  %v368_v39 = vpop.f32.mrb[24].mxu0 }
 0x1a7   :  { %599 = vst [vmem:[#allocation4 + $0x178] sm:$0xff] %v526_v38  ;;  %v369_v40 = vadd.f32 %v368_v39, %v7746_v57  ;;  %v529_v41 = vpop.f32.mrb[24].mxu1  ;;  %v370_v42 = vpop.f32.mrb[25].mxu0 }
 0x1a8   :  { %v530_v43 = vadd.f32 %v529_v41, %v7749_v58  ;;  %v371_v44 = vadd.f32 %v370_v42, %v7752_v59  ;;  %v531_v45 = vpop.f32.mrb[25].mxu1 }
 0x1a9   :  { %600 = vst [vmem:[#allocation4 + $0x180] sm:$0xff] %v369_v40  ;;  %v532_v46 = vadd.f32 %v531_v45, %v7755_v60 }
 0x1aa   :  { %602 = vst [vmem:[#allocation4 + $0x190] sm:$0xff] %v530_v43  ;;  %601 = vst [vmem:[#allocation4 + $0x188] sm:$0xff] %v371_v44  ;;  %v374_v47 = vpop.f32.mrb[26].mxu0 }
 0x1ab   :  { %603 = vst [vmem:[#allocation4 + $0x198] sm:$0xff] %v532_v46  ;;  %v375_v48 = vadd.f32 %v374_v47, %v7746_v57  ;;  %v535_v49 = vpop.f32.mrb[26].mxu1  ;;  %v376_v50 = vpop.f32.mrb[27].mxu0 }
 0x1ac   :  { %v536_v51 = vadd.f32 %v535_v49, %v7749_v58  ;;  %v377_v53 = vadd.f32 %v376_v50, %v7752_v59  ;;  %v537_v61 = vpop.f32.mrb[27].mxu1 }
 0x1ad   :  { %604 = vst [vmem:[#allocation4 + $0x1a0] sm:$0xff] %v375_v48  ;;  %v538_v62 = vadd.f32 %v537_v61, %v7755_v60 }
 0x1ae   :  { %606 = vst [vmem:[#allocation4 + $0x1b0] sm:$0xff] %v536_v51  ;;  %605 = vst [vmem:[#allocation4 + $0x1a8] sm:$0xff] %v377_v53  ;;  %v380_v63 = vpop.f32.mrb[28].mxu0 }
 0x1af   :  { %607 = vst [vmem:[#allocation4 + $0x1b8] sm:$0xff] %v538_v62  ;;  %v381_v1 = vadd.f32 %v380_v63, %v7746_v57  ;;  %v541_v2 = vpop.f32.mrb[28].mxu1  ;;  %v382_v3 = vpop.f32.mrb[29].mxu0 }
 0x1b0   :  { %v542_v4 = vadd.f32 %v541_v2, %v7749_v58  ;;  %v383_v5 = vadd.f32 %v382_v3, %v7752_v59  ;;  %v543_v6 = vpop.f32.mrb[29].mxu1 }
 0x1b1   :  { %608 = vst [vmem:[#allocation4 + $0x1c0] sm:$0xff] %v381_v1  ;;  %v544_v7 = vadd.f32 %v543_v6, %v7755_v60 }
 0x1b2   :  { %610 = vst [vmem:[#allocation4 + $0x1d0] sm:$0xff] %v542_v4  ;;  %609 = vst [vmem:[#allocation4 + $0x1c8] sm:$0xff] %v383_v5  ;;  %v386_v8 = vpop.f32.mrb[30].mxu0 }
 0x1b3   :  { %611 = vst [vmem:[#allocation4 + $0x1d8] sm:$0xff] %v544_v7  ;;  %v387_v9 = vadd.f32 %v386_v8, %v7746_v57  ;;  %v547_v10 = vpop.f32.mrb[30].mxu1  ;;  %v388_v11 = vpop.f32.mrb[31].mxu0 }
 0x1b4   :  { %v548_v12 = vadd.f32 %v547_v10, %v7749_v58  ;;  %v389_v13 = vadd.f32 %v388_v11, %v7752_v59  ;;  %v549_v14 = vpop.f32.mrb[31].mxu1 }
 0x1b5   :  { %612 = vst [vmem:[#allocation4 + $0x1e0] sm:$0xff] %v387_v9  ;;  %v550_v15 = vadd.f32 %v549_v14, %v7755_v60 }
 0x1b6   :  { %614 = vst [vmem:[#allocation4 + $0x1f0] sm:$0xff] %v548_v12  ;;  %613 = vst [vmem:[#allocation4 + $0x1e8] sm:$0xff] %v389_v13 }
 0x1b7   :  { %615 = vst [vmem:[#allocation4 + $0x1f8] sm:$0xff] %v550_v15 }
 0x1b8 LB: > { %v632_v57 = vld [vmem:[#allocation11 + $0x8] sm:$0xff]  ;;  %v631_v59 = vld [vmem:[#allocation11] sm:$0xff]  ;;  %v7543_v21 = vmov 0.0   ;;  %v634_v33 = vld [vmem:[#allocation11 + $0x18] sm:$0xff]  ;;  %s5751_s10 = sshll.u32 %s7443_s6, 5  ;;  %s5705_s16 = sshll.u32 %s7443_s6, 3  ;;  %s7443_s6 = sphi %s7825_s6, %s621_s6   ;;  %v7439_v17 = vphi %v7823_v17, %v8685_v17   ;;  %v7435_v16 = vphi %v7821_v16, %v8684_v16  }
 0x1b9   : > { %v636_v58 = vld [vmem:[#allocation11 + $0x28] sm:$0xff]  ;;  %v635_v18 = vld [vmem:[#allocation11 + $0x20] sm:$0xff]  ;;  %759 = vmatprep.mubr.f32.mxu0 %v7543_v21  ;;  %830 = vmatprep.mubr.f32.mxu1 %v7543_v21  ;;  %v638_v34 = vld [vmem:[#allocation11 + $0x38] sm:$0xff]  ;;  %s626_s14 = scalar_lea.vmem [#allocation4], %s5751_s10  ;;  %s866_s17 = scalar_lea.vmem [#allocation17], %s5705_s16 }
 0x1ba   : > { %v5823_v60 = vpack.c.bf16 %v636_v58, %v632_v57  ;;  %v640_v19 = vld [vmem:[#allocation11 + $0x48] sm:$0xff]  ;;  %v5825_v22 = vpack.c.bf16 %v635_v18, %v631_v59  ;;  %v639_v24 = vld [vmem:[#allocation11 + $0x40] sm:$0xff]  ;;  %v5855_v36 = vpack.c.bf16 %v638_v34, %v634_v33  ;;  %v633_v37 = vld [vmem:[#allocation11 + $0x10] sm:$0xff]  ;;  %s621_s6 = sadd.s32 1, %s7443_s6  }
 0x1bb   : > { %v644_v20 = vld [vmem:[#allocation11 + $0x68] sm:$0xff]  ;;  %v643_v25 = vld [vmem:[#allocation11 + $0x60] sm:$0xff]  ;;  %v637_v38 = vld [vmem:[#allocation11 + $0x30] sm:$0xff]  ;;  %p618_p0 = scmp.ge.s32.totalorder %s621_s6, 16  }
 0x1bc   : > { %v5827_v23 = vpack.c.bf16 %v644_v20, %v640_v19  ;;  %v648_v26 = vld [vmem:[#allocation11 + $0x88] sm:$0xff]  ;;  %5824 = vmatprep.subr.bf16.mxu0 %v5823_v60  ;;  %v5829_v28 = vpack.c.bf16 %v643_v25, %v639_v24  ;;  %v647_v29 = vld [vmem:[#allocation11 + $0x80] sm:$0xff]  ;;  %v5857_v39 = vpack.c.bf16 %v637_v38, %v633_v37  ;;  %5856 = vmatprep.subr.bf16.mxu1 %v5855_v36  ;;  %v642_v41 = vld [vmem:[#allocation11 + $0x58] sm:$0xff]  ;;  %s7960_s18 = smov (%p618_p0), 0  }
 0x1bd   : > { %v652_v27 = vld [vmem:[#allocation11 + $0xa8] sm:$0xff]  ;;  %5826 = vmatpush1.bf16.msra.mxu0 %v5825_v22  ;;  %v651_v30 = vld [vmem:[#allocation11 + $0xa0] sm:$0xff]  ;;  %v646_v42 = vld [vmem:[#allocation11 + $0x78] sm:$0xff] }
 0x1be   : > { %5828 = vmatprep.subr.bf16.mxu0 %v5827_v23  ;;  %v5831_v31 = vpack.c.bf16 %v652_v27, %v648_v26  ;;  %v656_v32 = vld [vmem:[#allocation11 + $0xc8] sm:$0xff]  ;;  %v5833_v40 = vpack.c.bf16 %v651_v30, %v647_v29  ;;  %v641_v43 = vld [vmem:[#allocation11 + $0x50] sm:$0xff]  ;;  %v655_v45 = vld [vmem:[#allocation11 + $0xc0] sm:$0xff]  ;;  %5858 = vmatpush1.bf16.msra.mxu1 %v5857_v39  ;;  %v5859_v47 = vpack.c.bf16 %v646_v42, %v642_v41 }
 0x1bf   : > { %v660_v35 = vld [vmem:[#allocation11 + $0xe8] sm:$0xff]  ;;  %v659_v46 = vld [vmem:[#allocation11 + $0xe0] sm:$0xff]  ;;  %v645_v48 = vld [vmem:[#allocation11 + $0x70] sm:$0xff] }
 0x1c0   : > { %v5835_v44 = vpack.c.bf16 %v660_v35, %v656_v32  ;;  %v664_v49 = vld [vmem:[#allocation11 + $0x108] sm:$0xff]  ;;  %v5861_v51 = vpack.c.bf16 %v645_v48, %v641_v43  ;;  %v650_v53 = vld [vmem:[#allocation11 + $0x98] sm:$0xff]  ;;  %5860 = vmatprep.subr.bf16.mxu1 %v5859_v47  ;;  %v649_v62 = vld [vmem:[#allocation11 + $0x90] sm:$0xff]  ;;  %v5837_v1 = vpack.c.bf16 %v659_v46, %v655_v45 }
 0x1c1   : > { %5830 = vmatpush1.bf16.msra.mxu0 %v5829_v28  ;;  %v668_v50 = vld [vmem:[#allocation11 + $0x128] sm:$0xff]  ;;  %v654_v61 = vld [vmem:[#allocation11 + $0xb8] sm:$0xff]  ;;  %v653_v63 = vld [vmem:[#allocation11 + $0xb0] sm:$0xff] }
 0x1c2   : > { %5832 = vmatprep.subr.bf16.mxu0 %v5831_v31  ;;  %v663_v2 = vld [vmem:[#allocation11 + $0x100] sm:$0xff]  ;;  %v5863_v4 = vpack.c.bf16 %v654_v61, %v650_v53  ;;  %v5839_v5 = vpack.c.bf16 %v668_v50, %v664_v49  ;;  %5862 = vmatpush1.bf16.msra.mxu1 %v5861_v51  ;;  %v672_v6 = vld [vmem:[#allocation11 + $0x148] sm:$0xff]  ;;  %v5865_v7 = vpack.c.bf16 %v653_v63, %v649_v62  ;;  %v658_v8 = vld [vmem:[#allocation11 + $0xd8] sm:$0xff] }
 0x1c3   : > { %v667_v3 = vld [vmem:[#allocation11 + $0x120] sm:$0xff]  ;;  %v662_v9 = vld [vmem:[#allocation11 + $0xf8] sm:$0xff]  ;;  %v676_v10 = vld [vmem:[#allocation11 + $0x168] sm:$0xff] }
 0x1c4   : > { %5864 = vmatprep.subr.bf16.mxu1 %v5863_v4  ;;  %v5867_v11 = vpack.c.bf16 %v662_v9, %v658_v8  ;;  %v657_v12 = vld [vmem:[#allocation11 + $0xd0] sm:$0xff]  ;;  %v5841_v14 = vpack.c.bf16 %v667_v3, %v663_v2  ;;  %v666_v15 = vld [vmem:[#allocation11 + $0x118] sm:$0xff]  ;;  %v5843_v58 = vpack.c.bf16 %v676_v10, %v672_v6  ;;  %v671_v59 = vld [vmem:[#allocation11 + $0x140] sm:$0xff] }
 0x1c5   : > { %5834 = vmatpush1.bf16.msra.mxu0 %v5833_v40  ;;  %v661_v13 = vld [vmem:[#allocation11 + $0xf0] sm:$0xff]  ;;  %v670_v57 = vld [vmem:[#allocation11 + $0x138] sm:$0xff]  ;;  %v675_v60 = vld [vmem:[#allocation11 + $0x160] sm:$0xff] }
 0x1c6   : > { %5836 = vmatprep.subr.bf16.mxu0 %v5835_v44  ;;  %5866 = vmatpush1.bf16.msra.mxu1 %v5865_v7  ;;  %v680_v18 = vld [vmem:[#allocation11 + $0x188] sm:$0xff]  ;;  %v5869_v19 = vpack.c.bf16 %v661_v13, %v657_v12  ;;  %v5871_v21 = vpack.c.bf16 %v670_v57, %v666_v15  ;;  %v665_v22 = vld [vmem:[#allocation11 + $0x110] sm:$0xff]  ;;  %v674_v24 = vld [vmem:[#allocation11 + $0x158] sm:$0xff]  ;;  %v5845_v26 = vpack.c.bf16 %v675_v60, %v671_v59 }
 0x1c7   : > { %v684_v20 = vld [vmem:[#allocation11 + $0x1a8] sm:$0xff]  ;;  %5868 = vmatprep.subr.bf16.mxu1 %v5867_v11  ;;  %v669_v23 = vld [vmem:[#allocation11 + $0x130] sm:$0xff]  ;;  %v678_v25 = vld [vmem:[#allocation11 + $0x178] sm:$0xff] }
 0x1c8   : > { %v5847_v27 = vpack.c.bf16 %v684_v20, %v680_v18  ;;  %v679_v28 = vld [vmem:[#allocation11 + $0x180] sm:$0xff]  ;;  %v688_v30 = vld [vmem:[#allocation11 + $0x1c8] sm:$0xff]  ;;  %v5873_v31 = vpack.c.bf16 %v669_v23, %v665_v22  ;;  %v5875_v33 = vpack.c.bf16 %v678_v25, %v674_v24  ;;  %v673_v34 = vld [vmem:[#allocation11 + $0x150] sm:$0xff] }
 0x1c9   : > { %5838 = vmatpush1.bf16.msra.mxu0 %v5837_v1  ;;  %v683_v29 = vld [vmem:[#allocation11 + $0x1a0] sm:$0xff]  ;;  %v692_v32 = vld [vmem:[#allocation11 + $0x1e8] sm:$0xff]  ;;  %v677_v35 = vld [vmem:[#allocation11 + $0x170] sm:$0xff] }
 0x1ca   : > { %5840 = vmatprep.subr.bf16.mxu0 %v5839_v5  ;;  %5870 = vmatpush1.bf16.msra.mxu1 %v5869_v19  ;;  %v682_v36 = vld [vmem:[#allocation11 + $0x198] sm:$0xff]  ;;  %v5849_v38 = vpack.c.bf16 %v683_v29, %v679_v28  ;;  %v5851_v39 = vpack.c.bf16 %v692_v32, %v688_v30  ;;  %v687_v40 = vld [vmem:[#allocation11 + $0x1c0] sm:$0xff]  ;;  %v5877_v42 = vpack.c.bf16 %v677_v35, %v673_v34  ;;  %v681_v44 = vld [vmem:[#allocation11 + $0x190] sm:$0xff] }
 0x1cb   : > { %5872 = vmatprep.subr.bf16.mxu1 %v5871_v21  ;;  %v686_v37 = vld [vmem:[#allocation11 + $0x1b8] sm:$0xff]  ;;  %v691_v41 = vld [vmem:[#allocation11 + $0x1e0] sm:$0xff]  ;;  %v685_v45 = vld [vmem:[#allocation11 + $0x1b0] sm:$0xff] }
 0x1cc   : > { %v5879_v43 = vpack.c.bf16 %v686_v37, %v682_v36  ;;  %v690_v46 = vld [vmem:[#allocation11 + $0x1d8] sm:$0xff]  ;;  %v5853_v48 = vpack.c.bf16 %v691_v41, %v687_v40  ;;  %v5881_v49 = vpack.c.bf16 %v685_v45, %v681_v44  ;;  %v689_v51 = vld [vmem:[#allocation11 + $0x1d0] sm:$0xff]  ;;  %v627_v62 = vld [vmem:[%s626_s14] sm:$0xff] }
 0x1cd   : > { %5842 = vmatpush1.bf16.msra.mxu0 %v5841_v14  ;;  %v694_v47 = vld [vmem:[#allocation11 + $0x1f8] sm:$0xff]  ;;  %v693_v53 = vld [vmem:[#allocation11 + $0x1f0] sm:$0xff]  ;;  %v628_v63 = vld [vmem:[%s626_s14 + $0x8] sm:$0xff] }
 0x1ce   : > { %5844 = vmatprep.subr.bf16.mxu0 %v5843_v58  ;;  %5874 = vmatpush1.bf16.msra.mxu1 %v5873_v31  ;;  %v5883_v50 = vpack.c.bf16 %v694_v47, %v690_v46  ;;  %v5885_v61 = vpack.c.bf16 %v693_v53, %v689_v51  ;;  %v629_v7 = vld [vmem:[%s626_s14 + $0x10] sm:$0xff]  ;;  %v630_v11 = vld [vmem:[%s626_s14 + $0x18] sm:$0xff]  ;;  %v887_v31 = vld [vmem:[#allocation10 + $0x200] sm:$0xff] (%p618_p0) }
 0x1cf   : > { %5876 = vmatprep.subr.bf16.mxu1 %v5875_v33  ;;  %v890_v28 = vld [vmem:[#allocation10 + $0x218] sm:$0xff] (%p618_p0)  ;;  %v891_v32 = vld [vmem:[#allocation10 + $0x220] sm:$0xff] (%p618_p0)  ;;  %v889_v35 = vld [vmem:[#allocation10 + $0x210] sm:$0xff] (%p618_p0) }
 0x1d0   :  { %v894_v30 = vld [vmem:[#allocation10 + $0x238] sm:$0xff] (%p618_p0)  ;;  %v5889_v34 = vpack.c.bf16 (%p618_p0), %v891_v32, %v887_v31  ;;  %v893_v36 = vld [vmem:[#allocation10 + $0x230] sm:$0xff] (%p618_p0)  ;;  %v896_v37 = vld [vmem:[#allocation10 + $0x248] sm:$0xff] (%p618_p0) }
 0x1d1   : > { %5846 = vmatpush1.bf16.msra.mxu0 %v5845_v26  ;;  %v888_v26 = vld [vmem:[#allocation10 + $0x208] sm:$0xff] (%p618_p0)  ;;  %v5919_v33 = vpack.c.bf16 (%p618_p0), %v894_v30, %v890_v28  ;;  %v902_v40 = vld [vmem:[#allocation10 + $0x278] sm:$0xff] (%p618_p0)  ;;  %v899_v44 = vld [vmem:[#allocation10 + $0x260] sm:$0xff] (%p618_p0) }
 0x1d2   : > { %5848 = vmatprep.subr.bf16.mxu0 %v5847_v27  ;;  %5878 = vmatpush1.bf16.msra.mxu1 %v5877_v42  ;;  %v892_v27 = vld [vmem:[#allocation10 + $0x228] sm:$0xff] (%p618_p0)  ;;  %v897_v45 = vld [vmem:[#allocation10 + $0x250] sm:$0xff] (%p618_p0)  ;;  %v906_v53 = vld [vmem:[#allocation10 + $0x298] sm:$0xff] (%p618_p0) }
 0x1d3   : > { %5880 = vmatprep.subr.bf16.mxu1 %v5879_v43  ;;  %v5887_v29 = vpack.c.bf16 (%p618_p0), %v892_v27, %v888_v26  ;;  %v895_v43 = vld [vmem:[#allocation10 + $0x240] sm:$0xff] (%p618_p0)  ;;  %v901_v47 = vld [vmem:[#allocation10 + $0x270] sm:$0xff] (%p618_p0)  ;;  %v932_v26 = vld [vmem:[#allocation10 + $0x368] sm:$0xff] (%p618_p0) }
 0x1d4   :  { %v5893_v46 = vpack.c.bf16 (%p618_p0), %v899_v44, %v895_v43  ;;  %v930_v27 = vld [vmem:[#allocation10 + $0x358] sm:$0xff] (%p618_p0)  ;;  %v927_v32 = vld [vmem:[#allocation10 + $0x340] sm:$0xff] (%p618_p0) }
 0x1d5   : > { %5850 = vmatpush1.bf16.msra.mxu0 %v5849_v38  ;;  %v5921_v38 = vpack.c.bf16 (%p618_p0), %v893_v36, %v889_v35  ;;  %v934_v28 = vld [vmem:[#allocation10 + $0x378] sm:$0xff] (%p618_p0)  ;;  %v933_v36 = vld [vmem:[#allocation10 + $0x370] sm:$0xff] (%p618_p0)  ;;  %v935_v43 = vld [vmem:[#allocation10 + $0x380] sm:$0xff] (%p618_p0) }
 0x1d6   : > { %5852 = vmatprep.subr.bf16.mxu0 %v5851_v39  ;;  %5882 = vmatpush1.bf16.msra.mxu1 %v5881_v49  ;;  %v898_v39 = vld [vmem:[#allocation10 + $0x258] sm:$0xff] (%p618_p0)  ;;  %v908_v49 = vld [vmem:[#allocation10 + $0x2a8] sm:$0xff] (%p618_p0)  ;;  %v5939_v35 = vpack.c.bf16 (%p618_p0), %v934_v28, %v930_v27  ;;  %v939_v44 = vld [vmem:[#allocation10 + $0x3a0] sm:$0xff] (%p618_p0) }
 0x1d7   : > { %5884 = vmatprep.subr.bf16.mxu1 %v5883_v50  ;;  %v5923_v42 = vpack.c.bf16 (%p618_p0), %v902_v40, %v898_v39  ;;  %v5925_v50 = vpack.c.bf16 (%p618_p0), %v901_v47, %v897_v45  ;;  %v942_v39 = vld [vmem:[#allocation10 + $0x3b8] sm:$0xff] (%p618_p0)  ;;  %v937_v45 = vld [vmem:[#allocation10 + $0x390] sm:$0xff] (%p618_p0) }
 0x1d8   :  { %v941_v47 = vld [vmem:[#allocation10 + $0x3b0] sm:$0xff] (%p618_p0) }
 0x1d9   : > { %5854 = vmatpush1.bf16.msra.mxu0 %v5853_v48  ;;  %v904_v48 = vld [vmem:[#allocation10 + $0x288] sm:$0xff] (%p618_p0) }
 0x1da   : > { %5886 = vmatpush1.bf16.msra.mxu1 %v5885_v61  ;;  %5888 = vmatprep.subr.bf16.mxu0 (%p618_p0), %v5887_v29  ;;  %v5895_v51 = vpack.c.bf16 (%p618_p0), %v908_v49, %v904_v48  ;;  %v910_v61 = vld [vmem:[#allocation10 + $0x2b8] sm:$0xff] (%p618_p0)  ;;  %v944_v48 = vld [vmem:[#allocation10 + $0x3c8] sm:$0xff] (%p618_p0) }
 0x1db   :  { %5920 = vmatprep.subr.bf16.mxu1 (%p618_p0), %v5919_v33  ;;  %v931_v33 = vld [vmem:[#allocation10 + $0x360] sm:$0xff] (%p618_p0)  ;;  %v948_v49 = vld [vmem:[#allocation10 + $0x3e8] sm:$0xff] (%p618_p0) }
 0x1dc   : > { %760 = vmatmul.mubr.f32.vlgmr.msra.gmra.mrb[0].mxu0 %v7439_v17  ;;  %v5909_v40 = vpack.c.bf16 (%p618_p0), %v931_v33, %v927_v32 }
 0x1dd   : > { %831 = vmatmul.mubr.f32.vlgmr.msra.gmra.mrb[0].mxu1 %v7439_v17  ;;  %1038 = vmatprep.mubr.f32.mxu0 (%p618_p0), %v7542_v0 }
 0x1de   :  { %1199 = vmatprep.mubr.f32.mxu1 (%p618_p0), %v7542_v0  ;;  %5890 = vmatpush1.bf16.msra.mxu0 (%p618_p0), %v5889_v34  ;;  %v929_v34 = vld [vmem:[#allocation10 + $0x350] sm:$0xff] (%p618_p0) }
 0x1df   :  { %5922 = vmatpush1.bf16.msra.mxu1 (%p618_p0), %v5921_v38  ;;  %v940_v38 = vld [vmem:[#allocation10 + $0x3a8] sm:$0xff] (%p618_p0) }
 0x1e0   :  { %5924 = vmatprep.subr.bf16.mxu1 (%p618_p0), %v5923_v42 }
 0x1e3   :  { %5926 = vmatpush1.bf16.msra.mxu1 (%p618_p0), %v5925_v50  ;;  %v946_v50 = vld [vmem:[#allocation10 + $0x3d8] sm:$0xff] (%p618_p0) }
 0x2af   : > { %v761_v1 = vpop.f32.mrb[0].mxu0 }
 0x2b0   : > { %v837_v2 = vadd.f32 %v761_v1, %v627_v62  ;;  %v763_v3 = vpop.f32.mrb[1].mxu0  ;;  %v832_v8 = vpop.f32.mrb[0].mxu1  ;;  %v903_v62 = vld [vmem:[#allocation10 + $0x280] sm:$0xff] (%p618_p0) }
 0x2b1   : > { %v838_v4 = vadd.f32 %v763_v3, %v628_v63  ;;  %v834_v9 = vpop.f32.mrb[1].mxu1  ;;  %v839_v10 = vadd.f32 %v832_v8, %v629_v7  ;;  %v5927_v63 = vpack.c.bf16 (%p618_p0), %v910_v61, %v906_v53  ;;  %v907_v1 = vld [vmem:[#allocation10 + $0x2a0] sm:$0xff] (%p618_p0)  ;;  %v909_v3 = vld [vmem:[#allocation10 + $0x2b0] sm:$0xff] (%p618_p0)  ;;  %v914_v7 = vld [vmem:[#allocation10 + $0x2d8] sm:$0xff] (%p618_p0)  ;;  %v5913_v53 = vpack.c.bf16 (%p618_p0), %v939_v44, %v935_v43 }
 0x2b2   : > { %v5702_v5 = vmul.f32 -1.442695, %v837_v2  ;;  %v840_v13 = vadd.f32 %v834_v9, %v630_v11  ;;  %v905_v2 = vld [vmem:[#allocation10 + $0x290] sm:$0xff] (%p618_p0)  ;;  %v911_v11 = vld [vmem:[#allocation10 + $0x2c0] sm:$0xff] (%p618_p0)  ;;  %v5945_v61 = vpack.c.bf16 (%p618_p0), %v941_v47, %v937_v45 }
 0x2b3   : > { %v5703_v6 = vmul.f32 -1.442695, %v838_v4  ;;  %v5704_v12 = vmul.f32 -1.442695, %v839_v10  ;;  %v5897_v4 = vpack.c.bf16 (%p618_p0), %v907_v1, %v903_v62  ;;  %v5929_v8 = vpack.c.bf16 (%p618_p0), %v909_v3, %v905_v2  ;;  %v918_v10 = vld [vmem:[#allocation10 + $0x2f8] sm:$0xff] (%p618_p0)  ;;  %5928 = vmatprep.subr.bf16.mxu1 (%p618_p0), %v5927_v63  ;;  %v943_v63 = vld [vmem:[#allocation10 + $0x3c0] sm:$0xff] (%p618_p0) }
 0x2b4   : > { %6999 = vpow2.f32 %v5702_v5  ;;  %v912_v5 = vld [vmem:[#allocation10 + $0x2c8] sm:$0xff] (%p618_p0)  ;;  %v5915_v62 = vpack.c.bf16 (%p618_p0), %v948_v49, %v944_v48  ;;  %v947_v1 = vld [vmem:[#allocation10 + $0x3e0] sm:$0xff] (%p618_p0)  ;;  %v945_v3 = vld [vmem:[#allocation10 + $0x3d0] sm:$0xff] (%p618_p0) }
 0x2b5   : > { %7001 = vpow2.f32 %v5703_v6  ;;  %v916_v6 = vld [vmem:[#allocation10 + $0x2e8] sm:$0xff] (%p618_p0)  ;;  %5930 = vmatpush1.bf16.msra.mxu1 (%p618_p0), %v5929_v8 }
 0x2b6   : > { %7003 = vpow2.f32 %v5704_v12  ;;  %v5899_v9 = vpack.c.bf16 (%p618_p0), %v916_v6, %v912_v5  ;;  %v915_v12 = vld [vmem:[#allocation10 + $0x2e0] sm:$0xff] (%p618_p0)  ;;  %v5917_v5 = vpack.c.bf16 (%p618_p0), %v947_v1, %v943_v63 }
 0x2b7   : > { %7005 = vtanh.f32 %v840_v13  ;;  %v5931_v13 = vpack.c.bf16 (%p618_p0), %v918_v10, %v914_v7 }
 0x2b9   :  { %5932 = vmatprep.subr.bf16.mxu1 (%p618_p0), %v5931_v13 }
 0x2be   : > { %v7000_v17 = vpop.eup %6999 }
 0x2bf   : > { %v7002_v14 = vpop.eup %7001  ;;  %v850_v15 = vadd.f32 1.0, %v7000_v17 }
 0x2c0   : > { %v851_v57 = vadd.f32 1.0, %v7002_v14  ;;  %v7004_v58 = vpop.eup %7003  ;;  %v917_v14 = vld [vmem:[#allocation10 + $0x2f0] sm:$0xff] (%p618_p0) }
 0x2c1   : > { %7007 = vrcp.f32 %v850_v15  ;;  %v7006_v59 = vpop.eup %7005  ;;  %v852_v18 = vadd.f32 1.0, %v7004_v58  ;;  %v920_v15 = vld [vmem:[#allocation10 + $0x308] sm:$0xff] (%p618_p0)  ;;  %v922_v58 = vld [vmem:[#allocation10 + $0x318] sm:$0xff] (%p618_p0) }
 0x2c2   : > { %7009 = vrcp.f32 %v851_v57  ;;  %v924_v57 = vld [vmem:[#allocation10 + $0x328] sm:$0xff] (%p618_p0) }
 0x2c3   : > { %7011 = vrcp.f32 %v852_v18 }
 0x2cb   : > { %v7008_v60 = vpop.eup %7007 }
 0x2cc   : > { %v7010_v19 = vpop.eup %7009  ;;  %v861_v20 = vmul.f32 %v7008_v60, %v7006_v59  ;;  %v926_v59 = vld [vmem:[#allocation10 + $0x338] sm:$0xff] (%p618_p0)  ;;  %v5901_v60 = vpack.c.bf16 (%p618_p0), %v915_v12, %v911_v11 }
 0x2cd   : > { %v860_v21 = vmul.f32 %v7435_v16, %v7010_v19  ;;  %v7012_v23 = vpop.eup %7011  ;;  %v5903_v19 = vpack.c.bf16 (%p618_p0), %v924_v57, %v920_v15 }
 0x2cf   : > { %v862_v22 = vadd.f32 %v861_v20, %v860_v21   ;;  %v919_v20 = vld [vmem:[#allocation10 + $0x300] sm:$0xff] (%p618_p0) }
 0x2d0   :  { %v923_v21 = vld [vmem:[#allocation10 + $0x320] sm:$0xff] (%p618_p0) }
 0x2d1   : > { %7013 = vtanh.f32 %v862_v22  ;;  %v8684_v16 = vmov %v862_v22  ;;  %869 = vst [vmem:[#allocation3] sm:$0xff] (%p618_p0), %v862_v22  ;;  %v921_v22 = vld [vmem:[#allocation10 + $0x310] sm:$0xff] (%p618_p0)  ;;  %v5905_v29 = vpack.c.bf16 (%p618_p0), %v923_v21, %v919_v20  ;;  %v952_v20 = vld [vmem:[#allocation13 + $0x4] sm:$0xf] (%p618_p0) }
 0x2d2   :  { %v900_v16 = vld [vmem:[#allocation10 + $0x268] sm:$0xff] (%p618_p0)  ;;  %v7881_v21 = vrot.slane (%p618_p0), %v952_v20, %v7737_v52 }
 0x2d3   :  { %v5891_v41 = vpack.c.bf16 (%p618_p0), %v900_v16, %v896_v37  ;;  %v936_v37 = vld [vmem:[#allocation10 + $0x388] sm:$0xff] (%p618_p0)  ;;  %v938_v16 = vld [vmem:[#allocation10 + $0x398] sm:$0xff] (%p618_p0) }
 0x2d4   :  { %v5911_v42 = vpack.c.bf16 (%p618_p0), %v940_v38, %v936_v37 }
 0x2d5   :  { %5892 = vmatprep.subr.bf16.mxu0 (%p618_p0), %v5891_v41  ;;  %v5941_v41 = vpack.c.bf16 (%p618_p0), %v933_v36, %v929_v34 }
 0x2d6   :  { %5894 = vmatpush1.bf16.msra.mxu0 (%p618_p0), %v5893_v46  ;;  %v5943_v46 = vpack.c.bf16 (%p618_p0), %v942_v39, %v938_v16 }
 0x2d7   :  { %5896 = vmatprep.subr.bf16.mxu0 (%p618_p0), %v5895_v51  ;;  %v950_v51 = vld [vmem:[#allocation10 + $0x3f8] sm:$0xff] (%p618_p0) }
 0x2d8   :  { %620 = sbr.rel (!%p618_p0) target bundleno = 440 (0x1b8), region = 184  ;;  %v5947_v2 = vpack.c.bf16 (%p618_p0), %v950_v51, %v946_v50 }
 0x2da   :  { %5898 = vmatpush1.bf16.msra.mxu0 (%p618_p0), %v5897_v4  ;;  %v949_v4 = vld [vmem:[#allocation10 + $0x3f0] sm:$0xff] (%p618_p0) }
 0x2db   : > { %v7014_v24 = vpop.eup %7013  ;;  %5900 = vmatprep.subr.bf16.mxu0 (%p618_p0), %v5899_v9  ;;  %v5949_v6 = vpack.c.bf16 (%p618_p0), %v949_v4, %v945_v3 }
 0x2dc   : > { %v864_v25 = vmul.f32 %v7014_v24, %v7012_v23   ;;  %v5935_v23 = vpack.c.bf16 (%p618_p0), %v926_v59, %v922_v58  ;;  %v925_v24 = vld [vmem:[#allocation10 + $0x330] sm:$0xff] (%p618_p0) }
 0x2dd   :  { %v5937_v30 = vpack.c.bf16 (%p618_p0), %v925_v24, %v921_v22  ;;  %v7884_v22 = vrot.slane (%p618_p0), %v952_v20, %v7739_v54  ;;  %v7890_v24 = vrot.slane (%p618_p0), %v952_v20, %v7743_v56 }
 0x2de   : > { %867 = vst [vmem:[%s866_s17] sm:$0xff] %v864_v25  ;;  %v8685_v17 = vmov %v864_v25  ;;  %868 = vst [vmem:[#allocation2] sm:$0xff] (%p618_p0), %v864_v25  ;;  %v928_v25 = vld [vmem:[#allocation10 + $0x348] sm:$0xff] (%p618_p0)  ;;  %5902 = vmatpush1.bf16.msra.mxu0 (%p618_p0), %v5901_v60 }
 0x2df   :  { %v913_v17 = vld [vmem:[#allocation10 + $0x2d0] sm:$0xff]  ;;  %5904 = vmatprep.subr.bf16.mxu0 %v5903_v19  ;;  %v5907_v31 = vpack.c.bf16 %v932_v26, %v928_v25 }
 0x2e0   :  { %v5933_v18 = vpack.c.bf16 %v917_v14, %v913_v17 }
 0x2e2   :  { %5934 = vmatpush1.bf16.msra.mxu1 %v5933_v18  ;;  %5906 = vmatpush1.bf16.msra.mxu0 %v5905_v29 }
 0x2e3   :  { %5936 = vmatprep.subr.bf16.mxu1 %v5935_v23  ;;  %5908 = vmatprep.subr.bf16.mxu0 %v5907_v31  ;;  %v7887_v23 = vrot.slane %v952_v20, %v7741_v55 }
 0x2e5   :  { %v870_v7 = vld [vmem:[#allocation17] sm:$0xff]  ;;  %v871_v8 = vld [vmem:[#allocation17 + $0x8] sm:$0xff]  ;;  %v872_v9 = vld [vmem:[#allocation17 + $0x10] sm:$0xff] }
 0x2e6   :  { %5938 = vmatpush1.bf16.msra.mxu1 %v5937_v30  ;;  %5910 = vmatpush1.bf16.msra.mxu0 %v5909_v40  ;;  %v873_v10 = vld [vmem:[#allocation17 + $0x18] sm:$0xff]  ;;  %v874_v11 = vld [vmem:[#allocation17 + $0x20] sm:$0xff]  ;;  %v875_v12 = vld [vmem:[#allocation17 + $0x28] sm:$0xff] }
 0x2e7   :  { %5940 = vmatprep.subr.bf16.mxu1 %v5939_v35  ;;  %5912 = vmatprep.subr.bf16.mxu0 %v5911_v42  ;;  %v876_v13 = vld [vmem:[#allocation17 + $0x30] sm:$0xff]  ;;  %v877_v17 = vld [vmem:[#allocation17 + $0x38] sm:$0xff]  ;;  %v878_v14 = vld [vmem:[#allocation17 + $0x40] sm:$0xff] }
 0x2e8   :  { %v879_v15 = vld [vmem:[#allocation17 + $0x48] sm:$0xff]  ;;  %v880_v57 = vld [vmem:[#allocation17 + $0x50] sm:$0xff]  ;;  %v881_v58 = vld [vmem:[#allocation17 + $0x58] sm:$0xff] }
 0x2e9   :  { %v882_v59 = vld [vmem:[#allocation17 + $0x60] sm:$0xff]  ;;  %v883_v60 = vld [vmem:[#allocation17 + $0x68] sm:$0xff]  ;;  %v884_v18 = vld [vmem:[#allocation17 + $0x70] sm:$0xff] }
 0x2ea   :  { %5942 = vmatpush1.bf16.msra.mxu1 %v5941_v41  ;;  %5914 = vmatpush1.bf16.msra.mxu0 %v5913_v53  ;;  %v885_v19 = vld [vmem:[#allocation17 + $0x78] sm:$0xff] }
 0x2eb   :  { %5944 = vmatprep.subr.bf16.mxu1 %v5943_v46  ;;  %5916 = vmatprep.subr.bf16.mxu0 %v5915_v62 }
 0x2ee   :  { %5946 = vmatpush1.bf16.msra.mxu1 %v5945_v61  ;;  %5918 = vmatpush1.bf16.msra.mxu0 %v5917_v5 }
 0x2ef   :  { %5948 = vmatprep.subr.bf16.mxu1 %v5947_v2 }
 0x2f1   :  { %1039 = vmatmul.mubr.f32.vlgmr.msra.gmra.mrb[0].mxu0 %v870_v7 }
 0x2f2   :  { %5950 = vmatpush1.bf16.msra.mxu1 %v5949_v6  ;;  %1044 = vmatprep.mubr.f32.mxu0 %v7542_v0 }
 0x2f5   :  { %1200 = vmatmul.mubr.f32.vlgmr.msra.gmra.mrb[0].mxu1 %v870_v7  ;;  %1045 = vmatmul.mubr.f32.gmra.mrb[2].mxu0 %v871_v8 }
 0x2f6   :  { %1205 = vmatprep.mubr.f32.mxu1 %v7542_v0  ;;  %1050 = vmatprep.mubr.f32.mxu0 %v7542_v0 }
 0x2f9   :  { %1206 = vmatmul.mubr.f32.gmra.mrb[2].mxu1 %v871_v8  ;;  %1051 = vmatmul.mubr.f32.gmra.mrb[4].mxu0 %v872_v9 }
 0x2fa   :  { %1211 = vmatprep.mubr.f32.mxu1 %v7542_v0  ;;  %1056 = vmatprep.mubr.f32.mxu0 %v7542_v0 }
 0x2fd   :  { %1212 = vmatmul.mubr.f32.gmra.mrb[4].mxu1 %v872_v9  ;;  %1057 = vmatmul.mubr.f32.gmra.mrb[6].mxu0 %v873_v10 }
 0x2fe   :  { %1217 = vmatprep.mubr.f32.mxu1 %v7542_v0  ;;  %1062 = vmatprep.mubr.f32.mxu0 %v7542_v0 }
 0x301   :  { %1218 = vmatmul.mubr.f32.gmra.mrb[6].mxu1 %v873_v10  ;;  %1063 = vmatmul.mubr.f32.gmra.mrb[8].mxu0 %v874_v11 }
 0x302   :  { %1223 = vmatprep.mubr.f32.mxu1 %v7542_v0  ;;  %1068 = vmatprep.mubr.f32.mxu0 %v7542_v0 }
 0x305   :  { %1224 = vmatmul.mubr.f32.gmra.mrb[8].mxu1 %v874_v11  ;;  %1069 = vmatmul.mubr.f32.gmra.mrb[10].mxu0 %v875_v12 }
 0x306   :  { %1229 = vmatprep.mubr.f32.mxu1 %v7542_v0  ;;  %1074 = vmatprep.mubr.f32.mxu0 %v7542_v0 }
 0x309   :  { %1230 = vmatmul.mubr.f32.gmra.mrb[10].mxu1 %v875_v12  ;;  %1075 = vmatmul.mubr.f32.gmra.mrb[12].mxu0 %v876_v13 }
 0x30a   :  { %1235 = vmatprep.mubr.f32.mxu1 %v7542_v0  ;;  %1080 = vmatprep.mubr.f32.mxu0 %v7542_v0 }
 0x30d   :  { %1236 = vmatmul.mubr.f32.gmra.mrb[12].mxu1 %v876_v13  ;;  %1081 = vmatmul.mubr.f32.gmra.mrb[14].mxu0 %v877_v17 }
 0x30e   :  { %1241 = vmatprep.mubr.f32.mxu1 %v7542_v0  ;;  %1086 = vmatprep.mubr.f32.mxu0 %v7542_v0 }
 0x311   :  { %1242 = vmatmul.mubr.f32.gmra.mrb[14].mxu1 %v877_v17  ;;  %1087 = vmatmul.mubr.f32.gmra.mrb[16].mxu0 %v878_v14 }
 0x312   :  { %1247 = vmatprep.mubr.f32.mxu1 %v7542_v0  ;;  %1092 = vmatprep.mubr.f32.mxu0 %v7542_v0 }
 0x315   :  { %1248 = vmatmul.mubr.f32.gmra.mrb[16].mxu1 %v878_v14  ;;  %1093 = vmatmul.mubr.f32.gmra.mrb[18].mxu0 %v879_v15 }
 0x316   :  { %1253 = vmatprep.mubr.f32.mxu1 %v7542_v0  ;;  %1098 = vmatprep.mubr.f32.mxu0 %v7542_v0 }
 0x319   :  { %1254 = vmatmul.mubr.f32.gmra.mrb[18].mxu1 %v879_v15  ;;  %1099 = vmatmul.mubr.f32.gmra.mrb[20].mxu0 %v880_v57 }
 0x31a   :  { %1259 = vmatprep.mubr.f32.mxu1 %v7542_v0  ;;  %1104 = vmatprep.mubr.f32.mxu0 %v7542_v0 }
 0x31d   :  { %1260 = vmatmul.mubr.f32.gmra.mrb[20].mxu1 %v880_v57  ;;  %1105 = vmatmul.mubr.f32.gmra.mrb[22].mxu0 %v881_v58 }
 0x31e   :  { %1265 = vmatprep.mubr.f32.mxu1 %v7542_v0  ;;  %1110 = vmatprep.mubr.f32.mxu0 %v7542_v0 }
 0x321   :  { %1266 = vmatmul.mubr.f32.gmra.mrb[22].mxu1 %v881_v58  ;;  %1111 = vmatmul.mubr.f32.gmra.mrb[24].mxu0 %v882_v59 }
 0x322   :  { %1271 = vmatprep.mubr.f32.mxu1 %v7542_v0  ;;  %1116 = vmatprep.mubr.f32.mxu0 %v7542_v0 }
 0x325   :  { %1272 = vmatmul.mubr.f32.gmra.mrb[24].mxu1 %v882_v59  ;;  %1117 = vmatmul.mubr.f32.gmra.mrb[26].mxu0 %v883_v60 }
 0x326   :  { %1277 = vmatprep.mubr.f32.mxu1 %v7542_v0  ;;  %1122 = vmatprep.mubr.f32.mxu0 %v7542_v0 }
 0x329   :  { %1278 = vmatmul.mubr.f32.gmra.mrb[26].mxu1 %v883_v60  ;;  %1123 = vmatmul.mubr.f32.gmra.mrb[28].mxu0 %v884_v18 }
 0x32a   :  { %1283 = vmatprep.mubr.f32.mxu1 %v7542_v0  ;;  %1128 = vmatprep.mubr.f32.mxu0 %v7542_v0 }
 0x32d   :  { %1284 = vmatmul.mubr.f32.gmra.mrb[28].mxu1 %v884_v18  ;;  %1129 = vmatmul.mubr.f32.gmra.mrb[30].mxu0 %v885_v19 }
 0x32e   :  { %1289 = vmatprep.mubr.f32.mxu1 %v7542_v0 }
 0x331   :  { %1290 = vmatmul.mubr.f32.gmra.mrb[30].mxu1 %v885_v19 }
 0x3c4   :  { %v1040_v25 = vpop.f32.mrb[0].mxu0 }
 0x3c5   :  { %v1041_v26 = vadd.f32 %v1040_v25, %v7881_v21  ;;  %v1042_v28 = vpop.f32.mrb[1].mxu0 }
 0x3c6   :  { %v1043_v30 = vadd.f32 %v1042_v28, %v7887_v23 }
 0x3c7   :  { %1296 = vst [vmem:[#allocation4] sm:$0xff] %v1041_v26 }
 0x3c8   :  { %v1201_v27 = vpop.f32.mrb[0].mxu1  ;;  %1297 = vst [vmem:[#allocation4 + $0x8] sm:$0xff] %v1043_v30  ;;  %v1046_v33 = vpop.f32.mrb[2].mxu0 }
 0x3c9   :  { %v1202_v29 = vadd.f32 %v1201_v27, %v7884_v22  ;;  %v1203_v31 = vpop.f32.mrb[1].mxu1  ;;  %v1047_v34 = vadd.f32 %v1046_v33, %v7881_v21  ;;  %v1048_v36 = vpop.f32.mrb[3].mxu0 }
 0x3ca   :  { %v1204_v32 = vadd.f32 %v1203_v31, %v7890_v24  ;;  %v1049_v38 = vadd.f32 %v1048_v36, %v7887_v23 }
 0x3cb   :  { %1298 = vst [vmem:[#allocation4 + $0x10] sm:$0xff] %v1202_v29  ;;  %1300 = vst [vmem:[#allocation4 + $0x20] sm:$0xff] %v1047_v34 }
 0x3cc   :  { %1299 = vst [vmem:[#allocation4 + $0x18] sm:$0xff] %v1204_v32  ;;  %v1207_v35 = vpop.f32.mrb[2].mxu1  ;;  %1301 = vst [vmem:[#allocation4 + $0x28] sm:$0xff] %v1049_v38  ;;  %v1052_v40 = vpop.f32.mrb[4].mxu0 }
 0x3cd   :  { %v1208_v37 = vadd.f32 %v1207_v35, %v7884_v22  ;;  %v1209_v16 = vpop.f32.mrb[3].mxu1  ;;  %v1053_v41 = vadd.f32 %v1052_v40, %v7881_v21  ;;  %v1054_v43 = vpop.f32.mrb[5].mxu0 }
 0x3ce   :  { %v1210_v39 = vadd.f32 %v1209_v16, %v7890_v24  ;;  %v1055_v45 = vadd.f32 %v1054_v43, %v7887_v23 }
 0x3cf   :  { %1302 = vst [vmem:[#allocation4 + $0x30] sm:$0xff] %v1208_v37  ;;  %1304 = vst [vmem:[#allocation4 + $0x40] sm:$0xff] %v1053_v41 }
 0x3d0   :  { %1303 = vst [vmem:[#allocation4 + $0x38] sm:$0xff] %v1210_v39  ;;  %v1213_v42 = vpop.f32.mrb[4].mxu1  ;;  %1305 = vst [vmem:[#allocation4 + $0x48] sm:$0xff] %v1055_v45  ;;  %v1058_v48 = vpop.f32.mrb[6].mxu0 }
 0x3d1   :  { %v1214_v44 = vadd.f32 %v1213_v42, %v7884_v22  ;;  %v1215_v46 = vpop.f32.mrb[5].mxu1  ;;  %v1059_v49 = vadd.f32 %v1058_v48, %v7881_v21  ;;  %v1060_v51 = vpop.f32.mrb[7].mxu0 }
 0x3d2   :  { %v1216_v47 = vadd.f32 %v1215_v46, %v7890_v24  ;;  %v1061_v61 = vadd.f32 %v1060_v51, %v7887_v23 }
 0x3d3   :  { %1306 = vst [vmem:[#allocation4 + $0x50] sm:$0xff] %v1214_v44  ;;  %1308 = vst [vmem:[#allocation4 + $0x60] sm:$0xff] %v1059_v49 }
 0x3d4   :  { %1307 = vst [vmem:[#allocation4 + $0x58] sm:$0xff] %v1216_v47  ;;  %v1219_v50 = vpop.f32.mrb[6].mxu1  ;;  %1309 = vst [vmem:[#allocation4 + $0x68] sm:$0xff] %v1061_v61  ;;  %v1064_v1 = vpop.f32.mrb[8].mxu0 }
 0x3d5   :  { %v1220_v53 = vadd.f32 %v1219_v50, %v7884_v22  ;;  %v1221_v62 = vpop.f32.mrb[7].mxu1  ;;  %v1065_v2 = vadd.f32 %v1064_v1, %v7881_v21  ;;  %v1066_v4 = vpop.f32.mrb[9].mxu0 }
 0x3d6   :  { %v1222_v63 = vadd.f32 %v1221_v62, %v7890_v24  ;;  %v1067_v6 = vadd.f32 %v1066_v4, %v7887_v23 }
 0x3d7   :  { %1310 = vst [vmem:[#allocation4 + $0x70] sm:$0xff] %v1220_v53  ;;  %1312 = vst [vmem:[#allocation4 + $0x80] sm:$0xff] %v1065_v2 }
 0x3d8   :  { %1311 = vst [vmem:[#allocation4 + $0x78] sm:$0xff] %v1222_v63  ;;  %v1225_v3 = vpop.f32.mrb[8].mxu1  ;;  %1313 = vst [vmem:[#allocation4 + $0x88] sm:$0xff] %v1067_v6  ;;  %v1070_v9 = vpop.f32.mrb[10].mxu0 }
 0x3d9   :  { %v1226_v5 = vadd.f32 %v1225_v3, %v7884_v22  ;;  %v1227_v7 = vpop.f32.mrb[9].mxu1  ;;  %v1071_v10 = vadd.f32 %v1070_v9, %v7881_v21  ;;  %v1072_v12 = vpop.f32.mrb[11].mxu0 }
 0x3da   :  { %v1228_v8 = vadd.f32 %v1227_v7, %v7890_v24  ;;  %v1073_v17 = vadd.f32 %v1072_v12, %v7887_v23 }
 0x3db   :  { %1314 = vst [vmem:[#allocation4 + $0x90] sm:$0xff] %v1226_v5  ;;  %1316 = vst [vmem:[#allocation4 + $0xa0] sm:$0xff] %v1071_v10 }
 0x3dc   :  { %1315 = vst [vmem:[#allocation4 + $0x98] sm:$0xff] %v1228_v8  ;;  %v1231_v11 = vpop.f32.mrb[10].mxu1  ;;  %1317 = vst [vmem:[#allocation4 + $0xa8] sm:$0xff] %v1073_v17  ;;  %v1076_v57 = vpop.f32.mrb[12].mxu0 }
 0x3dd   :  { %v1232_v13 = vadd.f32 %v1231_v11, %v7884_v22  ;;  %v1233_v14 = vpop.f32.mrb[11].mxu1  ;;  %v1077_v58 = vadd.f32 %v1076_v57, %v7881_v21  ;;  %v1078_v60 = vpop.f32.mrb[13].mxu0 }
 0x3de   :  { %v1234_v15 = vadd.f32 %v1233_v14, %v7890_v24  ;;  %v1079_v19 = vadd.f32 %v1078_v60, %v7887_v23 }
 0x3df   :  { %1318 = vst [vmem:[#allocation4 + $0xb0] sm:$0xff] %v1232_v13  ;;  %1320 = vst [vmem:[#allocation4 + $0xc0] sm:$0xff] %v1077_v58 }
 0x3e0   :  { %1319 = vst [vmem:[#allocation4 + $0xb8] sm:$0xff] %v1234_v15  ;;  %v1237_v59 = vpop.f32.mrb[12].mxu1  ;;  %1321 = vst [vmem:[#allocation4 + $0xc8] sm:$0xff] %v1079_v19  ;;  %v1082_v26 = vpop.f32.mrb[14].mxu0 }
 0x3e1   :  { %v1238_v18 = vadd.f32 %v1237_v59, %v7884_v22  ;;  %v1239_v20 = vpop.f32.mrb[13].mxu1  ;;  %v1083_v27 = vadd.f32 %v1082_v26, %v7881_v21  ;;  %v1084_v29 = vpop.f32.mrb[15].mxu0 }
 0x3e2   :  { %v1240_v25 = vadd.f32 %v1239_v20, %v7890_v24  ;;  %v1085_v31 = vadd.f32 %v1084_v29, %v7887_v23 }
 0x3e3   :  { %1322 = vst [vmem:[#allocation4 + $0xd0] sm:$0xff] %v1238_v18  ;;  %1324 = vst [vmem:[#allocation4 + $0xe0] sm:$0xff] %v1083_v27 }
 0x3e4   :  { %1323 = vst [vmem:[#allocation4 + $0xd8] sm:$0xff] %v1240_v25  ;;  %v1243_v28 = vpop.f32.mrb[14].mxu1  ;;  %1325 = vst [vmem:[#allocation4 + $0xe8] sm:$0xff] %v1085_v31  ;;  %v1088_v34 = vpop.f32.mrb[16].mxu0 }
 0x3e5   :  { %v1244_v30 = vadd.f32 %v1243_v28, %v7884_v22  ;;  %v1245_v32 = vpop.f32.mrb[15].mxu1  ;;  %v1089_v35 = vadd.f32 %v1088_v34, %v7881_v21  ;;  %v1090_v37 = vpop.f32.mrb[17].mxu0 }
 0x3e6   :  { %v1246_v33 = vadd.f32 %v1245_v32, %v7890_v24  ;;  %v1091_v16 = vadd.f32 %v1090_v37, %v7887_v23 }
 0x3e7   :  { %1326 = vst [vmem:[#allocation4 + $0xf0] sm:$0xff] %v1244_v30  ;;  %1328 = vst [vmem:[#allocation4 + $0x100] sm:$0xff] %v1089_v35 }
 0x3e8   :  { %1327 = vst [vmem:[#allocation4 + $0xf8] sm:$0xff] %v1246_v33  ;;  %v1249_v36 = vpop.f32.mrb[16].mxu1  ;;  %1329 = vst [vmem:[#allocation4 + $0x108] sm:$0xff] %v1091_v16  ;;  %v1094_v41 = vpop.f32.mrb[18].mxu0 }
 0x3e9   :  { %v1250_v38 = vadd.f32 %v1249_v36, %v7884_v22  ;;  %v1251_v39 = vpop.f32.mrb[17].mxu1  ;;  %v1095_v42 = vadd.f32 %v1094_v41, %v7881_v21  ;;  %v1096_v44 = vpop.f32.mrb[19].mxu0 }
 0x3ea   :  { %v1252_v40 = vadd.f32 %v1251_v39, %v7890_v24  ;;  %v1097_v46 = vadd.f32 %v1096_v44, %v7887_v23 }
 0x3eb   :  { %1330 = vst [vmem:[#allocation4 + $0x110] sm:$0xff] %v1250_v38  ;;  %1332 = vst [vmem:[#allocation4 + $0x120] sm:$0xff] %v1095_v42  ;;  %v7956_v42 = vmov 0.0  }
 0x3ec   :  { %1331 = vst [vmem:[#allocation4 + $0x118] sm:$0xff] %v1252_v40  ;;  %v1255_v43 = vpop.f32.mrb[18].mxu1  ;;  %1333 = vst [vmem:[#allocation4 + $0x128] sm:$0xff] %v1097_v46  ;;  %v1100_v49 = vpop.f32.mrb[20].mxu0 }
 0x3ed   :  { %v1256_v45 = vadd.f32 %v1255_v43, %v7884_v22  ;;  %v1257_v47 = vpop.f32.mrb[19].mxu1  ;;  %v1101_v50 = vadd.f32 %v1100_v49, %v7881_v21  ;;  %v1102_v53 = vpop.f32.mrb[21].mxu0  ;;  %v7958_v43 = vmov 0.0  }
 0x3ee   :  { %v1258_v48 = vadd.f32 %v1257_v47, %v7890_v24  ;;  %v1103_v62 = vadd.f32 %v1102_v53, %v7887_v23 }
 0x3ef   :  { %1334 = vst [vmem:[#allocation4 + $0x130] sm:$0xff] %v1256_v45  ;;  %1336 = vst [vmem:[#allocation4 + $0x140] sm:$0xff] %v1101_v50 }
 0x3f0   :  { %1335 = vst [vmem:[#allocation4 + $0x138] sm:$0xff] %v1258_v48  ;;  %v1261_v51 = vpop.f32.mrb[20].mxu1  ;;  %1337 = vst [vmem:[#allocation4 + $0x148] sm:$0xff] %v1103_v62  ;;  %v1106_v2 = vpop.f32.mrb[22].mxu0 }
 0x3f1   :  { %v1262_v61 = vadd.f32 %v1261_v51, %v7884_v22  ;;  %v1263_v63 = vpop.f32.mrb[21].mxu1  ;;  %v1107_v3 = vadd.f32 %v1106_v2, %v7881_v21  ;;  %v1108_v5 = vpop.f32.mrb[23].mxu0 }
 0x3f2   :  { %v1264_v1 = vadd.f32 %v1263_v63, %v7890_v24  ;;  %v1109_v7 = vadd.f32 %v1108_v5, %v7887_v23 }
 0x3f3   :  { %1338 = vst [vmem:[#allocation4 + $0x150] sm:$0xff] %v1262_v61  ;;  %1340 = vst [vmem:[#allocation4 + $0x160] sm:$0xff] %v1107_v3 }
 0x3f4   :  { %1339 = vst [vmem:[#allocation4 + $0x158] sm:$0xff] %v1264_v1  ;;  %v1267_v4 = vpop.f32.mrb[22].mxu1  ;;  %1341 = vst [vmem:[#allocation4 + $0x168] sm:$0xff] %v1109_v7  ;;  %v1112_v10 = vpop.f32.mrb[24].mxu0 }
 0x3f5   :  { %v1268_v6 = vadd.f32 %v1267_v4, %v7884_v22  ;;  %v1269_v8 = vpop.f32.mrb[23].mxu1  ;;  %v1113_v11 = vadd.f32 %v1112_v10, %v7881_v21  ;;  %v1114_v13 = vpop.f32.mrb[25].mxu0 }
 0x3f6   :  { %v1270_v9 = vadd.f32 %v1269_v8, %v7890_v24  ;;  %v1115_v14 = vadd.f32 %v1114_v13, %v7887_v23 }
 0x3f7   :  { %1342 = vst [vmem:[#allocation4 + $0x170] sm:$0xff] %v1268_v6  ;;  %1344 = vst [vmem:[#allocation4 + $0x180] sm:$0xff] %v1113_v11 }
 0x3f8   :  { %1343 = vst [vmem:[#allocation4 + $0x178] sm:$0xff] %v1270_v9  ;;  %v1273_v12 = vpop.f32.mrb[24].mxu1  ;;  %1345 = vst [vmem:[#allocation4 + $0x188] sm:$0xff] %v1115_v14  ;;  %v1118_v58 = vpop.f32.mrb[26].mxu0 }
 0x3f9   :  { %v1274_v17 = vadd.f32 %v1273_v12, %v7884_v22  ;;  %v1275_v15 = vpop.f32.mrb[25].mxu1  ;;  %v1119_v59 = vadd.f32 %v1118_v58, %v7881_v21  ;;  %v1120_v18 = vpop.f32.mrb[27].mxu0 }
 0x3fa   :  { %v1276_v57 = vadd.f32 %v1275_v15, %v7890_v24  ;;  %v1121_v20 = vadd.f32 %v1120_v18, %v7887_v23 }
 0x3fb   :  { %1346 = vst [vmem:[#allocation4 + $0x190] sm:$0xff] %v1274_v17  ;;  %1348 = vst [vmem:[#allocation4 + $0x1a0] sm:$0xff] %v1119_v59 }
 0x3fc   :  { %1347 = vst [vmem:[#allocation4 + $0x198] sm:$0xff] %v1276_v57  ;;  %v1279_v60 = vpop.f32.mrb[26].mxu1  ;;  %1349 = vst [vmem:[#allocation4 + $0x1a8] sm:$0xff] %v1121_v20  ;;  %v1124_v27 = vpop.f32.mrb[28].mxu0 }
 0x3fd   :  { %v1280_v19 = vadd.f32 %v1279_v60, %v7884_v22  ;;  %v1281_v25 = vpop.f32.mrb[27].mxu1  ;;  %v1125_v28 = vadd.f32 %v1124_v27, %v7881_v21  ;;  %v1126_v30 = vpop.f32.mrb[29].mxu0 }
 0x3fe   :  { %v1282_v26 = vadd.f32 %v1281_v25, %v7890_v24  ;;  %v1127_v32 = vadd.f32 %v1126_v30, %v7887_v23 }
 0x3ff   :  { %1350 = vst [vmem:[#allocation4 + $0x1b0] sm:$0xff] %v1280_v19  ;;  %1352 = vst [vmem:[#allocation4 + $0x1c0] sm:$0xff] %v1125_v28 }
 0x400   :  { %1351 = vst [vmem:[#allocation4 + $0x1b8] sm:$0xff] %v1282_v26  ;;  %v1285_v29 = vpop.f32.mrb[28].mxu1  ;;  %1353 = vst [vmem:[#allocation4 + $0x1c8] sm:$0xff] %v1127_v32  ;;  %v1130_v35 = vpop.f32.mrb[30].mxu0 }
 0x401   :  { %v1286_v31 = vadd.f32 %v1285_v29, %v7884_v22  ;;  %v1287_v33 = vpop.f32.mrb[29].mxu1  ;;  %v1131_v36 = vadd.f32 %v1130_v35, %v7881_v21  ;;  %v1132_v38 = vpop.f32.mrb[31].mxu0 }
 0x402   :  { %v1288_v34 = vadd.f32 %v1287_v33, %v7890_v24  ;;  %v1133_v39 = vadd.f32 %v1132_v38, %v7887_v23 }
 0x403   :  { %1354 = vst [vmem:[#allocation4 + $0x1d0] sm:$0xff] %v1286_v31  ;;  %1356 = vst [vmem:[#allocation4 + $0x1e0] sm:$0xff] %v1131_v36 }
 0x404   :  { %1355 = vst [vmem:[#allocation4 + $0x1d8] sm:$0xff] %v1288_v34  ;;  %v1291_v37 = vpop.f32.mrb[30].mxu1  ;;  %1357 = vst [vmem:[#allocation4 + $0x1e8] sm:$0xff] %v1133_v39 }
 0x405   :  { %v1292_v16 = vadd.f32 %v1291_v37, %v7884_v22  ;;  %v1293_v40 = vpop.f32.mrb[31].mxu1 }
 0x406   :  { %v1294_v41 = vadd.f32 %v1293_v40, %v7890_v24 }
 0x407   :  { %1358 = vst [vmem:[#allocation4 + $0x1f0] sm:$0xff] %v1292_v16 }
 0x408   :  { %1359 = vst [vmem:[#allocation4 + $0x1f8] sm:$0xff] %v1294_v41 }
 0x409 LB: > { %v1377_v21 = vld [vmem:[#allocation11 + $0x208] sm:$0xff]  ;;  %v1376_v23 = vld [vmem:[#allocation11 + $0x200] sm:$0xff]  ;;  %v7544_v47 = vmov 0.0   ;;  %v1379_v4 = vld [vmem:[#allocation11 + $0x218] sm:$0xff]  ;;  %s5752_s21 = sshll.u32 %s7455_s18, 5  ;;  %s5711_s26 = sshll.u32 %s7455_s18, 3  ;;  %s7455_s18 = sphi %s7960_s18, %s1365_s18   ;;  %v7451_v43 = vphi %v7958_v43, %v8687_v43   ;;  %v7447_v42 = vphi %v7956_v42, %v8686_v42  }
 0x40a   : > { %v1381_v22 = vld [vmem:[#allocation11 + $0x228] sm:$0xff]  ;;  %v1380_v44 = vld [vmem:[#allocation11 + $0x220] sm:$0xff]  ;;  %1504 = vmatprep.mubr.f32.mxu0 %v7544_v47  ;;  %1575 = vmatprep.mubr.f32.mxu1 %v7544_v47  ;;  %v1383_v5 = vld [vmem:[#allocation11 + $0x238] sm:$0xff]  ;;  %s1370_s5 = scalar_lea.vmem [#allocation4], %s5752_s21  ;;  %s1611_s22 = scalar_lea.vmem [#allocation17], %s5711_s26 }
 0x40b   : > { %v5951_v24 = vpack.c.bf16 %v1381_v22, %v1377_v21  ;;  %v1385_v45 = vld [vmem:[#allocation11 + $0x248] sm:$0xff]  ;;  %v5953_v48 = vpack.c.bf16 %v1380_v44, %v1376_v23  ;;  %v1384_v50 = vld [vmem:[#allocation11 + $0x240] sm:$0xff]  ;;  %v5983_v7 = vpack.c.bf16 %v1383_v5, %v1379_v4  ;;  %v1378_v8 = vld [vmem:[#allocation11 + $0x210] sm:$0xff]  ;;  %s1365_s18 = sadd.s32 1, %s7455_s18  }
 0x40c   : > { %v1389_v46 = vld [vmem:[#allocation11 + $0x268] sm:$0xff]  ;;  %v1388_v51 = vld [vmem:[#allocation11 + $0x260] sm:$0xff]  ;;  %v1382_v9 = vld [vmem:[#allocation11 + $0x230] sm:$0xff]  ;;  %p1362_p1 = scmp.ge.s32.totalorder %s1365_s18, 16  }
 0x40d   : > { %v5955_v49 = vpack.c.bf16 %v1389_v46, %v1385_v45  ;;  %v1393_v53 = vld [vmem:[#allocation11 + $0x288] sm:$0xff]  ;;  %5952 = vmatprep.subr.bf16.mxu0 %v5951_v24  ;;  %v5957_v62 = vpack.c.bf16 %v1388_v51, %v1384_v50  ;;  %v1392_v63 = vld [vmem:[#allocation11 + $0x280] sm:$0xff]  ;;  %v5985_v10 = vpack.c.bf16 %v1382_v9, %v1378_v8  ;;  %5984 = vmatprep.subr.bf16.mxu1 %v5983_v7  ;;  %v1387_v12 = vld [vmem:[#allocation11 + $0x258] sm:$0xff]  ;;  %s8095_s2 = smov (%p1362_p1), 0  }
 0x40e   : > { %v1397_v61 = vld [vmem:[#allocation11 + $0x2a8] sm:$0xff]  ;;  %5954 = vmatpush1.bf16.msra.mxu0 %v5953_v48  ;;  %v1396_v1 = vld [vmem:[#allocation11 + $0x2a0] sm:$0xff]  ;;  %v1391_v13 = vld [vmem:[#allocation11 + $0x278] sm:$0xff] }
 0x40f   : > { %5956 = vmatprep.subr.bf16.mxu0 %v5955_v49  ;;  %v5959_v2 = vpack.c.bf16 %v1397_v61, %v1393_v53  ;;  %v1401_v3 = vld [vmem:[#allocation11 + $0x2c8] sm:$0xff]  ;;  %v5961_v11 = vpack.c.bf16 %v1396_v1, %v1392_v63  ;;  %v1386_v17 = vld [vmem:[#allocation11 + $0x250] sm:$0xff]  ;;  %v1400_v15 = vld [vmem:[#allocation11 + $0x2c0] sm:$0xff]  ;;  %5986 = vmatpush1.bf16.msra.mxu1 %v5985_v10  ;;  %v5987_v58 = vpack.c.bf16 %v1391_v13, %v1387_v12 }
 0x410   : > { %v1405_v6 = vld [vmem:[#allocation11 + $0x2e8] sm:$0xff]  ;;  %v1404_v57 = vld [vmem:[#allocation11 + $0x2e0] sm:$0xff]  ;;  %v1390_v59 = vld [vmem:[#allocation11 + $0x270] sm:$0xff] }
 0x411   : > { %v5963_v14 = vpack.c.bf16 %v1405_v6, %v1401_v3  ;;  %v1409_v60 = vld [vmem:[#allocation11 + $0x308] sm:$0xff]  ;;  %v5989_v19 = vpack.c.bf16 %v1390_v59, %v1386_v17  ;;  %v1395_v20 = vld [vmem:[#allocation11 + $0x298] sm:$0xff]  ;;  %5988 = vmatprep.subr.bf16.mxu1 %v5987_v58  ;;  %v1394_v26 = vld [vmem:[#allocation11 + $0x290] sm:$0xff]  ;;  %v5965_v28 = vpack.c.bf16 %v1404_v57, %v1400_v15 }
 0x412   : > { %5958 = vmatpush1.bf16.msra.mxu0 %v5957_v62  ;;  %v1413_v18 = vld [vmem:[#allocation11 + $0x328] sm:$0xff]  ;;  %v1399_v25 = vld [vmem:[#allocation11 + $0x2b8] sm:$0xff]  ;;  %v1398_v27 = vld [vmem:[#allocation11 + $0x2b0] sm:$0xff] }
 0x413   : > { %5960 = vmatprep.subr.bf16.mxu0 %v5959_v2  ;;  %v1408_v29 = vld [vmem:[#allocation11 + $0x300] sm:$0xff]  ;;  %v5991_v31 = vpack.c.bf16 %v1399_v25, %v1395_v20  ;;  %v5967_v32 = vpack.c.bf16 %v1413_v18, %v1409_v60  ;;  %5990 = vmatpush1.bf16.msra.mxu1 %v5989_v19  ;;  %v1417_v33 = vld [vmem:[#allocation11 + $0x348] sm:$0xff]  ;;  %v5993_v34 = vpack.c.bf16 %v1398_v27, %v1394_v26  ;;  %v1403_v35 = vld [vmem:[#allocation11 + $0x2d8] sm:$0xff] }
 0x414   : > { %v1412_v30 = vld [vmem:[#allocation11 + $0x320] sm:$0xff]  ;;  %v1407_v36 = vld [vmem:[#allocation11 + $0x2f8] sm:$0xff]  ;;  %v1421_v37 = vld [vmem:[#allocation11 + $0x368] sm:$0xff] }
 0x415   : > { %5992 = vmatprep.subr.bf16.mxu1 %v5991_v31  ;;  %v5995_v38 = vpack.c.bf16 %v1407_v36, %v1403_v35  ;;  %v1402_v16 = vld [vmem:[#allocation11 + $0x2d0] sm:$0xff]  ;;  %v5969_v40 = vpack.c.bf16 %v1412_v30, %v1408_v29  ;;  %v1411_v41 = vld [vmem:[#allocation11 + $0x318] sm:$0xff]  ;;  %v5971_v22 = vpack.c.bf16 %v1421_v37, %v1417_v33  ;;  %v1416_v23 = vld [vmem:[#allocation11 + $0x340] sm:$0xff] }
 0x416   : > { %5962 = vmatpush1.bf16.msra.mxu0 %v5961_v11  ;;  %v1406_v39 = vld [vmem:[#allocation11 + $0x2f0] sm:$0xff]  ;;  %v1415_v21 = vld [vmem:[#allocation11 + $0x338] sm:$0xff]  ;;  %v1420_v24 = vld [vmem:[#allocation11 + $0x360] sm:$0xff] }
 0x417   : > { %5964 = vmatprep.subr.bf16.mxu0 %v5963_v14  ;;  %5994 = vmatpush1.bf16.msra.mxu1 %v5993_v34  ;;  %v1425_v44 = vld [vmem:[#allocation11 + $0x388] sm:$0xff]  ;;  %v5997_v45 = vpack.c.bf16 %v1406_v39, %v1402_v16  ;;  %v5999_v47 = vpack.c.bf16 %v1415_v21, %v1411_v41  ;;  %v1410_v48 = vld [vmem:[#allocation11 + $0x310] sm:$0xff]  ;;  %v1419_v50 = vld [vmem:[#allocation11 + $0x358] sm:$0xff]  ;;  %v5973_v53 = vpack.c.bf16 %v1420_v24, %v1416_v23 }
 0x418   : > { %v1429_v46 = vld [vmem:[#allocation11 + $0x3a8] sm:$0xff]  ;;  %5996 = vmatprep.subr.bf16.mxu1 %v5995_v38  ;;  %v1414_v49 = vld [vmem:[#allocation11 + $0x330] sm:$0xff]  ;;  %v1423_v51 = vld [vmem:[#allocation11 + $0x378] sm:$0xff] }
 0x419   : > { %v5975_v61 = vpack.c.bf16 %v1429_v46, %v1425_v44  ;;  %v1424_v62 = vld [vmem:[#allocation11 + $0x380] sm:$0xff]  ;;  %v1433_v1 = vld [vmem:[#allocation11 + $0x3c8] sm:$0xff]  ;;  %v6001_v2 = vpack.c.bf16 %v1414_v49, %v1410_v48  ;;  %v6003_v4 = vpack.c.bf16 %v1423_v51, %v1419_v50  ;;  %v1418_v5 = vld [vmem:[#allocation11 + $0x350] sm:$0xff] }
 0x41a   : > { %5966 = vmatpush1.bf16.msra.mxu0 %v5965_v28  ;;  %v1428_v63 = vld [vmem:[#allocation11 + $0x3a0] sm:$0xff]  ;;  %v1437_v3 = vld [vmem:[#allocation11 + $0x3e8] sm:$0xff]  ;;  %v1422_v6 = vld [vmem:[#allocation11 + $0x370] sm:$0xff] }
 0x41b   : > { %5968 = vmatprep.subr.bf16.mxu0 %v5967_v32  ;;  %5998 = vmatpush1.bf16.msra.mxu1 %v5997_v45  ;;  %v1427_v7 = vld [vmem:[#allocation11 + $0x398] sm:$0xff]  ;;  %v5977_v9 = vpack.c.bf16 %v1428_v63, %v1424_v62  ;;  %v5979_v10 = vpack.c.bf16 %v1437_v3, %v1433_v1  ;;  %v1432_v11 = vld [vmem:[#allocation11 + $0x3c0] sm:$0xff]  ;;  %v6005_v13 = vpack.c.bf16 %v1422_v6, %v1418_v5  ;;  %v1426_v14 = vld [vmem:[#allocation11 + $0x390] sm:$0xff] }
 0x41c   : > { %6000 = vmatprep.subr.bf16.mxu1 %v5999_v47  ;;  %v1431_v8 = vld [vmem:[#allocation11 + $0x3b8] sm:$0xff]  ;;  %v1436_v12 = vld [vmem:[#allocation11 + $0x3e0] sm:$0xff]  ;;  %v1430_v15 = vld [vmem:[#allocation11 + $0x3b0] sm:$0xff] }
 0x41d   : > { %v6007_v17 = vpack.c.bf16 %v1431_v8, %v1427_v7  ;;  %v1435_v57 = vld [vmem:[#allocation11 + $0x3d8] sm:$0xff]  ;;  %v5981_v59 = vpack.c.bf16 %v1436_v12, %v1432_v11  ;;  %v6009_v60 = vpack.c.bf16 %v1430_v15, %v1426_v14  ;;  %v1434_v19 = vld [vmem:[#allocation11 + $0x3d0] sm:$0xff]  ;;  %v1371_v26 = vld [vmem:[%s1370_s5] sm:$0xff] }
 0x41e   : > { %5970 = vmatpush1.bf16.msra.mxu0 %v5969_v40  ;;  %v1439_v58 = vld [vmem:[#allocation11 + $0x3f8] sm:$0xff]  ;;  %v1438_v20 = vld [vmem:[#allocation11 + $0x3f0] sm:$0xff]  ;;  %v1372_v27 = vld [vmem:[%s1370_s5 + $0x8] sm:$0xff] }
 0x41f   : > { %5972 = vmatprep.subr.bf16.mxu0 %v5971_v22  ;;  %6002 = vmatpush1.bf16.msra.mxu1 %v6001_v2  ;;  %v6011_v18 = vpack.c.bf16 %v1439_v58, %v1435_v57  ;;  %v6013_v25 = vpack.c.bf16 %v1438_v20, %v1434_v19  ;;  %v1373_v34 = vld [vmem:[%s1370_s5 + $0x10] sm:$0xff]  ;;  %v1374_v38 = vld [vmem:[%s1370_s5 + $0x18] sm:$0xff]  ;;  %v1634_v2 = vld [vmem:[#allocation10 + $0x400] sm:$0xff] (%p1362_p1) }
 0x420   : > { %6004 = vmatprep.subr.bf16.mxu1 %v6003_v4  ;;  %v1637_v62 = vld [vmem:[#allocation10 + $0x418] sm:$0xff] (%p1362_p1)  ;;  %v1638_v3 = vld [vmem:[#allocation10 + $0x420] sm:$0xff] (%p1362_p1)  ;;  %v1636_v6 = vld [vmem:[#allocation10 + $0x410] sm:$0xff] (%p1362_p1) }
 0x421   :  { %v1641_v1 = vld [vmem:[#allocation10 + $0x438] sm:$0xff] (%p1362_p1)  ;;  %v6017_v5 = vpack.c.bf16 (%p1362_p1), %v1638_v3, %v1634_v2  ;;  %v1640_v7 = vld [vmem:[#allocation10 + $0x430] sm:$0xff] (%p1362_p1)  ;;  %v1643_v8 = vld [vmem:[#allocation10 + $0x448] sm:$0xff] (%p1362_p1) }
 0x422   : > { %5974 = vmatpush1.bf16.msra.mxu0 %v5973_v53  ;;  %v1635_v53 = vld [vmem:[#allocation10 + $0x408] sm:$0xff] (%p1362_p1)  ;;  %v6047_v4 = vpack.c.bf16 (%p1362_p1), %v1641_v1, %v1637_v62  ;;  %v1649_v11 = vld [vmem:[#allocation10 + $0x478] sm:$0xff] (%p1362_p1)  ;;  %v1646_v14 = vld [vmem:[#allocation10 + $0x460] sm:$0xff] (%p1362_p1) }
 0x423   : > { %5976 = vmatprep.subr.bf16.mxu0 %v5975_v61  ;;  %6006 = vmatpush1.bf16.msra.mxu1 %v6005_v13  ;;  %v1639_v61 = vld [vmem:[#allocation10 + $0x428] sm:$0xff] (%p1362_p1)  ;;  %v1644_v15 = vld [vmem:[#allocation10 + $0x450] sm:$0xff] (%p1362_p1)  ;;  %v1653_v20 = vld [vmem:[#allocation10 + $0x498] sm:$0xff] (%p1362_p1) }
 0x424   : > { %6008 = vmatprep.subr.bf16.mxu1 %v6007_v17  ;;  %v6015_v63 = vpack.c.bf16 (%p1362_p1), %v1639_v61, %v1635_v53  ;;  %v1642_v17 = vld [vmem:[#allocation10 + $0x440] sm:$0xff] (%p1362_p1)  ;;  %v1648_v58 = vld [vmem:[#allocation10 + $0x470] sm:$0xff] (%p1362_p1)  ;;  %v1679_v53 = vld [vmem:[#allocation10 + $0x568] sm:$0xff] (%p1362_p1) }
 0x425   :  { %v6021_v57 = vpack.c.bf16 (%p1362_p1), %v1646_v14, %v1642_v17  ;;  %v1677_v61 = vld [vmem:[#allocation10 + $0x558] sm:$0xff] (%p1362_p1)  ;;  %v1674_v3 = vld [vmem:[#allocation10 + $0x540] sm:$0xff] (%p1362_p1) }
 0x426   : > { %5978 = vmatpush1.bf16.msra.mxu0 %v5977_v9  ;;  %v6049_v9 = vpack.c.bf16 (%p1362_p1), %v1640_v7, %v1636_v6  ;;  %v1681_v62 = vld [vmem:[#allocation10 + $0x578] sm:$0xff] (%p1362_p1)  ;;  %v1680_v7 = vld [vmem:[#allocation10 + $0x570] sm:$0xff] (%p1362_p1)  ;;  %v1682_v17 = vld [vmem:[#allocation10 + $0x580] sm:$0xff] (%p1362_p1) }
 0x427   : > { %5980 = vmatprep.subr.bf16.mxu0 %v5979_v10  ;;  %6010 = vmatpush1.bf16.msra.mxu1 %v6009_v60  ;;  %v1645_v10 = vld [vmem:[#allocation10 + $0x458] sm:$0xff] (%p1362_p1)  ;;  %v1655_v60 = vld [vmem:[#allocation10 + $0x4a8] sm:$0xff] (%p1362_p1)  ;;  %v6067_v6 = vpack.c.bf16 (%p1362_p1), %v1681_v62, %v1677_v61  ;;  %v1686_v14 = vld [vmem:[#allocation10 + $0x5a0] sm:$0xff] (%p1362_p1) }
 0x428   : > { %6012 = vmatprep.subr.bf16.mxu1 %v6011_v18  ;;  %v6051_v13 = vpack.c.bf16 (%p1362_p1), %v1649_v11, %v1645_v10  ;;  %v6053_v18 = vpack.c.bf16 (%p1362_p1), %v1648_v58, %v1644_v15  ;;  %v1689_v10 = vld [vmem:[#allocation10 + $0x5b8] sm:$0xff] (%p1362_p1)  ;;  %v1684_v15 = vld [vmem:[#allocation10 + $0x590] sm:$0xff] (%p1362_p1) }
 0x429   :  { %v1688_v58 = vld [vmem:[#allocation10 + $0x5b0] sm:$0xff] (%p1362_p1) }
 0x42a   : > { %5982 = vmatpush1.bf16.msra.mxu0 %v5981_v59  ;;  %v1651_v59 = vld [vmem:[#allocation10 + $0x488] sm:$0xff] (%p1362_p1) }
 0x42b   : > { %6014 = vmatpush1.bf16.msra.mxu1 %v6013_v25  ;;  %6016 = vmatprep.subr.bf16.mxu0 (%p1362_p1), %v6015_v63  ;;  %v6023_v19 = vpack.c.bf16 (%p1362_p1), %v1655_v60, %v1651_v59  ;;  %v1657_v25 = vld [vmem:[#allocation10 + $0x4b8] sm:$0xff] (%p1362_p1)  ;;  %v1691_v59 = vld [vmem:[#allocation10 + $0x5c8] sm:$0xff] (%p1362_p1) }
 0x42c   :  { %6048 = vmatprep.subr.bf16.mxu1 (%p1362_p1), %v6047_v4  ;;  %v1678_v4 = vld [vmem:[#allocation10 + $0x560] sm:$0xff] (%p1362_p1)  ;;  %v1695_v60 = vld [vmem:[#allocation10 + $0x5e8] sm:$0xff] (%p1362_p1) }
 0x42d   : > { %1505 = vmatmul.mubr.f32.vlgmr.msra.gmra.mrb[0].mxu0 %v7451_v43  ;;  %v6037_v11 = vpack.c.bf16 (%p1362_p1), %v1678_v4, %v1674_v3 }
 0x42e   : > { %1576 = vmatmul.mubr.f32.vlgmr.msra.gmra.mrb[0].mxu1 %v7451_v43  ;;  %1785 = vmatprep.mubr.f32.mxu0 (%p1362_p1), %v7542_v0 }
 0x42f   :  { %1946 = vmatprep.mubr.f32.mxu1 (%p1362_p1), %v7542_v0  ;;  %6018 = vmatpush1.bf16.msra.mxu0 (%p1362_p1), %v6017_v5  ;;  %v1676_v5 = vld [vmem:[#allocation10 + $0x550] sm:$0xff] (%p1362_p1) }
 0x430   :  { %6050 = vmatpush1.bf16.msra.mxu1 (%p1362_p1), %v6049_v9  ;;  %v1687_v9 = vld [vmem:[#allocation10 + $0x5a8] sm:$0xff] (%p1362_p1) }
 0x431   :  { %6052 = vmatprep.subr.bf16.mxu1 (%p1362_p1), %v6051_v13 }
 0x434   :  { %6054 = vmatpush1.bf16.msra.mxu1 (%p1362_p1), %v6053_v18  ;;  %v1693_v18 = vld [vmem:[#allocation10 + $0x5d8] sm:$0xff] (%p1362_p1) }
 0x500   : > { %v1506_v28 = vpop.f32.mrb[0].mxu0 }
 0x501   : > { %v1582_v29 = vadd.f32 %v1506_v28, %v1371_v26  ;;  %v1508_v30 = vpop.f32.mrb[1].mxu0  ;;  %v1577_v35 = vpop.f32.mrb[0].mxu1  ;;  %v1650_v26 = vld [vmem:[#allocation10 + $0x480] sm:$0xff] (%p1362_p1) }
 0x502   : > { %v1583_v31 = vadd.f32 %v1508_v30, %v1372_v27  ;;  %v1579_v36 = vpop.f32.mrb[1].mxu1  ;;  %v1584_v37 = vadd.f32 %v1577_v35, %v1373_v34  ;;  %v6055_v27 = vpack.c.bf16 (%p1362_p1), %v1657_v25, %v1653_v20  ;;  %v1654_v28 = vld [vmem:[#allocation10 + $0x4a0] sm:$0xff] (%p1362_p1)  ;;  %v1656_v30 = vld [vmem:[#allocation10 + $0x4b0] sm:$0xff] (%p1362_p1)  ;;  %v1661_v34 = vld [vmem:[#allocation10 + $0x4d8] sm:$0xff] (%p1362_p1)  ;;  %v6041_v20 = vpack.c.bf16 (%p1362_p1), %v1686_v14, %v1682_v17 }
 0x503   : > { %v5708_v32 = vmul.f32 -1.442695, %v1582_v29  ;;  %v1585_v39 = vadd.f32 %v1579_v36, %v1374_v38  ;;  %v1652_v29 = vld [vmem:[#allocation10 + $0x490] sm:$0xff] (%p1362_p1)  ;;  %v1658_v38 = vld [vmem:[#allocation10 + $0x4c0] sm:$0xff] (%p1362_p1)  ;;  %v6073_v25 = vpack.c.bf16 (%p1362_p1), %v1688_v58, %v1684_v15 }
 0x504   : > { %v5709_v33 = vmul.f32 -1.442695, %v1583_v31  ;;  %v5710_v16 = vmul.f32 -1.442695, %v1584_v37  ;;  %v6025_v31 = vpack.c.bf16 (%p1362_p1), %v1654_v28, %v1650_v26  ;;  %v6057_v35 = vpack.c.bf16 (%p1362_p1), %v1656_v30, %v1652_v29  ;;  %v1665_v37 = vld [vmem:[#allocation10 + $0x4f8] sm:$0xff] (%p1362_p1)  ;;  %6056 = vmatprep.subr.bf16.mxu1 (%p1362_p1), %v6055_v27  ;;  %v1690_v27 = vld [vmem:[#allocation10 + $0x5c0] sm:$0xff] (%p1362_p1) }
 0x505   : > { %7015 = vpow2.f32 %v5708_v32  ;;  %v1659_v32 = vld [vmem:[#allocation10 + $0x4c8] sm:$0xff] (%p1362_p1)  ;;  %v6043_v26 = vpack.c.bf16 (%p1362_p1), %v1695_v60, %v1691_v59  ;;  %v1694_v28 = vld [vmem:[#allocation10 + $0x5e0] sm:$0xff] (%p1362_p1)  ;;  %v1692_v30 = vld [vmem:[#allocation10 + $0x5d0] sm:$0xff] (%p1362_p1) }
 0x506   : > { %7017 = vpow2.f32 %v5709_v33  ;;  %v1663_v33 = vld [vmem:[#allocation10 + $0x4e8] sm:$0xff] (%p1362_p1)  ;;  %6058 = vmatpush1.bf16.msra.mxu1 (%p1362_p1), %v6057_v35 }
 0x507   : > { %7019 = vpow2.f32 %v5710_v16  ;;  %v6027_v36 = vpack.c.bf16 (%p1362_p1), %v1663_v33, %v1659_v32  ;;  %v1662_v16 = vld [vmem:[#allocation10 + $0x4e0] sm:$0xff] (%p1362_p1)  ;;  %v6045_v32 = vpack.c.bf16 (%p1362_p1), %v1694_v28, %v1690_v27 }
 0x508   : > { %7021 = vtanh.f32 %v1585_v39  ;;  %v6059_v39 = vpack.c.bf16 (%p1362_p1), %v1665_v37, %v1661_v34 }
 0x50a   :  { %6060 = vmatprep.subr.bf16.mxu1 (%p1362_p1), %v6059_v39 }
 0x50f   : > { %v7016_v43 = vpop.eup %7015 }
 0x510   : > { %v7018_v40 = vpop.eup %7017  ;;  %v1595_v41 = vadd.f32 1.0, %v7016_v43 }
 0x511   : > { %v1596_v21 = vadd.f32 1.0, %v7018_v40  ;;  %v7020_v22 = vpop.eup %7019  ;;  %v1664_v40 = vld [vmem:[#allocation10 + $0x4f0] sm:$0xff] (%p1362_p1) }
 0x512   : > { %7023 = vrcp.f32 %v1595_v41  ;;  %v7022_v23 = vpop.eup %7021  ;;  %v1597_v44 = vadd.f32 1.0, %v7020_v22  ;;  %v1667_v41 = vld [vmem:[#allocation10 + $0x508] sm:$0xff] (%p1362_p1)  ;;  %v1669_v22 = vld [vmem:[#allocation10 + $0x518] sm:$0xff] (%p1362_p1) }
 0x513   : > { %7025 = vrcp.f32 %v1596_v21  ;;  %v1671_v21 = vld [vmem:[#allocation10 + $0x528] sm:$0xff] (%p1362_p1) }
 0x514   : > { %7027 = vrcp.f32 %v1597_v44 }
 0x51c   : > { %v7024_v24 = vpop.eup %7023 }
 0x51d   : > { %v7026_v45 = vpop.eup %7025  ;;  %v1606_v46 = vmul.f32 %v7024_v24, %v7022_v23  ;;  %v1673_v23 = vld [vmem:[#allocation10 + $0x538] sm:$0xff] (%p1362_p1)  ;;  %v6029_v24 = vpack.c.bf16 (%p1362_p1), %v1662_v16, %v1658_v38 }
 0x51e   : > { %v1605_v47 = vmul.f32 %v7447_v42, %v7026_v45  ;;  %v7028_v49 = vpop.eup %7027  ;;  %v6031_v45 = vpack.c.bf16 (%p1362_p1), %v1671_v21, %v1667_v41 }
 0x520   : > { %v1607_v48 = vadd.f32 %v1606_v46, %v1605_v47   ;;  %v1666_v46 = vld [vmem:[#allocation10 + $0x500] sm:$0xff] (%p1362_p1) }
 0x521   :  { %v1670_v47 = vld [vmem:[#allocation10 + $0x520] sm:$0xff] (%p1362_p1) }
 0x522   : > { %7029 = vtanh.f32 %v1607_v48  ;;  %v8686_v42 = vmov %v1607_v48  ;;  %1616 = vst [vmem:[#allocation3 + $0x8] sm:$0xff] (%p1362_p1), %v1607_v48  ;;  %v1668_v48 = vld [vmem:[#allocation10 + $0x510] sm:$0xff] (%p1362_p1)  ;;  %v6033_v63 = vpack.c.bf16 (%p1362_p1), %v1670_v47, %v1666_v46  ;;  %v1699_v46 = vld [vmem:[#allocation13 + $0x8] sm:$0xf] (%p1362_p1) }
 0x523   :  { %v1647_v42 = vld [vmem:[#allocation10 + $0x468] sm:$0xff] (%p1362_p1)  ;;  %v8016_v47 = vrot.slane (%p1362_p1), %v1699_v46, %v7737_v52 }
 0x524   :  { %v6019_v12 = vpack.c.bf16 (%p1362_p1), %v1647_v42, %v1643_v8  ;;  %v1683_v8 = vld [vmem:[#allocation10 + $0x588] sm:$0xff] (%p1362_p1)  ;;  %v1685_v42 = vld [vmem:[#allocation10 + $0x598] sm:$0xff] (%p1362_p1) }
 0x525   :  { %v6039_v13 = vpack.c.bf16 (%p1362_p1), %v1687_v9, %v1683_v8 }
 0x526   :  { %6020 = vmatprep.subr.bf16.mxu0 (%p1362_p1), %v6019_v12  ;;  %v6069_v12 = vpack.c.bf16 (%p1362_p1), %v1680_v7, %v1676_v5 }
 0x527   :  { %6022 = vmatpush1.bf16.msra.mxu0 (%p1362_p1), %v6021_v57  ;;  %v6071_v57 = vpack.c.bf16 (%p1362_p1), %v1689_v10, %v1685_v42 }
 0x528   :  { %6024 = vmatprep.subr.bf16.mxu0 (%p1362_p1), %v6023_v19  ;;  %v1697_v19 = vld [vmem:[#allocation10 + $0x5f8] sm:$0xff] (%p1362_p1) }
 0x529   :  { %1364 = sbr.rel (!%p1362_p1) target bundleno = 1033 (0x409), region = 195  ;;  %v6075_v29 = vpack.c.bf16 (%p1362_p1), %v1697_v19, %v1693_v18 }
 0x52b   :  { %6026 = vmatpush1.bf16.msra.mxu0 (%p1362_p1), %v6025_v31  ;;  %v1696_v31 = vld [vmem:[#allocation10 + $0x5f0] sm:$0xff] (%p1362_p1) }
 0x52c   : > { %v7030_v50 = vpop.eup %7029  ;;  %6028 = vmatprep.subr.bf16.mxu0 (%p1362_p1), %v6027_v36  ;;  %v6077_v33 = vpack.c.bf16 (%p1362_p1), %v1696_v31, %v1692_v30 }
 0x52d   : > { %v1609_v51 = vmul.f32 %v7030_v50, %v7028_v49   ;;  %v6063_v49 = vpack.c.bf16 (%p1362_p1), %v1673_v23, %v1669_v22  ;;  %v1672_v50 = vld [vmem:[#allocation10 + $0x530] sm:$0xff] (%p1362_p1) }
 0x52e   :  { %v6065_v1 = vpack.c.bf16 (%p1362_p1), %v1672_v50, %v1668_v48  ;;  %v8019_v48 = vrot.slane (%p1362_p1), %v1699_v46, %v7739_v54  ;;  %v8025_v50 = vrot.slane (%p1362_p1), %v1699_v46, %v7743_v56 }
 0x52f   : > { %1612 = vst [vmem:[%s1611_s22] sm:$0xff] %v1609_v51  ;;  %v8687_v43 = vmov %v1609_v51  ;;  %1614 = vst [vmem:[#allocation2 + $0x8] sm:$0xff] (%p1362_p1), %v1609_v51  ;;  %v1675_v51 = vld [vmem:[#allocation10 + $0x548] sm:$0xff] (%p1362_p1)  ;;  %6030 = vmatpush1.bf16.msra.mxu0 (%p1362_p1), %v6029_v24 }
 0x530   :  { %v1660_v43 = vld [vmem:[#allocation10 + $0x4d0] sm:$0xff]  ;;  %6032 = vmatprep.subr.bf16.mxu0 %v6031_v45  ;;  %v6035_v2 = vpack.c.bf16 %v1679_v53, %v1675_v51 }
 0x531   :  { %v6061_v44 = vpack.c.bf16 %v1664_v40, %v1660_v43 }
 0x533   :  { %6062 = vmatpush1.bf16.msra.mxu1 %v6061_v44  ;;  %6034 = vmatpush1.bf16.msra.mxu0 %v6033_v63 }
 0x534   :  { %6064 = vmatprep.subr.bf16.mxu1 %v6063_v49  ;;  %6036 = vmatprep.subr.bf16.mxu0 %v6035_v2  ;;  %v8022_v49 = vrot.slane %v1699_v46, %v7741_v55 }
 0x536   :  { %v1617_v34 = vld [vmem:[#allocation17] sm:$0xff]  ;;  %v1618_v35 = vld [vmem:[#allocation17 + $0x8] sm:$0xff]  ;;  %v1619_v36 = vld [vmem:[#allocation17 + $0x10] sm:$0xff] }
 0x537   :  { %6066 = vmatpush1.bf16.msra.mxu1 %v6065_v1  ;;  %6038 = vmatpush1.bf16.msra.mxu0 %v6037_v11  ;;  %v1620_v37 = vld [vmem:[#allocation17 + $0x18] sm:$0xff]  ;;  %v1621_v38 = vld [vmem:[#allocation17 + $0x20] sm:$0xff]  ;;  %v1622_v16 = vld [vmem:[#allocation17 + $0x28] sm:$0xff] }
 0x538   :  { %6068 = vmatprep.subr.bf16.mxu1 %v6067_v6  ;;  %6040 = vmatprep.subr.bf16.mxu0 %v6039_v13  ;;  %v1623_v39 = vld [vmem:[#allocation17 + $0x30] sm:$0xff]  ;;  %v1624_v43 = vld [vmem:[#allocation17 + $0x38] sm:$0xff]  ;;  %v1625_v40 = vld [vmem:[#allocation17 + $0x40] sm:$0xff] }
 0x539   :  { %v1626_v41 = vld [vmem:[#allocation17 + $0x48] sm:$0xff]  ;;  %v1627_v21 = vld [vmem:[#allocation17 + $0x50] sm:$0xff]  ;;  %v1628_v22 = vld [vmem:[#allocation17 + $0x58] sm:$0xff] }
 0x53a   :  { %v1629_v23 = vld [vmem:[#allocation17 + $0x60] sm:$0xff]  ;;  %v1630_v24 = vld [vmem:[#allocation17 + $0x68] sm:$0xff]  ;;  %v1631_v44 = vld [vmem:[#allocation17 + $0x70] sm:$0xff] }
 0x53b   :  { %6070 = vmatpush1.bf16.msra.mxu1 %v6069_v12  ;;  %6042 = vmatpush1.bf16.msra.mxu0 %v6041_v20  ;;  %v1632_v45 = vld [vmem:[#allocation17 + $0x78] sm:$0xff] }
 0x53c   :  { %6072 = vmatprep.subr.bf16.mxu1 %v6071_v57  ;;  %6044 = vmatprep.subr.bf16.mxu0 %v6043_v26 }
 0x53f   :  { %6074 = vmatpush1.bf16.msra.mxu1 %v6073_v25  ;;  %6046 = vmatpush1.bf16.msra.mxu0 %v6045_v32 }
 0x540   :  { %6076 = vmatprep.subr.bf16.mxu1 %v6075_v29 }
 0x542   :  { %1786 = vmatmul.mubr.f32.vlgmr.msra.gmra.mrb[0].mxu0 %v1617_v34 }
 0x543   :  { %6078 = vmatpush1.bf16.msra.mxu1 %v6077_v33  ;;  %1791 = vmatprep.mubr.f32.mxu0 %v7542_v0 }
 0x546   :  { %1947 = vmatmul.mubr.f32.vlgmr.msra.gmra.mrb[0].mxu1 %v1617_v34  ;;  %1792 = vmatmul.mubr.f32.gmra.mrb[2].mxu0 %v1618_v35 }
 0x547   :  { %1952 = vmatprep.mubr.f32.mxu1 %v7542_v0  ;;  %1797 = vmatprep.mubr.f32.mxu0 %v7542_v0 }
 0x54a   :  { %1953 = vmatmul.mubr.f32.gmra.mrb[2].mxu1 %v1618_v35  ;;  %1798 = vmatmul.mubr.f32.gmra.mrb[4].mxu0 %v1619_v36 }
 0x54b   :  { %1958 = vmatprep.mubr.f32.mxu1 %v7542_v0  ;;  %1803 = vmatprep.mubr.f32.mxu0 %v7542_v0 }
 0x54e   :  { %1959 = vmatmul.mubr.f32.gmra.mrb[4].mxu1 %v1619_v36  ;;  %1804 = vmatmul.mubr.f32.gmra.mrb[6].mxu0 %v1620_v37 }
 0x54f   :  { %1964 = vmatprep.mubr.f32.mxu1 %v7542_v0  ;;  %1809 = vmatprep.mubr.f32.mxu0 %v7542_v0 }
 0x552   :  { %1965 = vmatmul.mubr.f32.gmra.mrb[6].mxu1 %v1620_v37  ;;  %1810 = vmatmul.mubr.f32.gmra.mrb[8].mxu0 %v1621_v38 }
 0x553   :  { %1970 = vmatprep.mubr.f32.mxu1 %v7542_v0  ;;  %1815 = vmatprep.mubr.f32.mxu0 %v7542_v0 }
 0x556   :  { %1971 = vmatmul.mubr.f32.gmra.mrb[8].mxu1 %v1621_v38  ;;  %1816 = vmatmul.mubr.f32.gmra.mrb[10].mxu0 %v1622_v16 }
 0x557   :  { %1976 = vmatprep.mubr.f32.mxu1 %v7542_v0  ;;  %1821 = vmatprep.mubr.f32.mxu0 %v7542_v0 }
 0x55a   :  { %1977 = vmatmul.mubr.f32.gmra.mrb[10].mxu1 %v1622_v16  ;;  %1822 = vmatmul.mubr.f32.gmra.mrb[12].mxu0 %v1623_v39 }
 0x55b   :  { %1982 = vmatprep.mubr.f32.mxu1 %v7542_v0  ;;  %1827 = vmatprep.mubr.f32.mxu0 %v7542_v0 }
 0x55e   :  { %1983 = vmatmul.mubr.f32.gmra.mrb[12].mxu1 %v1623_v39  ;;  %1828 = vmatmul.mubr.f32.gmra.mrb[14].mxu0 %v1624_v43 }
 0x55f   :  { %1988 = vmatprep.mubr.f32.mxu1 %v7542_v0  ;;  %1833 = vmatprep.mubr.f32.mxu0 %v7542_v0 }
 0x562   :  { %1989 = vmatmul.mubr.f32.gmra.mrb[14].mxu1 %v1624_v43  ;;  %1834 = vmatmul.mubr.f32.gmra.mrb[16].mxu0 %v1625_v40 }
 0x563   :  { %1994 = vmatprep.mubr.f32.mxu1 %v7542_v0  ;;  %1839 = vmatprep.mubr.f32.mxu0 %v7542_v0 }
 0x566   :  { %1995 = vmatmul.mubr.f32.gmra.mrb[16].mxu1 %v1625_v40  ;;  %1840 = vmatmul.mubr.f32.gmra.mrb[18].mxu0 %v1626_v41 }
 0x567   :  { %2000 = vmatprep.mubr.f32.mxu1 %v7542_v0  ;;  %1845 = vmatprep.mubr.f32.mxu0 %v7542_v0 }
 0x56a   :  { %2001 = vmatmul.mubr.f32.gmra.mrb[18].mxu1 %v1626_v41  ;;  %1846 = vmatmul.mubr.f32.gmra.mrb[20].mxu0 %v1627_v21 }
 0x56b   :  { %2006 = vmatprep.mubr.f32.mxu1 %v7542_v0  ;;  %1851 = vmatprep.mubr.f32.mxu0 %v7542_v0 }
 0x56e   :  { %2007 = vmatmul.mubr.f32.gmra.mrb[20].mxu1 %v1627_v21  ;;  %1852 = vmatmul.mubr.f32.gmra.mrb[22].mxu0 %v1628_v22 }
 0x56f   :  { %2012 = vmatprep.mubr.f32.mxu1 %v7542_v0  ;;  %1857 = vmatprep.mubr.f32.mxu0 %v7542_v0 }
 0x572   :  { %2013 = vmatmul.mubr.f32.gmra.mrb[22].mxu1 %v1628_v22  ;;  %1858 = vmatmul.mubr.f32.gmra.mrb[24].mxu0 %v1629_v23 }
 0x573   :  { %2018 = vmatprep.mubr.f32.mxu1 %v7542_v0  ;;  %1863 = vmatprep.mubr.f32.mxu0 %v7542_v0 }
 0x576   :  { %2019 = vmatmul.mubr.f32.gmra.mrb[24].mxu1 %v1629_v23  ;;  %1864 = vmatmul.mubr.f32.gmra.mrb[26].mxu0 %v1630_v24 }
 0x577   :  { %2024 = vmatprep.mubr.f32.mxu1 %v7542_v0  ;;  %1869 = vmatprep.mubr.f32.mxu0 %v7542_v0 }
 0x57a   :  { %2025 = vmatmul.mubr.f32.gmra.mrb[26].mxu1 %v1630_v24  ;;  %1870 = vmatmul.mubr.f32.gmra.mrb[28].mxu0 %v1631_v44 }
 0x57b   :  { %2030 = vmatprep.mubr.f32.mxu1 %v7542_v0  ;;  %1875 = vmatprep.mubr.f32.mxu0 %v7542_v0 }
 0x57e   :  { %2031 = vmatmul.mubr.f32.gmra.mrb[28].mxu1 %v1631_v44  ;;  %1876 = vmatmul.mubr.f32.gmra.mrb[30].mxu0 %v1632_v45 }
 0x57f   :  { %2036 = vmatprep.mubr.f32.mxu1 %v7542_v0 }
 0x582   :  { %2037 = vmatmul.mubr.f32.gmra.mrb[30].mxu1 %v1632_v45 }
 0x615   :  { %v1787_v51 = vpop.f32.mrb[0].mxu0 }
 0x616   :  { %v1788_v53 = vadd.f32 %v1787_v51, %v8016_v47  ;;  %v1789_v62 = vpop.f32.mrb[1].mxu0 }
 0x617   :  { %v1790_v1 = vadd.f32 %v1789_v62, %v8022_v49 }
 0x618   :  { %2043 = vst [vmem:[#allocation4] sm:$0xff] %v1788_v53 }
 0x619   :  { %v1948_v61 = vpop.f32.mrb[0].mxu1  ;;  %2044 = vst [vmem:[#allocation4 + $0x8] sm:$0xff] %v1790_v1  ;;  %v1793_v4 = vpop.f32.mrb[2].mxu0 }
 0x61a   :  { %v1949_v63 = vadd.f32 %v1948_v61, %v8019_v48  ;;  %v1950_v2 = vpop.f32.mrb[1].mxu1  ;;  %v1794_v5 = vadd.f32 %v1793_v4, %v8016_v47  ;;  %v1795_v7 = vpop.f32.mrb[3].mxu0 }
 0x61b   :  { %v1951_v3 = vadd.f32 %v1950_v2, %v8025_v50  ;;  %v1796_v9 = vadd.f32 %v1795_v7, %v8022_v49 }
 0x61c   :  { %2045 = vst [vmem:[#allocation4 + $0x10] sm:$0xff] %v1949_v63  ;;  %2047 = vst [vmem:[#allocation4 + $0x20] sm:$0xff] %v1794_v5 }
 0x61d   :  { %2046 = vst [vmem:[#allocation4 + $0x18] sm:$0xff] %v1951_v3  ;;  %v1954_v6 = vpop.f32.mrb[2].mxu1  ;;  %2048 = vst [vmem:[#allocation4 + $0x28] sm:$0xff] %v1796_v9  ;;  %v1799_v11 = vpop.f32.mrb[4].mxu0 }
 0x61e   :  { %v1955_v8 = vadd.f32 %v1954_v6, %v8019_v48  ;;  %v1956_v42 = vpop.f32.mrb[3].mxu1  ;;  %v1800_v12 = vadd.f32 %v1799_v11, %v8016_v47  ;;  %v1801_v17 = vpop.f32.mrb[5].mxu0 }
 0x61f   :  { %v1957_v10 = vadd.f32 %v1956_v42, %v8025_v50  ;;  %v1802_v15 = vadd.f32 %v1801_v17, %v8022_v49 }
 0x620   :  { %2049 = vst [vmem:[#allocation4 + $0x30] sm:$0xff] %v1955_v8  ;;  %2051 = vst [vmem:[#allocation4 + $0x40] sm:$0xff] %v1800_v12 }
 0x621   :  { %2050 = vst [vmem:[#allocation4 + $0x38] sm:$0xff] %v1957_v10  ;;  %v1960_v13 = vpop.f32.mrb[4].mxu1  ;;  %2052 = vst [vmem:[#allocation4 + $0x48] sm:$0xff] %v1802_v15  ;;  %v1805_v59 = vpop.f32.mrb[6].mxu0 }
 0x622   :  { %v1961_v14 = vadd.f32 %v1960_v13, %v8019_v48  ;;  %v1962_v57 = vpop.f32.mrb[5].mxu1  ;;  %v1806_v60 = vadd.f32 %v1805_v59, %v8016_v47  ;;  %v1807_v19 = vpop.f32.mrb[7].mxu0 }
 0x623   :  { %v1963_v58 = vadd.f32 %v1962_v57, %v8025_v50  ;;  %v1808_v25 = vadd.f32 %v1807_v19, %v8022_v49 }
 0x624   :  { %2053 = vst [vmem:[#allocation4 + $0x50] sm:$0xff] %v1961_v14  ;;  %2055 = vst [vmem:[#allocation4 + $0x60] sm:$0xff] %v1806_v60 }
 0x625   :  { %2054 = vst [vmem:[#allocation4 + $0x58] sm:$0xff] %v1963_v58  ;;  %v1966_v18 = vpop.f32.mrb[6].mxu1  ;;  %2056 = vst [vmem:[#allocation4 + $0x68] sm:$0xff] %v1808_v25  ;;  %v1811_v28 = vpop.f32.mrb[8].mxu0 }
 0x626   :  { %v1967_v20 = vadd.f32 %v1966_v18, %v8019_v48  ;;  %v1968_v26 = vpop.f32.mrb[7].mxu1  ;;  %v1812_v29 = vadd.f32 %v1811_v28, %v8016_v47  ;;  %v1813_v31 = vpop.f32.mrb[9].mxu0 }
 0x627   :  { %v1969_v27 = vadd.f32 %v1968_v26, %v8025_v50  ;;  %v1814_v33 = vadd.f32 %v1813_v31, %v8022_v49 }
 0x628   :  { %2057 = vst [vmem:[#allocation4 + $0x70] sm:$0xff] %v1967_v20  ;;  %2059 = vst [vmem:[#allocation4 + $0x80] sm:$0xff] %v1812_v29 }
 0x629   :  { %2058 = vst [vmem:[#allocation4 + $0x78] sm:$0xff] %v1969_v27  ;;  %v1972_v30 = vpop.f32.mrb[8].mxu1  ;;  %2060 = vst [vmem:[#allocation4 + $0x88] sm:$0xff] %v1814_v33  ;;  %v1817_v36 = vpop.f32.mrb[10].mxu0 }
 0x62a   :  { %v1973_v32 = vadd.f32 %v1972_v30, %v8019_v48  ;;  %v1974_v34 = vpop.f32.mrb[9].mxu1  ;;  %v1818_v37 = vadd.f32 %v1817_v36, %v8016_v47  ;;  %v1819_v16 = vpop.f32.mrb[11].mxu0 }
 0x62b   :  { %v1975_v35 = vadd.f32 %v1974_v34, %v8025_v50  ;;  %v1820_v43 = vadd.f32 %v1819_v16, %v8022_v49 }
 0x62c   :  { %2061 = vst [vmem:[#allocation4 + $0x90] sm:$0xff] %v1973_v32  ;;  %2063 = vst [vmem:[#allocation4 + $0xa0] sm:$0xff] %v1818_v37 }
 0x62d   :  { %2062 = vst [vmem:[#allocation4 + $0x98] sm:$0xff] %v1975_v35  ;;  %v1978_v38 = vpop.f32.mrb[10].mxu1  ;;  %2064 = vst [vmem:[#allocation4 + $0xa8] sm:$0xff] %v1820_v43  ;;  %v1823_v21 = vpop.f32.mrb[12].mxu0 }
 0x62e   :  { %v1979_v39 = vadd.f32 %v1978_v38, %v8019_v48  ;;  %v1980_v40 = vpop.f32.mrb[11].mxu1  ;;  %v1824_v22 = vadd.f32 %v1823_v21, %v8016_v47  ;;  %v1825_v24 = vpop.f32.mrb[13].mxu0 }
 0x62f   :  { %v1981_v41 = vadd.f32 %v1980_v40, %v8025_v50  ;;  %v1826_v45 = vadd.f32 %v1825_v24, %v8022_v49 }
 0x630   :  { %2065 = vst [vmem:[#allocation4 + $0xb0] sm:$0xff] %v1979_v39  ;;  %2067 = vst [vmem:[#allocation4 + $0xc0] sm:$0xff] %v1824_v22 }
 0x631   :  { %2066 = vst [vmem:[#allocation4 + $0xb8] sm:$0xff] %v1981_v41  ;;  %v1984_v23 = vpop.f32.mrb[12].mxu1  ;;  %2068 = vst [vmem:[#allocation4 + $0xc8] sm:$0xff] %v1826_v45  ;;  %v1829_v53 = vpop.f32.mrb[14].mxu0 }
 0x632   :  { %v1985_v44 = vadd.f32 %v1984_v23, %v8019_v48  ;;  %v1986_v46 = vpop.f32.mrb[13].mxu1  ;;  %v1830_v61 = vadd.f32 %v1829_v53, %v8016_v47  ;;  %v1831_v63 = vpop.f32.mrb[15].mxu0 }
 0x633   :  { %v1987_v51 = vadd.f32 %v1986_v46, %v8025_v50  ;;  %v1832_v2 = vadd.f32 %v1831_v63, %v8022_v49 }
 0x634   :  { %2069 = vst [vmem:[#allocation4 + $0xd0] sm:$0xff] %v1985_v44  ;;  %2071 = vst [vmem:[#allocation4 + $0xe0] sm:$0xff] %v1830_v61 }
 0x635   :  { %2070 = vst [vmem:[#allocation4 + $0xd8] sm:$0xff] %v1987_v51  ;;  %v1990_v62 = vpop.f32.mrb[14].mxu1  ;;  %2072 = vst [vmem:[#allocation4 + $0xe8] sm:$0xff] %v1832_v2  ;;  %v1835_v5 = vpop.f32.mrb[16].mxu0 }
 0x636   :  { %v1991_v1 = vadd.f32 %v1990_v62, %v8019_v48  ;;  %v1992_v3 = vpop.f32.mrb[15].mxu1  ;;  %v1836_v6 = vadd.f32 %v1835_v5, %v8016_v47  ;;  %v1837_v8 = vpop.f32.mrb[17].mxu0 }
 0x637   :  { %v1993_v4 = vadd.f32 %v1992_v3, %v8025_v50  ;;  %v1838_v42 = vadd.f32 %v1837_v8, %v8022_v49 }
 0x638   :  { %2073 = vst [vmem:[#allocation4 + $0xf0] sm:$0xff] %v1991_v1  ;;  %2075 = vst [vmem:[#allocation4 + $0x100] sm:$0xff] %v1836_v6 }
 0x639   :  { %2074 = vst [vmem:[#allocation4 + $0xf8] sm:$0xff] %v1993_v4  ;;  %v1996_v7 = vpop.f32.mrb[16].mxu1  ;;  %2076 = vst [vmem:[#allocation4 + $0x108] sm:$0xff] %v1838_v42  ;;  %v1841_v12 = vpop.f32.mrb[18].mxu0 }
 0x63a   :  { %v1997_v9 = vadd.f32 %v1996_v7, %v8019_v48  ;;  %v1998_v10 = vpop.f32.mrb[17].mxu1  ;;  %v1842_v13 = vadd.f32 %v1841_v12, %v8016_v47  ;;  %v1843_v14 = vpop.f32.mrb[19].mxu0 }
 0x63b   :  { %v1999_v11 = vadd.f32 %v1998_v10, %v8025_v50  ;;  %v1844_v57 = vadd.f32 %v1843_v14, %v8022_v49 }
 0x63c   :  { %2077 = vst [vmem:[#allocation4 + $0x110] sm:$0xff] %v1997_v9  ;;  %2079 = vst [vmem:[#allocation4 + $0x120] sm:$0xff] %v1842_v13  ;;  %v8091_v13 = vmov 0.0  }
 0x63d   :  { %2078 = vst [vmem:[#allocation4 + $0x118] sm:$0xff] %v1999_v11  ;;  %v2002_v17 = vpop.f32.mrb[18].mxu1  ;;  %2080 = vst [vmem:[#allocation4 + $0x128] sm:$0xff] %v1844_v57  ;;  %v1847_v60 = vpop.f32.mrb[20].mxu0 }
 0x63e   :  { %v2003_v15 = vadd.f32 %v2002_v17, %v8019_v48  ;;  %v2004_v58 = vpop.f32.mrb[19].mxu1  ;;  %v1848_v18 = vadd.f32 %v1847_v60, %v8016_v47  ;;  %v1849_v20 = vpop.f32.mrb[21].mxu0  ;;  %v8093_v17 = vmov 0.0  }
 0x63f   :  { %v2005_v59 = vadd.f32 %v2004_v58, %v8025_v50  ;;  %v1850_v26 = vadd.f32 %v1849_v20, %v8022_v49 }
 0x640   :  { %2081 = vst [vmem:[#allocation4 + $0x130] sm:$0xff] %v2003_v15  ;;  %2083 = vst [vmem:[#allocation4 + $0x140] sm:$0xff] %v1848_v18 }
 0x641   :  { %2082 = vst [vmem:[#allocation4 + $0x138] sm:$0xff] %v2005_v59  ;;  %v2008_v19 = vpop.f32.mrb[20].mxu1  ;;  %2084 = vst [vmem:[#allocation4 + $0x148] sm:$0xff] %v1850_v26  ;;  %v1853_v29 = vpop.f32.mrb[22].mxu0 }
 0x642   :  { %v2009_v25 = vadd.f32 %v2008_v19, %v8019_v48  ;;  %v2010_v27 = vpop.f32.mrb[21].mxu1  ;;  %v1854_v30 = vadd.f32 %v1853_v29, %v8016_v47  ;;  %v1855_v32 = vpop.f32.mrb[23].mxu0 }
 0x643   :  { %v2011_v28 = vadd.f32 %v2010_v27, %v8025_v50  ;;  %v1856_v34 = vadd.f32 %v1855_v32, %v8022_v49 }
 0x644   :  { %2085 = vst [vmem:[#allocation4 + $0x150] sm:$0xff] %v2009_v25  ;;  %2087 = vst [vmem:[#allocation4 + $0x160] sm:$0xff] %v1854_v30 }
 0x645   :  { %2086 = vst [vmem:[#allocation4 + $0x158] sm:$0xff] %v2011_v28  ;;  %v2014_v31 = vpop.f32.mrb[22].mxu1  ;;  %2088 = vst [vmem:[#allocation4 + $0x168] sm:$0xff] %v1856_v34  ;;  %v1859_v37 = vpop.f32.mrb[24].mxu0 }
 0x646   :  { %v2015_v33 = vadd.f32 %v2014_v31, %v8019_v48  ;;  %v2016_v35 = vpop.f32.mrb[23].mxu1  ;;  %v1860_v38 = vadd.f32 %v1859_v37, %v8016_v47  ;;  %v1861_v39 = vpop.f32.mrb[25].mxu0 }
 0x647   :  { %v2017_v36 = vadd.f32 %v2016_v35, %v8025_v50  ;;  %v1862_v40 = vadd.f32 %v1861_v39, %v8022_v49 }
 0x648   :  { %2089 = vst [vmem:[#allocation4 + $0x170] sm:$0xff] %v2015_v33  ;;  %2091 = vst [vmem:[#allocation4 + $0x180] sm:$0xff] %v1860_v38 }
 0x649   :  { %2090 = vst [vmem:[#allocation4 + $0x178] sm:$0xff] %v2017_v36  ;;  %v2020_v16 = vpop.f32.mrb[24].mxu1  ;;  %2092 = vst [vmem:[#allocation4 + $0x188] sm:$0xff] %v1862_v40  ;;  %v1865_v22 = vpop.f32.mrb[26].mxu0 }
 0x64a   :  { %v2021_v43 = vadd.f32 %v2020_v16, %v8019_v48  ;;  %v2022_v41 = vpop.f32.mrb[25].mxu1  ;;  %v1866_v23 = vadd.f32 %v1865_v22, %v8016_v47  ;;  %v1867_v44 = vpop.f32.mrb[27].mxu0 }
 0x64b   :  { %v2023_v21 = vadd.f32 %v2022_v41, %v8025_v50  ;;  %v1868_v46 = vadd.f32 %v1867_v44, %v8022_v49 }
 0x64c   :  { %2093 = vst [vmem:[#allocation4 + $0x190] sm:$0xff] %v2021_v43  ;;  %2095 = vst [vmem:[#allocation4 + $0x1a0] sm:$0xff] %v1866_v23 }
 0x64d   :  { %2094 = vst [vmem:[#allocation4 + $0x198] sm:$0xff] %v2023_v21  ;;  %v2026_v24 = vpop.f32.mrb[26].mxu1  ;;  %2096 = vst [vmem:[#allocation4 + $0x1a8] sm:$0xff] %v1868_v46  ;;  %v1871_v61 = vpop.f32.mrb[28].mxu0 }
 0x64e   :  { %v2027_v45 = vadd.f32 %v2026_v24, %v8019_v48  ;;  %v2028_v51 = vpop.f32.mrb[27].mxu1  ;;  %v1872_v62 = vadd.f32 %v1871_v61, %v8016_v47  ;;  %v1873_v1 = vpop.f32.mrb[29].mxu0 }
 0x64f   :  { %v2029_v53 = vadd.f32 %v2028_v51, %v8025_v50  ;;  %v1874_v3 = vadd.f32 %v1873_v1, %v8022_v49 }
 0x650   :  { %2097 = vst [vmem:[#allocation4 + $0x1b0] sm:$0xff] %v2027_v45  ;;  %2099 = vst [vmem:[#allocation4 + $0x1c0] sm:$0xff] %v1872_v62 }
 0x651   :  { %2098 = vst [vmem:[#allocation4 + $0x1b8] sm:$0xff] %v2029_v53  ;;  %v2032_v63 = vpop.f32.mrb[28].mxu1  ;;  %2100 = vst [vmem:[#allocation4 + $0x1c8] sm:$0xff] %v1874_v3  ;;  %v1877_v6 = vpop.f32.mrb[30].mxu0 }
 0x652   :  { %v2033_v2 = vadd.f32 %v2032_v63, %v8019_v48  ;;  %v2034_v4 = vpop.f32.mrb[29].mxu1  ;;  %v1878_v7 = vadd.f32 %v1877_v6, %v8016_v47  ;;  %v1879_v9 = vpop.f32.mrb[31].mxu0 }
 0x653   :  { %v2035_v5 = vadd.f32 %v2034_v4, %v8025_v50  ;;  %v1880_v10 = vadd.f32 %v1879_v9, %v8022_v49 }
 0x654   :  { %2101 = vst [vmem:[#allocation4 + $0x1d0] sm:$0xff] %v2033_v2  ;;  %2103 = vst [vmem:[#allocation4 + $0x1e0] sm:$0xff] %v1878_v7 }
 0x655   :  { %2102 = vst [vmem:[#allocation4 + $0x1d8] sm:$0xff] %v2035_v5  ;;  %v2038_v8 = vpop.f32.mrb[30].mxu1  ;;  %2104 = vst [vmem:[#allocation4 + $0x1e8] sm:$0xff] %v1880_v10 }
 0x656   :  { %v2039_v42 = vadd.f32 %v2038_v8, %v8019_v48  ;;  %v2040_v11 = vpop.f32.mrb[31].mxu1 }
 0x657   :  { %v2041_v12 = vadd.f32 %v2040_v11, %v8025_v50 }
 0x658   :  { %2105 = vst [vmem:[#allocation4 + $0x1f0] sm:$0xff] %v2039_v42 }
 0x659   :  { %2106 = vst [vmem:[#allocation4 + $0x1f8] sm:$0xff] %v2041_v12 }
 0x65a LB: > { %v2124_v47 = vld [vmem:[#allocation11 + $0x408] sm:$0xff]  ;;  %v2123_v49 = vld [vmem:[#allocation11 + $0x400] sm:$0xff]  ;;  %v7545_v58 = vmov 0.0   ;;  %v2126_v31 = vld [vmem:[#allocation11 + $0x418] sm:$0xff]  ;;  %s5753_s12 = sshll.u32 %s7467_s2, 5  ;;  %s5717_s25 = sshll.u32 %s7467_s2, 3  ;;  %s7467_s2 = sphi %s8095_s2, %s2112_s2   ;;  %v7463_v17 = vphi %v8093_v17, %v8689_v17   ;;  %v7459_v13 = vphi %v8091_v13, %v8688_v13  }
 0x65b   : > { %v2128_v48 = vld [vmem:[#allocation11 + $0x428] sm:$0xff]  ;;  %v2127_v14 = vld [vmem:[#allocation11 + $0x420] sm:$0xff]  ;;  %2251 = vmatprep.mubr.f32.mxu0 %v7545_v58  ;;  %2322 = vmatprep.mubr.f32.mxu1 %v7545_v58  ;;  %v2130_v32 = vld [vmem:[#allocation11 + $0x438] sm:$0xff]  ;;  %s2117_s23 = scalar_lea.vmem [#allocation4], %s5753_s12  ;;  %s2358_s27 = scalar_lea.vmem [#allocation17], %s5717_s25 }
 0x65c   : > { %v6079_v50 = vpack.c.bf16 %v2128_v48, %v2124_v47  ;;  %v2132_v15 = vld [vmem:[#allocation11 + $0x448] sm:$0xff]  ;;  %v6081_v59 = vpack.c.bf16 %v2127_v14, %v2123_v49  ;;  %v2131_v18 = vld [vmem:[#allocation11 + $0x440] sm:$0xff]  ;;  %v6111_v34 = vpack.c.bf16 %v2130_v32, %v2126_v31  ;;  %v2125_v35 = vld [vmem:[#allocation11 + $0x410] sm:$0xff]  ;;  %s2112_s2 = sadd.s32 1, %s7467_s2  }
 0x65d   : > { %v2136_v57 = vld [vmem:[#allocation11 + $0x468] sm:$0xff]  ;;  %v2135_v19 = vld [vmem:[#allocation11 + $0x460] sm:$0xff]  ;;  %v2129_v36 = vld [vmem:[#allocation11 + $0x430] sm:$0xff]  ;;  %p2109_p2 = scmp.ge.s32.totalorder %s2112_s2, 16  }
 0x65e   : > { %v6083_v60 = vpack.c.bf16 %v2136_v57, %v2132_v15  ;;  %v2140_v20 = vld [vmem:[#allocation11 + $0x488] sm:$0xff]  ;;  %6080 = vmatprep.subr.bf16.mxu0 %v6079_v50  ;;  %v6085_v26 = vpack.c.bf16 %v2135_v19, %v2131_v18  ;;  %v2139_v27 = vld [vmem:[#allocation11 + $0x480] sm:$0xff]  ;;  %v6113_v37 = vpack.c.bf16 %v2129_v36, %v2125_v35  ;;  %6112 = vmatprep.subr.bf16.mxu1 %v6111_v34  ;;  %v2134_v16 = vld [vmem:[#allocation11 + $0x458] sm:$0xff]  ;;  %s8230_s28 = smov (%p2109_p2), 0  }
 0x65f   : > { %v2144_v25 = vld [vmem:[#allocation11 + $0x4a8] sm:$0xff]  ;;  %6082 = vmatpush1.bf16.msra.mxu0 %v6081_v59  ;;  %v2143_v28 = vld [vmem:[#allocation11 + $0x4a0] sm:$0xff]  ;;  %v2138_v39 = vld [vmem:[#allocation11 + $0x478] sm:$0xff] }
 0x660   : > { %6084 = vmatprep.subr.bf16.mxu0 %v6083_v60  ;;  %v6087_v29 = vpack.c.bf16 %v2144_v25, %v2140_v20  ;;  %v2148_v30 = vld [vmem:[#allocation11 + $0x4c8] sm:$0xff]  ;;  %v6089_v38 = vpack.c.bf16 %v2143_v28, %v2139_v27  ;;  %v2133_v43 = vld [vmem:[#allocation11 + $0x450] sm:$0xff]  ;;  %v2147_v41 = vld [vmem:[#allocation11 + $0x4c0] sm:$0xff]  ;;  %6114 = vmatpush1.bf16.msra.mxu1 %v6113_v37  ;;  %v6115_v22 = vpack.c.bf16 %v2138_v39, %v2134_v16 }
 0x661   : > { %v2152_v33 = vld [vmem:[#allocation11 + $0x4e8] sm:$0xff]  ;;  %v2151_v21 = vld [vmem:[#allocation11 + $0x4e0] sm:$0xff]  ;;  %v2137_v23 = vld [vmem:[#allocation11 + $0x470] sm:$0xff] }
 0x662   : > { %v6091_v40 = vpack.c.bf16 %v2152_v33, %v2148_v30  ;;  %v2156_v24 = vld [vmem:[#allocation11 + $0x508] sm:$0xff]  ;;  %v6117_v45 = vpack.c.bf16 %v2137_v23, %v2133_v43  ;;  %v2142_v46 = vld [vmem:[#allocation11 + $0x498] sm:$0xff]  ;;  %6116 = vmatprep.subr.bf16.mxu1 %v6115_v22  ;;  %v2141_v53 = vld [vmem:[#allocation11 + $0x490] sm:$0xff]  ;;  %v6093_v62 = vpack.c.bf16 %v2151_v21, %v2147_v41 }
 0x663   : > { %6086 = vmatpush1.bf16.msra.mxu0 %v6085_v26  ;;  %v2160_v44 = vld [vmem:[#allocation11 + $0x528] sm:$0xff]  ;;  %v2146_v51 = vld [vmem:[#allocation11 + $0x4b8] sm:$0xff]  ;;  %v2145_v61 = vld [vmem:[#allocation11 + $0x4b0] sm:$0xff] }
 0x664   : > { %6088 = vmatprep.subr.bf16.mxu0 %v6087_v29  ;;  %v2155_v63 = vld [vmem:[#allocation11 + $0x500] sm:$0xff]  ;;  %v6119_v2 = vpack.c.bf16 %v2146_v51, %v2142_v46  ;;  %v6095_v3 = vpack.c.bf16 %v2160_v44, %v2156_v24  ;;  %6118 = vmatpush1.bf16.msra.mxu1 %v6117_v45  ;;  %v2164_v4 = vld [vmem:[#allocation11 + $0x548] sm:$0xff]  ;;  %v6121_v5 = vpack.c.bf16 %v2145_v61, %v2141_v53  ;;  %v2150_v6 = vld [vmem:[#allocation11 + $0x4d8] sm:$0xff] }
 0x665   : > { %v2159_v1 = vld [vmem:[#allocation11 + $0x520] sm:$0xff]  ;;  %v2154_v7 = vld [vmem:[#allocation11 + $0x4f8] sm:$0xff]  ;;  %v2168_v8 = vld [vmem:[#allocation11 + $0x568] sm:$0xff] }
 0x666   : > { %6120 = vmatprep.subr.bf16.mxu1 %v6119_v2  ;;  %v6123_v9 = vpack.c.bf16 %v2154_v7, %v2150_v6  ;;  %v2149_v42 = vld [vmem:[#allocation11 + $0x4d0] sm:$0xff]  ;;  %v6097_v11 = vpack.c.bf16 %v2159_v1, %v2155_v63  ;;  %v2158_v12 = vld [vmem:[#allocation11 + $0x518] sm:$0xff]  ;;  %v6099_v48 = vpack.c.bf16 %v2168_v8, %v2164_v4  ;;  %v2163_v49 = vld [vmem:[#allocation11 + $0x540] sm:$0xff] }
 0x667   : > { %6090 = vmatpush1.bf16.msra.mxu0 %v6089_v38  ;;  %v2153_v10 = vld [vmem:[#allocation11 + $0x4f0] sm:$0xff]  ;;  %v2162_v47 = vld [vmem:[#allocation11 + $0x538] sm:$0xff]  ;;  %v2167_v50 = vld [vmem:[#allocation11 + $0x560] sm:$0xff] }
 0x668   : > { %6092 = vmatprep.subr.bf16.mxu0 %v6091_v40  ;;  %6122 = vmatpush1.bf16.msra.mxu1 %v6121_v5  ;;  %v2172_v14 = vld [vmem:[#allocation11 + $0x588] sm:$0xff]  ;;  %v6125_v15 = vpack.c.bf16 %v2153_v10, %v2149_v42  ;;  %v6127_v58 = vpack.c.bf16 %v2162_v47, %v2158_v12  ;;  %v2157_v59 = vld [vmem:[#allocation11 + $0x510] sm:$0xff]  ;;  %v2166_v18 = vld [vmem:[#allocation11 + $0x558] sm:$0xff]  ;;  %v6101_v20 = vpack.c.bf16 %v2167_v50, %v2163_v49 }
 0x669   : > { %v2176_v57 = vld [vmem:[#allocation11 + $0x5a8] sm:$0xff]  ;;  %6124 = vmatprep.subr.bf16.mxu1 %v6123_v9  ;;  %v2161_v60 = vld [vmem:[#allocation11 + $0x530] sm:$0xff]  ;;  %v2170_v19 = vld [vmem:[#allocation11 + $0x578] sm:$0xff] }
 0x66a   : > { %v6103_v25 = vpack.c.bf16 %v2176_v57, %v2172_v14  ;;  %v2171_v26 = vld [vmem:[#allocation11 + $0x580] sm:$0xff]  ;;  %v2180_v28 = vld [vmem:[#allocation11 + $0x5c8] sm:$0xff]  ;;  %v6129_v29 = vpack.c.bf16 %v2161_v60, %v2157_v59  ;;  %v6131_v31 = vpack.c.bf16 %v2170_v19, %v2166_v18  ;;  %v2165_v32 = vld [vmem:[#allocation11 + $0x550] sm:$0xff] }
 0x66b   : > { %6094 = vmatpush1.bf16.msra.mxu0 %v6093_v62  ;;  %v2175_v27 = vld [vmem:[#allocation11 + $0x5a0] sm:$0xff]  ;;  %v2184_v30 = vld [vmem:[#allocation11 + $0x5e8] sm:$0xff]  ;;  %v2169_v33 = vld [vmem:[#allocation11 + $0x570] sm:$0xff] }
 0x66c   : > { %6096 = vmatprep.subr.bf16.mxu0 %v6095_v3  ;;  %6126 = vmatpush1.bf16.msra.mxu1 %v6125_v15  ;;  %v2174_v34 = vld [vmem:[#allocation11 + $0x598] sm:$0xff]  ;;  %v6105_v36 = vpack.c.bf16 %v2175_v27, %v2171_v26  ;;  %v6107_v37 = vpack.c.bf16 %v2184_v30, %v2180_v28  ;;  %v2179_v38 = vld [vmem:[#allocation11 + $0x5c0] sm:$0xff]  ;;  %v6133_v39 = vpack.c.bf16 %v2169_v33, %v2165_v32  ;;  %v2173_v40 = vld [vmem:[#allocation11 + $0x590] sm:$0xff] }
 0x66d   : > { %6128 = vmatprep.subr.bf16.mxu1 %v6127_v58  ;;  %v2178_v35 = vld [vmem:[#allocation11 + $0x5b8] sm:$0xff]  ;;  %v2183_v16 = vld [vmem:[#allocation11 + $0x5e0] sm:$0xff]  ;;  %v2177_v41 = vld [vmem:[#allocation11 + $0x5b0] sm:$0xff] }
 0x66e   : > { %v6135_v43 = vpack.c.bf16 %v2178_v35, %v2174_v34  ;;  %v2182_v21 = vld [vmem:[#allocation11 + $0x5d8] sm:$0xff]  ;;  %v6109_v23 = vpack.c.bf16 %v2183_v16, %v2179_v38  ;;  %v6137_v24 = vpack.c.bf16 %v2177_v41, %v2173_v40  ;;  %v2181_v45 = vld [vmem:[#allocation11 + $0x5d0] sm:$0xff]  ;;  %v2118_v53 = vld [vmem:[%s2117_s23] sm:$0xff] }
 0x66f   : > { %6098 = vmatpush1.bf16.msra.mxu0 %v6097_v11  ;;  %v2186_v22 = vld [vmem:[#allocation11 + $0x5f8] sm:$0xff]  ;;  %v2185_v46 = vld [vmem:[#allocation11 + $0x5f0] sm:$0xff]  ;;  %v2119_v61 = vld [vmem:[%s2117_s23 + $0x8] sm:$0xff] }
 0x670   : > { %6100 = vmatprep.subr.bf16.mxu0 %v6099_v48  ;;  %6130 = vmatpush1.bf16.msra.mxu1 %v6129_v29  ;;  %v6139_v44 = vpack.c.bf16 %v2186_v22, %v2182_v21  ;;  %v6141_v51 = vpack.c.bf16 %v2185_v46, %v2181_v45  ;;  %v2120_v5 = vld [vmem:[%s2117_s23 + $0x10] sm:$0xff]  ;;  %v2121_v9 = vld [vmem:[%s2117_s23 + $0x18] sm:$0xff]  ;;  %v2381_v29 = vld [vmem:[#allocation10 + $0x600] sm:$0xff] (%p2109_p2) }
 0x671   : > { %6132 = vmatprep.subr.bf16.mxu1 %v6131_v31  ;;  %v2384_v26 = vld [vmem:[#allocation10 + $0x618] sm:$0xff] (%p2109_p2)  ;;  %v2385_v30 = vld [vmem:[#allocation10 + $0x620] sm:$0xff] (%p2109_p2)  ;;  %v2383_v33 = vld [vmem:[#allocation10 + $0x610] sm:$0xff] (%p2109_p2) }
 0x672   :  { %v2388_v28 = vld [vmem:[#allocation10 + $0x638] sm:$0xff] (%p2109_p2)  ;;  %v6145_v32 = vpack.c.bf16 (%p2109_p2), %v2385_v30, %v2381_v29  ;;  %v2387_v34 = vld [vmem:[#allocation10 + $0x630] sm:$0xff] (%p2109_p2)  ;;  %v2390_v35 = vld [vmem:[#allocation10 + $0x648] sm:$0xff] (%p2109_p2) }
 0x673   : > { %6102 = vmatpush1.bf16.msra.mxu0 %v6101_v20  ;;  %v2382_v20 = vld [vmem:[#allocation10 + $0x608] sm:$0xff] (%p2109_p2)  ;;  %v6175_v31 = vpack.c.bf16 (%p2109_p2), %v2388_v28, %v2384_v26  ;;  %v2396_v38 = vld [vmem:[#allocation10 + $0x678] sm:$0xff] (%p2109_p2)  ;;  %v2393_v40 = vld [vmem:[#allocation10 + $0x660] sm:$0xff] (%p2109_p2) }
 0x674   : > { %6104 = vmatprep.subr.bf16.mxu0 %v6103_v25  ;;  %6134 = vmatpush1.bf16.msra.mxu1 %v6133_v39  ;;  %v2386_v25 = vld [vmem:[#allocation10 + $0x628] sm:$0xff] (%p2109_p2)  ;;  %v2391_v41 = vld [vmem:[#allocation10 + $0x650] sm:$0xff] (%p2109_p2)  ;;  %v2400_v46 = vld [vmem:[#allocation10 + $0x698] sm:$0xff] (%p2109_p2) }
 0x675   : > { %6136 = vmatprep.subr.bf16.mxu1 %v6135_v43  ;;  %v6143_v27 = vpack.c.bf16 (%p2109_p2), %v2386_v25, %v2382_v20  ;;  %v2389_v43 = vld [vmem:[#allocation10 + $0x640] sm:$0xff] (%p2109_p2)  ;;  %v2395_v22 = vld [vmem:[#allocation10 + $0x670] sm:$0xff] (%p2109_p2)  ;;  %v2426_v20 = vld [vmem:[#allocation10 + $0x768] sm:$0xff] (%p2109_p2) }
 0x676   :  { %v6149_v21 = vpack.c.bf16 (%p2109_p2), %v2393_v40, %v2389_v43  ;;  %v2424_v25 = vld [vmem:[#allocation10 + $0x758] sm:$0xff] (%p2109_p2)  ;;  %v2421_v30 = vld [vmem:[#allocation10 + $0x740] sm:$0xff] (%p2109_p2) }
 0x677   : > { %6106 = vmatpush1.bf16.msra.mxu0 %v6105_v36  ;;  %v6177_v36 = vpack.c.bf16 (%p2109_p2), %v2387_v34, %v2383_v33  ;;  %v2428_v26 = vld [vmem:[#allocation10 + $0x778] sm:$0xff] (%p2109_p2)  ;;  %v2427_v34 = vld [vmem:[#allocation10 + $0x770] sm:$0xff] (%p2109_p2)  ;;  %v2429_v43 = vld [vmem:[#allocation10 + $0x780] sm:$0xff] (%p2109_p2) }
 0x678   : > { %6108 = vmatprep.subr.bf16.mxu0 %v6107_v37  ;;  %6138 = vmatpush1.bf16.msra.mxu1 %v6137_v24  ;;  %v2392_v37 = vld [vmem:[#allocation10 + $0x658] sm:$0xff] (%p2109_p2)  ;;  %v2402_v24 = vld [vmem:[#allocation10 + $0x6a8] sm:$0xff] (%p2109_p2)  ;;  %v6195_v33 = vpack.c.bf16 (%p2109_p2), %v2428_v26, %v2424_v25  ;;  %v2433_v40 = vld [vmem:[#allocation10 + $0x7a0] sm:$0xff] (%p2109_p2) }
 0x679   : > { %6140 = vmatprep.subr.bf16.mxu1 %v6139_v44  ;;  %v6179_v39 = vpack.c.bf16 (%p2109_p2), %v2396_v38, %v2392_v37  ;;  %v6181_v44 = vpack.c.bf16 (%p2109_p2), %v2395_v22, %v2391_v41  ;;  %v2436_v37 = vld [vmem:[#allocation10 + $0x7b8] sm:$0xff] (%p2109_p2)  ;;  %v2431_v41 = vld [vmem:[#allocation10 + $0x790] sm:$0xff] (%p2109_p2) }
 0x67a   :  { %v2435_v22 = vld [vmem:[#allocation10 + $0x7b0] sm:$0xff] (%p2109_p2) }
 0x67b   : > { %6110 = vmatpush1.bf16.msra.mxu0 %v6109_v23  ;;  %v2398_v23 = vld [vmem:[#allocation10 + $0x688] sm:$0xff] (%p2109_p2) }
 0x67c   : > { %6142 = vmatpush1.bf16.msra.mxu1 %v6141_v51  ;;  %6144 = vmatprep.subr.bf16.mxu0 (%p2109_p2), %v6143_v27  ;;  %v6151_v45 = vpack.c.bf16 (%p2109_p2), %v2402_v24, %v2398_v23  ;;  %v2404_v51 = vld [vmem:[#allocation10 + $0x6b8] sm:$0xff] (%p2109_p2)  ;;  %v2438_v23 = vld [vmem:[#allocation10 + $0x7c8] sm:$0xff] (%p2109_p2) }
 0x67d   :  { %6176 = vmatprep.subr.bf16.mxu1 (%p2109_p2), %v6175_v31  ;;  %v2425_v31 = vld [vmem:[#allocation10 + $0x760] sm:$0xff] (%p2109_p2)  ;;  %v2442_v24 = vld [vmem:[#allocation10 + $0x7e8] sm:$0xff] (%p2109_p2) }
 0x67e   : > { %2252 = vmatmul.mubr.f32.vlgmr.msra.gmra.mrb[0].mxu0 %v7463_v17  ;;  %v6165_v38 = vpack.c.bf16 (%p2109_p2), %v2425_v31, %v2421_v30 }
 0x67f   : > { %2323 = vmatmul.mubr.f32.vlgmr.msra.gmra.mrb[0].mxu1 %v7463_v17  ;;  %2532 = vmatprep.mubr.f32.mxu0 (%p2109_p2), %v7542_v0 }
 0x680   :  { %2693 = vmatprep.mubr.f32.mxu1 (%p2109_p2), %v7542_v0  ;;  %6146 = vmatpush1.bf16.msra.mxu0 (%p2109_p2), %v6145_v32  ;;  %v2423_v32 = vld [vmem:[#allocation10 + $0x750] sm:$0xff] (%p2109_p2) }
 0x681   :  { %6178 = vmatpush1.bf16.msra.mxu1 (%p2109_p2), %v6177_v36  ;;  %v2434_v36 = vld [vmem:[#allocation10 + $0x7a8] sm:$0xff] (%p2109_p2) }
 0x682   :  { %6180 = vmatprep.subr.bf16.mxu1 (%p2109_p2), %v6179_v39 }
 0x685   :  { %6182 = vmatpush1.bf16.msra.mxu1 (%p2109_p2), %v6181_v44  ;;  %v2440_v44 = vld [vmem:[#allocation10 + $0x7d8] sm:$0xff] (%p2109_p2) }
 0x751   : > { %v2253_v62 = vpop.f32.mrb[0].mxu0 }
 0x752   : > { %v2329_v63 = vadd.f32 %v2253_v62, %v2118_v53  ;;  %v2255_v1 = vpop.f32.mrb[1].mxu0  ;;  %v2324_v6 = vpop.f32.mrb[0].mxu1  ;;  %v2397_v53 = vld [vmem:[#allocation10 + $0x680] sm:$0xff] (%p2109_p2) }
 0x753   : > { %v2330_v2 = vadd.f32 %v2255_v1, %v2119_v61  ;;  %v2326_v7 = vpop.f32.mrb[1].mxu1  ;;  %v2331_v8 = vadd.f32 %v2324_v6, %v2120_v5  ;;  %v6183_v61 = vpack.c.bf16 (%p2109_p2), %v2404_v51, %v2400_v46  ;;  %v2401_v62 = vld [vmem:[#allocation10 + $0x6a0] sm:$0xff] (%p2109_p2)  ;;  %v2403_v1 = vld [vmem:[#allocation10 + $0x6b0] sm:$0xff] (%p2109_p2)  ;;  %v2408_v5 = vld [vmem:[#allocation10 + $0x6d8] sm:$0xff] (%p2109_p2)  ;;  %v6169_v46 = vpack.c.bf16 (%p2109_p2), %v2433_v40, %v2429_v43 }
 0x754   : > { %v5714_v3 = vmul.f32 -1.442695, %v2329_v63  ;;  %v2332_v10 = vadd.f32 %v2326_v7, %v2121_v9  ;;  %v2399_v63 = vld [vmem:[#allocation10 + $0x690] sm:$0xff] (%p2109_p2)  ;;  %v2405_v9 = vld [vmem:[#allocation10 + $0x6c0] sm:$0xff] (%p2109_p2)  ;;  %v6201_v51 = vpack.c.bf16 (%p2109_p2), %v2435_v22, %v2431_v41 }
 0x755   : > { %v5715_v4 = vmul.f32 -1.442695, %v2330_v2  ;;  %v5716_v42 = vmul.f32 -1.442695, %v2331_v8  ;;  %v6153_v2 = vpack.c.bf16 (%p2109_p2), %v2401_v62, %v2397_v53  ;;  %v6185_v6 = vpack.c.bf16 (%p2109_p2), %v2403_v1, %v2399_v63  ;;  %v2412_v8 = vld [vmem:[#allocation10 + $0x6f8] sm:$0xff] (%p2109_p2)  ;;  %6184 = vmatprep.subr.bf16.mxu1 (%p2109_p2), %v6183_v61  ;;  %v2437_v61 = vld [vmem:[#allocation10 + $0x7c0] sm:$0xff] (%p2109_p2) }
 0x756   : > { %7031 = vpow2.f32 %v5714_v3  ;;  %v2406_v3 = vld [vmem:[#allocation10 + $0x6c8] sm:$0xff] (%p2109_p2)  ;;  %v6171_v53 = vpack.c.bf16 (%p2109_p2), %v2442_v24, %v2438_v23  ;;  %v2441_v62 = vld [vmem:[#allocation10 + $0x7e0] sm:$0xff] (%p2109_p2)  ;;  %v2439_v1 = vld [vmem:[#allocation10 + $0x7d0] sm:$0xff] (%p2109_p2) }
 0x757   : > { %7033 = vpow2.f32 %v5715_v4  ;;  %v2410_v4 = vld [vmem:[#allocation10 + $0x6e8] sm:$0xff] (%p2109_p2)  ;;  %6186 = vmatpush1.bf16.msra.mxu1 (%p2109_p2), %v6185_v6 }
 0x758   : > { %7035 = vpow2.f32 %v5716_v42  ;;  %v6155_v7 = vpack.c.bf16 (%p2109_p2), %v2410_v4, %v2406_v3  ;;  %v2409_v42 = vld [vmem:[#allocation10 + $0x6e0] sm:$0xff] (%p2109_p2)  ;;  %v6173_v3 = vpack.c.bf16 (%p2109_p2), %v2441_v62, %v2437_v61 }
 0x759   : > { %7037 = vtanh.f32 %v2332_v10  ;;  %v6187_v10 = vpack.c.bf16 (%p2109_p2), %v2412_v8, %v2408_v5 }
 0x75b   :  { %6188 = vmatprep.subr.bf16.mxu1 (%p2109_p2), %v6187_v10 }
 0x760   : > { %v7032_v17 = vpop.eup %7031 }
 0x761   : > { %v7034_v11 = vpop.eup %7033  ;;  %v2342_v12 = vadd.f32 1.0, %v7032_v17 }
 0x762   : > { %v2343_v47 = vadd.f32 1.0, %v7034_v11  ;;  %v7036_v48 = vpop.eup %7035  ;;  %v2411_v11 = vld [vmem:[#allocation10 + $0x6f0] sm:$0xff] (%p2109_p2) }
 0x763   : > { %7039 = vrcp.f32 %v2342_v12  ;;  %v7038_v49 = vpop.eup %7037  ;;  %v2344_v14 = vadd.f32 1.0, %v7036_v48  ;;  %v2414_v12 = vld [vmem:[#allocation10 + $0x708] sm:$0xff] (%p2109_p2)  ;;  %v2416_v48 = vld [vmem:[#allocation10 + $0x718] sm:$0xff] (%p2109_p2) }
 0x764   : > { %7041 = vrcp.f32 %v2343_v47  ;;  %v2418_v47 = vld [vmem:[#allocation10 + $0x728] sm:$0xff] (%p2109_p2) }
 0x765   : > { %7043 = vrcp.f32 %v2344_v14 }
 0x76d   : > { %v7040_v50 = vpop.eup %7039 }
 0x76e   : > { %v7042_v15 = vpop.eup %7041  ;;  %v2353_v57 = vmul.f32 %v7040_v50, %v7038_v49  ;;  %v2420_v49 = vld [vmem:[#allocation10 + $0x738] sm:$0xff] (%p2109_p2)  ;;  %v6157_v50 = vpack.c.bf16 (%p2109_p2), %v2409_v42, %v2405_v9 }
 0x76f   : > { %v2352_v58 = vmul.f32 %v7459_v13, %v7042_v15  ;;  %v7044_v60 = vpop.eup %7043  ;;  %v6159_v15 = vpack.c.bf16 (%p2109_p2), %v2418_v47, %v2414_v12 }
 0x771   : > { %v2354_v59 = vadd.f32 %v2353_v57, %v2352_v58   ;;  %v2413_v57 = vld [vmem:[#allocation10 + $0x700] sm:$0xff] (%p2109_p2) }
 0x772   :  { %v2417_v58 = vld [vmem:[#allocation10 + $0x720] sm:$0xff] (%p2109_p2) }
 0x773   : > { %7045 = vtanh.f32 %v2354_v59  ;;  %v8688_v13 = vmov %v2354_v59  ;;  %2363 = vst [vmem:[#allocation3 + $0x10] sm:$0xff] (%p2109_p2), %v2354_v59  ;;  %v2415_v59 = vld [vmem:[#allocation10 + $0x710] sm:$0xff] (%p2109_p2)  ;;  %v6161_v27 = vpack.c.bf16 (%p2109_p2), %v2417_v58, %v2413_v57  ;;  %v2446_v57 = vld [vmem:[#allocation13 + $0xc] sm:$0xf] (%p2109_p2) }
 0x774   :  { %v2394_v13 = vld [vmem:[#allocation10 + $0x668] sm:$0xff] (%p2109_p2)  ;;  %v8151_v58 = vrot.slane (%p2109_p2), %v2446_v57, %v7737_v52 }
 0x775   :  { %v6147_v16 = vpack.c.bf16 (%p2109_p2), %v2394_v13, %v2390_v35  ;;  %v2430_v35 = vld [vmem:[#allocation10 + $0x788] sm:$0xff] (%p2109_p2)  ;;  %v2432_v13 = vld [vmem:[#allocation10 + $0x798] sm:$0xff] (%p2109_p2) }
 0x776   :  { %v6167_v39 = vpack.c.bf16 (%p2109_p2), %v2434_v36, %v2430_v35 }
 0x777   :  { %6148 = vmatprep.subr.bf16.mxu0 (%p2109_p2), %v6147_v16  ;;  %v6197_v16 = vpack.c.bf16 (%p2109_p2), %v2427_v34, %v2423_v32 }
 0x778   :  { %6150 = vmatpush1.bf16.msra.mxu0 (%p2109_p2), %v6149_v21  ;;  %v6199_v21 = vpack.c.bf16 (%p2109_p2), %v2436_v37, %v2432_v13 }
 0x779   :  { %6152 = vmatprep.subr.bf16.mxu0 (%p2109_p2), %v6151_v45  ;;  %v2444_v45 = vld [vmem:[#allocation10 + $0x7f8] sm:$0xff] (%p2109_p2) }
 0x77a   :  { %2111 = sbr.rel (!%p2109_p2) target bundleno = 1626 (0x65a), region = 206  ;;  %v6203_v63 = vpack.c.bf16 (%p2109_p2), %v2444_v45, %v2440_v44 }
 0x77c   :  { %6154 = vmatpush1.bf16.msra.mxu0 (%p2109_p2), %v6153_v2  ;;  %v2443_v2 = vld [vmem:[#allocation10 + $0x7f0] sm:$0xff] (%p2109_p2) }
 0x77d   : > { %v7046_v18 = vpop.eup %7045  ;;  %6156 = vmatprep.subr.bf16.mxu0 (%p2109_p2), %v6155_v7  ;;  %v6205_v4 = vpack.c.bf16 (%p2109_p2), %v2443_v2, %v2439_v1 }
 0x77e   : > { %v2356_v19 = vmul.f32 %v7046_v18, %v7044_v60   ;;  %v6191_v60 = vpack.c.bf16 (%p2109_p2), %v2420_v49, %v2416_v48  ;;  %v2419_v18 = vld [vmem:[#allocation10 + $0x730] sm:$0xff] (%p2109_p2) }
 0x77f   :  { %v6193_v28 = vpack.c.bf16 (%p2109_p2), %v2419_v18, %v2415_v59  ;;  %v8154_v59 = vrot.slane (%p2109_p2), %v2446_v57, %v7739_v54  ;;  %v8160_v18 = vrot.slane (%p2109_p2), %v2446_v57, %v7743_v56 }
 0x780   : > { %2359 = vst [vmem:[%s2358_s27] sm:$0xff] %v2356_v19  ;;  %v8689_v17 = vmov %v2356_v19  ;;  %2361 = vst [vmem:[#allocation2 + $0x10] sm:$0xff] (%p2109_p2), %v2356_v19  ;;  %v2422_v19 = vld [vmem:[#allocation10 + $0x748] sm:$0xff] (%p2109_p2)  ;;  %6158 = vmatpush1.bf16.msra.mxu0 (%p2109_p2), %v6157_v50 }
 0x781   :  { %v2407_v17 = vld [vmem:[#allocation10 + $0x6d0] sm:$0xff]  ;;  %6160 = vmatprep.subr.bf16.mxu0 %v6159_v15  ;;  %v6163_v29 = vpack.c.bf16 %v2426_v20, %v2422_v19 }
 0x782   :  { %v6189_v14 = vpack.c.bf16 %v2411_v11, %v2407_v17 }
 0x784   :  { %6190 = vmatpush1.bf16.msra.mxu1 %v6189_v14  ;;  %6162 = vmatpush1.bf16.msra.mxu0 %v6161_v27 }
 0x785   :  { %6192 = vmatprep.subr.bf16.mxu1 %v6191_v60  ;;  %6164 = vmatprep.subr.bf16.mxu0 %v6163_v29  ;;  %v8157_v60 = vrot.slane %v2446_v57, %v7741_v55 }
 0x787   :  { %v2364_v5 = vld [vmem:[#allocation17] sm:$0xff]  ;;  %v2365_v6 = vld [vmem:[#allocation17 + $0x8] sm:$0xff]  ;;  %v2366_v7 = vld [vmem:[#allocation17 + $0x10] sm:$0xff] }
 0x788   :  { %6194 = vmatpush1.bf16.msra.mxu1 %v6193_v28  ;;  %6166 = vmatpush1.bf16.msra.mxu0 %v6165_v38  ;;  %v2367_v8 = vld [vmem:[#allocation17 + $0x18] sm:$0xff]  ;;  %v2368_v9 = vld [vmem:[#allocation17 + $0x20] sm:$0xff]  ;;  %v2369_v42 = vld [vmem:[#allocation17 + $0x28] sm:$0xff] }
 0x789   :  { %6196 = vmatprep.subr.bf16.mxu1 %v6195_v33  ;;  %6168 = vmatprep.subr.bf16.mxu0 %v6167_v39  ;;  %v2370_v10 = vld [vmem:[#allocation17 + $0x30] sm:$0xff]  ;;  %v2371_v17 = vld [vmem:[#allocation17 + $0x38] sm:$0xff]  ;;  %v2372_v11 = vld [vmem:[#allocation17 + $0x40] sm:$0xff] }
 0x78a   :  { %v2373_v12 = vld [vmem:[#allocation17 + $0x48] sm:$0xff]  ;;  %v2374_v47 = vld [vmem:[#allocation17 + $0x50] sm:$0xff]  ;;  %v2375_v48 = vld [vmem:[#allocation17 + $0x58] sm:$0xff] }
 0x78b   :  { %v2376_v49 = vld [vmem:[#allocation17 + $0x60] sm:$0xff]  ;;  %v2377_v50 = vld [vmem:[#allocation17 + $0x68] sm:$0xff]  ;;  %v2378_v14 = vld [vmem:[#allocation17 + $0x70] sm:$0xff] }
 0x78c   :  { %6198 = vmatpush1.bf16.msra.mxu1 %v6197_v16  ;;  %6170 = vmatpush1.bf16.msra.mxu0 %v6169_v46  ;;  %v2379_v15 = vld [vmem:[#allocation17 + $0x78] sm:$0xff] }
 0x78d   :  { %6200 = vmatprep.subr.bf16.mxu1 %v6199_v21  ;;  %6172 = vmatprep.subr.bf16.mxu0 %v6171_v53 }
 0x790   :  { %6202 = vmatpush1.bf16.msra.mxu1 %v6201_v51  ;;  %6174 = vmatpush1.bf16.msra.mxu0 %v6173_v3 }
 0x791   :  { %6204 = vmatprep.subr.bf16.mxu1 %v6203_v63 }
 0x793   :  { %2533 = vmatmul.mubr.f32.vlgmr.msra.gmra.mrb[0].mxu0 %v2364_v5 }
 0x794   :  { %6206 = vmatpush1.bf16.msra.mxu1 %v6205_v4  ;;  %2538 = vmatprep.mubr.f32.mxu0 %v7542_v0 }
 0x797   :  { %2694 = vmatmul.mubr.f32.vlgmr.msra.gmra.mrb[0].mxu1 %v2364_v5  ;;  %2539 = vmatmul.mubr.f32.gmra.mrb[2].mxu0 %v2365_v6 }
 0x798   :  { %2699 = vmatprep.mubr.f32.mxu1 %v7542_v0  ;;  %2544 = vmatprep.mubr.f32.mxu0 %v7542_v0 }
 0x79b   :  { %2700 = vmatmul.mubr.f32.gmra.mrb[2].mxu1 %v2365_v6  ;;  %2545 = vmatmul.mubr.f32.gmra.mrb[4].mxu0 %v2366_v7 }
 0x79c   :  { %2705 = vmatprep.mubr.f32.mxu1 %v7542_v0  ;;  %2550 = vmatprep.mubr.f32.mxu0 %v7542_v0 }
 0x79f   :  { %2706 = vmatmul.mubr.f32.gmra.mrb[4].mxu1 %v2366_v7  ;;  %2551 = vmatmul.mubr.f32.gmra.mrb[6].mxu0 %v2367_v8 }
 0x7a0   :  { %2711 = vmatprep.mubr.f32.mxu1 %v7542_v0  ;;  %2556 = vmatprep.mubr.f32.mxu0 %v7542_v0 }
 0x7a3   :  { %2712 = vmatmul.mubr.f32.gmra.mrb[6].mxu1 %v2367_v8  ;;  %2557 = vmatmul.mubr.f32.gmra.mrb[8].mxu0 %v2368_v9 }
 0x7a4   :  { %2717 = vmatprep.mubr.f32.mxu1 %v7542_v0  ;;  %2562 = vmatprep.mubr.f32.mxu0 %v7542_v0 }
 0x7a7   :  { %2718 = vmatmul.mubr.f32.gmra.mrb[8].mxu1 %v2368_v9  ;;  %2563 = vmatmul.mubr.f32.gmra.mrb[10].mxu0 %v2369_v42 }
 0x7a8   :  { %2723 = vmatprep.mubr.f32.mxu1 %v7542_v0  ;;  %2568 = vmatprep.mubr.f32.mxu0 %v7542_v0 }
 0x7ab   :  { %2724 = vmatmul.mubr.f32.gmra.mrb[10].mxu1 %v2369_v42  ;;  %2569 = vmatmul.mubr.f32.gmra.mrb[12].mxu0 %v2370_v10 }
 0x7ac   :  { %2729 = vmatprep.mubr.f32.mxu1 %v7542_v0  ;;  %2574 = vmatprep.mubr.f32.mxu0 %v7542_v0 }
 0x7af   :  { %2730 = vmatmul.mubr.f32.gmra.mrb[12].mxu1 %v2370_v10  ;;  %2575 = vmatmul.mubr.f32.gmra.mrb[14].mxu0 %v2371_v17 }
 0x7b0   :  { %2735 = vmatprep.mubr.f32.mxu1 %v7542_v0  ;;  %2580 = vmatprep.mubr.f32.mxu0 %v7542_v0 }
 0x7b3   :  { %2736 = vmatmul.mubr.f32.gmra.mrb[14].mxu1 %v2371_v17  ;;  %2581 = vmatmul.mubr.f32.gmra.mrb[16].mxu0 %v2372_v11 }
 0x7b4   :  { %2741 = vmatprep.mubr.f32.mxu1 %v7542_v0  ;;  %2586 = vmatprep.mubr.f32.mxu0 %v7542_v0 }
 0x7b7   :  { %2742 = vmatmul.mubr.f32.gmra.mrb[16].mxu1 %v2372_v11  ;;  %2587 = vmatmul.mubr.f32.gmra.mrb[18].mxu0 %v2373_v12 }
 0x7b8   :  { %2747 = vmatprep.mubr.f32.mxu1 %v7542_v0  ;;  %2592 = vmatprep.mubr.f32.mxu0 %v7542_v0 }
 0x7bb   :  { %2748 = vmatmul.mubr.f32.gmra.mrb[18].mxu1 %v2373_v12  ;;  %2593 = vmatmul.mubr.f32.gmra.mrb[20].mxu0 %v2374_v47 }
 0x7bc   :  { %2753 = vmatprep.mubr.f32.mxu1 %v7542_v0  ;;  %2598 = vmatprep.mubr.f32.mxu0 %v7542_v0 }
 0x7bf   :  { %2754 = vmatmul.mubr.f32.gmra.mrb[20].mxu1 %v2374_v47  ;;  %2599 = vmatmul.mubr.f32.gmra.mrb[22].mxu0 %v2375_v48 }
 0x7c0   :  { %2759 = vmatprep.mubr.f32.mxu1 %v7542_v0  ;;  %2604 = vmatprep.mubr.f32.mxu0 %v7542_v0 }
 0x7c3   :  { %2760 = vmatmul.mubr.f32.gmra.mrb[22].mxu1 %v2375_v48  ;;  %2605 = vmatmul.mubr.f32.gmra.mrb[24].mxu0 %v2376_v49 }
 0x7c4   :  { %2765 = vmatprep.mubr.f32.mxu1 %v7542_v0  ;;  %2610 = vmatprep.mubr.f32.mxu0 %v7542_v0 }
 0x7c7   :  { %2766 = vmatmul.mubr.f32.gmra.mrb[24].mxu1 %v2376_v49  ;;  %2611 = vmatmul.mubr.f32.gmra.mrb[26].mxu0 %v2377_v50 }
 0x7c8   :  { %2771 = vmatprep.mubr.f32.mxu1 %v7542_v0  ;;  %2616 = vmatprep.mubr.f32.mxu0 %v7542_v0 }
 0x7cb   :  { %2772 = vmatmul.mubr.f32.gmra.mrb[26].mxu1 %v2377_v50  ;;  %2617 = vmatmul.mubr.f32.gmra.mrb[28].mxu0 %v2378_v14 }
 0x7cc   :  { %2777 = vmatprep.mubr.f32.mxu1 %v7542_v0  ;;  %2622 = vmatprep.mubr.f32.mxu0 %v7542_v0 }
 0x7cf   :  { %2778 = vmatmul.mubr.f32.gmra.mrb[28].mxu1 %v2378_v14  ;;  %2623 = vmatmul.mubr.f32.gmra.mrb[30].mxu0 %v2379_v15 }
 0x7d0   :  { %2783 = vmatprep.mubr.f32.mxu1 %v7542_v0 }
 0x7d3   :  { %2784 = vmatmul.mubr.f32.gmra.mrb[30].mxu1 %v2379_v15 }
 0x866   :  { %v2534_v19 = vpop.f32.mrb[0].mxu0 }
 0x867   :  { %v2535_v20 = vadd.f32 %v2534_v19, %v8151_v58  ;;  %v2536_v26 = vpop.f32.mrb[1].mxu0 }
 0x868   :  { %v2537_v28 = vadd.f32 %v2536_v26, %v8157_v60 }
 0x869   :  { %2790 = vst [vmem:[#allocation4] sm:$0xff] %v2535_v20 }
 0x86a   :  { %v2695_v25 = vpop.f32.mrb[0].mxu1  ;;  %2791 = vst [vmem:[#allocation4 + $0x8] sm:$0xff] %v2537_v28  ;;  %v2540_v31 = vpop.f32.mrb[2].mxu0 }
 0x86b   :  { %v2696_v27 = vadd.f32 %v2695_v25, %v8154_v59  ;;  %v2697_v29 = vpop.f32.mrb[1].mxu1  ;;  %v2541_v32 = vadd.f32 %v2540_v31, %v8151_v58  ;;  %v2542_v34 = vpop.f32.mrb[3].mxu0 }
 0x86c   :  { %v2698_v30 = vadd.f32 %v2697_v29, %v8160_v18  ;;  %v2543_v36 = vadd.f32 %v2542_v34, %v8157_v60 }
 0x86d   :  { %2792 = vst [vmem:[#allocation4 + $0x10] sm:$0xff] %v2696_v27  ;;  %2794 = vst [vmem:[#allocation4 + $0x20] sm:$0xff] %v2541_v32 }
 0x86e   :  { %2793 = vst [vmem:[#allocation4 + $0x18] sm:$0xff] %v2698_v30  ;;  %v2701_v33 = vpop.f32.mrb[2].mxu1  ;;  %2795 = vst [vmem:[#allocation4 + $0x28] sm:$0xff] %v2543_v36  ;;  %v2546_v38 = vpop.f32.mrb[4].mxu0 }
 0x86f   :  { %v2702_v35 = vadd.f32 %v2701_v33, %v8154_v59  ;;  %v2703_v13 = vpop.f32.mrb[3].mxu1  ;;  %v2547_v16 = vadd.f32 %v2546_v38, %v8151_v58  ;;  %v2548_v43 = vpop.f32.mrb[5].mxu0 }
 0x870   :  { %v2704_v37 = vadd.f32 %v2703_v13, %v8160_v18  ;;  %v2549_v41 = vadd.f32 %v2548_v43, %v8157_v60 }
 0x871   :  { %2796 = vst [vmem:[#allocation4 + $0x30] sm:$0xff] %v2702_v35  ;;  %2798 = vst [vmem:[#allocation4 + $0x40] sm:$0xff] %v2547_v16 }
 0x872   :  { %2797 = vst [vmem:[#allocation4 + $0x38] sm:$0xff] %v2704_v37  ;;  %v2707_v39 = vpop.f32.mrb[4].mxu1  ;;  %2799 = vst [vmem:[#allocation4 + $0x48] sm:$0xff] %v2549_v41  ;;  %v2552_v23 = vpop.f32.mrb[6].mxu0 }
 0x873   :  { %v2708_v40 = vadd.f32 %v2707_v39, %v8154_v59  ;;  %v2709_v21 = vpop.f32.mrb[5].mxu1  ;;  %v2553_v24 = vadd.f32 %v2552_v23, %v8151_v58  ;;  %v2554_v45 = vpop.f32.mrb[7].mxu0 }
 0x874   :  { %v2710_v22 = vadd.f32 %v2709_v21, %v8160_v18  ;;  %v2555_v51 = vadd.f32 %v2554_v45, %v8157_v60 }
 0x875   :  { %2800 = vst [vmem:[#allocation4 + $0x50] sm:$0xff] %v2708_v40  ;;  %2802 = vst [vmem:[#allocation4 + $0x60] sm:$0xff] %v2553_v24 }
 0x876   :  { %2801 = vst [vmem:[#allocation4 + $0x58] sm:$0xff] %v2710_v22  ;;  %v2713_v44 = vpop.f32.mrb[6].mxu1  ;;  %2803 = vst [vmem:[#allocation4 + $0x68] sm:$0xff] %v2555_v51  ;;  %v2558_v62 = vpop.f32.mrb[8].mxu0 }
 0x877   :  { %v2714_v46 = vadd.f32 %v2713_v44, %v8154_v59  ;;  %v2715_v53 = vpop.f32.mrb[7].mxu1  ;;  %v2559_v63 = vadd.f32 %v2558_v62, %v8151_v58  ;;  %v2560_v2 = vpop.f32.mrb[9].mxu0 }
 0x878   :  { %v2716_v61 = vadd.f32 %v2715_v53, %v8160_v18  ;;  %v2561_v4 = vadd.f32 %v2560_v2, %v8157_v60 }
 0x879   :  { %2804 = vst [vmem:[#allocation4 + $0x70] sm:$0xff] %v2714_v46  ;;  %2806 = vst [vmem:[#allocation4 + $0x80] sm:$0xff] %v2559_v63 }
 0x87a   :  { %2805 = vst [vmem:[#allocation4 + $0x78] sm:$0xff] %v2716_v61  ;;  %v2719_v1 = vpop.f32.mrb[8].mxu1  ;;  %2807 = vst [vmem:[#allocation4 + $0x88] sm:$0xff] %v2561_v4  ;;  %v2564_v7 = vpop.f32.mrb[10].mxu0 }
 0x87b   :  { %v2720_v3 = vadd.f32 %v2719_v1, %v8154_v59  ;;  %v2721_v5 = vpop.f32.mrb[9].mxu1  ;;  %v2565_v8 = vadd.f32 %v2564_v7, %v8151_v58  ;;  %v2566_v42 = vpop.f32.mrb[11].mxu0 }
 0x87c   :  { %v2722_v6 = vadd.f32 %v2721_v5, %v8160_v18  ;;  %v2567_v17 = vadd.f32 %v2566_v42, %v8157_v60 }
 0x87d   :  { %2808 = vst [vmem:[#allocation4 + $0x90] sm:$0xff] %v2720_v3  ;;  %2810 = vst [vmem:[#allocation4 + $0xa0] sm:$0xff] %v2565_v8 }
 0x87e   :  { %2809 = vst [vmem:[#allocation4 + $0x98] sm:$0xff] %v2722_v6  ;;  %v2725_v9 = vpop.f32.mrb[10].mxu1  ;;  %2811 = vst [vmem:[#allocation4 + $0xa8] sm:$0xff] %v2567_v17  ;;  %v2570_v47 = vpop.f32.mrb[12].mxu0 }
 0x87f   :  { %v2726_v10 = vadd.f32 %v2725_v9, %v8154_v59  ;;  %v2727_v11 = vpop.f32.mrb[11].mxu1  ;;  %v2571_v48 = vadd.f32 %v2570_v47, %v8151_v58  ;;  %v2572_v50 = vpop.f32.mrb[13].mxu0 }
 0x880   :  { %v2728_v12 = vadd.f32 %v2727_v11, %v8160_v18  ;;  %v2573_v15 = vadd.f32 %v2572_v50, %v8157_v60 }
 0x881   :  { %2812 = vst [vmem:[#allocation4 + $0xb0] sm:$0xff] %v2726_v10  ;;  %2814 = vst [vmem:[#allocation4 + $0xc0] sm:$0xff] %v2571_v48 }
 0x882   :  { %2813 = vst [vmem:[#allocation4 + $0xb8] sm:$0xff] %v2728_v12  ;;  %v2731_v49 = vpop.f32.mrb[12].mxu1  ;;  %2815 = vst [vmem:[#allocation4 + $0xc8] sm:$0xff] %v2573_v15  ;;  %v2576_v20 = vpop.f32.mrb[14].mxu0 }
 0x883   :  { %v2732_v14 = vadd.f32 %v2731_v49, %v8154_v59  ;;  %v2733_v57 = vpop.f32.mrb[13].mxu1  ;;  %v2577_v25 = vadd.f32 %v2576_v20, %v8151_v58  ;;  %v2578_v27 = vpop.f32.mrb[15].mxu0 }
 0x884   :  { %v2734_v19 = vadd.f32 %v2733_v57, %v8160_v18  ;;  %v2579_v29 = vadd.f32 %v2578_v27, %v8157_v60 }
 0x885   :  { %2816 = vst [vmem:[#allocation4 + $0xd0] sm:$0xff] %v2732_v14  ;;  %2818 = vst [vmem:[#allocation4 + $0xe0] sm:$0xff] %v2577_v25 }
 0x886   :  { %2817 = vst [vmem:[#allocation4 + $0xd8] sm:$0xff] %v2734_v19  ;;  %v2737_v26 = vpop.f32.mrb[14].mxu1  ;;  %2819 = vst [vmem:[#allocation4 + $0xe8] sm:$0xff] %v2579_v29  ;;  %v2582_v32 = vpop.f32.mrb[16].mxu0 }
 0x887   :  { %v2738_v28 = vadd.f32 %v2737_v26, %v8154_v59  ;;  %v2739_v30 = vpop.f32.mrb[15].mxu1  ;;  %v2583_v33 = vadd.f32 %v2582_v32, %v8151_v58  ;;  %v2584_v35 = vpop.f32.mrb[17].mxu0 }
 0x888   :  { %v2740_v31 = vadd.f32 %v2739_v30, %v8160_v18  ;;  %v2585_v13 = vadd.f32 %v2584_v35, %v8157_v60 }
 0x889   :  { %2820 = vst [vmem:[#allocation4 + $0xf0] sm:$0xff] %v2738_v28  ;;  %2822 = vst [vmem:[#allocation4 + $0x100] sm:$0xff] %v2583_v33 }
 0x88a   :  { %2821 = vst [vmem:[#allocation4 + $0xf8] sm:$0xff] %v2740_v31  ;;  %v2743_v34 = vpop.f32.mrb[16].mxu1  ;;  %2823 = vst [vmem:[#allocation4 + $0x108] sm:$0xff] %v2585_v13  ;;  %v2588_v16 = vpop.f32.mrb[18].mxu0 }
 0x88b   :  { %v2744_v36 = vadd.f32 %v2743_v34, %v8154_v59  ;;  %v2745_v37 = vpop.f32.mrb[17].mxu1  ;;  %v2589_v39 = vadd.f32 %v2588_v16, %v8151_v58  ;;  %v2590_v40 = vpop.f32.mrb[19].mxu0 }
 0x88c   :  { %v2746_v38 = vadd.f32 %v2745_v37, %v8160_v18  ;;  %v2591_v21 = vadd.f32 %v2590_v40, %v8157_v60 }
 0x88d   :  { %2824 = vst [vmem:[#allocation4 + $0x110] sm:$0xff] %v2744_v36  ;;  %2826 = vst [vmem:[#allocation4 + $0x120] sm:$0xff] %v2589_v39  ;;  %v8226_v39 = vmov 0.0  }
 0x88e   :  { %2825 = vst [vmem:[#allocation4 + $0x118] sm:$0xff] %v2746_v38  ;;  %v2749_v43 = vpop.f32.mrb[18].mxu1  ;;  %2827 = vst [vmem:[#allocation4 + $0x128] sm:$0xff] %v2591_v21  ;;  %v2594_v24 = vpop.f32.mrb[20].mxu0 }
 0x88f   :  { %v2750_v41 = vadd.f32 %v2749_v43, %v8154_v59  ;;  %v2751_v22 = vpop.f32.mrb[19].mxu1  ;;  %v2595_v44 = vadd.f32 %v2594_v24, %v8151_v58  ;;  %v2596_v46 = vpop.f32.mrb[21].mxu0  ;;  %v8228_v43 = vmov 0.0  }
 0x890   :  { %v2752_v23 = vadd.f32 %v2751_v22, %v8160_v18  ;;  %v2597_v53 = vadd.f32 %v2596_v46, %v8157_v60 }
 0x891   :  { %2828 = vst [vmem:[#allocation4 + $0x130] sm:$0xff] %v2750_v41  ;;  %2830 = vst [vmem:[#allocation4 + $0x140] sm:$0xff] %v2595_v44 }
 0x892   :  { %2829 = vst [vmem:[#allocation4 + $0x138] sm:$0xff] %v2752_v23  ;;  %v2755_v45 = vpop.f32.mrb[20].mxu1  ;;  %2831 = vst [vmem:[#allocation4 + $0x148] sm:$0xff] %v2597_v53  ;;  %v2600_v63 = vpop.f32.mrb[22].mxu0 }
 0x893   :  { %v2756_v51 = vadd.f32 %v2755_v45, %v8154_v59  ;;  %v2757_v61 = vpop.f32.mrb[21].mxu1  ;;  %v2601_v1 = vadd.f32 %v2600_v63, %v8151_v58  ;;  %v2602_v3 = vpop.f32.mrb[23].mxu0 }
 0x894   :  { %v2758_v62 = vadd.f32 %v2757_v61, %v8160_v18  ;;  %v2603_v5 = vadd.f32 %v2602_v3, %v8157_v60 }
 0x895   :  { %2832 = vst [vmem:[#allocation4 + $0x150] sm:$0xff] %v2756_v51  ;;  %2834 = vst [vmem:[#allocation4 + $0x160] sm:$0xff] %v2601_v1 }
 0x896   :  { %2833 = vst [vmem:[#allocation4 + $0x158] sm:$0xff] %v2758_v62  ;;  %v2761_v2 = vpop.f32.mrb[22].mxu1  ;;  %2835 = vst [vmem:[#allocation4 + $0x168] sm:$0xff] %v2603_v5  ;;  %v2606_v8 = vpop.f32.mrb[24].mxu0 }
 0x897   :  { %v2762_v4 = vadd.f32 %v2761_v2, %v8154_v59  ;;  %v2763_v6 = vpop.f32.mrb[23].mxu1  ;;  %v2607_v9 = vadd.f32 %v2606_v8, %v8151_v58  ;;  %v2608_v10 = vpop.f32.mrb[25].mxu0 }
 0x898   :  { %v2764_v7 = vadd.f32 %v2763_v6, %v8160_v18  ;;  %v2609_v11 = vadd.f32 %v2608_v10, %v8157_v60 }
 0x899   :  { %2836 = vst [vmem:[#allocation4 + $0x170] sm:$0xff] %v2762_v4  ;;  %2838 = vst [vmem:[#allocation4 + $0x180] sm:$0xff] %v2607_v9 }
 0x89a   :  { %2837 = vst [vmem:[#allocation4 + $0x178] sm:$0xff] %v2764_v7  ;;  %v2767_v42 = vpop.f32.mrb[24].mxu1  ;;  %2839 = vst [vmem:[#allocation4 + $0x188] sm:$0xff] %v2609_v11  ;;  %v2612_v48 = vpop.f32.mrb[26].mxu0 }
 0x89b   :  { %v2768_v17 = vadd.f32 %v2767_v42, %v8154_v59  ;;  %v2769_v12 = vpop.f32.mrb[25].mxu1  ;;  %v2613_v49 = vadd.f32 %v2612_v48, %v8151_v58  ;;  %v2614_v14 = vpop.f32.mrb[27].mxu0 }
 0x89c   :  { %v2770_v47 = vadd.f32 %v2769_v12, %v8160_v18  ;;  %v2615_v57 = vadd.f32 %v2614_v14, %v8157_v60 }
 0x89d   :  { %2840 = vst [vmem:[#allocation4 + $0x190] sm:$0xff] %v2768_v17  ;;  %2842 = vst [vmem:[#allocation4 + $0x1a0] sm:$0xff] %v2613_v49 }
 0x89e   :  { %2841 = vst [vmem:[#allocation4 + $0x198] sm:$0xff] %v2770_v47  ;;  %v2773_v50 = vpop.f32.mrb[26].mxu1  ;;  %2843 = vst [vmem:[#allocation4 + $0x1a8] sm:$0xff] %v2615_v57  ;;  %v2618_v25 = vpop.f32.mrb[28].mxu0 }
 0x89f   :  { %v2774_v15 = vadd.f32 %v2773_v50, %v8154_v59  ;;  %v2775_v19 = vpop.f32.mrb[27].mxu1  ;;  %v2619_v26 = vadd.f32 %v2618_v25, %v8151_v58  ;;  %v2620_v28 = vpop.f32.mrb[29].mxu0 }
 0x8a0   :  { %v2776_v20 = vadd.f32 %v2775_v19, %v8160_v18  ;;  %v2621_v30 = vadd.f32 %v2620_v28, %v8157_v60 }
 0x8a1   :  { %2844 = vst [vmem:[#allocation4 + $0x1b0] sm:$0xff] %v2774_v15  ;;  %2846 = vst [vmem:[#allocation4 + $0x1c0] sm:$0xff] %v2619_v26 }
 0x8a2   :  { %2845 = vst [vmem:[#allocation4 + $0x1b8] sm:$0xff] %v2776_v20  ;;  %v2779_v27 = vpop.f32.mrb[28].mxu1  ;;  %2847 = vst [vmem:[#allocation4 + $0x1c8] sm:$0xff] %v2621_v30  ;;  %v2624_v33 = vpop.f32.mrb[30].mxu0 }
 0x8a3   :  { %v2780_v29 = vadd.f32 %v2779_v27, %v8154_v59  ;;  %v2781_v31 = vpop.f32.mrb[29].mxu1  ;;  %v2625_v34 = vadd.f32 %v2624_v33, %v8151_v58  ;;  %v2626_v36 = vpop.f32.mrb[31].mxu0 }
 0x8a4   :  { %v2782_v32 = vadd.f32 %v2781_v31, %v8160_v18  ;;  %v2627_v37 = vadd.f32 %v2626_v36, %v8157_v60 }
 0x8a5   :  { %2848 = vst [vmem:[#allocation4 + $0x1d0] sm:$0xff] %v2780_v29  ;;  %2850 = vst [vmem:[#allocation4 + $0x1e0] sm:$0xff] %v2625_v34 }
 0x8a6   :  { %2849 = vst [vmem:[#allocation4 + $0x1d8] sm:$0xff] %v2782_v32  ;;  %v2785_v35 = vpop.f32.mrb[30].mxu1  ;;  %2851 = vst [vmem:[#allocation4 + $0x1e8] sm:$0xff] %v2627_v37 }
 0x8a7   :  { %v2786_v13 = vadd.f32 %v2785_v35, %v8154_v59  ;;  %v2787_v38 = vpop.f32.mrb[31].mxu1 }
 0x8a8   :  { %v2788_v16 = vadd.f32 %v2787_v38, %v8160_v18 }
 0x8a9   :  { %2852 = vst [vmem:[#allocation4 + $0x1f0] sm:$0xff] %v2786_v13 }
 0x8aa   :  { %2853 = vst [vmem:[#allocation4 + $0x1f8] sm:$0xff] %v2788_v16 }
 0x8ab LB: > { %v2871_v58 = vld [vmem:[#allocation11 + $0x608] sm:$0xff]  ;;  %v2870_v60 = vld [vmem:[#allocation11 + $0x600] sm:$0xff]  ;;  %v7546_v22 = vmov 0.0   ;;  %v2873_v2 = vld [vmem:[#allocation11 + $0x618] sm:$0xff]  ;;  %s5754_s3 = sshll.u32 %s7479_s28, 5  ;;  %s5723_s29 = sshll.u32 %s7479_s28, 3  ;;  %s7479_s28 = sphi %s8230_s28, %s2859_s28   ;;  %v7475_v43 = vphi %v8228_v43, %v8691_v43   ;;  %v7471_v39 = vphi %v8226_v39, %v8690_v39  }
 0x8ac   : > { %v2875_v59 = vld [vmem:[#allocation11 + $0x628] sm:$0xff]  ;;  %v2874_v40 = vld [vmem:[#allocation11 + $0x620] sm:$0xff]  ;;  %2998 = vmatprep.mubr.f32.mxu0 %v7546_v22  ;;  %3069 = vmatprep.mubr.f32.mxu1 %v7546_v22  ;;  %v2877_v3 = vld [vmem:[#allocation11 + $0x638] sm:$0xff]  ;;  %s2864_s24 = scalar_lea.vmem [#allocation4], %s5754_s3  ;;  %s3105_s11 = scalar_lea.vmem [#allocation17], %s5723_s29 }
 0x8ad   : > { %v6207_v18 = vpack.c.bf16 %v2875_v59, %v2871_v58  ;;  %v2879_v41 = vld [vmem:[#allocation11 + $0x648] sm:$0xff]  ;;  %v6209_v23 = vpack.c.bf16 %v2874_v40, %v2870_v60  ;;  %v2878_v44 = vld [vmem:[#allocation11 + $0x640] sm:$0xff]  ;;  %v6239_v5 = vpack.c.bf16 %v2877_v3, %v2873_v2  ;;  %v2872_v6 = vld [vmem:[#allocation11 + $0x610] sm:$0xff]  ;;  %s2859_s28 = sadd.s32 1, %s7479_s28  }
 0x8ae   : > { %v2883_v21 = vld [vmem:[#allocation11 + $0x668] sm:$0xff]  ;;  %v2882_v45 = vld [vmem:[#allocation11 + $0x660] sm:$0xff]  ;;  %v2876_v7 = vld [vmem:[#allocation11 + $0x630] sm:$0xff]  ;;  %p2856_p3 = scmp.ge.s32.totalorder %s2859_s28, 16  }
 0x8af   : > { %v6211_v24 = vpack.c.bf16 %v2883_v21, %v2879_v41  ;;  %v2887_v46 = vld [vmem:[#allocation11 + $0x688] sm:$0xff]  ;;  %6208 = vmatprep.subr.bf16.mxu0 %v6207_v18  ;;  %v6213_v53 = vpack.c.bf16 %v2882_v45, %v2878_v44  ;;  %v2886_v61 = vld [vmem:[#allocation11 + $0x680] sm:$0xff]  ;;  %v6241_v8 = vpack.c.bf16 %v2876_v7, %v2872_v6  ;;  %6240 = vmatprep.subr.bf16.mxu1 %v6239_v5  ;;  %v2881_v42 = vld [vmem:[#allocation11 + $0x658] sm:$0xff]  ;;  %s8326_s13 = smov (%p2856_p3), 0  }
 0x8b0   : > { %v2891_v51 = vld [vmem:[#allocation11 + $0x6a8] sm:$0xff]  ;;  %6210 = vmatpush1.bf16.msra.mxu0 %v6209_v23  ;;  %v2890_v62 = vld [vmem:[#allocation11 + $0x6a0] sm:$0xff]  ;;  %v2885_v10 = vld [vmem:[#allocation11 + $0x678] sm:$0xff] }
 0x8b1   : > { %6212 = vmatprep.subr.bf16.mxu0 %v6211_v24  ;;  %v6215_v63 = vpack.c.bf16 %v2891_v51, %v2887_v46  ;;  %v2895_v1 = vld [vmem:[#allocation11 + $0x6c8] sm:$0xff]  ;;  %v6217_v9 = vpack.c.bf16 %v2890_v62, %v2886_v61  ;;  %v2880_v17 = vld [vmem:[#allocation11 + $0x650] sm:$0xff]  ;;  %v2894_v12 = vld [vmem:[#allocation11 + $0x6c0] sm:$0xff]  ;;  %6242 = vmatpush1.bf16.msra.mxu1 %v6241_v8  ;;  %v6243_v48 = vpack.c.bf16 %v2885_v10, %v2881_v42 }
 0x8b2   : > { %v2899_v4 = vld [vmem:[#allocation11 + $0x6e8] sm:$0xff]  ;;  %v2898_v47 = vld [vmem:[#allocation11 + $0x6e0] sm:$0xff]  ;;  %v2884_v49 = vld [vmem:[#allocation11 + $0x670] sm:$0xff] }
 0x8b3   : > { %v6219_v11 = vpack.c.bf16 %v2899_v4, %v2895_v1  ;;  %v2903_v50 = vld [vmem:[#allocation11 + $0x708] sm:$0xff]  ;;  %v6245_v15 = vpack.c.bf16 %v2884_v49, %v2880_v17  ;;  %v2889_v57 = vld [vmem:[#allocation11 + $0x698] sm:$0xff]  ;;  %6244 = vmatprep.subr.bf16.mxu1 %v6243_v48  ;;  %v2888_v20 = vld [vmem:[#allocation11 + $0x690] sm:$0xff]  ;;  %v6221_v26 = vpack.c.bf16 %v2898_v47, %v2894_v12 }
 0x8b4   : > { %6214 = vmatpush1.bf16.msra.mxu0 %v6213_v53  ;;  %v2907_v14 = vld [vmem:[#allocation11 + $0x728] sm:$0xff]  ;;  %v2893_v19 = vld [vmem:[#allocation11 + $0x6b8] sm:$0xff]  ;;  %v2892_v25 = vld [vmem:[#allocation11 + $0x6b0] sm:$0xff] }
 0x8b5   : > { %6216 = vmatprep.subr.bf16.mxu0 %v6215_v63  ;;  %v2902_v27 = vld [vmem:[#allocation11 + $0x700] sm:$0xff]  ;;  %v6247_v29 = vpack.c.bf16 %v2893_v19, %v2889_v57  ;;  %v6223_v30 = vpack.c.bf16 %v2907_v14, %v2903_v50  ;;  %6246 = vmatpush1.bf16.msra.mxu1 %v6245_v15  ;;  %v2911_v31 = vld [vmem:[#allocation11 + $0x748] sm:$0xff]  ;;  %v6249_v32 = vpack.c.bf16 %v2892_v25, %v2888_v20  ;;  %v2897_v33 = vld [vmem:[#allocation11 + $0x6d8] sm:$0xff] }
 0x8b6   : > { %v2906_v28 = vld [vmem:[#allocation11 + $0x720] sm:$0xff]  ;;  %v2901_v34 = vld [vmem:[#allocation11 + $0x6f8] sm:$0xff]  ;;  %v2915_v35 = vld [vmem:[#allocation11 + $0x768] sm:$0xff] }
 0x8b7   : > { %6248 = vmatprep.subr.bf16.mxu1 %v6247_v29  ;;  %v6251_v36 = vpack.c.bf16 %v2901_v34, %v2897_v33  ;;  %v2896_v13 = vld [vmem:[#allocation11 + $0x6d0] sm:$0xff]  ;;  %v6225_v38 = vpack.c.bf16 %v2906_v28, %v2902_v27  ;;  %v2905_v16 = vld [vmem:[#allocation11 + $0x718] sm:$0xff]  ;;  %v6227_v59 = vpack.c.bf16 %v2915_v35, %v2911_v31  ;;  %v2910_v60 = vld [vmem:[#allocation11 + $0x740] sm:$0xff] }
 0x8b8   : > { %6218 = vmatpush1.bf16.msra.mxu0 %v6217_v9  ;;  %v2900_v37 = vld [vmem:[#allocation11 + $0x6f0] sm:$0xff]  ;;  %v2909_v58 = vld [vmem:[#allocation11 + $0x738] sm:$0xff]  ;;  %v2914_v18 = vld [vmem:[#allocation11 + $0x760] sm:$0xff] }
 0x8b9   : > { %6220 = vmatprep.subr.bf16.mxu0 %v6219_v11  ;;  %6250 = vmatpush1.bf16.msra.mxu1 %v6249_v32  ;;  %v2919_v40 = vld [vmem:[#allocation11 + $0x788] sm:$0xff]  ;;  %v6253_v41 = vpack.c.bf16 %v2900_v37, %v2896_v13  ;;  %v6255_v22 = vpack.c.bf16 %v2909_v58, %v2905_v16  ;;  %v2904_v23 = vld [vmem:[#allocation11 + $0x710] sm:$0xff]  ;;  %v2913_v44 = vld [vmem:[#allocation11 + $0x758] sm:$0xff]  ;;  %v6229_v46 = vpack.c.bf16 %v2914_v18, %v2910_v60 }
 0x8ba   : > { %v2923_v21 = vld [vmem:[#allocation11 + $0x7a8] sm:$0xff]  ;;  %6252 = vmatprep.subr.bf16.mxu1 %v6251_v36  ;;  %v2908_v24 = vld [vmem:[#allocation11 + $0x730] sm:$0xff]  ;;  %v2917_v45 = vld [vmem:[#allocation11 + $0x778] sm:$0xff] }
 0x8bb   : > { %v6231_v51 = vpack.c.bf16 %v2923_v21, %v2919_v40  ;;  %v2918_v53 = vld [vmem:[#allocation11 + $0x780] sm:$0xff]  ;;  %v2927_v62 = vld [vmem:[#allocation11 + $0x7c8] sm:$0xff]  ;;  %v6257_v63 = vpack.c.bf16 %v2908_v24, %v2904_v23  ;;  %v6259_v2 = vpack.c.bf16 %v2917_v45, %v2913_v44  ;;  %v2912_v3 = vld [vmem:[#allocation11 + $0x750] sm:$0xff] }
 0x8bc   : > { %6222 = vmatpush1.bf16.msra.mxu0 %v6221_v26  ;;  %v2922_v61 = vld [vmem:[#allocation11 + $0x7a0] sm:$0xff]  ;;  %v2931_v1 = vld [vmem:[#allocation11 + $0x7e8] sm:$0xff]  ;;  %v2916_v4 = vld [vmem:[#allocation11 + $0x770] sm:$0xff] }
 0x8bd   : > { %6224 = vmatprep.subr.bf16.mxu0 %v6223_v30  ;;  %6254 = vmatpush1.bf16.msra.mxu1 %v6253_v41  ;;  %v2921_v5 = vld [vmem:[#allocation11 + $0x798] sm:$0xff]  ;;  %v6233_v7 = vpack.c.bf16 %v2922_v61, %v2918_v53  ;;  %v6235_v8 = vpack.c.bf16 %v2931_v1, %v2927_v62  ;;  %v2926_v9 = vld [vmem:[#allocation11 + $0x7c0] sm:$0xff]  ;;  %v6261_v10 = vpack.c.bf16 %v2916_v4, %v2912_v3  ;;  %v2920_v11 = vld [vmem:[#allocation11 + $0x790] sm:$0xff] }
 0x8be   : > { %6256 = vmatprep.subr.bf16.mxu1 %v6255_v22  ;;  %v2925_v6 = vld [vmem:[#allocation11 + $0x7b8] sm:$0xff]  ;;  %v2930_v42 = vld [vmem:[#allocation11 + $0x7e0] sm:$0xff]  ;;  %v2924_v12 = vld [vmem:[#allocation11 + $0x7b0] sm:$0xff] }
 0x8bf   : > { %v6263_v17 = vpack.c.bf16 %v2925_v6, %v2921_v5  ;;  %v2929_v47 = vld [vmem:[#allocation11 + $0x7d8] sm:$0xff]  ;;  %v6237_v49 = vpack.c.bf16 %v2930_v42, %v2926_v9  ;;  %v6265_v50 = vpack.c.bf16 %v2924_v12, %v2920_v11  ;;  %v2928_v15 = vld [vmem:[#allocation11 + $0x7d0] sm:$0xff]  ;;  %v2865_v20 = vld [vmem:[%s2864_s24] sm:$0xff] }
 0x8c0   : > { %6226 = vmatpush1.bf16.msra.mxu0 %v6225_v38  ;;  %v2933_v48 = vld [vmem:[#allocation11 + $0x7f8] sm:$0xff]  ;;  %v2932_v57 = vld [vmem:[#allocation11 + $0x7f0] sm:$0xff]  ;;  %v2866_v25 = vld [vmem:[%s2864_s24 + $0x8] sm:$0xff] }
 0x8c1   : > { %6228 = vmatprep.subr.bf16.mxu0 %v6227_v59  ;;  %6258 = vmatpush1.bf16.msra.mxu1 %v6257_v63  ;;  %v6267_v14 = vpack.c.bf16 %v2933_v48, %v2929_v47  ;;  %v6269_v19 = vpack.c.bf16 %v2932_v57, %v2928_v15  ;;  %v2867_v32 = vld [vmem:[%s2864_s24 + $0x10] sm:$0xff]  ;;  %v2868_v36 = vld [vmem:[%s2864_s24 + $0x18] sm:$0xff]  ;;  %v3122_v53 = vld [vmem:[#allocation14 + $0x18] sm:$0xff] (%p2856_p3) }
 0x8c2   : > { %6260 = vmatprep.subr.bf16.mxu1 %v6259_v2  ;;  %v3126_v62 = vld [vmem:[#allocation14 + $0x38] sm:$0xff] (%p2856_p3)  ;;  %v3119_v63 = vld [vmem:[#allocation14] sm:$0xff] (%p2856_p3)  ;;  %v3121_v4 = vld [vmem:[#allocation14 + $0x10] sm:$0xff] (%p2856_p3) }
 0x8c3   :  { %v3123_v1 = vld [vmem:[#allocation14 + $0x20] sm:$0xff] (%p2856_p3)  ;;  %v6303_v2 = vpack.c.bf16 (%p2856_p3), %v3126_v62, %v3122_v53  ;;  %v3125_v5 = vld [vmem:[#allocation14 + $0x30] sm:$0xff] (%p2856_p3)  ;;  %v3128_v6 = vld [vmem:[#allocation14 + $0x48] sm:$0xff] (%p2856_p3) }
 0x8c4   : > { %6230 = vmatpush1.bf16.msra.mxu0 %v6229_v46  ;;  %v3120_v46 = vld [vmem:[#allocation14 + $0x8] sm:$0xff] (%p2856_p3)  ;;  %v6273_v3 = vpack.c.bf16 (%p2856_p3), %v3123_v1, %v3119_v63  ;;  %v3134_v9 = vld [vmem:[#allocation14 + $0x78] sm:$0xff] (%p2856_p3)  ;;  %v3131_v11 = vld [vmem:[#allocation14 + $0x60] sm:$0xff] (%p2856_p3) }
 0x8c5   : > { %6232 = vmatprep.subr.bf16.mxu0 %v6231_v51  ;;  %6262 = vmatpush1.bf16.msra.mxu1 %v6261_v10  ;;  %v3124_v51 = vld [vmem:[#allocation14 + $0x28] sm:$0xff] (%p2856_p3)  ;;  %v3129_v12 = vld [vmem:[#allocation14 + $0x50] sm:$0xff] (%p2856_p3)  ;;  %v3138_v57 = vld [vmem:[#allocation14 + $0x98] sm:$0xff] (%p2856_p3) }
 0x8c6   : > { %6264 = vmatprep.subr.bf16.mxu1 %v6263_v17  ;;  %v6271_v61 = vpack.c.bf16 (%p2856_p3), %v3124_v51, %v3120_v46  ;;  %v3127_v17 = vld [vmem:[#allocation14 + $0x40] sm:$0xff] (%p2856_p3)  ;;  %v3133_v48 = vld [vmem:[#allocation14 + $0x70] sm:$0xff] (%p2856_p3)  ;;  %v3164_v46 = vld [vmem:[#allocation14 + $0x168] sm:$0xff] (%p2856_p3) }
 0x8c7   :  { %v6277_v47 = vpack.c.bf16 (%p2856_p3), %v3131_v11, %v3127_v17  ;;  %v3162_v51 = vld [vmem:[#allocation14 + $0x158] sm:$0xff] (%p2856_p3)  ;;  %v3159_v1 = vld [vmem:[#allocation14 + $0x140] sm:$0xff] (%p2856_p3) }
 0x8c8   : > { %6234 = vmatpush1.bf16.msra.mxu0 %v6233_v7  ;;  %v6305_v7 = vpack.c.bf16 (%p2856_p3), %v3125_v5, %v3121_v4  ;;  %v3166_v53 = vld [vmem:[#allocation14 + $0x178] sm:$0xff] (%p2856_p3)  ;;  %v3165_v5 = vld [vmem:[#allocation14 + $0x170] sm:$0xff] (%p2856_p3)  ;;  %v3167_v17 = vld [vmem:[#allocation14 + $0x180] sm:$0xff] (%p2856_p3) }
 0x8c9   : > { %6236 = vmatprep.subr.bf16.mxu0 %v6235_v8  ;;  %6266 = vmatpush1.bf16.msra.mxu1 %v6265_v50  ;;  %v3130_v8 = vld [vmem:[#allocation14 + $0x58] sm:$0xff] (%p2856_p3)  ;;  %v3140_v50 = vld [vmem:[#allocation14 + $0xa8] sm:$0xff] (%p2856_p3)  ;;  %v6323_v4 = vpack.c.bf16 (%p2856_p3), %v3166_v53, %v3162_v51  ;;  %v3171_v11 = vld [vmem:[#allocation14 + $0x1a0] sm:$0xff] (%p2856_p3) }
 0x8ca   : > { %6268 = vmatprep.subr.bf16.mxu1 %v6267_v14  ;;  %v6307_v10 = vpack.c.bf16 (%p2856_p3), %v3134_v9, %v3130_v8  ;;  %v6309_v14 = vpack.c.bf16 (%p2856_p3), %v3133_v48, %v3129_v12  ;;  %v3174_v8 = vld [vmem:[#allocation14 + $0x1b8] sm:$0xff] (%p2856_p3)  ;;  %v3169_v12 = vld [vmem:[#allocation14 + $0x190] sm:$0xff] (%p2856_p3) }
 0x8cb   :  { %v3173_v48 = vld [vmem:[#allocation14 + $0x1b0] sm:$0xff] (%p2856_p3) }
 0x8cc   : > { %6238 = vmatpush1.bf16.msra.mxu0 %v6237_v49  ;;  %v3136_v49 = vld [vmem:[#allocation14 + $0x88] sm:$0xff] (%p2856_p3) }
 0x8cd   : > { %6270 = vmatpush1.bf16.msra.mxu1 %v6269_v19  ;;  %6272 = vmatprep.subr.bf16.mxu0 (%p2856_p3), %v6271_v61  ;;  %v6279_v15 = vpack.c.bf16 (%p2856_p3), %v3140_v50, %v3136_v49  ;;  %v3142_v19 = vld [vmem:[#allocation14 + $0xb8] sm:$0xff] (%p2856_p3)  ;;  %v3176_v49 = vld [vmem:[#allocation14 + $0x1c8] sm:$0xff] (%p2856_p3) }
 0x8ce   :  { %6304 = vmatprep.subr.bf16.mxu1 (%p2856_p3), %v6303_v2  ;;  %v3163_v2 = vld [vmem:[#allocation14 + $0x160] sm:$0xff] (%p2856_p3)  ;;  %v3180_v50 = vld [vmem:[#allocation14 + $0x1e8] sm:$0xff] (%p2856_p3) }
 0x8cf   : > { %2999 = vmatmul.mubr.f32.vlgmr.msra.gmra.mrb[0].mxu0 %v7475_v43  ;;  %v6293_v9 = vpack.c.bf16 (%p2856_p3), %v3163_v2, %v3159_v1 }
 0x8d0   : > { %3070 = vmatmul.mubr.f32.vlgmr.msra.gmra.mrb[0].mxu1 %v7475_v43  ;;  %3269 = vmatprep.mubr.f32.mxu0 (%p2856_p3), %v7542_v0 }
 0x8d1   :  { %3382 = vmatprep.mubr.f32.mxu1 (%p2856_p3), %v7542_v0  ;;  %6274 = vmatpush1.bf16.msra.mxu0 (%p2856_p3), %v6273_v3  ;;  %v3161_v3 = vld [vmem:[#allocation14 + $0x150] sm:$0xff] (%p2856_p3) }
 0x8d2   :  { %6306 = vmatpush1.bf16.msra.mxu1 (%p2856_p3), %v6305_v7  ;;  %v3172_v7 = vld [vmem:[#allocation14 + $0x1a8] sm:$0xff] (%p2856_p3) }
 0x8d3   :  { %6308 = vmatprep.subr.bf16.mxu1 (%p2856_p3), %v6307_v10 }
 0x8d6   :  { %6310 = vmatpush1.bf16.msra.mxu1 (%p2856_p3), %v6309_v14  ;;  %v3178_v14 = vld [vmem:[#allocation14 + $0x1d8] sm:$0xff] (%p2856_p3) }
 0x9a2   : > { %v3000_v26 = vpop.f32.mrb[0].mxu0 }
 0x9a3   : > { %v3076_v27 = vadd.f32 %v3000_v26, %v2865_v20  ;;  %v3002_v28 = vpop.f32.mrb[1].mxu0  ;;  %v3071_v33 = vpop.f32.mrb[0].mxu1  ;;  %v3135_v20 = vld [vmem:[#allocation14 + $0x80] sm:$0xff] (%p2856_p3) }
 0x9a4   : > { %v3077_v29 = vadd.f32 %v3002_v28, %v2866_v25  ;;  %v3073_v34 = vpop.f32.mrb[1].mxu1  ;;  %v3078_v35 = vadd.f32 %v3071_v33, %v2867_v32  ;;  %v6311_v25 = vpack.c.bf16 (%p2856_p3), %v3142_v19, %v3138_v57  ;;  %v3139_v26 = vld [vmem:[#allocation14 + $0xa0] sm:$0xff] (%p2856_p3)  ;;  %v3141_v28 = vld [vmem:[#allocation14 + $0xb0] sm:$0xff] (%p2856_p3)  ;;  %v3146_v32 = vld [vmem:[#allocation14 + $0xd8] sm:$0xff] (%p2856_p3)  ;;  %v6297_v57 = vpack.c.bf16 (%p2856_p3), %v3171_v11, %v3167_v17 }
 0x9a5   : > { %v5720_v30 = vmul.f32 -1.442695, %v3076_v27  ;;  %v3079_v37 = vadd.f32 %v3073_v34, %v2868_v36  ;;  %v3137_v27 = vld [vmem:[#allocation14 + $0x90] sm:$0xff] (%p2856_p3)  ;;  %v3143_v36 = vld [vmem:[#allocation14 + $0xc0] sm:$0xff] (%p2856_p3)  ;;  %v6329_v19 = vpack.c.bf16 (%p2856_p3), %v3173_v48, %v3169_v12 }
 0x9a6   : > { %v5721_v31 = vmul.f32 -1.442695, %v3077_v29  ;;  %v5722_v13 = vmul.f32 -1.442695, %v3078_v35  ;;  %v6281_v29 = vpack.c.bf16 (%p2856_p3), %v3139_v26, %v3135_v20  ;;  %v6313_v33 = vpack.c.bf16 (%p2856_p3), %v3141_v28, %v3137_v27  ;;  %v3150_v35 = vld [vmem:[#allocation14 + $0xf8] sm:$0xff] (%p2856_p3)  ;;  %6312 = vmatprep.subr.bf16.mxu1 (%p2856_p3), %v6311_v25  ;;  %v3175_v25 = vld [vmem:[#allocation14 + $0x1c0] sm:$0xff] (%p2856_p3) }
 0x9a7   : > { %7047 = vpow2.f32 %v5720_v30  ;;  %v3144_v30 = vld [vmem:[#allocation14 + $0xc8] sm:$0xff] (%p2856_p3)  ;;  %v6299_v20 = vpack.c.bf16 (%p2856_p3), %v3180_v50, %v3176_v49  ;;  %v3179_v26 = vld [vmem:[#allocation14 + $0x1e0] sm:$0xff] (%p2856_p3)  ;;  %v3177_v28 = vld [vmem:[#allocation14 + $0x1d0] sm:$0xff] (%p2856_p3) }
 0x9a8   : > { %7049 = vpow2.f32 %v5721_v31  ;;  %v3148_v31 = vld [vmem:[#allocation14 + $0xe8] sm:$0xff] (%p2856_p3)  ;;  %6314 = vmatpush1.bf16.msra.mxu1 (%p2856_p3), %v6313_v33  ;;  %v3112_v33 = vld [vmem:[#allocation8 + $0x8] sm:$0xff] (%p2856_p3) }
 0x9a9   : > { %7051 = vpow2.f32 %v5722_v13  ;;  %v6283_v34 = vpack.c.bf16 (%p2856_p3), %v3148_v31, %v3144_v30  ;;  %v3147_v13 = vld [vmem:[#allocation14 + $0xe0] sm:$0xff] (%p2856_p3)  ;;  %v6301_v30 = vpack.c.bf16 (%p2856_p3), %v3179_v26, %v3175_v25 }
 0x9aa   : > { %7053 = vtanh.f32 %v3079_v37  ;;  %v6315_v37 = vpack.c.bf16 (%p2856_p3), %v3150_v35, %v3146_v32  ;;  %v3111_v32 = vld [vmem:[#allocation8] sm:$0xff] (%p2856_p3)  ;;  %v3114_v35 = vld [vmem:[#allocation8 + $0x18] sm:$0xff] (%p2856_p3) }
 0x9ac   :  { %6316 = vmatprep.subr.bf16.mxu1 (%p2856_p3), %v6315_v37  ;;  %v3117_v37 = vld [vmem:[#allocation8 + $0x30] sm:$0xff] (%p2856_p3) }
 0x9b1   : > { %v7048_v43 = vpop.eup %7047 }
 0x9b2   : > { %v7050_v38 = vpop.eup %7049  ;;  %v3089_v16 = vadd.f32 1.0, %v7048_v43 }
 0x9b3   : > { %v3090_v58 = vadd.f32 1.0, %v7050_v38  ;;  %v7052_v59 = vpop.eup %7051  ;;  %v3149_v38 = vld [vmem:[#allocation14 + $0xf0] sm:$0xff] (%p2856_p3) }
 0x9b4   : > { %7055 = vrcp.f32 %v3089_v16  ;;  %v7054_v60 = vpop.eup %7053  ;;  %v3091_v40 = vadd.f32 1.0, %v7052_v59  ;;  %v3152_v16 = vld [vmem:[#allocation14 + $0x108] sm:$0xff] (%p2856_p3)  ;;  %v3154_v59 = vld [vmem:[#allocation14 + $0x118] sm:$0xff] (%p2856_p3) }
 0x9b5   : > { %7057 = vrcp.f32 %v3090_v58  ;;  %v3156_v58 = vld [vmem:[#allocation14 + $0x128] sm:$0xff] (%p2856_p3) }
 0x9b6   : > { %7059 = vrcp.f32 %v3091_v40 }
 0x9be   : > { %v7056_v18 = vpop.eup %7055 }
 0x9bf   : > { %v7058_v41 = vpop.eup %7057  ;;  %v3100_v21 = vmul.f32 %v7056_v18, %v7054_v60  ;;  %v3158_v60 = vld [vmem:[#allocation14 + $0x138] sm:$0xff] (%p2856_p3)  ;;  %v6285_v18 = vpack.c.bf16 (%p2856_p3), %v3147_v13, %v3143_v36  ;;  %v3115_v36 = vld [vmem:[#allocation8 + $0x20] sm:$0xff] (%p2856_p3) }
 0x9c0   : > { %v3099_v22 = vmul.f32 %v7471_v39, %v7058_v41  ;;  %v7060_v24 = vpop.eup %7059  ;;  %v6287_v41 = vpack.c.bf16 (%p2856_p3), %v3156_v58, %v3152_v16  ;;  %v3116_v13 = vld [vmem:[#allocation8 + $0x28] sm:$0xff] (%p2856_p3)  ;;  %v8271_v16 = vld [vmem:[#allocation3] sm:$0xff] (%p2856_p3)  }
 0x9c1   :  { %v3183_v58 = vld [vmem:[%s8681_s7] sm:$0xf] (%p2856_p3) }
 0x9c2   : > { %v3101_v23 = vadd.f32 %v3100_v21, %v3099_v22   ;;  %v3151_v21 = vld [vmem:[#allocation14 + $0x100] sm:$0xff] (%p2856_p3) }
 0x9c3   :  { %v3155_v22 = vld [vmem:[#allocation14 + $0x120] sm:$0xff] (%p2856_p3) }
 0x9c4   : > { %7061 = vtanh.f32 %v3101_v23  ;;  %v8690_v39 = vmov %v3101_v23  ;;  %3110 = vst [vmem:[#allocation3 + $0x18] sm:$0xff] (%p2856_p3), %v3101_v23  ;;  %v3153_v23 = vld [vmem:[#allocation14 + $0x110] sm:$0xff] (%p2856_p3)  ;;  %v6289_v61 = vpack.c.bf16 (%p2856_p3), %v3155_v22, %v3151_v21 }
 0x9c5   :  { %v3132_v39 = vld [vmem:[#allocation14 + $0x68] sm:$0xff] (%p2856_p3) }
 0x9c6   :  { %v6275_v42 = vpack.c.bf16 (%p2856_p3), %v3132_v39, %v3128_v6  ;;  %v3168_v6 = vld [vmem:[#allocation14 + $0x188] sm:$0xff] (%p2856_p3)  ;;  %v3170_v39 = vld [vmem:[#allocation14 + $0x198] sm:$0xff] (%p2856_p3) }
 0x9c7   :  { %v6295_v10 = vpack.c.bf16 (%p2856_p3), %v3172_v7, %v3168_v6 }
 0x9c8   :  { %6276 = vmatprep.subr.bf16.mxu0 (%p2856_p3), %v6275_v42  ;;  %v6325_v42 = vpack.c.bf16 (%p2856_p3), %v3165_v5, %v3161_v3 }
 0x9c9   :  { %6278 = vmatpush1.bf16.msra.mxu0 (%p2856_p3), %v6277_v47  ;;  %v6327_v47 = vpack.c.bf16 (%p2856_p3), %v3174_v8, %v3170_v39 }
 0x9ca   :  { %6280 = vmatprep.subr.bf16.mxu0 (%p2856_p3), %v6279_v15  ;;  %v3182_v15 = vld [vmem:[#allocation14 + $0x1f8] sm:$0xff] (%p2856_p3) }
 0x9cb   :  { %2858 = sbr.rel (!%p2856_p3) target bundleno = 2219 (0x8ab), region = 217  ;;  %v6331_v27 = vpack.c.bf16 (%p2856_p3), %v3182_v15, %v3178_v14 }
 0x9cd   :  { %6282 = vmatpush1.bf16.msra.mxu0 (%p2856_p3), %v6281_v29  ;;  %v3181_v29 = vld [vmem:[#allocation14 + $0x1f0] sm:$0xff] (%p2856_p3) }
 0x9ce   : > { %v7062_v44 = vpop.eup %7061  ;;  %6284 = vmatprep.subr.bf16.mxu0 (%p2856_p3), %v6283_v34  ;;  %v6333_v31 = vpack.c.bf16 (%p2856_p3), %v3181_v29, %v3177_v28  ;;  %v3113_v34 = vld [vmem:[#allocation8 + $0x10] sm:$0xff] (%p2856_p3) }
 0x9cf   : > { %v3103_v45 = vmul.f32 %v7062_v44, %v7060_v24   ;;  %v6319_v24 = vpack.c.bf16 (%p2856_p3), %v3158_v60, %v3154_v59  ;;  %v3157_v44 = vld [vmem:[#allocation14 + $0x130] sm:$0xff] (%p2856_p3)  ;;  %v8277_v59 = vrot.slane (%p2856_p3), %v3183_v58, %v7737_v52  ;;  %v8280_v60 = vrot.slane (%p2856_p3), %v3183_v58, %v7739_v54 }
 0x9d0   :  { %v6321_v62 = vpack.c.bf16 (%p2856_p3), %v3157_v44, %v3153_v23 }
 0x9d1   : > { %3106 = vst [vmem:[%s3105_s11] sm:$0xff] %v3103_v45  ;;  %v8691_v43 = vmov %v3103_v45  ;;  %3108 = vst [vmem:[#allocation2 + $0x18] sm:$0xff] (%p2856_p3), %v3103_v45  ;;  %v3160_v45 = vld [vmem:[#allocation14 + $0x148] sm:$0xff] (%p2856_p3)  ;;  %6286 = vmatpush1.bf16.msra.mxu0 (%p2856_p3), %v6285_v18  ;;  %v8283_v18 = vrot.slane (%p2856_p3), %v3183_v58, %v7741_v55 }
 0x9d2   :  { %v3145_v43 = vld [vmem:[#allocation14 + $0xd0] sm:$0xff]  ;;  %6288 = vmatprep.subr.bf16.mxu0 %v6287_v41  ;;  %v6291_v63 = vpack.c.bf16 %v3164_v46, %v3160_v45 }
 0x9d3   :  { %v6317_v40 = vpack.c.bf16 %v3149_v38, %v3145_v43  ;;  %v3118_v43 = vld [vmem:[#allocation8 + $0x38] sm:$0xff]  ;;  %v8269_v38 = vld [vmem:[#allocation2] sm:$0xff]  }
 0x9d5   :  { %6318 = vmatpush1.bf16.msra.mxu1 %v6317_v40  ;;  %6290 = vmatpush1.bf16.msra.mxu0 %v6289_v61  ;;  %v8286_v40 = vrot.slane %v3183_v58, %v7743_v56 }
 0x9d6   :  { %6320 = vmatprep.subr.bf16.mxu1 %v6319_v24  ;;  %6292 = vmatprep.subr.bf16.mxu0 %v6291_v63 }
 0x9d9   :  { %6322 = vmatpush1.bf16.msra.mxu1 %v6321_v62  ;;  %6294 = vmatpush1.bf16.msra.mxu0 %v6293_v9 }
 0x9da   :  { %6324 = vmatprep.subr.bf16.mxu1 %v6323_v4  ;;  %6296 = vmatprep.subr.bf16.mxu0 %v6295_v10 }
 0x9dd   :  { %6326 = vmatpush1.bf16.msra.mxu1 %v6325_v42  ;;  %6298 = vmatpush1.bf16.msra.mxu0 %v6297_v57 }
 0x9de   :  { %6328 = vmatprep.subr.bf16.mxu1 %v6327_v47  ;;  %6300 = vmatprep.subr.bf16.mxu0 %v6299_v20 }
 0x9e1   :  { %6330 = vmatpush1.bf16.msra.mxu1 %v6329_v19  ;;  %6302 = vmatpush1.bf16.msra.mxu0 %v6301_v30 }
 0x9e2   :  { %6332 = vmatprep.subr.bf16.mxu1 %v6331_v27 }
 0x9e4   :  { %3270 = vmatmul.mubr.f32.vlgmr.msra.gmra.mrb[0].mxu0 %v3111_v32 }
 0x9e5   :  { %6334 = vmatpush1.bf16.msra.mxu1 %v6333_v31  ;;  %3275 = vmatprep.mubr.f32.mxu0 %v7542_v0 }
 0x9e8   :  { %3383 = vmatmul.mubr.f32.vlgmr.msra.gmra.mrb[0].mxu1 %v3111_v32  ;;  %3276 = vmatmul.mubr.f32.gmra.mrb[2].mxu0 %v3112_v33 }
 0x9e9   :  { %3388 = vmatprep.mubr.f32.mxu1 %v7542_v0  ;;  %3281 = vmatprep.mubr.f32.mxu0 %v7542_v0 }
 0x9ec   :  { %3389 = vmatmul.mubr.f32.gmra.mrb[2].mxu1 %v3112_v33  ;;  %3282 = vmatmul.mubr.f32.gmra.mrb[4].mxu0 %v3113_v34 }
 0x9ed   :  { %3394 = vmatprep.mubr.f32.mxu1 %v7542_v0  ;;  %3287 = vmatprep.mubr.f32.mxu0 %v7542_v0 }
 0x9f0   :  { %3395 = vmatmul.mubr.f32.gmra.mrb[4].mxu1 %v3113_v34  ;;  %3288 = vmatmul.mubr.f32.gmra.mrb[6].mxu0 %v3114_v35 }
 0x9f1   :  { %3400 = vmatprep.mubr.f32.mxu1 %v7542_v0  ;;  %3293 = vmatprep.mubr.f32.mxu0 %v7542_v0 }
 0x9f4   :  { %3401 = vmatmul.mubr.f32.gmra.mrb[6].mxu1 %v3114_v35  ;;  %3294 = vmatmul.mubr.f32.gmra.mrb[8].mxu0 %v3115_v36 }
 0x9f5   :  { %3406 = vmatprep.mubr.f32.mxu1 %v7542_v0  ;;  %3299 = vmatprep.mubr.f32.mxu0 %v7542_v0 }
 0x9f8   :  { %3407 = vmatmul.mubr.f32.gmra.mrb[8].mxu1 %v3115_v36  ;;  %3300 = vmatmul.mubr.f32.gmra.mrb[10].mxu0 %v3116_v13 }
 0x9f9   :  { %3412 = vmatprep.mubr.f32.mxu1 %v7542_v0  ;;  %3305 = vmatprep.mubr.f32.mxu0 %v7542_v0 }
 0x9fc   :  { %3413 = vmatmul.mubr.f32.gmra.mrb[10].mxu1 %v3116_v13  ;;  %3306 = vmatmul.mubr.f32.gmra.mrb[12].mxu0 %v3117_v37 }
 0x9fd   :  { %3418 = vmatprep.mubr.f32.mxu1 %v7542_v0  ;;  %3311 = vmatprep.mubr.f32.mxu0 %v7542_v0 }
 0xa00   :  { %3419 = vmatmul.mubr.f32.gmra.mrb[12].mxu1 %v3117_v37  ;;  %3312 = vmatmul.mubr.f32.gmra.mrb[14].mxu0 %v3118_v43 }
 0xa01   :  { %3424 = vmatprep.mubr.f32.mxu1 %v7542_v0 }
 0xa04   :  { %3425 = vmatmul.mubr.f32.gmra.mrb[14].mxu1 %v3118_v43 }
 0xab7   :  { %v3271_v41 = vpop.f32.mrb[0].mxu0 }
 0xab8   :  { %v3272_v21 = vadd.f32 %v3271_v41, %v8277_v59  ;;  %v3273_v23 = vpop.f32.mrb[1].mxu0 }
 0xab9   :  { %v3274_v44 = vadd.f32 %v3273_v23, %v8283_v18 }
 0xaba   :  { %3431 = vst [vmem:[#allocation4] sm:$0xff] %v3272_v21 }
 0xabb   :  { %v3384_v22 = vpop.f32.mrb[0].mxu1  ;;  %3432 = vst [vmem:[#allocation4 + $0x8] sm:$0xff] %v3274_v44  ;;  %v3277_v51 = vpop.f32.mrb[2].mxu0 }
 0xabc   :  { %v3385_v24 = vadd.f32 %v3384_v22, %v8280_v60  ;;  %v3386_v45 = vpop.f32.mrb[1].mxu1  ;;  %v3278_v53 = vadd.f32 %v3277_v51, %v8277_v59  ;;  %v3279_v62 = vpop.f32.mrb[3].mxu0 }
 0xabd   :  { %v3387_v46 = vadd.f32 %v3386_v45, %v8286_v40  ;;  %v3280_v1 = vadd.f32 %v3279_v62, %v8283_v18 }
 0xabe   :  { %3433 = vst [vmem:[#allocation4 + $0x10] sm:$0xff] %v3385_v24  ;;  %3435 = vst [vmem:[#allocation4 + $0x20] sm:$0xff] %v3278_v53 }
 0xabf   :  { %3434 = vst [vmem:[#allocation4 + $0x18] sm:$0xff] %v3387_v46  ;;  %v3390_v61 = vpop.f32.mrb[2].mxu1  ;;  %3436 = vst [vmem:[#allocation4 + $0x28] sm:$0xff] %v3280_v1  ;;  %v3283_v4 = vpop.f32.mrb[4].mxu0 }
 0xac0   :  { %v3391_v63 = vadd.f32 %v3390_v61, %v8280_v60  ;;  %v3392_v2 = vpop.f32.mrb[3].mxu1  ;;  %v3284_v5 = vadd.f32 %v3283_v4, %v8277_v59  ;;  %v3285_v7 = vpop.f32.mrb[5].mxu0 }
 0xac1   :  { %v3393_v3 = vadd.f32 %v3392_v2, %v8286_v40  ;;  %v3286_v8 = vadd.f32 %v3285_v7, %v8283_v18 }
 0xac2   :  { %3437 = vst [vmem:[#allocation4 + $0x30] sm:$0xff] %v3391_v63  ;;  %3439 = vst [vmem:[#allocation4 + $0x40] sm:$0xff] %v3284_v5 }
 0xac3   :  { %3438 = vst [vmem:[#allocation4 + $0x38] sm:$0xff] %v3393_v3  ;;  %v3396_v6 = vpop.f32.mrb[4].mxu1  ;;  %3440 = vst [vmem:[#allocation4 + $0x48] sm:$0xff] %v3286_v8  ;;  %v3289_v10 = vpop.f32.mrb[6].mxu0 }
 0xac4   :  { %v3397_v39 = vadd.f32 %v3396_v6, %v8280_v60  ;;  %v3398_v9 = vpop.f32.mrb[5].mxu1  ;;  %v3290_v17 = vadd.f32 %v3289_v10, %v8277_v59  ;;  %v3291_v12 = vpop.f32.mrb[7].mxu0 }
 0xac5   :  { %v3399_v42 = vadd.f32 %v3398_v9, %v8286_v40  ;;  %v3292_v48 = vadd.f32 %v3291_v12, %v8283_v18 }
 0xac6   :  { %3441 = vst [vmem:[#allocation4 + $0x50] sm:$0xff] %v3397_v39  ;;  %3443 = vst [vmem:[#allocation4 + $0x60] sm:$0xff] %v3290_v17 }
 0xac7   :  { %3442 = vst [vmem:[#allocation4 + $0x58] sm:$0xff] %v3399_v42  ;;  %v3402_v11 = vpop.f32.mrb[6].mxu1  ;;  %3444 = vst [vmem:[#allocation4 + $0x68] sm:$0xff] %v3292_v48  ;;  %v3295_v14 = vpop.f32.mrb[8].mxu0 }
 0xac8   :  { %v3403_v47 = vadd.f32 %v3402_v11, %v8280_v60  ;;  %v3404_v49 = vpop.f32.mrb[7].mxu1  ;;  %v3296_v15 = vadd.f32 %v3295_v14, %v8277_v59  ;;  %v3297_v19 = vpop.f32.mrb[9].mxu0 }
 0xac9   :  { %v3405_v50 = vadd.f32 %v3404_v49, %v8286_v40  ;;  %v3298_v25 = vadd.f32 %v3297_v19, %v8283_v18 }
 0xaca   :  { %3445 = vst [vmem:[#allocation4 + $0x70] sm:$0xff] %v3403_v47  ;;  %3447 = vst [vmem:[#allocation4 + $0x80] sm:$0xff] %v3296_v15 }
 0xacb   :  { %3446 = vst [vmem:[#allocation4 + $0x78] sm:$0xff] %v3405_v50  ;;  %v3408_v57 = vpop.f32.mrb[8].mxu1  ;;  %3448 = vst [vmem:[#allocation4 + $0x88] sm:$0xff] %v3298_v25  ;;  %v3301_v28 = vpop.f32.mrb[10].mxu0 }
 0xacc   :  { %v3409_v20 = vadd.f32 %v3408_v57, %v8280_v60  ;;  %v3410_v26 = vpop.f32.mrb[9].mxu1  ;;  %v3302_v29 = vadd.f32 %v3301_v28, %v8277_v59  ;;  %v3303_v31 = vpop.f32.mrb[11].mxu0 }
 0xacd   :  { %v3411_v27 = vadd.f32 %v3410_v26, %v8286_v40  ;;  %v3304_v33 = vadd.f32 %v3303_v31, %v8283_v18 }
 0xace   :  { %3449 = vst [vmem:[#allocation4 + $0x90] sm:$0xff] %v3409_v20  ;;  %3451 = vst [vmem:[#allocation4 + $0xa0] sm:$0xff] %v3302_v29 }
 0xacf   :  { %3450 = vst [vmem:[#allocation4 + $0x98] sm:$0xff] %v3411_v27  ;;  %v3414_v30 = vpop.f32.mrb[10].mxu1  ;;  %3452 = vst [vmem:[#allocation4 + $0xa8] sm:$0xff] %v3304_v33  ;;  %v3307_v36 = vpop.f32.mrb[12].mxu0 }
 0xad0   :  { %v3415_v32 = vadd.f32 %v3414_v30, %v8280_v60  ;;  %v3416_v34 = vpop.f32.mrb[11].mxu1  ;;  %v3308_v13 = vadd.f32 %v3307_v36, %v8277_v59  ;;  %v3309_v43 = vpop.f32.mrb[13].mxu0 }
 0xad1   :  { %v3417_v35 = vadd.f32 %v3416_v34, %v8286_v40  ;;  %v3310_v41 = vadd.f32 %v3309_v43, %v8283_v18 }
 0xad2   :  { %3453 = vst [vmem:[#allocation4 + $0xb0] sm:$0xff] %v3415_v32  ;;  %3455 = vst [vmem:[#allocation4 + $0xc0] sm:$0xff] %v3308_v13 }
 0xad3   :  { %3454 = vst [vmem:[#allocation4 + $0xb8] sm:$0xff] %v3417_v35  ;;  %v3420_v37 = vpop.f32.mrb[12].mxu1  ;;  %3456 = vst [vmem:[#allocation4 + $0xc8] sm:$0xff] %v3310_v41  ;;  %v3313_v23 = vpop.f32.mrb[14].mxu0 }
 0xad4   :  { %v3421_v58 = vadd.f32 %v3420_v37, %v8280_v60  ;;  %v3422_v21 = vpop.f32.mrb[13].mxu1  ;;  %v3314_v24 = vadd.f32 %v3313_v23, %v8277_v59  ;;  %v3315_v45 = vpop.f32.mrb[15].mxu0 }
 0xad5   :  { %v3423_v22 = vadd.f32 %v3422_v21, %v8286_v40  ;;  %v3316_v51 = vadd.f32 %v3315_v45, %v8283_v18 }
 0xad6   :  { %3457 = vst [vmem:[#allocation4 + $0xd0] sm:$0xff] %v3421_v58  ;;  %3459 = vst [vmem:[#allocation4 + $0xe0] sm:$0xff] %v3314_v24 }
 0xad7   :  { %3458 = vst [vmem:[#allocation4 + $0xd8] sm:$0xff] %v3423_v22  ;;  %v3426_v44 = vpop.f32.mrb[14].mxu1  ;;  %3460 = vst [vmem:[#allocation4 + $0xe8] sm:$0xff] %v3316_v51 }
 0xad8   :  { %v3427_v46 = vadd.f32 %v3426_v44, %v8280_v60  ;;  %v3428_v53 = vpop.f32.mrb[15].mxu1 }
 0xad9   :  { %v3429_v61 = vadd.f32 %v3428_v53, %v8286_v40 }
 0xada   :  { %3461 = vst [vmem:[#allocation4 + $0xf0] sm:$0xff] %v3427_v46 }
 0xadb   :  { %3462 = vst [vmem:[#allocation4 + $0xf8] sm:$0xff] %v3429_v61 }
 0xadc LB: > { %v3481_v59 = vld [vmem:[#allocation16 + $0x8] sm:$0xff]  ;;  %v3480_v18 = vld [vmem:[#allocation16] sm:$0xff]  ;;  %v7547_v2 = vmov 0.0   ;;  %v3483_v11 = vld [vmem:[#allocation16 + $0x18] sm:$0xff]  ;;  %s5755_s15 = sshll.u32 %s7491_s13, 5  ;;  %s5729_s1 = sshll.u32 %s7491_s13, 3  ;;  %s7491_s13 = sphi %s8326_s13, %s3470_s13   ;;  %v7487_v38 = vphi %v8269_v38, %v3713_v38   ;;  %v7483_v16 = vphi %v8271_v16, %v3711_v16  }
 0xadd   : > { %v3485_v60 = vld [vmem:[#allocation16 + $0x28] sm:$0xff]  ;;  %v3484_v62 = vld [vmem:[#allocation16 + $0x20] sm:$0xff]  ;;  %3608 = vmatprep.mubr.f32.mxu0 %v7547_v2  ;;  %3679 = vmatprep.mubr.f32.mxu1 %v7547_v2  ;;  %v3487_v12 = vld [vmem:[#allocation16 + $0x38] sm:$0xff]  ;;  %s3475_s4 = scalar_lea.vmem [#allocation4], %s5755_s15  ;;  %s3715_s6 = scalar_lea.vmem [#allocation18], %s5729_s1 }
 0xade   : > { %v6335_v40 = vpack.c.bf16 %v3485_v60, %v3481_v59  ;;  %v3489_v63 = vld [vmem:[#allocation16 + $0x48] sm:$0xff]  ;;  %v6337_v3 = vpack.c.bf16 %v3484_v62, %v3480_v18  ;;  %v3488_v5 = vld [vmem:[#allocation16 + $0x40] sm:$0xff]  ;;  %v6367_v48 = vpack.c.bf16 %v3487_v12, %v3483_v11  ;;  %v3482_v49 = vld [vmem:[#allocation16 + $0x10] sm:$0xff]  ;;  %s3470_s13 = sadd.s32 1, %s7491_s13  }
 0xadf   : > { %v3493_v1 = vld [vmem:[#allocation16 + $0x68] sm:$0xff]  ;;  %v3492_v6 = vld [vmem:[#allocation16 + $0x60] sm:$0xff]  ;;  %v3486_v50 = vld [vmem:[#allocation16 + $0x30] sm:$0xff]  ;;  %p3467_p4 = scmp.ge.s32.totalorder %s3470_s13, 8  }
 0xae0   : > { %v6339_v4 = vpack.c.bf16 %v3493_v1, %v3489_v63  ;;  %v3497_v7 = vld [vmem:[#allocation16 + $0x88] sm:$0xff]  ;;  %6336 = vmatprep.subr.bf16.mxu0 %v6335_v40  ;;  %v6341_v8 = vpack.c.bf16 %v3492_v6, %v3488_v5  ;;  %v3496_v9 = vld [vmem:[#allocation16 + $0x80] sm:$0xff]  ;;  %v6369_v14 = vpack.c.bf16 %v3486_v50, %v3482_v49  ;;  %6368 = vmatprep.subr.bf16.mxu1 %v6367_v48  ;;  %v3491_v57 = vld [vmem:[#allocation16 + $0x58] sm:$0xff]  ;;  %s8422_s16 = smov (%p3467_p4), 0  }
 0xae1   : > { %v3501_v39 = vld [vmem:[#allocation16 + $0xa8] sm:$0xff]  ;;  %6338 = vmatpush1.bf16.msra.mxu0 %v6337_v3  ;;  %v3500_v42 = vld [vmem:[#allocation16 + $0xa0] sm:$0xff]  ;;  %v3495_v19 = vld [vmem:[#allocation16 + $0x78] sm:$0xff] }
 0xae2   : > { %6340 = vmatprep.subr.bf16.mxu0 %v6339_v4  ;;  %v6343_v10 = vpack.c.bf16 %v3501_v39, %v3497_v7  ;;  %v3505_v17 = vld [vmem:[#allocation16 + $0xc8] sm:$0xff]  ;;  %v6345_v15 = vpack.c.bf16 %v3500_v42, %v3496_v9  ;;  %v3490_v20 = vld [vmem:[#allocation16 + $0x50] sm:$0xff]  ;;  %v3504_v26 = vld [vmem:[#allocation16 + $0xc0] sm:$0xff]  ;;  %6370 = vmatpush1.bf16.msra.mxu1 %v6369_v14  ;;  %v6371_v28 = vpack.c.bf16 %v3495_v19, %v3491_v57 }
 0xae3   : > { %v3509_v47 = vld [vmem:[#allocation16 + $0xe8] sm:$0xff]  ;;  %v3508_v27 = vld [vmem:[#allocation16 + $0xe0] sm:$0xff]  ;;  %v3494_v29 = vld [vmem:[#allocation16 + $0x70] sm:$0xff] }
 0xae4   : > { %v6347_v25 = vpack.c.bf16 %v3509_v47, %v3505_v17  ;;  %v3513_v30 = vld [vmem:[#allocation16 + $0x108] sm:$0xff]  ;;  %v6373_v32 = vpack.c.bf16 %v3494_v29, %v3490_v20  ;;  %v3499_v33 = vld [vmem:[#allocation16 + $0x98] sm:$0xff]  ;;  %6372 = vmatprep.subr.bf16.mxu1 %v6371_v28  ;;  %v3498_v35 = vld [vmem:[#allocation16 + $0x90] sm:$0xff]  ;;  %v6349_v13 = vpack.c.bf16 %v3508_v27, %v3504_v26 }
 0xae5   : > { %6342 = vmatpush1.bf16.msra.mxu0 %v6341_v8  ;;  %v3517_v31 = vld [vmem:[#allocation16 + $0x128] sm:$0xff]  ;;  %v3503_v34 = vld [vmem:[#allocation16 + $0xb8] sm:$0xff]  ;;  %v3502_v36 = vld [vmem:[#allocation16 + $0xb0] sm:$0xff] }
 0xae6   : > { %6344 = vmatprep.subr.bf16.mxu0 %v6343_v10  ;;  %v3512_v37 = vld [vmem:[#allocation16 + $0x100] sm:$0xff]  ;;  %v6375_v58 = vpack.c.bf16 %v3503_v34, %v3499_v33  ;;  %v6351_v41 = vpack.c.bf16 %v3517_v31, %v3513_v30  ;;  %6374 = vmatpush1.bf16.msra.mxu1 %v6373_v32  ;;  %v3521_v21 = vld [vmem:[#allocation16 + $0x148] sm:$0xff]  ;;  %v6377_v22 = vpack.c.bf16 %v3502_v36, %v3498_v35  ;;  %v3507_v23 = vld [vmem:[#allocation16 + $0xd8] sm:$0xff] }
 0xae7   : > { %v3516_v43 = vld [vmem:[#allocation16 + $0x120] sm:$0xff]  ;;  %v3511_v24 = vld [vmem:[#allocation16 + $0xf8] sm:$0xff]  ;;  %v3525_v44 = vld [vmem:[#allocation16 + $0x168] sm:$0xff] }
 0xae8   : > { %6376 = vmatprep.subr.bf16.mxu1 %v6375_v58  ;;  %v6379_v45 = vpack.c.bf16 %v3511_v24, %v3507_v23  ;;  %v3506_v46 = vld [vmem:[#allocation16 + $0xd0] sm:$0xff]  ;;  %v6353_v53 = vpack.c.bf16 %v3516_v43, %v3512_v37  ;;  %v3515_v61 = vld [vmem:[#allocation16 + $0x118] sm:$0xff]  ;;  %v6355_v60 = vpack.c.bf16 %v3525_v44, %v3521_v21  ;;  %v3520_v18 = vld [vmem:[#allocation16 + $0x140] sm:$0xff] }
 0xae9   : > { %6346 = vmatpush1.bf16.msra.mxu0 %v6345_v15  ;;  %v3510_v51 = vld [vmem:[#allocation16 + $0xf0] sm:$0xff]  ;;  %v3519_v59 = vld [vmem:[#allocation16 + $0x138] sm:$0xff]  ;;  %v3524_v40 = vld [vmem:[#allocation16 + $0x160] sm:$0xff] }
 0xaea   : > { %6348 = vmatprep.subr.bf16.mxu0 %v6347_v25  ;;  %6378 = vmatpush1.bf16.msra.mxu1 %v6377_v22  ;;  %v3529_v62 = vld [vmem:[#allocation16 + $0x188] sm:$0xff]  ;;  %v6381_v63 = vpack.c.bf16 %v3510_v51, %v3506_v46  ;;  %v6383_v2 = vpack.c.bf16 %v3519_v59, %v3515_v61  ;;  %v3514_v3 = vld [vmem:[#allocation16 + $0x110] sm:$0xff]  ;;  %v3523_v5 = vld [vmem:[#allocation16 + $0x158] sm:$0xff]  ;;  %v6357_v7 = vpack.c.bf16 %v3524_v40, %v3520_v18 }
 0xaeb   : > { %v3533_v1 = vld [vmem:[#allocation16 + $0x1a8] sm:$0xff]  ;;  %6380 = vmatprep.subr.bf16.mxu1 %v6379_v45  ;;  %v3518_v4 = vld [vmem:[#allocation16 + $0x130] sm:$0xff]  ;;  %v3527_v6 = vld [vmem:[#allocation16 + $0x178] sm:$0xff] }
 0xaec   : > { %v6359_v39 = vpack.c.bf16 %v3533_v1, %v3529_v62  ;;  %v3528_v8 = vld [vmem:[#allocation16 + $0x180] sm:$0xff]  ;;  %v3537_v42 = vld [vmem:[#allocation16 + $0x1c8] sm:$0xff]  ;;  %v6385_v10 = vpack.c.bf16 %v3518_v4, %v3514_v3  ;;  %v6387_v11 = vpack.c.bf16 %v3527_v6, %v3523_v5  ;;  %v3522_v12 = vld [vmem:[#allocation16 + $0x150] sm:$0xff] }
 0xaed   : > { %6350 = vmatpush1.bf16.msra.mxu0 %v6349_v13  ;;  %v3532_v9 = vld [vmem:[#allocation16 + $0x1a0] sm:$0xff]  ;;  %v3541_v17 = vld [vmem:[#allocation16 + $0x1e8] sm:$0xff]  ;;  %v3526_v47 = vld [vmem:[#allocation16 + $0x170] sm:$0xff] }
 0xaee   : > { %6352 = vmatprep.subr.bf16.mxu0 %v6351_v41  ;;  %6382 = vmatpush1.bf16.msra.mxu1 %v6381_v63  ;;  %v3531_v48 = vld [vmem:[#allocation16 + $0x198] sm:$0xff]  ;;  %v6361_v50 = vpack.c.bf16 %v3532_v9, %v3528_v8  ;;  %v6363_v14 = vpack.c.bf16 %v3541_v17, %v3537_v42  ;;  %v3536_v15 = vld [vmem:[#allocation16 + $0x1c0] sm:$0xff]  ;;  %v6389_v19 = vpack.c.bf16 %v3526_v47, %v3522_v12  ;;  %v3530_v25 = vld [vmem:[#allocation16 + $0x190] sm:$0xff] }
 0xaef   : > { %6384 = vmatprep.subr.bf16.mxu1 %v6383_v2  ;;  %v3535_v49 = vld [vmem:[#allocation16 + $0x1b8] sm:$0xff]  ;;  %v3540_v57 = vld [vmem:[#allocation16 + $0x1e0] sm:$0xff]  ;;  %v3534_v26 = vld [vmem:[#allocation16 + $0x1b0] sm:$0xff] }
 0xaf0   : > { %v6391_v20 = vpack.c.bf16 %v3535_v49, %v3531_v48  ;;  %v3539_v27 = vld [vmem:[#allocation16 + $0x1d8] sm:$0xff]  ;;  %v6365_v29 = vpack.c.bf16 %v3540_v57, %v3536_v15  ;;  %v6393_v30 = vpack.c.bf16 %v3534_v26, %v3530_v25  ;;  %v3538_v32 = vld [vmem:[#allocation16 + $0x1d0] sm:$0xff]  ;;  %v3478_v22 = vld [vmem:[%s3475_s4 + $0x10] sm:$0xff] }
 0xaf1   : > { %6354 = vmatpush1.bf16.msra.mxu0 %v6353_v53  ;;  %v3543_v28 = vld [vmem:[#allocation16 + $0x1f8] sm:$0xff]  ;;  %v3542_v33 = vld [vmem:[#allocation16 + $0x1f0] sm:$0xff]  ;;  %v3479_v45 = vld [vmem:[%s3475_s4 + $0x18] sm:$0xff] }
 0xaf2   : > { %6356 = vmatprep.subr.bf16.mxu0 %v6355_v60  ;;  %6386 = vmatpush1.bf16.msra.mxu1 %v6385_v10  ;;  %v6395_v31 = vpack.c.bf16 %v3543_v28, %v3539_v27  ;;  %v6397_v34 = vpack.c.bf16 %v3542_v33, %v3538_v32  ;;  %v3476_v35 = vld [vmem:[%s3475_s4] sm:$0xff]  ;;  %v3477_v36 = vld [vmem:[%s3475_s4 + $0x8] sm:$0xff]  ;;  %v3727_v5 = vld [vmem:[#allocation14 + $0x208] sm:$0xff] (%p3467_p4) }
 0xaf3   : > { %6388 = vmatprep.subr.bf16.mxu1 %v6387_v11  ;;  %v3731_v6 = vld [vmem:[#allocation14 + $0x228] sm:$0xff] (%p3467_p4)  ;;  %v3733_v8 = vld [vmem:[#allocation14 + $0x238] sm:$0xff] (%p3467_p4)  ;;  %v3726_v9 = vld [vmem:[#allocation14 + $0x200] sm:$0xff] (%p3467_p4) }
 0xaf4   :  { %v3730_v42 = vld [vmem:[#allocation14 + $0x220] sm:$0xff] (%p3467_p4)  ;;  %v3728_v11 = vld [vmem:[#allocation14 + $0x210] sm:$0xff] (%p3467_p4)  ;;  %v3735_v47 = vld [vmem:[#allocation14 + $0x248] sm:$0xff] (%p3467_p4) }
 0xaf5   : > { %6358 = vmatpush1.bf16.msra.mxu0 %v6357_v7  ;;  %v3729_v7 = vld [vmem:[#allocation14 + $0x218] sm:$0xff] (%p3467_p4)  ;;  %v6401_v17 = vpack.c.bf16 (%p3467_p4), %v3730_v42, %v3726_v9  ;;  %v3732_v12 = vld [vmem:[#allocation14 + $0x230] sm:$0xff] (%p3467_p4)  ;;  %v3739_v49 = vld [vmem:[#allocation14 + $0x268] sm:$0xff] (%p3467_p4) }
 0xaf6   : > { %6360 = vmatprep.subr.bf16.mxu0 %v6359_v39  ;;  %6390 = vmatpush1.bf16.msra.mxu1 %v6389_v19  ;;  %v6399_v39 = vpack.c.bf16 (%p3467_p4), %v3731_v6, %v3727_v5  ;;  %v6431_v10 = vpack.c.bf16 (%p3467_p4), %v3733_v8, %v3729_v7  ;;  %v6433_v48 = vpack.c.bf16 (%p3467_p4), %v3732_v12, %v3728_v11  ;;  %v3734_v57 = vld [vmem:[#allocation14 + $0x240] sm:$0xff] (%p3467_p4)  ;;  %v3740_v26 = vld [vmem:[#allocation14 + $0x270] sm:$0xff] (%p3467_p4)  ;;  %v3743_v27 = vld [vmem:[#allocation14 + $0x288] sm:$0xff] (%p3467_p4) }
 0xaf7   : > { %6392 = vmatprep.subr.bf16.mxu1 %v6391_v20  ;;  %v3738_v19 = vld [vmem:[#allocation14 + $0x260] sm:$0xff] (%p3467_p4)  ;;  %v3736_v20 = vld [vmem:[#allocation14 + $0x250] sm:$0xff] (%p3467_p4)  ;;  %v3747_v28 = vld [vmem:[#allocation14 + $0x2a8] sm:$0xff] (%p3467_p4) }
 0xaf8   :  { %v6405_v25 = vpack.c.bf16 (%p3467_p4), %v3738_v19, %v3734_v57  ;;  %v3749_v32 = vld [vmem:[#allocation14 + $0x2b8] sm:$0xff] (%p3467_p4)  ;;  %v3742_v33 = vld [vmem:[#allocation14 + $0x280] sm:$0xff] (%p3467_p4)  ;;  %v3771_v5 = vld [vmem:[#allocation14 + $0x368] sm:$0xff] (%p3467_p4) }
 0xaf9   : > { %6362 = vmatpush1.bf16.msra.mxu0 %v6361_v50  ;;  %v3737_v50 = vld [vmem:[#allocation14 + $0x258] sm:$0xff] (%p3467_p4)  ;;  %v3766_v42 = vld [vmem:[#allocation14 + $0x340] sm:$0xff] (%p3467_p4)  ;;  %v3772_v12 = vld [vmem:[#allocation14 + $0x370] sm:$0xff] (%p3467_p4) }
 0xafa   : > { %6364 = vmatprep.subr.bf16.mxu0 %v6363_v14  ;;  %6394 = vmatpush1.bf16.msra.mxu1 %v6393_v30  ;;  %v6403_v14 = vpack.c.bf16 (%p3467_p4), %v3739_v49, %v3735_v47  ;;  %v6407_v30 = vpack.c.bf16 (%p3467_p4), %v3747_v28, %v3743_v27  ;;  %v3769_v6 = vld [vmem:[#allocation14 + $0x358] sm:$0xff] (%p3467_p4)  ;;  %v3775_v47 = vld [vmem:[#allocation14 + $0x388] sm:$0xff] (%p3467_p4)  ;;  %v3774_v57 = vld [vmem:[#allocation14 + $0x380] sm:$0xff] (%p3467_p4) }
 0xafb   : > { %6396 = vmatprep.subr.bf16.mxu1 %v6395_v31  ;;  %v3745_v31 = vld [vmem:[#allocation14 + $0x298] sm:$0xff] (%p3467_p4)  ;;  %v3778_v19 = vld [vmem:[#allocation14 + $0x3a0] sm:$0xff] (%p3467_p4)  ;;  %v3783_v27 = vld [vmem:[#allocation14 + $0x3c8] sm:$0xff] (%p3467_p4) }
 0xafc   :  { %v3773_v7 = vld [vmem:[#allocation14 + $0x378] sm:$0xff] (%p3467_p4)  ;;  %v3787_v28 = vld [vmem:[#allocation14 + $0x3e8] sm:$0xff] (%p3467_p4) }
 0xafd   : > { %6366 = vmatpush1.bf16.msra.mxu0 %v6365_v29  ;;  %v6437_v29 = vpack.c.bf16 (%p3467_p4), %v3740_v26, %v3736_v20  ;;  %v6451_v11 = vpack.c.bf16 (%p3467_p4), %v3773_v7, %v3769_v6  ;;  %v3777_v49 = vld [vmem:[#allocation14 + $0x398] sm:$0xff] (%p3467_p4)  ;;  %v3776_v20 = vld [vmem:[#allocation14 + $0x390] sm:$0xff] (%p3467_p4) }
 0xafe   : > { %6398 = vmatpush1.bf16.msra.mxu1 %v6397_v34  ;;  %6400 = vmatprep.subr.bf16.mxu0 (%p3467_p4), %v6399_v39  ;;  %v6439_v34 = vpack.c.bf16 (%p3467_p4), %v3749_v32, %v3745_v31  ;;  %v3780_v26 = vld [vmem:[#allocation14 + $0x3b0] sm:$0xff] (%p3467_p4)  ;;  %v6425_v31 = vpack.c.bf16 (%p3467_p4), %v3778_v19, %v3774_v57 }
 0xaff   :  { %6432 = vmatprep.subr.bf16.mxu1 (%p3467_p4), %v6431_v10  ;;  %v3770_v10 = vld [vmem:[#allocation14 + $0x360] sm:$0xff] (%p3467_p4)  ;;  %v6457_v32 = vpack.c.bf16 (%p3467_p4), %v3780_v26, %v3776_v20 }
 0xb00   : > { %3609 = vmatmul.mubr.f32.vlgmr.msra.gmra.mrb[0].mxu0 %v7487_v38 }
 0xb01   : > { %3680 = vmatmul.mubr.f32.vlgmr.msra.gmra.mrb[0].mxu1 %v7487_v38  ;;  %3877 = vmatprep.mubr.f32.mxu0 (%p3467_p4), %v7542_v0 }
 0xb02   :  { %3990 = vmatprep.mubr.f32.mxu1 (%p3467_p4), %v7542_v0  ;;  %6402 = vmatpush1.bf16.msra.mxu0 (%p3467_p4), %v6401_v17  ;;  %v3768_v17 = vld [vmem:[#allocation14 + $0x350] sm:$0xff] (%p3467_p4) }
 0xb03   :  { %6434 = vmatpush1.bf16.msra.mxu1 (%p3467_p4), %v6433_v48  ;;  %6404 = vmatprep.subr.bf16.mxu0 (%p3467_p4), %v6403_v14  ;;  %v3779_v48 = vld [vmem:[#allocation14 + $0x3a8] sm:$0xff] (%p3467_p4)  ;;  %v6453_v14 = vpack.c.bf16 (%p3467_p4), %v3772_v12, %v3768_v17 }
 0xb06   :  { %6406 = vmatpush1.bf16.msra.mxu0 (%p3467_p4), %v6405_v25 }
 0xb07   :  { %6408 = vmatprep.subr.bf16.mxu0 (%p3467_p4), %v6407_v30  ;;  %v3789_v30 = vld [vmem:[#allocation14 + $0x3f8] sm:$0xff] (%p3467_p4) }
 0xbd3   : > { %v3610_v13 = vpop.f32.mrb[0].mxu0 }
 0xbd4   : > { %v3686_v37 = vadd.f32 %v3610_v13, %v3476_v35  ;;  %v3612_v43 = vpop.f32.mrb[1].mxu0  ;;  %v3681_v23 = vpop.f32.mrb[0].mxu1  ;;  %v3746_v35 = vld [vmem:[#allocation14 + $0x2a0] sm:$0xff] (%p3467_p4)  ;;  %v3748_v13 = vld [vmem:[#allocation14 + $0x2b0] sm:$0xff] (%p3467_p4) }
 0xbd5   : > { %v3687_v58 = vadd.f32 %v3612_v43, %v3477_v36  ;;  %v3683_v24 = vpop.f32.mrb[1].mxu1  ;;  %v3688_v44 = vadd.f32 %v3681_v23, %v3478_v22  ;;  %v3744_v36 = vld [vmem:[#allocation14 + $0x290] sm:$0xff] (%p3467_p4)  ;;  %v3751_v43 = vld [vmem:[#allocation14 + $0x2c8] sm:$0xff] (%p3467_p4)  ;;  %v3757_v23 = vld [vmem:[#allocation14 + $0x2f8] sm:$0xff] (%p3467_p4) }
 0xbd6   : > { %v5726_v41 = vmul.f32 -1.442695, %v3686_v37  ;;  %v3689_v51 = vadd.f32 %v3683_v24, %v3479_v45  ;;  %v6409_v37 = vpack.c.bf16 (%p3467_p4), %v3746_v35, %v3742_v33  ;;  %v3750_v24 = vld [vmem:[#allocation14 + $0x2c0] sm:$0xff] (%p3467_p4)  ;;  %v6427_v33 = vpack.c.bf16 (%p3467_p4), %v3787_v28, %v3783_v27 }
 0xbd7   : > { %v5727_v21 = vmul.f32 -1.442695, %v3687_v58  ;;  %v5728_v46 = vmul.f32 -1.442695, %v3688_v44  ;;  %v3755_v58 = vld [vmem:[#allocation14 + $0x2e8] sm:$0xff] (%p3467_p4)  ;;  %v3754_v44 = vld [vmem:[#allocation14 + $0x2e0] sm:$0xff] (%p3467_p4) }
 0xbd8   : > { %7063 = vpow2.f32 %v5726_v41  ;;  %v3753_v41 = vld [vmem:[#allocation14 + $0x2d8] sm:$0xff] (%p3467_p4)  ;;  %v6411_v22 = vpack.c.bf16 (%p3467_p4), %v3755_v58, %v3751_v43  ;;  %6410 = vmatpush1.bf16.msra.mxu0 (%p3467_p4), %v6409_v37  ;;  %v3786_v35 = vld [vmem:[#allocation14 + $0x3e0] sm:$0xff] (%p3467_p4)  ;;  %v3788_v37 = vld [vmem:[#allocation14 + $0x3f0] sm:$0xff] (%p3467_p4) }
 0xbd9   : > { %7065 = vpow2.f32 %v5727_v21  ;;  %v6441_v21 = vpack.c.bf16 (%p3467_p4), %v3748_v13, %v3744_v36  ;;  %v6443_v45 = vpack.c.bf16 (%p3467_p4), %v3757_v23, %v3753_v41  ;;  %v3784_v13 = vld [vmem:[#allocation14 + $0x3d0] sm:$0xff] (%p3467_p4) }
 0xbda   : > { %7067 = vpow2.f32 %v5728_v46  ;;  %v3752_v46 = vld [vmem:[#allocation14 + $0x2d0] sm:$0xff] (%p3467_p4)  ;;  %6412 = vmatprep.subr.bf16.mxu0 (%p3467_p4), %v6411_v22  ;;  %v6461_v58 = vpack.c.bf16 (%p3467_p4), %v3788_v37, %v3784_v13 }
 0xbdb   : > { %7069 = vtanh.f32 %v3689_v51  ;;  %v3756_v51 = vld [vmem:[#allocation14 + $0x2f0] sm:$0xff] (%p3467_p4) }
 0xbe2   : > { %v7064_v38 = vpop.eup %7063 }
 0xbe3   : > { %v7066_v53 = vpop.eup %7065  ;;  %v3699_v61 = vadd.f32 1.0, %v7064_v38 }
 0xbe4   : > { %v3700_v59 = vadd.f32 1.0, %v7066_v53  ;;  %v7068_v60 = vpop.eup %7067  ;;  %v3763_v53 = vld [vmem:[#allocation14 + $0x328] sm:$0xff] (%p3467_p4) }
 0xbe5   : > { %7071 = vrcp.f32 %v3699_v61  ;;  %v7070_v18 = vpop.eup %7069  ;;  %v3701_v62 = vadd.f32 1.0, %v7068_v60  ;;  %v3761_v61 = vld [vmem:[#allocation14 + $0x318] sm:$0xff] (%p3467_p4)  ;;  %v6413_v60 = vpack.c.bf16 (%p3467_p4), %v3754_v44, %v3750_v24 }
 0xbe6   : > { %7073 = vrcp.f32 %v3700_v59  ;;  %v3765_v59 = vld [vmem:[#allocation14 + $0x338] sm:$0xff] (%p3467_p4) }
 0xbe7   : > { %7075 = vrcp.f32 %v3701_v62  ;;  %v3758_v62 = vld [vmem:[#allocation14 + $0x300] sm:$0xff] (%p3467_p4)  ;;  %6414 = vmatpush1.bf16.msra.mxu0 (%p3467_p4), %v6413_v60 }
 0xbef   : > { %v7072_v40 = vpop.eup %7071 }
 0xbf0   : > { %v7074_v63 = vpop.eup %7073  ;;  %v3710_v1 = vmul.f32 %v7072_v40, %v7070_v18  ;;  %v6445_v18 = vpack.c.bf16 (%p3467_p4), %v3756_v51, %v3752_v46  ;;  %v8365_v51 = vld [vmem:[#allocation2 + $0x8] sm:$0xff] (%p3467_p4)  }
 0xbf1   : > { %v3709_v2 = vmul.f32 %v7483_v16, %v7074_v63  ;;  %v7076_v3 = vpop.eup %7075  ;;  %v3762_v63 = vld [vmem:[#allocation14 + $0x320] sm:$0xff] (%p3467_p4) }
 0xbf2   :  { %v6417_v39 = vpack.c.bf16 (%p3467_p4), %v3762_v63, %v3758_v62 }
 0xbf3   : > { %v3711_v16 = vadd.f32 %v3710_v1, %v3709_v2   ;;  %v3760_v1 = vld [vmem:[#allocation14 + $0x310] sm:$0xff] (%p3467_p4)  ;;  %v6447_v2 = vpack.c.bf16 (%p3467_p4), %v3765_v59, %v3761_v61 }
 0xbf5   : > { %7077 = vtanh.f32 %v3711_v16  ;;  %v3741_v16 = vld [vmem:[#allocation14 + $0x278] sm:$0xff] (%p3467_p4) }
 0xbf6   :  { %v6435_v15 = vpack.c.bf16 (%p3467_p4), %v3741_v16, %v3737_v50  ;;  %v3781_v50 = vld [vmem:[#allocation14 + $0x3b8] sm:$0xff] (%p3467_p4)  ;;  %v6421_v16 = vpack.c.bf16 (%p3467_p4), %v3770_v10, %v3766_v42 }
 0xbf7   :  { %v6455_v25 = vpack.c.bf16 (%p3467_p4), %v3781_v50, %v3777_v49 }
 0xbf8   :  { %6436 = vmatprep.subr.bf16.mxu1 (%p3467_p4), %v6435_v15  ;;  %v6423_v15 = vpack.c.bf16 (%p3467_p4), %v3779_v48, %v3775_v47 }
 0xbf9   :  { %6438 = vmatpush1.bf16.msra.mxu1 (%p3467_p4), %v6437_v29  ;;  %v3785_v29 = vld [vmem:[#allocation14 + $0x3d8] sm:$0xff] (%p3467_p4) }
 0xbfa   :  { %6440 = vmatprep.subr.bf16.mxu1 (%p3467_p4), %v6439_v34  ;;  %v3782_v34 = vld [vmem:[#allocation14 + $0x3c0] sm:$0xff] (%p3467_p4)  ;;  %v6459_v36 = vpack.c.bf16 (%p3467_p4), %v3789_v30, %v3785_v29 }
 0xbfb   :  { %v6429_v43 = vpack.c.bf16 (%p3467_p4), %v3786_v35, %v3782_v34 }
 0xbfc   :  { %3469 = sbr.rel (!%p3467_p4) target bundleno = 2780 (0xadc), region = 228 }
 0xbfd   :  { %6442 = vmatpush1.bf16.msra.mxu1 (%p3467_p4), %v6441_v21 }
 0xbfe   :  { %6444 = vmatprep.subr.bf16.mxu1 (%p3467_p4), %v6443_v45 }
 0xbff   : > { %v7078_v4 = vpop.eup %7077 }
 0xc00   : > { %v3713_v38 = vmul.f32 %v7078_v4, %v7076_v3   ;;  %v3764_v3 = vld [vmem:[#allocation14 + $0x330] sm:$0xff] (%p3467_p4)  ;;  %v3767_v4 = vld [vmem:[#allocation14 + $0x348] sm:$0xff] (%p3467_p4) }
 0xc01   :  { %6446 = vmatpush1.bf16.msra.mxu1 (%p3467_p4), %v6445_v18  ;;  %v6449_v8 = vpack.c.bf16 (%p3467_p4), %v3764_v3, %v3760_v1  ;;  %v6419_v9 = vpack.c.bf16 (%p3467_p4), %v3771_v5, %v3767_v4 }
 0xc02   : > { %3716 = vst [vmem:[%s3715_s6] sm:$0xff] %v3713_v38  ;;  %v3759_v38 = vld [vmem:[#allocation14 + $0x308] sm:$0xff] (%p3467_p4)  ;;  %6448 = vmatprep.subr.bf16.mxu1 (%p3467_p4), %v6447_v2 }
 0xc03   :  { %v6415_v40 = vpack.c.bf16 %v3763_v53, %v3759_v38  ;;  %v8367_v38 = vld [vmem:[#allocation3 + $0x8] sm:$0xff]   ;;  %v5730_v53 = vld [vmem:[%s8681_s7 + $0x4] sm:$0xf] }
 0xc04   :  { %v8373_v61 = vrot.slane %v5730_v53, %v7737_v52  ;;  %v8376_v59 = vrot.slane %v5730_v53, %v7739_v54  ;;  %v8379_v60 = vrot.slane %v5730_v53, %v7741_v55  ;;  %v8382_v18 = vrot.slane %v5730_v53, %v7743_v56 }
 0xc05   :  { %6416 = vmatprep.subr.bf16.mxu0 %v6415_v40  ;;  %6450 = vmatpush1.bf16.msra.mxu1 %v6449_v8 }
 0xc06   :  { %6418 = vmatpush1.bf16.msra.mxu0 %v6417_v39  ;;  %6452 = vmatprep.subr.bf16.mxu1 %v6451_v11 }
 0xc07   :  { %6420 = vmatprep.subr.bf16.mxu0 %v6419_v9 }
 0xc09   :  { %6454 = vmatpush1.bf16.msra.mxu1 %v6453_v14  ;;  %v3717_v41 = vld [vmem:[#allocation18] sm:$0xff]  ;;  %v3718_v21 = vld [vmem:[#allocation18 + $0x8] sm:$0xff]  ;;  %v3719_v22 = vld [vmem:[#allocation18 + $0x10] sm:$0xff] }
 0xc0a   :  { %6422 = vmatpush1.bf16.msra.mxu0 %v6421_v16  ;;  %6456 = vmatprep.subr.bf16.mxu1 %v6455_v25  ;;  %v3720_v23 = vld [vmem:[#allocation18 + $0x18] sm:$0xff]  ;;  %v3721_v24 = vld [vmem:[#allocation18 + $0x20] sm:$0xff]  ;;  %v3722_v44 = vld [vmem:[#allocation18 + $0x28] sm:$0xff] }
 0xc0b   :  { %6424 = vmatprep.subr.bf16.mxu0 %v6423_v15  ;;  %v3723_v45 = vld [vmem:[#allocation18 + $0x30] sm:$0xff]  ;;  %v3724_v46 = vld [vmem:[#allocation18 + $0x38] sm:$0xff] }
 0xc0d   :  { %6458 = vmatpush1.bf16.msra.mxu1 %v6457_v32 }
 0xc0e   :  { %6426 = vmatpush1.bf16.msra.mxu0 %v6425_v31  ;;  %6460 = vmatprep.subr.bf16.mxu1 %v6459_v36 }
 0xc0f   :  { %6428 = vmatprep.subr.bf16.mxu0 %v6427_v33 }
 0xc11   :  { %6462 = vmatpush1.bf16.msra.mxu1 %v6461_v58 }
 0xc12   :  { %6430 = vmatpush1.bf16.msra.mxu0 %v6429_v43 }
 0xc14   :  { %3991 = vmatmul.mubr.f32.vlgmr.msra.gmra.mrb[0].mxu1 %v3717_v41 }
 0xc15   :  { %3878 = vmatmul.mubr.f32.vlgmr.msra.gmra.mrb[0].mxu0 %v3717_v41  ;;  %3996 = vmatprep.mubr.f32.mxu1 %v7542_v0 }
 0xc16   :  { %3883 = vmatprep.mubr.f32.mxu0 %v7542_v0 }
 0xc18   :  { %3997 = vmatmul.mubr.f32.gmra.mrb[2].mxu1 %v3718_v21 }
 0xc19   :  { %3884 = vmatmul.mubr.f32.gmra.mrb[2].mxu0 %v3718_v21  ;;  %4002 = vmatprep.mubr.f32.mxu1 %v7542_v0 }
 0xc1a   :  { %3889 = vmatprep.mubr.f32.mxu0 %v7542_v0 }
 0xc1c   :  { %4003 = vmatmul.mubr.f32.gmra.mrb[4].mxu1 %v3719_v22 }
 0xc1d   :  { %3890 = vmatmul.mubr.f32.gmra.mrb[4].mxu0 %v3719_v22  ;;  %4008 = vmatprep.mubr.f32.mxu1 %v7542_v0 }
 0xc1e   :  { %3895 = vmatprep.mubr.f32.mxu0 %v7542_v0 }
 0xc20   :  { %4009 = vmatmul.mubr.f32.gmra.mrb[6].mxu1 %v3720_v23 }
 0xc21   :  { %3896 = vmatmul.mubr.f32.gmra.mrb[6].mxu0 %v3720_v23  ;;  %4014 = vmatprep.mubr.f32.mxu1 %v7542_v0 }
 0xc22   :  { %3901 = vmatprep.mubr.f32.mxu0 %v7542_v0 }
 0xc24   :  { %4015 = vmatmul.mubr.f32.gmra.mrb[8].mxu1 %v3721_v24 }
 0xc25   :  { %3902 = vmatmul.mubr.f32.gmra.mrb[8].mxu0 %v3721_v24  ;;  %4020 = vmatprep.mubr.f32.mxu1 %v7542_v0 }
 0xc26   :  { %3907 = vmatprep.mubr.f32.mxu0 %v7542_v0 }
 0xc28   :  { %4021 = vmatmul.mubr.f32.gmra.mrb[10].mxu1 %v3722_v44 }
 0xc29   :  { %3908 = vmatmul.mubr.f32.gmra.mrb[10].mxu0 %v3722_v44  ;;  %4026 = vmatprep.mubr.f32.mxu1 %v7542_v0 }
 0xc2a   :  { %3913 = vmatprep.mubr.f32.mxu0 %v7542_v0 }
 0xc2c   :  { %4027 = vmatmul.mubr.f32.gmra.mrb[12].mxu1 %v3723_v45 }
 0xc2d   :  { %3914 = vmatmul.mubr.f32.gmra.mrb[12].mxu0 %v3723_v45  ;;  %4032 = vmatprep.mubr.f32.mxu1 %v7542_v0 }
 0xc2e   :  { %3919 = vmatprep.mubr.f32.mxu0 %v7542_v0 }
 0xc30   :  { %4033 = vmatmul.mubr.f32.gmra.mrb[14].mxu1 %v3724_v46 }
 0xc31   :  { %3920 = vmatmul.mubr.f32.gmra.mrb[14].mxu0 %v3724_v46 }
 0xce7   :  { %v3992_v63 = vpop.f32.mrb[0].mxu1 }
 0xce8   :  { %v3879_v40 = vpop.f32.mrb[0].mxu0  ;;  %v3993_v2 = vadd.f32 %v3992_v63, %v8376_v59  ;;  %v3994_v4 = vpop.f32.mrb[1].mxu1 }
 0xce9   :  { %v3880_v62 = vadd.f32 %v3879_v40, %v8373_v61  ;;  %v3881_v1 = vpop.f32.mrb[1].mxu0  ;;  %v3995_v5 = vadd.f32 %v3994_v4, %v8382_v18 }
 0xcea   :  { %v3882_v3 = vadd.f32 %v3881_v1, %v8379_v60  ;;  %4041 = vst [vmem:[#allocation4 + $0x10] sm:$0xff] %v3993_v2 }
 0xceb   :  { %4039 = vst [vmem:[#allocation4] sm:$0xff] %v3880_v62  ;;  %4042 = vst [vmem:[#allocation4 + $0x18] sm:$0xff] %v3995_v5  ;;  %v3998_v39 = vpop.f32.mrb[2].mxu1 }
 0xcec   :  { %4040 = vst [vmem:[#allocation4 + $0x8] sm:$0xff] %v3882_v3  ;;  %v3885_v6 = vpop.f32.mrb[2].mxu0  ;;  %v3999_v9 = vadd.f32 %v3998_v39, %v8376_v59  ;;  %v4000_v10 = vpop.f32.mrb[3].mxu1 }
 0xced   :  { %v3886_v7 = vadd.f32 %v3885_v6, %v8373_v61  ;;  %v3887_v8 = vpop.f32.mrb[3].mxu0  ;;  %v4001_v17 = vadd.f32 %v4000_v10, %v8382_v18 }
 0xcee   :  { %v3888_v42 = vadd.f32 %v3887_v8, %v8379_v60  ;;  %4045 = vst [vmem:[#allocation4 + $0x30] sm:$0xff] %v3999_v9 }
 0xcef   :  { %4043 = vst [vmem:[#allocation4 + $0x20] sm:$0xff] %v3886_v7  ;;  %4046 = vst [vmem:[#allocation4 + $0x38] sm:$0xff] %v4001_v17  ;;  %v4004_v47 = vpop.f32.mrb[4].mxu1 }
 0xcf0   :  { %4044 = vst [vmem:[#allocation4 + $0x28] sm:$0xff] %v3888_v42  ;;  %v3891_v11 = vpop.f32.mrb[4].mxu0  ;;  %v4005_v49 = vadd.f32 %v4004_v47, %v8376_v59  ;;  %v4006_v16 = vpop.f32.mrb[5].mxu1 }
 0xcf1   :  { %v3892_v12 = vadd.f32 %v3891_v11, %v8373_v61  ;;  %v3893_v48 = vpop.f32.mrb[5].mxu0  ;;  %v4007_v14 = vadd.f32 %v4006_v16, %v8382_v18 }
 0xcf2   :  { %v3894_v50 = vadd.f32 %v3893_v48, %v8379_v60  ;;  %4049 = vst [vmem:[#allocation4 + $0x50] sm:$0xff] %v4005_v49 }
 0xcf3   :  { %4047 = vst [vmem:[#allocation4 + $0x40] sm:$0xff] %v3892_v12  ;;  %4050 = vst [vmem:[#allocation4 + $0x58] sm:$0xff] %v4007_v14  ;;  %v4010_v19 = vpop.f32.mrb[6].mxu1 }
 0xcf4   :  { %4048 = vst [vmem:[#allocation4 + $0x48] sm:$0xff] %v3894_v50  ;;  %v3897_v15 = vpop.f32.mrb[6].mxu0  ;;  %v4011_v25 = vadd.f32 %v4010_v19, %v8376_v59  ;;  %v4012_v27 = vpop.f32.mrb[7].mxu1 }
 0xcf5   :  { %v3898_v57 = vadd.f32 %v3897_v15, %v8373_v61  ;;  %v3899_v20 = vpop.f32.mrb[7].mxu0  ;;  %v4013_v28 = vadd.f32 %v4012_v27, %v8382_v18 }
 0xcf6   :  { %v3900_v26 = vadd.f32 %v3899_v20, %v8379_v60  ;;  %4053 = vst [vmem:[#allocation4 + $0x70] sm:$0xff] %v4011_v25 }
 0xcf7   :  { %4051 = vst [vmem:[#allocation4 + $0x60] sm:$0xff] %v3898_v57  ;;  %4054 = vst [vmem:[#allocation4 + $0x78] sm:$0xff] %v4013_v28  ;;  %v4016_v31 = vpop.f32.mrb[8].mxu1 }
 0xcf8   :  { %4052 = vst [vmem:[#allocation4 + $0x68] sm:$0xff] %v3900_v26  ;;  %v3903_v29 = vpop.f32.mrb[8].mxu0  ;;  %v4017_v33 = vadd.f32 %v4016_v31, %v8376_v59  ;;  %v4018_v35 = vpop.f32.mrb[9].mxu1 }
 0xcf9   :  { %v3904_v30 = vadd.f32 %v3903_v29, %v8373_v61  ;;  %v3905_v32 = vpop.f32.mrb[9].mxu0  ;;  %v4019_v36 = vadd.f32 %v4018_v35, %v8382_v18 }
 0xcfa   :  { %v3906_v34 = vadd.f32 %v3905_v32, %v8379_v60  ;;  %4057 = vst [vmem:[#allocation4 + $0x90] sm:$0xff] %v4017_v33 }
 0xcfb   :  { %4055 = vst [vmem:[#allocation4 + $0x80] sm:$0xff] %v3904_v30  ;;  %4058 = vst [vmem:[#allocation4 + $0x98] sm:$0xff] %v4019_v36  ;;  %v4022_v43 = vpop.f32.mrb[10].mxu1 }
 0xcfc   :  { %4056 = vst [vmem:[#allocation4 + $0x88] sm:$0xff] %v3906_v34  ;;  %v3909_v13 = vpop.f32.mrb[10].mxu0  ;;  %v4023_v41 = vadd.f32 %v4022_v43, %v8376_v59  ;;  %v4024_v22 = vpop.f32.mrb[11].mxu1 }
 0xcfd   :  { %v3910_v37 = vadd.f32 %v3909_v13, %v8373_v61  ;;  %v3911_v58 = vpop.f32.mrb[11].mxu0  ;;  %v4025_v23 = vadd.f32 %v4024_v22, %v8382_v18 }
 0xcfe   :  { %v3912_v21 = vadd.f32 %v3911_v58, %v8379_v60  ;;  %4061 = vst [vmem:[#allocation4 + $0xb0] sm:$0xff] %v4023_v41 }
 0xcff   :  { %4059 = vst [vmem:[#allocation4 + $0xa0] sm:$0xff] %v3910_v37  ;;  %4062 = vst [vmem:[#allocation4 + $0xb8] sm:$0xff] %v4025_v23  ;;  %v4028_v45 = vpop.f32.mrb[12].mxu1 }
 0xd00   :  { %4060 = vst [vmem:[#allocation4 + $0xa8] sm:$0xff] %v3912_v21  ;;  %v3915_v24 = vpop.f32.mrb[12].mxu0  ;;  %v4029_v53 = vadd.f32 %v4028_v45, %v8376_v59  ;;  %v4030_v62 = vpop.f32.mrb[13].mxu1 }
 0xd01   :  { %v3916_v44 = vadd.f32 %v3915_v24, %v8373_v61  ;;  %v3917_v46 = vpop.f32.mrb[13].mxu0  ;;  %v4031_v63 = vadd.f32 %v4030_v62, %v8382_v18 }
 0xd02   :  { %v3918_v40 = vadd.f32 %v3917_v46, %v8379_v60  ;;  %4065 = vst [vmem:[#allocation4 + $0xd0] sm:$0xff] %v4029_v53 }
 0xd03   :  { %4063 = vst [vmem:[#allocation4 + $0xc0] sm:$0xff] %v3916_v44  ;;  %4066 = vst [vmem:[#allocation4 + $0xd8] sm:$0xff] %v4031_v63  ;;  %v4034_v3 = vpop.f32.mrb[14].mxu1 }
 0xd04   :  { %4064 = vst [vmem:[#allocation4 + $0xc8] sm:$0xff] %v3918_v40  ;;  %v3921_v1 = vpop.f32.mrb[14].mxu0  ;;  %v4035_v5 = vadd.f32 %v4034_v3, %v8376_v59  ;;  %v4036_v7 = vpop.f32.mrb[15].mxu1 }
 0xd05   :  { %v3922_v2 = vadd.f32 %v3921_v1, %v8373_v61  ;;  %v3923_v4 = vpop.f32.mrb[15].mxu0  ;;  %v4037_v39 = vadd.f32 %v4036_v7, %v8382_v18 }
 0xd06   :  { %v3924_v6 = vadd.f32 %v3923_v4, %v8379_v60  ;;  %4069 = vst [vmem:[#allocation4 + $0xf0] sm:$0xff] %v4035_v5 }
 0xd07   :  { %4067 = vst [vmem:[#allocation4 + $0xe0] sm:$0xff] %v3922_v2  ;;  %4070 = vst [vmem:[#allocation4 + $0xf8] sm:$0xff] %v4037_v39 }
 0xd08   :  { %4068 = vst [vmem:[#allocation4 + $0xe8] sm:$0xff] %v3924_v6 }
 0xd09 LB: > { %v4090_v61 = vld [vmem:[#allocation16 + $0x208] sm:$0xff]  ;;  %v4089_v60 = vld [vmem:[#allocation16 + $0x200] sm:$0xff]  ;;  %v7548_v10 = vmov 0.0   ;;  %v4092_v19 = vld [vmem:[#allocation16 + $0x218] sm:$0xff]  ;;  %s5756_s17 = sshll.u32 %s7503_s16, 5  ;;  %s5736_s21 = sshll.u32 %s7503_s16, 3  ;;  %s7503_s16 = sphi %s8422_s16, %s4078_s16   ;;  %v7499_v51 = vphi %v8365_v51, %v4322_v51   ;;  %v7495_v38 = vphi %v8367_v38, %v4320_v38  }
 0xd0a   : > { %v4094_v59 = vld [vmem:[#allocation16 + $0x228] sm:$0xff]  ;;  %v4093_v8 = vld [vmem:[#allocation16 + $0x220] sm:$0xff]  ;;  %4217 = vmatprep.mubr.f32.mxu0 %v7548_v10  ;;  %4288 = vmatprep.mubr.f32.mxu1 %v7548_v10  ;;  %v4096_v20 = vld [vmem:[#allocation16 + $0x238] sm:$0xff]  ;;  %s4083_s18 = scalar_lea.vmem [#allocation4], %s5756_s17  ;;  %s4324_s5 = scalar_lea.vmem [#allocation18], %s5736_s21 }
 0xd0b   : > { %v6463_v18 = vpack.c.bf16 %v4094_v59, %v4090_v61  ;;  %v4098_v9 = vld [vmem:[#allocation16 + $0x248] sm:$0xff]  ;;  %v6465_v17 = vpack.c.bf16 %v4093_v8, %v4089_v60  ;;  %v4097_v12 = vld [vmem:[#allocation16 + $0x240] sm:$0xff]  ;;  %v6495_v26 = vpack.c.bf16 %v4096_v20, %v4092_v19  ;;  %v4091_v27 = vld [vmem:[#allocation16 + $0x210] sm:$0xff]  ;;  %s4078_s16 = sadd.s32 1, %s7503_s16  }
 0xd0c   : > { %v4102_v42 = vld [vmem:[#allocation16 + $0x268] sm:$0xff]  ;;  %v4101_v47 = vld [vmem:[#allocation16 + $0x260] sm:$0xff]  ;;  %v4095_v28 = vld [vmem:[#allocation16 + $0x230] sm:$0xff]  ;;  %p4075_p5 = scmp.ge.s32.totalorder %s4078_s16, 8  }
 0xd0d   : > { %v6467_v11 = vpack.c.bf16 %v4102_v42, %v4098_v9  ;;  %v4106_v48 = vld [vmem:[#allocation16 + $0x288] sm:$0xff]  ;;  %6464 = vmatprep.subr.bf16.mxu0 %v6463_v18  ;;  %v6469_v50 = vpack.c.bf16 %v4101_v47, %v4097_v12  ;;  %v4105_v16 = vld [vmem:[#allocation16 + $0x280] sm:$0xff]  ;;  %v6497_v29 = vpack.c.bf16 %v4095_v28, %v4091_v27  ;;  %6496 = vmatprep.subr.bf16.mxu1 %v6495_v26  ;;  %v4100_v31 = vld [vmem:[#allocation16 + $0x258] sm:$0xff]  ;;  %s8518_s2 = smov (%p4075_p5), 0  }
 0xd0e   : > { %v4110_v49 = vld [vmem:[#allocation16 + $0x2a8] sm:$0xff]  ;;  %6466 = vmatpush1.bf16.msra.mxu0 %v6465_v17  ;;  %v4109_v14 = vld [vmem:[#allocation16 + $0x2a0] sm:$0xff]  ;;  %v4104_v32 = vld [vmem:[#allocation16 + $0x278] sm:$0xff] }
 0xd0f   : > { %6468 = vmatprep.subr.bf16.mxu0 %v6467_v11  ;;  %v6471_v15 = vpack.c.bf16 %v4110_v49, %v4106_v48  ;;  %v4114_v57 = vld [vmem:[#allocation16 + $0x2c8] sm:$0xff]  ;;  %v6473_v30 = vpack.c.bf16 %v4109_v14, %v4105_v16  ;;  %v4099_v33 = vld [vmem:[#allocation16 + $0x250] sm:$0xff]  ;;  %v4113_v35 = vld [vmem:[#allocation16 + $0x2c0] sm:$0xff]  ;;  %6498 = vmatpush1.bf16.msra.mxu1 %v6497_v29  ;;  %v6499_v13 = vpack.c.bf16 %v4104_v32, %v4100_v31 }
 0xd10   : > { %v4118_v25 = vld [vmem:[#allocation16 + $0x2e8] sm:$0xff]  ;;  %v4117_v36 = vld [vmem:[#allocation16 + $0x2e0] sm:$0xff]  ;;  %v4103_v37 = vld [vmem:[#allocation16 + $0x270] sm:$0xff] }
 0xd11   : > { %v6475_v34 = vpack.c.bf16 %v4118_v25, %v4114_v57  ;;  %v4122_v43 = vld [vmem:[#allocation16 + $0x308] sm:$0xff]  ;;  %v6501_v41 = vpack.c.bf16 %v4103_v37, %v4099_v33  ;;  %v4108_v21 = vld [vmem:[#allocation16 + $0x298] sm:$0xff]  ;;  %6500 = vmatprep.subr.bf16.mxu1 %v6499_v13  ;;  %v4107_v23 = vld [vmem:[#allocation16 + $0x290] sm:$0xff]  ;;  %v6477_v44 = vpack.c.bf16 %v4117_v36, %v4113_v35 }
 0xd12   : > { %6470 = vmatpush1.bf16.msra.mxu0 %v6469_v50  ;;  %v4126_v58 = vld [vmem:[#allocation16 + $0x328] sm:$0xff]  ;;  %v4112_v22 = vld [vmem:[#allocation16 + $0x2b8] sm:$0xff]  ;;  %v4111_v24 = vld [vmem:[#allocation16 + $0x2b0] sm:$0xff] }
 0xd13   : > { %6472 = vmatprep.subr.bf16.mxu0 %v6471_v15  ;;  %v4121_v45 = vld [vmem:[#allocation16 + $0x300] sm:$0xff]  ;;  %v6503_v53 = vpack.c.bf16 %v4112_v22, %v4108_v21  ;;  %v6479_v40 = vpack.c.bf16 %v4126_v58, %v4122_v43  ;;  %6502 = vmatpush1.bf16.msra.mxu1 %v6501_v41  ;;  %v4130_v62 = vld [vmem:[#allocation16 + $0x348] sm:$0xff]  ;;  %v6505_v63 = vpack.c.bf16 %v4111_v24, %v4107_v23  ;;  %v4116_v1 = vld [vmem:[#allocation16 + $0x2d8] sm:$0xff] }
 0xd14   : > { %v4125_v46 = vld [vmem:[#allocation16 + $0x320] sm:$0xff]  ;;  %v4120_v2 = vld [vmem:[#allocation16 + $0x2f8] sm:$0xff]  ;;  %v4134_v3 = vld [vmem:[#allocation16 + $0x368] sm:$0xff] }
 0xd15   : > { %6504 = vmatprep.subr.bf16.mxu1 %v6503_v53  ;;  %v6507_v4 = vpack.c.bf16 %v4120_v2, %v4116_v1  ;;  %v4115_v5 = vld [vmem:[#allocation16 + $0x2d0] sm:$0xff]  ;;  %v6481_v7 = vpack.c.bf16 %v4125_v46, %v4121_v45  ;;  %v4124_v39 = vld [vmem:[#allocation16 + $0x318] sm:$0xff]  ;;  %v6483_v59 = vpack.c.bf16 %v4134_v3, %v4130_v62  ;;  %v4129_v60 = vld [vmem:[#allocation16 + $0x340] sm:$0xff] }
 0xd16   : > { %6474 = vmatpush1.bf16.msra.mxu0 %v6473_v30  ;;  %v4119_v6 = vld [vmem:[#allocation16 + $0x2f0] sm:$0xff]  ;;  %v4128_v61 = vld [vmem:[#allocation16 + $0x338] sm:$0xff]  ;;  %v4133_v18 = vld [vmem:[#allocation16 + $0x360] sm:$0xff] }
 0xd17   : > { %6476 = vmatprep.subr.bf16.mxu0 %v6475_v34  ;;  %6506 = vmatpush1.bf16.msra.mxu1 %v6505_v63  ;;  %v4138_v8 = vld [vmem:[#allocation16 + $0x388] sm:$0xff]  ;;  %v6509_v9 = vpack.c.bf16 %v4119_v6, %v4115_v5  ;;  %v6511_v10 = vpack.c.bf16 %v4128_v61, %v4124_v39  ;;  %v4123_v17 = vld [vmem:[#allocation16 + $0x310] sm:$0xff]  ;;  %v4132_v12 = vld [vmem:[#allocation16 + $0x358] sm:$0xff]  ;;  %v6485_v48 = vpack.c.bf16 %v4133_v18, %v4129_v60 }
 0xd18   : > { %v4142_v42 = vld [vmem:[#allocation16 + $0x3a8] sm:$0xff]  ;;  %6508 = vmatprep.subr.bf16.mxu1 %v6507_v4  ;;  %v4127_v11 = vld [vmem:[#allocation16 + $0x330] sm:$0xff]  ;;  %v4136_v47 = vld [vmem:[#allocation16 + $0x378] sm:$0xff] }
 0xd19   : > { %v6487_v49 = vpack.c.bf16 %v4142_v42, %v4138_v8  ;;  %v4137_v50 = vld [vmem:[#allocation16 + $0x380] sm:$0xff]  ;;  %v4146_v14 = vld [vmem:[#allocation16 + $0x3c8] sm:$0xff]  ;;  %v6513_v15 = vpack.c.bf16 %v4127_v11, %v4123_v17  ;;  %v6515_v19 = vpack.c.bf16 %v4136_v47, %v4132_v12  ;;  %v4131_v20 = vld [vmem:[#allocation16 + $0x350] sm:$0xff] }
 0xd1a   : > { %6478 = vmatpush1.bf16.msra.mxu0 %v6477_v44  ;;  %v4141_v16 = vld [vmem:[#allocation16 + $0x3a0] sm:$0xff]  ;;  %v4150_v57 = vld [vmem:[#allocation16 + $0x3e8] sm:$0xff]  ;;  %v4135_v25 = vld [vmem:[#allocation16 + $0x370] sm:$0xff] }
 0xd1b   : > { %6480 = vmatprep.subr.bf16.mxu0 %v6479_v40  ;;  %6510 = vmatpush1.bf16.msra.mxu1 %v6509_v9  ;;  %v4140_v26 = vld [vmem:[#allocation16 + $0x398] sm:$0xff]  ;;  %v6489_v28 = vpack.c.bf16 %v4141_v16, %v4137_v50  ;;  %v6491_v29 = vpack.c.bf16 %v4150_v57, %v4146_v14  ;;  %v4145_v30 = vld [vmem:[#allocation16 + $0x3c0] sm:$0xff]  ;;  %v6517_v32 = vpack.c.bf16 %v4135_v25, %v4131_v20  ;;  %v4139_v34 = vld [vmem:[#allocation16 + $0x390] sm:$0xff] }
 0xd1c   : > { %6512 = vmatprep.subr.bf16.mxu1 %v6511_v10  ;;  %v4144_v27 = vld [vmem:[#allocation16 + $0x3b8] sm:$0xff]  ;;  %v4149_v31 = vld [vmem:[#allocation16 + $0x3e0] sm:$0xff]  ;;  %v4143_v35 = vld [vmem:[#allocation16 + $0x3b0] sm:$0xff] }
 0xd1d   : > { %v6519_v33 = vpack.c.bf16 %v4144_v27, %v4140_v26  ;;  %v4148_v36 = vld [vmem:[#allocation16 + $0x3d8] sm:$0xff]  ;;  %v6493_v37 = vpack.c.bf16 %v4149_v31, %v4145_v30  ;;  %v6521_v43 = vpack.c.bf16 %v4143_v35, %v4139_v34  ;;  %v4147_v41 = vld [vmem:[#allocation16 + $0x3d0] sm:$0xff]  ;;  %v4086_v63 = vld [vmem:[%s4083_s18 + $0x10] sm:$0xff] }
 0xd1e   : > { %6482 = vmatpush1.bf16.msra.mxu0 %v6481_v7  ;;  %v4152_v13 = vld [vmem:[#allocation16 + $0x3f8] sm:$0xff]  ;;  %v4151_v21 = vld [vmem:[#allocation16 + $0x3f0] sm:$0xff]  ;;  %v4087_v4 = vld [vmem:[%s4083_s18 + $0x18] sm:$0xff] }
 0xd1f   : > { %6484 = vmatprep.subr.bf16.mxu0 %v6483_v59  ;;  %6514 = vmatpush1.bf16.msra.mxu1 %v6513_v15  ;;  %v6523_v58 = vpack.c.bf16 %v4152_v13, %v4148_v36  ;;  %v6525_v22 = vpack.c.bf16 %v4151_v21, %v4147_v41  ;;  %v4084_v23 = vld [vmem:[%s4083_s18] sm:$0xff]  ;;  %v4085_v24 = vld [vmem:[%s4083_s18 + $0x8] sm:$0xff]  ;;  %v4336_v12 = vld [vmem:[#allocation14 + $0x408] sm:$0xff] (%p4075_p5) }
 0xd20   : > { %6516 = vmatprep.subr.bf16.mxu1 %v6515_v19  ;;  %v4340_v47 = vld [vmem:[#allocation14 + $0x428] sm:$0xff] (%p4075_p5)  ;;  %v4342_v50 = vld [vmem:[#allocation14 + $0x438] sm:$0xff] (%p4075_p5)  ;;  %v4335_v16 = vld [vmem:[#allocation14 + $0x400] sm:$0xff] (%p4075_p5) }
 0xd21   :  { %v4339_v14 = vld [vmem:[#allocation14 + $0x420] sm:$0xff] (%p4075_p5)  ;;  %v4337_v19 = vld [vmem:[#allocation14 + $0x410] sm:$0xff] (%p4075_p5)  ;;  %v4344_v25 = vld [vmem:[#allocation14 + $0x448] sm:$0xff] (%p4075_p5) }
 0xd22   : > { %6486 = vmatpush1.bf16.msra.mxu0 %v6485_v48  ;;  %v4338_v48 = vld [vmem:[#allocation14 + $0x418] sm:$0xff] (%p4075_p5)  ;;  %v6529_v57 = vpack.c.bf16 (%p4075_p5), %v4339_v14, %v4335_v16  ;;  %v4341_v20 = vld [vmem:[#allocation14 + $0x430] sm:$0xff] (%p4075_p5)  ;;  %v4348_v27 = vld [vmem:[#allocation14 + $0x468] sm:$0xff] (%p4075_p5) }
 0xd23   : > { %6488 = vmatprep.subr.bf16.mxu0 %v6487_v49  ;;  %6518 = vmatpush1.bf16.msra.mxu1 %v6517_v32  ;;  %v6527_v49 = vpack.c.bf16 (%p4075_p5), %v4340_v47, %v4336_v12  ;;  %v6559_v15 = vpack.c.bf16 (%p4075_p5), %v4342_v50, %v4338_v48  ;;  %v6561_v26 = vpack.c.bf16 (%p4075_p5), %v4341_v20, %v4337_v19  ;;  %v4343_v31 = vld [vmem:[#allocation14 + $0x440] sm:$0xff] (%p4075_p5)  ;;  %v4349_v35 = vld [vmem:[#allocation14 + $0x470] sm:$0xff] (%p4075_p5)  ;;  %v4352_v36 = vld [vmem:[#allocation14 + $0x488] sm:$0xff] (%p4075_p5) }
 0xd24   : > { %6520 = vmatprep.subr.bf16.mxu1 %v6519_v33  ;;  %v4347_v32 = vld [vmem:[#allocation14 + $0x460] sm:$0xff] (%p4075_p5)  ;;  %v4345_v33 = vld [vmem:[#allocation14 + $0x450] sm:$0xff] (%p4075_p5)  ;;  %v4356_v13 = vld [vmem:[#allocation14 + $0x4a8] sm:$0xff] (%p4075_p5) }
 0xd25   :  { %v6533_v34 = vpack.c.bf16 (%p4075_p5), %v4347_v32, %v4343_v31  ;;  %v4358_v41 = vld [vmem:[#allocation14 + $0x4b8] sm:$0xff] (%p4075_p5)  ;;  %v4351_v21 = vld [vmem:[#allocation14 + $0x480] sm:$0xff] (%p4075_p5)  ;;  %v4380_v12 = vld [vmem:[#allocation14 + $0x568] sm:$0xff] (%p4075_p5) }
 0xd26   : > { %6490 = vmatpush1.bf16.msra.mxu0 %v6489_v28  ;;  %v4346_v28 = vld [vmem:[#allocation14 + $0x458] sm:$0xff] (%p4075_p5)  ;;  %v4375_v14 = vld [vmem:[#allocation14 + $0x540] sm:$0xff] (%p4075_p5)  ;;  %v4381_v20 = vld [vmem:[#allocation14 + $0x570] sm:$0xff] (%p4075_p5) }
 0xd27   : > { %6492 = vmatprep.subr.bf16.mxu0 %v6491_v29  ;;  %6522 = vmatpush1.bf16.msra.mxu1 %v6521_v43  ;;  %v6531_v29 = vpack.c.bf16 (%p4075_p5), %v4348_v27, %v4344_v25  ;;  %v6535_v43 = vpack.c.bf16 (%p4075_p5), %v4356_v13, %v4352_v36  ;;  %v4378_v47 = vld [vmem:[#allocation14 + $0x558] sm:$0xff] (%p4075_p5)  ;;  %v4384_v25 = vld [vmem:[#allocation14 + $0x588] sm:$0xff] (%p4075_p5)  ;;  %v4383_v31 = vld [vmem:[#allocation14 + $0x580] sm:$0xff] (%p4075_p5) }
 0xd28   : > { %6524 = vmatprep.subr.bf16.mxu1 %v6523_v58  ;;  %v4354_v58 = vld [vmem:[#allocation14 + $0x498] sm:$0xff] (%p4075_p5)  ;;  %v4387_v32 = vld [vmem:[#allocation14 + $0x5a0] sm:$0xff] (%p4075_p5)  ;;  %v4392_v36 = vld [vmem:[#allocation14 + $0x5c8] sm:$0xff] (%p4075_p5) }
 0xd29   :  { %v4382_v48 = vld [vmem:[#allocation14 + $0x578] sm:$0xff] (%p4075_p5)  ;;  %v4396_v13 = vld [vmem:[#allocation14 + $0x5e8] sm:$0xff] (%p4075_p5) }
 0xd2a   : > { %6494 = vmatpush1.bf16.msra.mxu0 %v6493_v37  ;;  %v6565_v37 = vpack.c.bf16 (%p4075_p5), %v4349_v35, %v4345_v33  ;;  %v6579_v19 = vpack.c.bf16 (%p4075_p5), %v4382_v48, %v4378_v47  ;;  %v4386_v27 = vld [vmem:[#allocation14 + $0x598] sm:$0xff] (%p4075_p5)  ;;  %v4385_v33 = vld [vmem:[#allocation14 + $0x590] sm:$0xff] (%p4075_p5) }
 0xd2b   : > { %6526 = vmatpush1.bf16.msra.mxu1 %v6525_v22  ;;  %6528 = vmatprep.subr.bf16.mxu0 (%p4075_p5), %v6527_v49  ;;  %v6567_v22 = vpack.c.bf16 (%p4075_p5), %v4358_v41, %v4354_v58  ;;  %v4389_v35 = vld [vmem:[#allocation14 + $0x5b0] sm:$0xff] (%p4075_p5)  ;;  %v6553_v58 = vpack.c.bf16 (%p4075_p5), %v4387_v32, %v4383_v31 }
 0xd2c   :  { %6560 = vmatprep.subr.bf16.mxu1 (%p4075_p5), %v6559_v15  ;;  %v4379_v15 = vld [vmem:[#allocation14 + $0x560] sm:$0xff] (%p4075_p5)  ;;  %v6585_v41 = vpack.c.bf16 (%p4075_p5), %v4389_v35, %v4385_v33 }
 0xd2d   : > { %4218 = vmatmul.mubr.f32.vlgmr.msra.gmra.mrb[0].mxu0 %v7499_v51 }
 0xd2e   : > { %4289 = vmatmul.mubr.f32.vlgmr.msra.gmra.mrb[0].mxu1 %v7499_v51  ;;  %4486 = vmatprep.mubr.f32.mxu0 (%p4075_p5), %v7542_v0 }
 0xd2f   :  { %4599 = vmatprep.mubr.f32.mxu1 (%p4075_p5), %v7542_v0  ;;  %6530 = vmatpush1.bf16.msra.mxu0 (%p4075_p5), %v6529_v57  ;;  %v4377_v57 = vld [vmem:[#allocation14 + $0x550] sm:$0xff] (%p4075_p5) }
 0xd30   :  { %6562 = vmatpush1.bf16.msra.mxu1 (%p4075_p5), %v6561_v26  ;;  %6532 = vmatprep.subr.bf16.mxu0 (%p4075_p5), %v6531_v29  ;;  %v4388_v26 = vld [vmem:[#allocation14 + $0x5a8] sm:$0xff] (%p4075_p5)  ;;  %v6581_v29 = vpack.c.bf16 (%p4075_p5), %v4381_v20, %v4377_v57 }
 0xd33   :  { %6534 = vmatpush1.bf16.msra.mxu0 (%p4075_p5), %v6533_v34 }
 0xd34   :  { %6536 = vmatprep.subr.bf16.mxu0 (%p4075_p5), %v6535_v43  ;;  %v4398_v43 = vld [vmem:[#allocation14 + $0x5f8] sm:$0xff] (%p4075_p5) }
 0xe00   : > { %v4219_v44 = vpop.f32.mrb[0].mxu0 }
 0xe01   : > { %v4295_v45 = vadd.f32 %v4219_v44, %v4084_v23  ;;  %v4221_v46 = vpop.f32.mrb[1].mxu0  ;;  %v4290_v1 = vpop.f32.mrb[0].mxu1  ;;  %v4355_v23 = vld [vmem:[#allocation14 + $0x4a0] sm:$0xff] (%p4075_p5)  ;;  %v4357_v44 = vld [vmem:[#allocation14 + $0x4b0] sm:$0xff] (%p4075_p5) }
 0xe02   : > { %v4296_v53 = vadd.f32 %v4221_v46, %v4085_v24  ;;  %v4292_v2 = vpop.f32.mrb[1].mxu1  ;;  %v4297_v3 = vadd.f32 %v4290_v1, %v4086_v63  ;;  %v4353_v24 = vld [vmem:[#allocation14 + $0x490] sm:$0xff] (%p4075_p5)  ;;  %v4360_v46 = vld [vmem:[#allocation14 + $0x4c8] sm:$0xff] (%p4075_p5)  ;;  %v4366_v1 = vld [vmem:[#allocation14 + $0x4f8] sm:$0xff] (%p4075_p5) }
 0xe03   : > { %v5733_v40 = vmul.f32 -1.442695, %v4295_v45  ;;  %v4298_v6 = vadd.f32 %v4292_v2, %v4087_v4  ;;  %v6537_v45 = vpack.c.bf16 (%p4075_p5), %v4355_v23, %v4351_v21  ;;  %v4359_v2 = vld [vmem:[#allocation14 + $0x4c0] sm:$0xff] (%p4075_p5)  ;;  %v6555_v21 = vpack.c.bf16 (%p4075_p5), %v4396_v13, %v4392_v36 }
 0xe04   : > { %v5734_v62 = vmul.f32 -1.442695, %v4296_v53  ;;  %v5735_v5 = vmul.f32 -1.442695, %v4297_v3  ;;  %v4364_v53 = vld [vmem:[#allocation14 + $0x4e8] sm:$0xff] (%p4075_p5)  ;;  %v4363_v3 = vld [vmem:[#allocation14 + $0x4e0] sm:$0xff] (%p4075_p5) }
 0xe05   : > { %7079 = vpow2.f32 %v5733_v40  ;;  %v4362_v40 = vld [vmem:[#allocation14 + $0x4d8] sm:$0xff] (%p4075_p5)  ;;  %v6539_v63 = vpack.c.bf16 (%p4075_p5), %v4364_v53, %v4360_v46  ;;  %6538 = vmatpush1.bf16.msra.mxu0 (%p4075_p5), %v6537_v45  ;;  %v4395_v23 = vld [vmem:[#allocation14 + $0x5e0] sm:$0xff] (%p4075_p5)  ;;  %v4397_v45 = vld [vmem:[#allocation14 + $0x5f0] sm:$0xff] (%p4075_p5) }
 0xe06   : > { %7081 = vpow2.f32 %v5734_v62  ;;  %v6569_v62 = vpack.c.bf16 (%p4075_p5), %v4357_v44, %v4353_v24  ;;  %v6571_v4 = vpack.c.bf16 (%p4075_p5), %v4366_v1, %v4362_v40  ;;  %v4393_v44 = vld [vmem:[#allocation14 + $0x5d0] sm:$0xff] (%p4075_p5) }
 0xe07   : > { %7083 = vpow2.f32 %v5735_v5  ;;  %v4361_v5 = vld [vmem:[#allocation14 + $0x4d0] sm:$0xff] (%p4075_p5)  ;;  %6540 = vmatprep.subr.bf16.mxu0 (%p4075_p5), %v6539_v63  ;;  %v6589_v53 = vpack.c.bf16 (%p4075_p5), %v4397_v45, %v4393_v44 }
 0xe08   : > { %7085 = vtanh.f32 %v4298_v6  ;;  %v4365_v6 = vld [vmem:[#allocation14 + $0x4f0] sm:$0xff] (%p4075_p5) }
 0xe0f   : > { %v7080_v51 = vpop.eup %7079 }
 0xe10   : > { %v7082_v7 = vpop.eup %7081  ;;  %v4308_v39 = vadd.f32 1.0, %v7080_v51 }
 0xe11   : > { %v4309_v61 = vadd.f32 1.0, %v7082_v7  ;;  %v7084_v59 = vpop.eup %7083  ;;  %v4372_v7 = vld [vmem:[#allocation14 + $0x528] sm:$0xff] (%p4075_p5) }
 0xe12   : > { %7087 = vrcp.f32 %v4308_v39  ;;  %v7086_v60 = vpop.eup %7085  ;;  %v4310_v8 = vadd.f32 1.0, %v7084_v59  ;;  %v4370_v39 = vld [vmem:[#allocation14 + $0x518] sm:$0xff] (%p4075_p5)  ;;  %v6541_v59 = vpack.c.bf16 (%p4075_p5), %v4363_v3, %v4359_v2 }
 0xe13   : > { %7089 = vrcp.f32 %v4309_v61  ;;  %v4374_v61 = vld [vmem:[#allocation14 + $0x538] sm:$0xff] (%p4075_p5) }
 0xe14   : > { %7091 = vrcp.f32 %v4310_v8  ;;  %v4367_v8 = vld [vmem:[#allocation14 + $0x500] sm:$0xff] (%p4075_p5)  ;;  %6542 = vmatpush1.bf16.msra.mxu0 (%p4075_p5), %v6541_v59 }
 0xe1c   : > { %v7088_v18 = vpop.eup %7087 }
 0xe1d   : > { %v7090_v9 = vpop.eup %7089  ;;  %v4319_v42 = vmul.f32 %v7088_v18, %v7086_v60  ;;  %v6573_v60 = vpack.c.bf16 (%p4075_p5), %v4365_v6, %v4361_v5  ;;  %v8461_v6 = vld [vmem:[#allocation2 + $0x10] sm:$0xff] (%p4075_p5)  }
 0xe1e   : > { %v4318_v10 = vmul.f32 %v7495_v38, %v7090_v9  ;;  %v7092_v17 = vpop.eup %7091  ;;  %v4371_v9 = vld [vmem:[#allocation14 + $0x520] sm:$0xff] (%p4075_p5) }
 0xe1f   :  { %v6545_v49 = vpack.c.bf16 (%p4075_p5), %v4371_v9, %v4367_v8 }
 0xe20   : > { %v4320_v38 = vadd.f32 %v4319_v42, %v4318_v10   ;;  %v4369_v42 = vld [vmem:[#allocation14 + $0x510] sm:$0xff] (%p4075_p5)  ;;  %v6575_v10 = vpack.c.bf16 (%p4075_p5), %v4374_v61, %v4370_v39 }
 0xe22   : > { %7093 = vtanh.f32 %v4320_v38  ;;  %v4350_v38 = vld [vmem:[#allocation14 + $0x478] sm:$0xff] (%p4075_p5) }
 0xe23   :  { %v6563_v30 = vpack.c.bf16 (%p4075_p5), %v4350_v38, %v4346_v28  ;;  %v4390_v28 = vld [vmem:[#allocation14 + $0x5b8] sm:$0xff] (%p4075_p5)  ;;  %v6549_v38 = vpack.c.bf16 (%p4075_p5), %v4379_v15, %v4375_v14 }
 0xe24   :  { %v6583_v34 = vpack.c.bf16 (%p4075_p5), %v4390_v28, %v4386_v27 }
 0xe25   :  { %6564 = vmatprep.subr.bf16.mxu1 (%p4075_p5), %v6563_v30  ;;  %v6551_v30 = vpack.c.bf16 (%p4075_p5), %v4388_v26, %v4384_v25 }
 0xe26   :  { %6566 = vmatpush1.bf16.msra.mxu1 (%p4075_p5), %v6565_v37  ;;  %v4394_v37 = vld [vmem:[#allocation14 + $0x5d8] sm:$0xff] (%p4075_p5) }
 0xe27   :  { %6568 = vmatprep.subr.bf16.mxu1 (%p4075_p5), %v6567_v22  ;;  %v4391_v22 = vld [vmem:[#allocation14 + $0x5c0] sm:$0xff] (%p4075_p5)  ;;  %v6587_v24 = vpack.c.bf16 (%p4075_p5), %v4398_v43, %v4394_v37 }
 0xe28   :  { %v6557_v46 = vpack.c.bf16 (%p4075_p5), %v4395_v23, %v4391_v22 }
 0xe29   :  { %4077 = sbr.rel (!%p4075_p5) target bundleno = 3337 (0xd09), region = 239 }
 0xe2a   :  { %6570 = vmatpush1.bf16.msra.mxu1 (%p4075_p5), %v6569_v62 }
 0xe2b   :  { %6572 = vmatprep.subr.bf16.mxu1 (%p4075_p5), %v6571_v4 }
 0xe2c   : > { %v7094_v11 = vpop.eup %7093 }
 0xe2d   : > { %v4322_v51 = vmul.f32 %v7094_v11, %v7092_v17   ;;  %v4373_v17 = vld [vmem:[#allocation14 + $0x530] sm:$0xff] (%p4075_p5)  ;;  %v4376_v11 = vld [vmem:[#allocation14 + $0x548] sm:$0xff] (%p4075_p5) }
 0xe2e   :  { %6574 = vmatpush1.bf16.msra.mxu1 (%p4075_p5), %v6573_v60  ;;  %v6577_v50 = vpack.c.bf16 (%p4075_p5), %v4373_v17, %v4369_v42  ;;  %v6547_v16 = vpack.c.bf16 (%p4075_p5), %v4380_v12, %v4376_v11 }
 0xe2f   : > { %4325 = vst [vmem:[%s4324_s5] sm:$0xff] %v4322_v51  ;;  %v4368_v51 = vld [vmem:[#allocation14 + $0x508] sm:$0xff] (%p4075_p5)  ;;  %6576 = vmatprep.subr.bf16.mxu1 (%p4075_p5), %v6575_v10 }
 0xe30   :  { %v6543_v18 = vpack.c.bf16 %v4372_v7, %v4368_v51  ;;  %v8463_v51 = vld [vmem:[#allocation3 + $0x10] sm:$0xff]   ;;  %v5737_v7 = vld [vmem:[%s8681_s7 + $0x8] sm:$0xf] }
 0xe31   :  { %v8469_v39 = vrot.slane %v5737_v7, %v7737_v52  ;;  %v8472_v61 = vrot.slane %v5737_v7, %v7739_v54  ;;  %v8475_v59 = vrot.slane %v5737_v7, %v7741_v55  ;;  %v8478_v60 = vrot.slane %v5737_v7, %v7743_v56 }
 0xe32   :  { %6544 = vmatprep.subr.bf16.mxu0 %v6543_v18  ;;  %6578 = vmatpush1.bf16.msra.mxu1 %v6577_v50 }
 0xe33   :  { %6546 = vmatpush1.bf16.msra.mxu0 %v6545_v49  ;;  %6580 = vmatprep.subr.bf16.mxu1 %v6579_v19 }
 0xe34   :  { %6548 = vmatprep.subr.bf16.mxu0 %v6547_v16 }
 0xe36   :  { %6582 = vmatpush1.bf16.msra.mxu1 %v6581_v29  ;;  %v4326_v40 = vld [vmem:[#allocation18] sm:$0xff]  ;;  %v4327_v62 = vld [vmem:[#allocation18 + $0x8] sm:$0xff]  ;;  %v4328_v63 = vld [vmem:[#allocation18 + $0x10] sm:$0xff] }
 0xe37   :  { %6550 = vmatpush1.bf16.msra.mxu0 %v6549_v38  ;;  %6584 = vmatprep.subr.bf16.mxu1 %v6583_v34  ;;  %v4329_v1 = vld [vmem:[#allocation18 + $0x18] sm:$0xff]  ;;  %v4330_v2 = vld [vmem:[#allocation18 + $0x20] sm:$0xff]  ;;  %v4331_v3 = vld [vmem:[#allocation18 + $0x28] sm:$0xff] }
 0xe38   :  { %6552 = vmatprep.subr.bf16.mxu0 %v6551_v30  ;;  %v4332_v4 = vld [vmem:[#allocation18 + $0x30] sm:$0xff]  ;;  %v4333_v5 = vld [vmem:[#allocation18 + $0x38] sm:$0xff] }
 0xe3a   :  { %6586 = vmatpush1.bf16.msra.mxu1 %v6585_v41 }
 0xe3b   :  { %6554 = vmatpush1.bf16.msra.mxu0 %v6553_v58  ;;  %6588 = vmatprep.subr.bf16.mxu1 %v6587_v24 }
 0xe3c   :  { %6556 = vmatprep.subr.bf16.mxu0 %v6555_v21 }
 0xe3e   :  { %6590 = vmatpush1.bf16.msra.mxu1 %v6589_v53 }
 0xe3f   :  { %6558 = vmatpush1.bf16.msra.mxu0 %v6557_v46 }
 0xe41   :  { %4600 = vmatmul.mubr.f32.vlgmr.msra.gmra.mrb[0].mxu1 %v4326_v40 }
 0xe42   :  { %4487 = vmatmul.mubr.f32.vlgmr.msra.gmra.mrb[0].mxu0 %v4326_v40  ;;  %4605 = vmatprep.mubr.f32.mxu1 %v7542_v0 }
 0xe43   :  { %4492 = vmatprep.mubr.f32.mxu0 %v7542_v0 }
 0xe45   :  { %4606 = vmatmul.mubr.f32.gmra.mrb[2].mxu1 %v4327_v62 }
 0xe46   :  { %4493 = vmatmul.mubr.f32.gmra.mrb[2].mxu0 %v4327_v62  ;;  %4611 = vmatprep.mubr.f32.mxu1 %v7542_v0 }
 0xe47   :  { %4498 = vmatprep.mubr.f32.mxu0 %v7542_v0 }
 0xe49   :  { %4612 = vmatmul.mubr.f32.gmra.mrb[4].mxu1 %v4328_v63 }
 0xe4a   :  { %4499 = vmatmul.mubr.f32.gmra.mrb[4].mxu0 %v4328_v63  ;;  %4617 = vmatprep.mubr.f32.mxu1 %v7542_v0 }
 0xe4b   :  { %4504 = vmatprep.mubr.f32.mxu0 %v7542_v0 }
 0xe4d   :  { %4618 = vmatmul.mubr.f32.gmra.mrb[6].mxu1 %v4329_v1 }
 0xe4e   :  { %4505 = vmatmul.mubr.f32.gmra.mrb[6].mxu0 %v4329_v1  ;;  %4623 = vmatprep.mubr.f32.mxu1 %v7542_v0 }
 0xe4f   :  { %4510 = vmatprep.mubr.f32.mxu0 %v7542_v0 }
 0xe51   :  { %4624 = vmatmul.mubr.f32.gmra.mrb[8].mxu1 %v4330_v2 }
 0xe52   :  { %4511 = vmatmul.mubr.f32.gmra.mrb[8].mxu0 %v4330_v2  ;;  %4629 = vmatprep.mubr.f32.mxu1 %v7542_v0 }
 0xe53   :  { %4516 = vmatprep.mubr.f32.mxu0 %v7542_v0 }
 0xe55   :  { %4630 = vmatmul.mubr.f32.gmra.mrb[10].mxu1 %v4331_v3 }
 0xe56   :  { %4517 = vmatmul.mubr.f32.gmra.mrb[10].mxu0 %v4331_v3  ;;  %4635 = vmatprep.mubr.f32.mxu1 %v7542_v0 }
 0xe57   :  { %4522 = vmatprep.mubr.f32.mxu0 %v7542_v0 }
 0xe59   :  { %4636 = vmatmul.mubr.f32.gmra.mrb[12].mxu1 %v4332_v4 }
 0xe5a   :  { %4523 = vmatmul.mubr.f32.gmra.mrb[12].mxu0 %v4332_v4  ;;  %4641 = vmatprep.mubr.f32.mxu1 %v7542_v0 }
 0xe5b   :  { %4528 = vmatprep.mubr.f32.mxu0 %v7542_v0 }
 0xe5d   :  { %4642 = vmatmul.mubr.f32.gmra.mrb[14].mxu1 %v4333_v5 }
 0xe5e   :  { %4529 = vmatmul.mubr.f32.gmra.mrb[14].mxu0 %v4333_v5 }
 0xf14   :  { %v4601_v9 = vpop.f32.mrb[0].mxu1 }
 0xf15   :  { %v4488_v18 = vpop.f32.mrb[0].mxu0  ;;  %v4602_v10 = vadd.f32 %v4601_v9, %v8472_v61  ;;  %v4603_v11 = vpop.f32.mrb[1].mxu1 }
 0xf16   :  { %v4489_v8 = vadd.f32 %v4488_v18, %v8469_v39  ;;  %v4490_v42 = vpop.f32.mrb[1].mxu0  ;;  %v4604_v12 = vadd.f32 %v4603_v11, %v8478_v60 }
 0xf17   :  { %v4491_v17 = vadd.f32 %v4490_v42, %v8475_v59  ;;  %4650 = vst [vmem:[#allocation4 + $0x10] sm:$0xff] %v4602_v10 }
 0xf18   :  { %4648 = vst [vmem:[#allocation4] sm:$0xff] %v4489_v8  ;;  %4651 = vst [vmem:[#allocation4 + $0x18] sm:$0xff] %v4604_v12  ;;  %v4607_v49 = vpop.f32.mrb[2].mxu1 }
 0xf19   :  { %4649 = vst [vmem:[#allocation4 + $0x8] sm:$0xff] %v4491_v17  ;;  %v4494_v47 = vpop.f32.mrb[2].mxu0  ;;  %v4608_v16 = vadd.f32 %v4607_v49, %v8472_v61  ;;  %v4609_v15 = vpop.f32.mrb[3].mxu1 }
 0xf1a   :  { %v4495_v48 = vadd.f32 %v4494_v47, %v8469_v39  ;;  %v4496_v50 = vpop.f32.mrb[3].mxu0  ;;  %v4610_v57 = vadd.f32 %v4609_v15, %v8478_v60 }
 0xf1b   :  { %v4497_v14 = vadd.f32 %v4496_v50, %v8475_v59  ;;  %4654 = vst [vmem:[#allocation4 + $0x30] sm:$0xff] %v4608_v16 }
 0xf1c   :  { %4652 = vst [vmem:[#allocation4 + $0x20] sm:$0xff] %v4495_v48  ;;  %4655 = vst [vmem:[#allocation4 + $0x38] sm:$0xff] %v4610_v57  ;;  %v4613_v25 = vpop.f32.mrb[4].mxu1 }
 0xf1d   :  { %4653 = vst [vmem:[#allocation4 + $0x28] sm:$0xff] %v4497_v14  ;;  %v4500_v19 = vpop.f32.mrb[4].mxu0  ;;  %v4614_v27 = vadd.f32 %v4613_v25, %v8472_v61  ;;  %v4615_v38 = vpop.f32.mrb[5].mxu1 }
 0xf1e   :  { %v4501_v20 = vadd.f32 %v4500_v19, %v8469_v39  ;;  %v4502_v26 = vpop.f32.mrb[5].mxu0  ;;  %v4616_v29 = vadd.f32 %v4615_v38, %v8478_v60 }
 0xf1f   :  { %v4503_v28 = vadd.f32 %v4502_v26, %v8475_v59  ;;  %4658 = vst [vmem:[#allocation4 + $0x50] sm:$0xff] %v4614_v27 }
 0xf20   :  { %4656 = vst [vmem:[#allocation4 + $0x40] sm:$0xff] %v4501_v20  ;;  %4659 = vst [vmem:[#allocation4 + $0x58] sm:$0xff] %v4616_v29  ;;  %v4619_v32 = vpop.f32.mrb[6].mxu1 }
 0xf21   :  { %4657 = vst [vmem:[#allocation4 + $0x48] sm:$0xff] %v4503_v28  ;;  %v4506_v30 = vpop.f32.mrb[6].mxu0  ;;  %v4620_v34 = vadd.f32 %v4619_v32, %v8472_v61  ;;  %v4621_v36 = vpop.f32.mrb[7].mxu1 }
 0xf22   :  { %v4507_v31 = vadd.f32 %v4506_v30, %v8469_v39  ;;  %v4508_v33 = vpop.f32.mrb[7].mxu0  ;;  %v4622_v13 = vadd.f32 %v4621_v36, %v8478_v60 }
 0xf23   :  { %v4509_v35 = vadd.f32 %v4508_v33, %v8475_v59  ;;  %4662 = vst [vmem:[#allocation4 + $0x70] sm:$0xff] %v4620_v34 }
 0xf24   :  { %4660 = vst [vmem:[#allocation4 + $0x60] sm:$0xff] %v4507_v31  ;;  %4663 = vst [vmem:[#allocation4 + $0x78] sm:$0xff] %v4622_v13  ;;  %v4625_v58 = vpop.f32.mrb[8].mxu1 }
 0xf25   :  { %4661 = vst [vmem:[#allocation4 + $0x68] sm:$0xff] %v4509_v35  ;;  %v4512_v37 = vpop.f32.mrb[8].mxu0  ;;  %v4626_v21 = vadd.f32 %v4625_v58, %v8472_v61  ;;  %v4627_v23 = vpop.f32.mrb[9].mxu1 }
 0xf26   :  { %v4513_v43 = vadd.f32 %v4512_v37, %v8469_v39  ;;  %v4514_v41 = vpop.f32.mrb[9].mxu0  ;;  %v4628_v24 = vadd.f32 %v4627_v23, %v8478_v60 }
 0xf27   :  { %v4515_v22 = vadd.f32 %v4514_v41, %v8475_v59  ;;  %4666 = vst [vmem:[#allocation4 + $0x90] sm:$0xff] %v4626_v21 }
 0xf28   :  { %4664 = vst [vmem:[#allocation4 + $0x80] sm:$0xff] %v4513_v43  ;;  %4667 = vst [vmem:[#allocation4 + $0x98] sm:$0xff] %v4628_v24  ;;  %v4631_v46 = vpop.f32.mrb[10].mxu1 }
 0xf29   :  { %4665 = vst [vmem:[#allocation4 + $0x88] sm:$0xff] %v4515_v22  ;;  %v4518_v44 = vpop.f32.mrb[10].mxu0  ;;  %v4632_v40 = vadd.f32 %v4631_v46, %v8472_v61  ;;  %v4633_v63 = vpop.f32.mrb[11].mxu1 }
 0xf2a   :  { %v4519_v45 = vadd.f32 %v4518_v44, %v8469_v39  ;;  %v4520_v53 = vpop.f32.mrb[11].mxu0  ;;  %v4634_v1 = vadd.f32 %v4633_v63, %v8478_v60 }
 0xf2b   :  { %v4521_v62 = vadd.f32 %v4520_v53, %v8475_v59  ;;  %4670 = vst [vmem:[#allocation4 + $0xb0] sm:$0xff] %v4632_v40 }
 0xf2c   :  { %4668 = vst [vmem:[#allocation4 + $0xa0] sm:$0xff] %v4519_v45  ;;  %4671 = vst [vmem:[#allocation4 + $0xb8] sm:$0xff] %v4634_v1  ;;  %v4637_v4 = vpop.f32.mrb[12].mxu1 }
 0xf2d   :  { %4669 = vst [vmem:[#allocation4 + $0xa8] sm:$0xff] %v4521_v62  ;;  %v4524_v2 = vpop.f32.mrb[12].mxu0  ;;  %v4638_v7 = vadd.f32 %v4637_v4, %v8472_v61  ;;  %v4639_v8 = vpop.f32.mrb[13].mxu1 }
 0xf2e   :  { %v4525_v3 = vadd.f32 %v4524_v2, %v8469_v39  ;;  %v4526_v5 = vpop.f32.mrb[13].mxu0  ;;  %v4640_v9 = vadd.f32 %v4639_v8, %v8478_v60 }
 0xf2f   :  { %v4527_v18 = vadd.f32 %v4526_v5, %v8475_v59  ;;  %4674 = vst [vmem:[#allocation4 + $0xd0] sm:$0xff] %v4638_v7 }
 0xf30   :  { %4672 = vst [vmem:[#allocation4 + $0xc0] sm:$0xff] %v4525_v3  ;;  %4675 = vst [vmem:[#allocation4 + $0xd8] sm:$0xff] %v4640_v9  ;;  %v4643_v17 = vpop.f32.mrb[14].mxu1 }
 0xf31   :  { %4673 = vst [vmem:[#allocation4 + $0xc8] sm:$0xff] %v4527_v18  ;;  %v4530_v42 = vpop.f32.mrb[14].mxu0  ;;  %v4644_v12 = vadd.f32 %v4643_v17, %v8472_v61  ;;  %v4645_v48 = vpop.f32.mrb[15].mxu1 }
 0xf32   :  { %v4531_v10 = vadd.f32 %v4530_v42, %v8469_v39  ;;  %v4532_v11 = vpop.f32.mrb[15].mxu0  ;;  %v4646_v49 = vadd.f32 %v4645_v48, %v8478_v60 }
 0xf33   :  { %v4533_v47 = vadd.f32 %v4532_v11, %v8475_v59  ;;  %4678 = vst [vmem:[#allocation4 + $0xf0] sm:$0xff] %v4644_v12 }
 0xf34   :  { %4676 = vst [vmem:[#allocation4 + $0xe0] sm:$0xff] %v4531_v10  ;;  %4679 = vst [vmem:[#allocation4 + $0xf8] sm:$0xff] %v4646_v49 }
 0xf35   :  { %4677 = vst [vmem:[#allocation4 + $0xe8] sm:$0xff] %v4533_v47 }
 0xf36 LB: > { %v4699_v39 = vld [vmem:[#allocation16 + $0x408] sm:$0xff]  ;;  %v4698_v59 = vld [vmem:[#allocation16 + $0x400] sm:$0xff]  ;;  %v7549_v15 = vmov 0.0   ;;  %v4701_v32 = vld [vmem:[#allocation16 + $0x418] sm:$0xff]  ;;  %s5757_s12 = sshll.u32 %s7515_s2, 5  ;;  %s5743_s25 = sshll.u32 %s7515_s2, 3  ;;  %s7515_s2 = sphi %s8518_s2, %s4687_s2   ;;  %v7511_v6 = vphi %v8461_v6, %v4931_v6   ;;  %v7507_v51 = vphi %v8463_v51, %v4929_v51  }
 0xf37   : > { %v4703_v61 = vld [vmem:[#allocation16 + $0x428] sm:$0xff]  ;;  %v4702_v50 = vld [vmem:[#allocation16 + $0x420] sm:$0xff]  ;;  %4826 = vmatprep.mubr.f32.mxu0 %v7549_v15  ;;  %4897 = vmatprep.mubr.f32.mxu1 %v7549_v15  ;;  %v4705_v33 = vld [vmem:[#allocation16 + $0x438] sm:$0xff]  ;;  %s4692_s23 = scalar_lea.vmem [#allocation4], %s5757_s12  ;;  %s4933_s27 = scalar_lea.vmem [#allocation18], %s5743_s25 }
 0xf38   : > { %v6591_v60 = vpack.c.bf16 %v4703_v61, %v4699_v39  ;;  %v4707_v16 = vld [vmem:[#allocation16 + $0x448] sm:$0xff]  ;;  %v6593_v57 = vpack.c.bf16 %v4702_v50, %v4698_v59  ;;  %v4706_v20 = vld [vmem:[#allocation16 + $0x440] sm:$0xff]  ;;  %v6623_v35 = vpack.c.bf16 %v4705_v33, %v4701_v32  ;;  %v4700_v36 = vld [vmem:[#allocation16 + $0x410] sm:$0xff]  ;;  %s4687_s2 = sadd.s32 1, %s7515_s2  }
 0xf39   : > { %v4711_v14 = vld [vmem:[#allocation16 + $0x468] sm:$0xff]  ;;  %v4710_v25 = vld [vmem:[#allocation16 + $0x460] sm:$0xff]  ;;  %v4704_v13 = vld [vmem:[#allocation16 + $0x430] sm:$0xff]  ;;  %p4684_p6 = scmp.ge.s32.totalorder %s4687_s2, 8  }
 0xf3a   : > { %v6595_v19 = vpack.c.bf16 %v4711_v14, %v4707_v16  ;;  %v4715_v26 = vld [vmem:[#allocation16 + $0x488] sm:$0xff]  ;;  %6592 = vmatprep.subr.bf16.mxu0 %v6591_v60  ;;  %v6597_v28 = vpack.c.bf16 %v4710_v25, %v4706_v20  ;;  %v4714_v38 = vld [vmem:[#allocation16 + $0x480] sm:$0xff]  ;;  %v6625_v37 = vpack.c.bf16 %v4704_v13, %v4700_v36  ;;  %6624 = vmatprep.subr.bf16.mxu1 %v6623_v35  ;;  %v4709_v58 = vld [vmem:[#allocation16 + $0x458] sm:$0xff] }
 0xf3b   : > { %v4719_v27 = vld [vmem:[#allocation16 + $0x4a8] sm:$0xff]  ;;  %6594 = vmatpush1.bf16.msra.mxu0 %v6593_v57  ;;  %v4718_v29 = vld [vmem:[#allocation16 + $0x4a0] sm:$0xff]  ;;  %v4713_v41 = vld [vmem:[#allocation16 + $0x478] sm:$0xff] }
 0xf3c   : > { %6596 = vmatprep.subr.bf16.mxu0 %v6595_v19  ;;  %v6599_v30 = vpack.c.bf16 %v4719_v27, %v4715_v26  ;;  %v4723_v31 = vld [vmem:[#allocation16 + $0x4c8] sm:$0xff]  ;;  %v6601_v43 = vpack.c.bf16 %v4718_v29, %v4714_v38  ;;  %v4708_v21 = vld [vmem:[#allocation16 + $0x450] sm:$0xff]  ;;  %v4722_v23 = vld [vmem:[#allocation16 + $0x4c0] sm:$0xff]  ;;  %6626 = vmatpush1.bf16.msra.mxu1 %v6625_v37  ;;  %v6627_v44 = vpack.c.bf16 %v4713_v41, %v4709_v58 }
 0xf3d   : > { %v4727_v34 = vld [vmem:[#allocation16 + $0x4e8] sm:$0xff]  ;;  %v4726_v24 = vld [vmem:[#allocation16 + $0x4e0] sm:$0xff]  ;;  %v4712_v45 = vld [vmem:[#allocation16 + $0x470] sm:$0xff] }
 0xf3e   : > { %v6603_v22 = vpack.c.bf16 %v4727_v34, %v4723_v31  ;;  %v4731_v46 = vld [vmem:[#allocation16 + $0x508] sm:$0xff]  ;;  %v6629_v40 = vpack.c.bf16 %v4712_v45, %v4708_v21  ;;  %v4717_v62 = vld [vmem:[#allocation16 + $0x498] sm:$0xff]  ;;  %6628 = vmatprep.subr.bf16.mxu1 %v6627_v44  ;;  %v4716_v1 = vld [vmem:[#allocation16 + $0x490] sm:$0xff]  ;;  %v6605_v3 = vpack.c.bf16 %v4726_v24, %v4722_v23 }
 0xf3f   : > { %6598 = vmatpush1.bf16.msra.mxu0 %v6597_v28  ;;  %v4735_v53 = vld [vmem:[#allocation16 + $0x528] sm:$0xff]  ;;  %v4721_v63 = vld [vmem:[#allocation16 + $0x4b8] sm:$0xff]  ;;  %v4720_v2 = vld [vmem:[#allocation16 + $0x4b0] sm:$0xff] }
 0xf40   : > { %6600 = vmatprep.subr.bf16.mxu0 %v6599_v30  ;;  %v4730_v4 = vld [vmem:[#allocation16 + $0x500] sm:$0xff]  ;;  %v6631_v7 = vpack.c.bf16 %v4721_v63, %v4717_v62  ;;  %v6607_v18 = vpack.c.bf16 %v4735_v53, %v4731_v46  ;;  %6630 = vmatpush1.bf16.msra.mxu1 %v6629_v40  ;;  %v4739_v8 = vld [vmem:[#allocation16 + $0x548] sm:$0xff]  ;;  %v6633_v9 = vpack.c.bf16 %v4720_v2, %v4716_v1  ;;  %v4725_v42 = vld [vmem:[#allocation16 + $0x4d8] sm:$0xff] }
 0xf41   : > { %v4734_v5 = vld [vmem:[#allocation16 + $0x520] sm:$0xff]  ;;  %v4729_v10 = vld [vmem:[#allocation16 + $0x4f8] sm:$0xff]  ;;  %v4743_v17 = vld [vmem:[#allocation16 + $0x568] sm:$0xff] }
 0xf42   : > { %6632 = vmatprep.subr.bf16.mxu1 %v6631_v7  ;;  %v6635_v11 = vpack.c.bf16 %v4729_v10, %v4725_v42  ;;  %v4724_v12 = vld [vmem:[#allocation16 + $0x4d0] sm:$0xff]  ;;  %v6609_v48 = vpack.c.bf16 %v4734_v5, %v4730_v4  ;;  %v4733_v49 = vld [vmem:[#allocation16 + $0x518] sm:$0xff]  ;;  %v6611_v61 = vpack.c.bf16 %v4743_v17, %v4739_v8  ;;  %v4738_v59 = vld [vmem:[#allocation16 + $0x540] sm:$0xff] }
 0xf43   : > { %6602 = vmatpush1.bf16.msra.mxu0 %v6601_v43  ;;  %v4728_v47 = vld [vmem:[#allocation16 + $0x4f0] sm:$0xff]  ;;  %v4737_v39 = vld [vmem:[#allocation16 + $0x538] sm:$0xff]  ;;  %v4742_v60 = vld [vmem:[#allocation16 + $0x560] sm:$0xff] }
 0xf44   : > { %6604 = vmatprep.subr.bf16.mxu0 %v6603_v22  ;;  %6634 = vmatpush1.bf16.msra.mxu1 %v6633_v9  ;;  %v4747_v50 = vld [vmem:[#allocation16 + $0x588] sm:$0xff]  ;;  %v6637_v16 = vpack.c.bf16 %v4728_v47, %v4724_v12  ;;  %v6639_v15 = vpack.c.bf16 %v4737_v39, %v4733_v49  ;;  %v4732_v57 = vld [vmem:[#allocation16 + $0x510] sm:$0xff]  ;;  %v4741_v20 = vld [vmem:[#allocation16 + $0x558] sm:$0xff]  ;;  %v6613_v26 = vpack.c.bf16 %v4742_v60, %v4738_v59 }
 0xf45   : > { %v4751_v14 = vld [vmem:[#allocation16 + $0x5a8] sm:$0xff]  ;;  %6636 = vmatprep.subr.bf16.mxu1 %v6635_v11  ;;  %v4736_v19 = vld [vmem:[#allocation16 + $0x530] sm:$0xff]  ;;  %v4745_v25 = vld [vmem:[#allocation16 + $0x578] sm:$0xff] }
 0xf46   : > { %v6615_v27 = vpack.c.bf16 %v4751_v14, %v4747_v50  ;;  %v4746_v28 = vld [vmem:[#allocation16 + $0x580] sm:$0xff]  ;;  %v4755_v29 = vld [vmem:[#allocation16 + $0x5c8] sm:$0xff]  ;;  %v6641_v30 = vpack.c.bf16 %v4736_v19, %v4732_v57  ;;  %v6643_v32 = vpack.c.bf16 %v4745_v25, %v4741_v20  ;;  %v4740_v33 = vld [vmem:[#allocation16 + $0x550] sm:$0xff] }
 0xf47   : > { %6606 = vmatpush1.bf16.msra.mxu0 %v6605_v3  ;;  %v4750_v38 = vld [vmem:[#allocation16 + $0x5a0] sm:$0xff]  ;;  %v4759_v31 = vld [vmem:[#allocation16 + $0x5e8] sm:$0xff]  ;;  %v4744_v34 = vld [vmem:[#allocation16 + $0x570] sm:$0xff] }
 0xf48   : > { %6608 = vmatprep.subr.bf16.mxu0 %v6607_v18  ;;  %6638 = vmatpush1.bf16.msra.mxu1 %v6637_v16  ;;  %v4749_v35 = vld [vmem:[#allocation16 + $0x598] sm:$0xff]  ;;  %v6617_v13 = vpack.c.bf16 %v4750_v38, %v4746_v28  ;;  %v6619_v37 = vpack.c.bf16 %v4759_v31, %v4755_v29  ;;  %v4754_v43 = vld [vmem:[#allocation16 + $0x5c0] sm:$0xff]  ;;  %v6645_v41 = vpack.c.bf16 %v4744_v34, %v4740_v33  ;;  %v4748_v22 = vld [vmem:[#allocation16 + $0x590] sm:$0xff] }
 0xf49   : > { %6640 = vmatprep.subr.bf16.mxu1 %v6639_v15  ;;  %v4753_v36 = vld [vmem:[#allocation16 + $0x5b8] sm:$0xff]  ;;  %v4758_v58 = vld [vmem:[#allocation16 + $0x5e0] sm:$0xff]  ;;  %v4752_v23 = vld [vmem:[#allocation16 + $0x5b0] sm:$0xff] }
 0xf4a   : > { %v6647_v21 = vpack.c.bf16 %v4753_v36, %v4749_v35  ;;  %v4757_v24 = vld [vmem:[#allocation16 + $0x5d8] sm:$0xff]  ;;  %v6621_v45 = vpack.c.bf16 %v4758_v58, %v4754_v43  ;;  %v6649_v46 = vpack.c.bf16 %v4752_v23, %v4748_v22  ;;  %v4756_v40 = vld [vmem:[#allocation16 + $0x5d0] sm:$0xff]  ;;  %v4695_v9 = vld [vmem:[%s4692_s23 + $0x10] sm:$0xff] }
 0xf4b   : > { %6610 = vmatpush1.bf16.msra.mxu0 %v6609_v48  ;;  %v4761_v44 = vld [vmem:[#allocation16 + $0x5f8] sm:$0xff]  ;;  %v4760_v62 = vld [vmem:[#allocation16 + $0x5f0] sm:$0xff]  ;;  %v4696_v11 = vld [vmem:[%s4692_s23 + $0x18] sm:$0xff] }
 0xf4c   : > { %6612 = vmatprep.subr.bf16.mxu0 %v6611_v61  ;;  %6642 = vmatpush1.bf16.msra.mxu1 %v6641_v30  ;;  %v6651_v53 = vpack.c.bf16 %v4761_v44, %v4757_v24  ;;  %v6653_v63 = vpack.c.bf16 %v4760_v62, %v4756_v40  ;;  %v4693_v1 = vld [vmem:[%s4692_s23] sm:$0xff]  ;;  %v4694_v2 = vld [vmem:[%s4692_s23 + $0x8] sm:$0xff]  ;;  %v4945_v20 = vld [vmem:[#allocation14 + $0x608] sm:$0xff] (%p4684_p6) }
 0xf4d   : > { %6644 = vmatprep.subr.bf16.mxu1 %v6643_v32  ;;  %v4949_v25 = vld [vmem:[#allocation14 + $0x628] sm:$0xff] (%p4684_p6)  ;;  %v4951_v28 = vld [vmem:[#allocation14 + $0x638] sm:$0xff] (%p4684_p6)  ;;  %v4944_v38 = vld [vmem:[#allocation14 + $0x600] sm:$0xff] (%p4684_p6) }
 0xf4e   :  { %v4948_v29 = vld [vmem:[#allocation14 + $0x620] sm:$0xff] (%p4684_p6)  ;;  %v4946_v32 = vld [vmem:[#allocation14 + $0x610] sm:$0xff] (%p4684_p6)  ;;  %v4953_v34 = vld [vmem:[#allocation14 + $0x648] sm:$0xff] (%p4684_p6) }
 0xf4f   : > { %6614 = vmatpush1.bf16.msra.mxu0 %v6613_v26  ;;  %v4947_v26 = vld [vmem:[#allocation14 + $0x618] sm:$0xff] (%p4684_p6)  ;;  %v6657_v31 = vpack.c.bf16 (%p4684_p6), %v4948_v29, %v4944_v38  ;;  %v4950_v33 = vld [vmem:[#allocation14 + $0x630] sm:$0xff] (%p4684_p6)  ;;  %v4957_v36 = vld [vmem:[#allocation14 + $0x668] sm:$0xff] (%p4684_p6) }
 0xf50   : > { %6616 = vmatprep.subr.bf16.mxu0 %v6615_v27  ;;  %6646 = vmatpush1.bf16.msra.mxu1 %v6645_v41  ;;  %v6655_v27 = vpack.c.bf16 (%p4684_p6), %v4949_v25, %v4945_v20  ;;  %v6687_v30 = vpack.c.bf16 (%p4684_p6), %v4951_v28, %v4947_v26  ;;  %v6689_v35 = vpack.c.bf16 (%p4684_p6), %v4950_v33, %v4946_v32  ;;  %v4952_v58 = vld [vmem:[#allocation14 + $0x640] sm:$0xff] (%p4684_p6)  ;;  %v4958_v23 = vld [vmem:[#allocation14 + $0x670] sm:$0xff] (%p4684_p6)  ;;  %v4961_v24 = vld [vmem:[#allocation14 + $0x688] sm:$0xff] (%p4684_p6) }
 0xf51   : > { %6648 = vmatprep.subr.bf16.mxu1 %v6647_v21  ;;  %v4956_v41 = vld [vmem:[#allocation14 + $0x660] sm:$0xff] (%p4684_p6)  ;;  %v4954_v21 = vld [vmem:[#allocation14 + $0x650] sm:$0xff] (%p4684_p6)  ;;  %v4965_v44 = vld [vmem:[#allocation14 + $0x6a8] sm:$0xff] (%p4684_p6) }
 0xf52   :  { %v6661_v22 = vpack.c.bf16 (%p4684_p6), %v4956_v41, %v4952_v58  ;;  %v4967_v40 = vld [vmem:[#allocation14 + $0x6b8] sm:$0xff] (%p4684_p6)  ;;  %v4960_v62 = vld [vmem:[#allocation14 + $0x680] sm:$0xff] (%p4684_p6)  ;;  %v4989_v20 = vld [vmem:[#allocation14 + $0x768] sm:$0xff] (%p4684_p6) }
 0xf53   : > { %6618 = vmatpush1.bf16.msra.mxu0 %v6617_v13  ;;  %v4955_v13 = vld [vmem:[#allocation14 + $0x658] sm:$0xff] (%p4684_p6)  ;;  %v4984_v29 = vld [vmem:[#allocation14 + $0x740] sm:$0xff] (%p4684_p6)  ;;  %v4990_v33 = vld [vmem:[#allocation14 + $0x770] sm:$0xff] (%p4684_p6) }
 0xf54   : > { %6620 = vmatprep.subr.bf16.mxu0 %v6619_v37  ;;  %6650 = vmatpush1.bf16.msra.mxu1 %v6649_v46  ;;  %v6659_v37 = vpack.c.bf16 (%p4684_p6), %v4957_v36, %v4953_v34  ;;  %v6663_v46 = vpack.c.bf16 (%p4684_p6), %v4965_v44, %v4961_v24  ;;  %v4987_v25 = vld [vmem:[#allocation14 + $0x758] sm:$0xff] (%p4684_p6)  ;;  %v4993_v34 = vld [vmem:[#allocation14 + $0x788] sm:$0xff] (%p4684_p6)  ;;  %v4992_v58 = vld [vmem:[#allocation14 + $0x780] sm:$0xff] (%p4684_p6) }
 0xf55   : > { %6652 = vmatprep.subr.bf16.mxu1 %v6651_v53  ;;  %v4963_v53 = vld [vmem:[#allocation14 + $0x698] sm:$0xff] (%p4684_p6)  ;;  %v4996_v41 = vld [vmem:[#allocation14 + $0x7a0] sm:$0xff] (%p4684_p6)  ;;  %v5001_v24 = vld [vmem:[#allocation14 + $0x7c8] sm:$0xff] (%p4684_p6) }
 0xf56   :  { %v4991_v26 = vld [vmem:[#allocation14 + $0x778] sm:$0xff] (%p4684_p6)  ;;  %v5005_v44 = vld [vmem:[#allocation14 + $0x7e8] sm:$0xff] (%p4684_p6) }
 0xf57   : > { %6622 = vmatpush1.bf16.msra.mxu0 %v6621_v45  ;;  %v6693_v45 = vpack.c.bf16 (%p4684_p6), %v4958_v23, %v4954_v21  ;;  %v6707_v32 = vpack.c.bf16 (%p4684_p6), %v4991_v26, %v4987_v25  ;;  %v4995_v36 = vld [vmem:[#allocation14 + $0x798] sm:$0xff] (%p4684_p6)  ;;  %v4994_v21 = vld [vmem:[#allocation14 + $0x790] sm:$0xff] (%p4684_p6) }
 0xf58   : > { %6654 = vmatpush1.bf16.msra.mxu1 %v6653_v63  ;;  %6656 = vmatprep.subr.bf16.mxu0 (%p4684_p6), %v6655_v27  ;;  %v6695_v63 = vpack.c.bf16 (%p4684_p6), %v4967_v40, %v4963_v53  ;;  %v4998_v23 = vld [vmem:[#allocation14 + $0x7b0] sm:$0xff] (%p4684_p6)  ;;  %v6681_v53 = vpack.c.bf16 (%p4684_p6), %v4996_v41, %v4992_v58 }
 0xf59   :  { %6688 = vmatprep.subr.bf16.mxu1 (%p4684_p6), %v6687_v30  ;;  %v4988_v30 = vld [vmem:[#allocation14 + $0x760] sm:$0xff] (%p4684_p6)  ;;  %v6713_v40 = vpack.c.bf16 (%p4684_p6), %v4998_v23, %v4994_v21 }
 0xf5a   : > { %4827 = vmatmul.mubr.f32.vlgmr.msra.gmra.mrb[0].mxu0 %v7511_v6 }
 0xf5b   : > { %4898 = vmatmul.mubr.f32.vlgmr.msra.gmra.mrb[0].mxu1 %v7511_v6  ;;  %5095 = vmatprep.mubr.f32.mxu0 (%p4684_p6), %v7542_v0 }
 0xf5c   :  { %5208 = vmatprep.mubr.f32.mxu1 (%p4684_p6), %v7542_v0  ;;  %6658 = vmatpush1.bf16.msra.mxu0 (%p4684_p6), %v6657_v31  ;;  %v4986_v31 = vld [vmem:[#allocation14 + $0x750] sm:$0xff] (%p4684_p6) }
 0xf5d   :  { %6690 = vmatpush1.bf16.msra.mxu1 (%p4684_p6), %v6689_v35  ;;  %6660 = vmatprep.subr.bf16.mxu0 (%p4684_p6), %v6659_v37  ;;  %v4997_v35 = vld [vmem:[#allocation14 + $0x7a8] sm:$0xff] (%p4684_p6)  ;;  %v6709_v37 = vpack.c.bf16 (%p4684_p6), %v4990_v33, %v4986_v31 }
 0xf60   :  { %6662 = vmatpush1.bf16.msra.mxu0 (%p4684_p6), %v6661_v22 }
 0xf61   :  { %6664 = vmatprep.subr.bf16.mxu0 (%p4684_p6), %v6663_v46  ;;  %v5007_v46 = vld [vmem:[#allocation14 + $0x7f8] sm:$0xff] (%p4684_p6) }
0x102d   : > { %v4828_v3 = vpop.f32.mrb[0].mxu0 }
0x102e   : > { %v4904_v4 = vadd.f32 %v4828_v3, %v4693_v1  ;;  %v4830_v5 = vpop.f32.mrb[1].mxu0  ;;  %v4899_v42 = vpop.f32.mrb[0].mxu1  ;;  %v4964_v1 = vld [vmem:[#allocation14 + $0x6a0] sm:$0xff] (%p4684_p6)  ;;  %v4966_v3 = vld [vmem:[#allocation14 + $0x6b0] sm:$0xff] (%p4684_p6) }
0x102f   : > { %v4905_v7 = vadd.f32 %v4830_v5, %v4694_v2  ;;  %v4901_v10 = vpop.f32.mrb[1].mxu1  ;;  %v4906_v17 = vadd.f32 %v4899_v42, %v4695_v9  ;;  %v4962_v2 = vld [vmem:[#allocation14 + $0x690] sm:$0xff] (%p4684_p6)  ;;  %v4969_v5 = vld [vmem:[#allocation14 + $0x6c8] sm:$0xff] (%p4684_p6)  ;;  %v4975_v42 = vld [vmem:[#allocation14 + $0x6f8] sm:$0xff] (%p4684_p6) }
0x1030   : > { %v5740_v18 = vmul.f32 -1.442695, %v4904_v4  ;;  %v4907_v47 = vadd.f32 %v4901_v10, %v4696_v11  ;;  %v6665_v4 = vpack.c.bf16 (%p4684_p6), %v4964_v1, %v4960_v62  ;;  %v4968_v10 = vld [vmem:[#allocation14 + $0x6c0] sm:$0xff] (%p4684_p6)  ;;  %v6683_v62 = vpack.c.bf16 (%p4684_p6), %v5005_v44, %v5001_v24 }
0x1031   : > { %v5741_v8 = vmul.f32 -1.442695, %v4905_v7  ;;  %v5742_v12 = vmul.f32 -1.442695, %v4906_v17  ;;  %v4973_v7 = vld [vmem:[#allocation14 + $0x6e8] sm:$0xff] (%p4684_p6)  ;;  %v4972_v17 = vld [vmem:[#allocation14 + $0x6e0] sm:$0xff] (%p4684_p6) }
0x1032   : > { %7095 = vpow2.f32 %v5740_v18  ;;  %v4971_v18 = vld [vmem:[#allocation14 + $0x6d8] sm:$0xff] (%p4684_p6)  ;;  %v6667_v9 = vpack.c.bf16 (%p4684_p6), %v4973_v7, %v4969_v5  ;;  %6666 = vmatpush1.bf16.msra.mxu0 (%p4684_p6), %v6665_v4  ;;  %v5004_v1 = vld [vmem:[#allocation14 + $0x7e0] sm:$0xff] (%p4684_p6)  ;;  %v5006_v4 = vld [vmem:[#allocation14 + $0x7f0] sm:$0xff] (%p4684_p6) }
0x1033   : > { %7097 = vpow2.f32 %v5741_v8  ;;  %v6697_v8 = vpack.c.bf16 (%p4684_p6), %v4966_v3, %v4962_v2  ;;  %v6699_v11 = vpack.c.bf16 (%p4684_p6), %v4975_v42, %v4971_v18  ;;  %v5002_v3 = vld [vmem:[#allocation14 + $0x7d0] sm:$0xff] (%p4684_p6) }
0x1034   : > { %7099 = vpow2.f32 %v5742_v12  ;;  %v4970_v12 = vld [vmem:[#allocation14 + $0x6d0] sm:$0xff] (%p4684_p6)  ;;  %6668 = vmatprep.subr.bf16.mxu0 (%p4684_p6), %v6667_v9  ;;  %v6717_v7 = vpack.c.bf16 (%p4684_p6), %v5006_v4, %v5002_v3 }
0x1035   : > { %7101 = vtanh.f32 %v4907_v47  ;;  %v4974_v47 = vld [vmem:[#allocation14 + $0x6f0] sm:$0xff] (%p4684_p6) }
0x103c   : > { %v7096_v6 = vpop.eup %7095 }
0x103d   : > { %v7098_v48 = vpop.eup %7097  ;;  %v4917_v49 = vadd.f32 1.0, %v7096_v6 }
0x103e   : > { %v4918_v39 = vadd.f32 1.0, %v7098_v48  ;;  %v7100_v61 = vpop.eup %7099  ;;  %v4981_v48 = vld [vmem:[#allocation14 + $0x728] sm:$0xff] (%p4684_p6) }
0x103f   : > { %7103 = vrcp.f32 %v4917_v49  ;;  %v7102_v59 = vpop.eup %7101  ;;  %v4919_v50 = vadd.f32 1.0, %v7100_v61  ;;  %v4979_v49 = vld [vmem:[#allocation14 + $0x718] sm:$0xff] (%p4684_p6)  ;;  %v6669_v61 = vpack.c.bf16 (%p4684_p6), %v4972_v17, %v4968_v10 }
0x1040   : > { %7105 = vrcp.f32 %v4918_v39  ;;  %v4983_v39 = vld [vmem:[#allocation14 + $0x738] sm:$0xff] (%p4684_p6) }
0x1041   : > { %7107 = vrcp.f32 %v4919_v50  ;;  %v4976_v50 = vld [vmem:[#allocation14 + $0x700] sm:$0xff] (%p4684_p6)  ;;  %6670 = vmatpush1.bf16.msra.mxu0 (%p4684_p6), %v6669_v61 }
0x1049   : > { %v7104_v60 = vpop.eup %7103 }
0x104a   : > { %v7106_v16 = vpop.eup %7105  ;;  %v4928_v14 = vmul.f32 %v7104_v60, %v7102_v59  ;;  %v6701_v59 = vpack.c.bf16 (%p4684_p6), %v4974_v47, %v4970_v12  ;;  %v8557_v47 = vld [vmem:[#allocation2 + $0x18] sm:$0xff] (%p4684_p6)  }
0x104b   : > { %v4927_v15 = vmul.f32 %v7507_v51, %v7106_v16  ;;  %v7108_v57 = vpop.eup %7107  ;;  %v4980_v16 = vld [vmem:[#allocation14 + $0x720] sm:$0xff] (%p4684_p6) }
0x104c   :  { %v6673_v27 = vpack.c.bf16 (%p4684_p6), %v4980_v16, %v4976_v50 }
0x104d   : > { %v4929_v51 = vadd.f32 %v4928_v14, %v4927_v15   ;;  %v4978_v14 = vld [vmem:[#allocation14 + $0x710] sm:$0xff] (%p4684_p6)  ;;  %v6703_v15 = vpack.c.bf16 (%p4684_p6), %v4983_v39, %v4979_v49 }
0x104f   : > { %7109 = vtanh.f32 %v4929_v51  ;;  %v4959_v51 = vld [vmem:[#allocation14 + $0x678] sm:$0xff] (%p4684_p6) }
0x1050   :  { %v6691_v43 = vpack.c.bf16 (%p4684_p6), %v4959_v51, %v4955_v13  ;;  %v4999_v13 = vld [vmem:[#allocation14 + $0x7b8] sm:$0xff] (%p4684_p6)  ;;  %v6677_v51 = vpack.c.bf16 (%p4684_p6), %v4988_v30, %v4984_v29 }
0x1051   :  { %v6711_v22 = vpack.c.bf16 (%p4684_p6), %v4999_v13, %v4995_v36 }
0x1052   :  { %6692 = vmatprep.subr.bf16.mxu1 (%p4684_p6), %v6691_v43  ;;  %v6679_v43 = vpack.c.bf16 (%p4684_p6), %v4997_v35, %v4993_v34 }
0x1053   :  { %6694 = vmatpush1.bf16.msra.mxu1 (%p4684_p6), %v6693_v45  ;;  %v5003_v45 = vld [vmem:[#allocation14 + $0x7d8] sm:$0xff] (%p4684_p6) }
0x1054   :  { %6696 = vmatprep.subr.bf16.mxu1 (%p4684_p6), %v6695_v63  ;;  %v5000_v63 = vld [vmem:[#allocation14 + $0x7c0] sm:$0xff] (%p4684_p6)  ;;  %v6715_v2 = vpack.c.bf16 (%p4684_p6), %v5007_v46, %v5003_v45 }
0x1055   :  { %v6685_v5 = vpack.c.bf16 (%p4684_p6), %v5004_v1, %v5000_v63 }
0x1056   :  { %4686 = sbr.rel (!%p4684_p6) target bundleno = 3894 (0xf36), region = 250 }
0x1057   :  { %6698 = vmatpush1.bf16.msra.mxu1 (%p4684_p6), %v6697_v8 }
0x1058   :  { %6700 = vmatprep.subr.bf16.mxu1 (%p4684_p6), %v6699_v11 }
0x1059   : > { %v7110_v19 = vpop.eup %7109 }
0x105a   : > { %v4931_v6 = vmul.f32 %v7110_v19, %v7108_v57   ;;  %v4982_v57 = vld [vmem:[#allocation14 + $0x730] sm:$0xff] (%p4684_p6)  ;;  %v4985_v19 = vld [vmem:[#allocation14 + $0x748] sm:$0xff] (%p4684_p6) }
0x105b   :  { %6702 = vmatpush1.bf16.msra.mxu1 (%p4684_p6), %v6701_v59  ;;  %v6705_v28 = vpack.c.bf16 (%p4684_p6), %v4982_v57, %v4978_v14  ;;  %v6675_v38 = vpack.c.bf16 (%p4684_p6), %v4989_v20, %v4985_v19 }
0x105c   : > { %4934 = vst [vmem:[%s4933_s27] sm:$0xff] %v4931_v6  ;;  %v4977_v6 = vld [vmem:[#allocation14 + $0x708] sm:$0xff] (%p4684_p6)  ;;  %6704 = vmatprep.subr.bf16.mxu1 (%p4684_p6), %v6703_v15 }
0x105d   :  { %v6671_v60 = vpack.c.bf16 %v4981_v48, %v4977_v6  ;;  %v8559_v6 = vld [vmem:[#allocation3 + $0x18] sm:$0xff]   ;;  %v5744_v48 = vld [vmem:[%s8681_s7 + $0xc] sm:$0xf]  ;;  %s8614_s7 = smov 0  }
0x105e   :  { %v8565_v49 = vrot.slane %v5744_v48, %v7737_v52  ;;  %v8568_v39 = vrot.slane %v5744_v48, %v7739_v54  ;;  %v8571_v61 = vrot.slane %v5744_v48, %v7741_v55 }
0x105f   :  { %6672 = vmatprep.subr.bf16.mxu0 %v6671_v60  ;;  %6706 = vmatpush1.bf16.msra.mxu1 %v6705_v28 }
0x1060   :  { %6674 = vmatpush1.bf16.msra.mxu0 %v6673_v27  ;;  %6708 = vmatprep.subr.bf16.mxu1 %v6707_v32 }
0x1061   :  { %6676 = vmatprep.subr.bf16.mxu0 %v6675_v38 }
0x1063   :  { %6710 = vmatpush1.bf16.msra.mxu1 %v6709_v37  ;;  %v4935_v18 = vld [vmem:[#allocation18] sm:$0xff]  ;;  %v4936_v8 = vld [vmem:[#allocation18 + $0x8] sm:$0xff]  ;;  %v4937_v9 = vld [vmem:[#allocation18 + $0x10] sm:$0xff] }
0x1064   :  { %6678 = vmatpush1.bf16.msra.mxu0 %v6677_v51  ;;  %6712 = vmatprep.subr.bf16.mxu1 %v6711_v22  ;;  %v4938_v42 = vld [vmem:[#allocation18 + $0x18] sm:$0xff]  ;;  %v4939_v10 = vld [vmem:[#allocation18 + $0x20] sm:$0xff]  ;;  %v4940_v17 = vld [vmem:[#allocation18 + $0x28] sm:$0xff] }
0x1065   :  { %6680 = vmatprep.subr.bf16.mxu0 %v6679_v43  ;;  %v4941_v11 = vld [vmem:[#allocation18 + $0x30] sm:$0xff]  ;;  %v4942_v12 = vld [vmem:[#allocation18 + $0x38] sm:$0xff] }
0x1067   :  { %6714 = vmatpush1.bf16.msra.mxu1 %v6713_v40 }
0x1068   :  { %6682 = vmatpush1.bf16.msra.mxu0 %v6681_v53  ;;  %6716 = vmatprep.subr.bf16.mxu1 %v6715_v2 }
0x1069   :  { %6684 = vmatprep.subr.bf16.mxu0 %v6683_v62 }
0x106b   :  { %6718 = vmatpush1.bf16.msra.mxu1 %v6717_v7 }
0x106c   :  { %6686 = vmatpush1.bf16.msra.mxu0 %v6685_v5 }
0x106e   :  { %5209 = vmatmul.mubr.f32.vlgmr.msra.gmra.mrb[0].mxu1 %v4935_v18 }
0x106f   :  { %5096 = vmatmul.mubr.f32.vlgmr.msra.gmra.mrb[0].mxu0 %v4935_v18  ;;  %5214 = vmatprep.mubr.f32.mxu1 %v7542_v0 }
0x1070   :  { %5101 = vmatprep.mubr.f32.mxu0 %v7542_v0 }
0x1072   :  { %5215 = vmatmul.mubr.f32.gmra.mrb[2].mxu1 %v4936_v8 }
0x1073   :  { %5102 = vmatmul.mubr.f32.gmra.mrb[2].mxu0 %v4936_v8  ;;  %5220 = vmatprep.mubr.f32.mxu1 %v7542_v0 }
0x1074   :  { %5107 = vmatprep.mubr.f32.mxu0 %v7542_v0 }
0x1076   :  { %5221 = vmatmul.mubr.f32.gmra.mrb[4].mxu1 %v4937_v9 }
0x1077   :  { %5108 = vmatmul.mubr.f32.gmra.mrb[4].mxu0 %v4937_v9  ;;  %5226 = vmatprep.mubr.f32.mxu1 %v7542_v0 }
0x1078   :  { %5113 = vmatprep.mubr.f32.mxu0 %v7542_v0 }
0x107a   :  { %5227 = vmatmul.mubr.f32.gmra.mrb[6].mxu1 %v4938_v42 }
0x107b   :  { %5114 = vmatmul.mubr.f32.gmra.mrb[6].mxu0 %v4938_v42  ;;  %5232 = vmatprep.mubr.f32.mxu1 %v7542_v0 }
0x107c   :  { %5119 = vmatprep.mubr.f32.mxu0 %v7542_v0 }
0x107e   :  { %5233 = vmatmul.mubr.f32.gmra.mrb[8].mxu1 %v4939_v10 }
0x107f   :  { %5120 = vmatmul.mubr.f32.gmra.mrb[8].mxu0 %v4939_v10  ;;  %5238 = vmatprep.mubr.f32.mxu1 %v7542_v0 }
0x1080   :  { %5125 = vmatprep.mubr.f32.mxu0 %v7542_v0 }
0x1082   :  { %5239 = vmatmul.mubr.f32.gmra.mrb[10].mxu1 %v4940_v17 }
0x1083   :  { %5126 = vmatmul.mubr.f32.gmra.mrb[10].mxu0 %v4940_v17  ;;  %5244 = vmatprep.mubr.f32.mxu1 %v7542_v0 }
0x1084   :  { %5131 = vmatprep.mubr.f32.mxu0 %v7542_v0 }
0x1086   :  { %5245 = vmatmul.mubr.f32.gmra.mrb[12].mxu1 %v4941_v11 }
0x1087   :  { %5132 = vmatmul.mubr.f32.gmra.mrb[12].mxu0 %v4941_v11  ;;  %5250 = vmatprep.mubr.f32.mxu1 %v7542_v0 }
0x1088   :  { %5137 = vmatprep.mubr.f32.mxu0 %v7542_v0  ;;  %v8574_v0 = vrot.slane %v5744_v48, %v7743_v56 }
0x108a   :  { %5251 = vmatmul.mubr.f32.gmra.mrb[14].mxu1 %v4942_v12 }
0x108b   :  { %5138 = vmatmul.mubr.f32.gmra.mrb[14].mxu0 %v4942_v12 }
0x1141   :  { %v5210_v50 = vpop.f32.mrb[0].mxu1 }
0x1142   :  { %v5097_v59 = vpop.f32.mrb[0].mxu0  ;;  %v5211_v14 = vadd.f32 %v5210_v50, %v8568_v39  ;;  %v5212_v52 = vpop.f32.mrb[1].mxu1 }
0x1143   :  { %v5098_v60 = vadd.f32 %v5097_v59, %v8565_v49  ;;  %v5099_v16 = vpop.f32.mrb[1].mxu0  ;;  %v5213_v54 = vadd.f32 %v5212_v52, %v8574_v0 }
0x1144   :  { %v5100_v15 = vadd.f32 %v5099_v16, %v8571_v61  ;;  %5259 = vst [vmem:[#allocation4 + $0x10] sm:$0xff] %v5211_v14 }
0x1145   :  { %5257 = vst [vmem:[#allocation4] sm:$0xff] %v5098_v60  ;;  %5260 = vst [vmem:[#allocation4 + $0x18] sm:$0xff] %v5213_v54  ;;  %v5216_v57 = vpop.f32.mrb[2].mxu1 }
0x1146   :  { %5258 = vst [vmem:[#allocation4 + $0x8] sm:$0xff] %v5100_v15  ;;  %v5103_v55 = vpop.f32.mrb[2].mxu0  ;;  %v5217_v20 = vadd.f32 %v5216_v57, %v8568_v39  ;;  %v5218_v26 = vpop.f32.mrb[3].mxu1 }
0x1147   :  { %v5104_v56 = vadd.f32 %v5103_v55, %v8565_v49  ;;  %v5105_v19 = vpop.f32.mrb[3].mxu0  ;;  %v5219_v27 = vadd.f32 %v5218_v26, %v8574_v0 }
0x1148   :  { %v5106_v25 = vadd.f32 %v5105_v19, %v8571_v61  ;;  %5263 = vst [vmem:[#allocation4 + $0x30] sm:$0xff] %v5217_v20 }
0x1149   :  { %5261 = vst [vmem:[#allocation4 + $0x20] sm:$0xff] %v5104_v56  ;;  %5264 = vst [vmem:[#allocation4 + $0x38] sm:$0xff] %v5219_v27  ;;  %v5222_v29 = vpop.f32.mrb[4].mxu1 }
0x114a   :  { %5262 = vst [vmem:[#allocation4 + $0x28] sm:$0xff] %v5106_v25  ;;  %v5109_v28 = vpop.f32.mrb[4].mxu0  ;;  %v5223_v31 = vadd.f32 %v5222_v29, %v8568_v39  ;;  %v5224_v33 = vpop.f32.mrb[5].mxu1 }
0x114b   :  { %v5110_v38 = vadd.f32 %v5109_v28, %v8565_v49  ;;  %v5111_v30 = vpop.f32.mrb[5].mxu0  ;;  %v5225_v34 = vadd.f32 %v5224_v33, %v8574_v0 }
0x114c   :  { %v5112_v32 = vadd.f32 %v5111_v30, %v8571_v61  ;;  %5267 = vst [vmem:[#allocation4 + $0x50] sm:$0xff] %v5223_v31 }
0x114d   :  { %5265 = vst [vmem:[#allocation4 + $0x40] sm:$0xff] %v5110_v38  ;;  %5268 = vst [vmem:[#allocation4 + $0x58] sm:$0xff] %v5225_v34  ;;  %v5228_v13 = vpop.f32.mrb[6].mxu1 }
0x114e   :  { %5266 = vst [vmem:[#allocation4 + $0x48] sm:$0xff] %v5112_v32  ;;  %v5115_v35 = vpop.f32.mrb[6].mxu0  ;;  %v5229_v37 = vadd.f32 %v5228_v13, %v8568_v39  ;;  %v5230_v58 = vpop.f32.mrb[7].mxu1 }
0x114f   :  { %v5116_v36 = vadd.f32 %v5115_v35, %v8565_v49  ;;  %v5117_v51 = vpop.f32.mrb[7].mxu0  ;;  %v5231_v41 = vadd.f32 %v5230_v58, %v8574_v0 }
0x1150   :  { %v5118_v43 = vadd.f32 %v5117_v51, %v8571_v61  ;;  %5271 = vst [vmem:[#allocation4 + $0x70] sm:$0xff] %v5229_v37 }
0x1151   :  { %5269 = vst [vmem:[#allocation4 + $0x60] sm:$0xff] %v5116_v36  ;;  %5272 = vst [vmem:[#allocation4 + $0x78] sm:$0xff] %v5231_v41  ;;  %v5234_v23 = vpop.f32.mrb[8].mxu1 }
0x1152   :  { %5270 = vst [vmem:[#allocation4 + $0x68] sm:$0xff] %v5118_v43  ;;  %v5121_v21 = vpop.f32.mrb[8].mxu0  ;;  %v5235_v44 = vadd.f32 %v5234_v23, %v8568_v39  ;;  %v5236_v46 = vpop.f32.mrb[9].mxu1 }
0x1153   :  { %v5122_v22 = vadd.f32 %v5121_v21, %v8565_v49  ;;  %v5123_v24 = vpop.f32.mrb[9].mxu0  ;;  %v5237_v53 = vadd.f32 %v5236_v46, %v8574_v0 }
0x1154   :  { %v5124_v45 = vadd.f32 %v5123_v24, %v8571_v61  ;;  %5275 = vst [vmem:[#allocation4 + $0x90] sm:$0xff] %v5235_v44 }
0x1155   :  { %5273 = vst [vmem:[#allocation4 + $0x80] sm:$0xff] %v5122_v22  ;;  %5276 = vst [vmem:[#allocation4 + $0x98] sm:$0xff] %v5237_v53  ;;  %v5240_v63 = vpop.f32.mrb[10].mxu1 }
0x1156   :  { %5274 = vst [vmem:[#allocation4 + $0x88] sm:$0xff] %v5124_v45  ;;  %v5127_v40 = vpop.f32.mrb[10].mxu0  ;;  %v5241_v2 = vadd.f32 %v5240_v63, %v8568_v39  ;;  %v5242_v4 = vpop.f32.mrb[11].mxu1 }
0x1157   :  { %v5128_v62 = vadd.f32 %v5127_v40, %v8565_v49  ;;  %v5129_v1 = vpop.f32.mrb[11].mxu0  ;;  %v5243_v5 = vadd.f32 %v5242_v4, %v8574_v0 }
0x1158   :  { %v5130_v3 = vadd.f32 %v5129_v1, %v8571_v61  ;;  %5279 = vst [vmem:[#allocation4 + $0xb0] sm:$0xff] %v5241_v2 }
0x1159   :  { %5277 = vst [vmem:[#allocation4 + $0xa0] sm:$0xff] %v5128_v62  ;;  %5280 = vst [vmem:[#allocation4 + $0xb8] sm:$0xff] %v5243_v5  ;;  %v5246_v8 = vpop.f32.mrb[12].mxu1 }
0x115a   :  { %5278 = vst [vmem:[#allocation4 + $0xa8] sm:$0xff] %v5130_v3  ;;  %v5133_v7 = vpop.f32.mrb[12].mxu0  ;;  %v5247_v42 = vadd.f32 %v5246_v8, %v8568_v39  ;;  %v5248_v17 = vpop.f32.mrb[13].mxu1 }
0x115b   :  { %v5134_v18 = vadd.f32 %v5133_v7, %v8565_v49  ;;  %v5135_v9 = vpop.f32.mrb[13].mxu0  ;;  %v5249_v11 = vadd.f32 %v5248_v17, %v8574_v0 }
0x115c   :  { %v5136_v10 = vadd.f32 %v5135_v9, %v8571_v61  ;;  %5283 = vst [vmem:[#allocation4 + $0xd0] sm:$0xff] %v5247_v42 }
0x115d   :  { %5281 = vst [vmem:[#allocation4 + $0xc0] sm:$0xff] %v5134_v18  ;;  %5284 = vst [vmem:[#allocation4 + $0xd8] sm:$0xff] %v5249_v11  ;;  %v5252_v59 = vpop.f32.mrb[14].mxu1 }
0x115e   :  { %5282 = vst [vmem:[#allocation4 + $0xc8] sm:$0xff] %v5136_v10  ;;  %v5139_v12 = vpop.f32.mrb[14].mxu0  ;;  %v5253_v50 = vadd.f32 %v5252_v59, %v8568_v39  ;;  %v5254_v14 = vpop.f32.mrb[15].mxu1 }
0x115f   :  { %v5140_v48 = vadd.f32 %v5139_v12, %v8565_v49  ;;  %v5141_v60 = vpop.f32.mrb[15].mxu0  ;;  %v5255_v15 = vadd.f32 %v5254_v14, %v8574_v0 }
0x1160   :  { %v5142_v16 = vadd.f32 %v5141_v60, %v8571_v61  ;;  %5287 = vst [vmem:[#allocation4 + $0xf0] sm:$0xff] %v5253_v50 }
0x1161   :  { %5285 = vst [vmem:[#allocation4 + $0xe0] sm:$0xff] %v5140_v48  ;;  %5288 = vst [vmem:[#allocation4 + $0xf8] sm:$0xff] %v5255_v15 }
0x1162   :  { %5286 = vst [vmem:[#allocation4 + $0xe8] sm:$0xff] %v5142_v16 }
0x1163 LB: > { %v5308_v49 = vld [vmem:[#allocation16 + $0x608] sm:$0xff]  ;;  %v5307_v61 = vld [vmem:[#allocation16 + $0x600] sm:$0xff]  ;;  %v7550_v56 = vmov 0.0   ;;  %v5310_v32 = vld [vmem:[#allocation16 + $0x618] sm:$0xff]  ;;  %s5758_s24 = sshll.u32 %s7527_s7, 5  ;;  %s5750_s11 = sshll.u32 %s7527_s7, 3  ;;  %s7527_s7 = sphi %s8614_s7, %s5296_s7   ;;  %v7523_v47 = vphi %v8557_v47, %v5540_v47   ;;  %v7519_v6 = vphi %v8559_v6, %v5538_v6  }
0x1164   : > { %v5312_v39 = vld [vmem:[#allocation16 + $0x628] sm:$0xff]  ;;  %v5311_v52 = vld [vmem:[#allocation16 + $0x620] sm:$0xff]  ;;  %5435 = vmatprep.mubr.f32.mxu0 %v7550_v56  ;;  %5506 = vmatprep.mubr.f32.mxu1 %v7550_v56  ;;  %v5314_v33 = vld [vmem:[#allocation16 + $0x638] sm:$0xff]  ;;  %s5301_s29 = scalar_lea.vmem [#allocation4], %s5758_s24  ;;  %s5542_s0 = scalar_lea.vmem [#allocation18], %s5750_s11 }
0x1165   : > { %v6719_v0 = vpack.c.bf16 %v5312_v39, %v5308_v49  ;;  %v5316_v54 = vld [vmem:[#allocation16 + $0x648] sm:$0xff]  ;;  %v6721_v57 = vpack.c.bf16 %v5311_v52, %v5307_v61  ;;  %v5315_v20 = vld [vmem:[#allocation16 + $0x640] sm:$0xff]  ;;  %v6751_v35 = vpack.c.bf16 %v5314_v33, %v5310_v32  ;;  %v5309_v36 = vld [vmem:[#allocation16 + $0x610] sm:$0xff]  ;;  %s5296_s7 = sadd.s32 1, %s7527_s7  }
0x1166   : > { %v5320_v55 = vld [vmem:[#allocation16 + $0x668] sm:$0xff]  ;;  %v5319_v25 = vld [vmem:[#allocation16 + $0x660] sm:$0xff]  ;;  %v5313_v13 = vld [vmem:[#allocation16 + $0x630] sm:$0xff]  ;;  %p5293_p7 = scmp.ge.s32.totalorder %s5296_s7, 8  }
0x1167   : > { %v6723_v19 = vpack.c.bf16 %v5320_v55, %v5316_v54  ;;  %v5324_v26 = vld [vmem:[#allocation16 + $0x688] sm:$0xff]  ;;  %6720 = vmatprep.subr.bf16.mxu0 %v6719_v0  ;;  %v6725_v28 = vpack.c.bf16 %v5319_v25, %v5315_v20  ;;  %v5323_v38 = vld [vmem:[#allocation16 + $0x680] sm:$0xff]  ;;  %v6753_v51 = vpack.c.bf16 %v5313_v13, %v5309_v36  ;;  %6752 = vmatprep.subr.bf16.mxu1 %v6751_v35  ;;  %v5318_v43 = vld [vmem:[#allocation16 + $0x658] sm:$0xff]  ;;  %s7551_s30 = smov (%p5293_p7), [#allocation17]   ;;  %s7552_s15 = smov (%p5293_p7), [#allocation18]  }
0x1168   : > { %v5328_v27 = vld [vmem:[#allocation16 + $0x6a8] sm:$0xff]  ;;  %6722 = vmatpush1.bf16.msra.mxu0 %v6721_v57  ;;  %v5327_v29 = vld [vmem:[#allocation16 + $0x6a0] sm:$0xff]  ;;  %v5322_v58 = vld [vmem:[#allocation16 + $0x678] sm:$0xff]  ;;  %s5549_s13 = sshll.u32 (%p5293_p7), %s7551_s30, 4  ;;  %s5561_s4 = sshll.u32 (%p5293_p7), %s7552_s15, 4  ;;  %s5550_s13 = int_to_ptr.vmem [resolvable:$true] %s5549_s13  ;;  %s8637_s4 = int_to_ptr.vmem [resolvable:$true] %s5561_s4 }
0x1169   : > { %6724 = vmatprep.subr.bf16.mxu0 %v6723_v19  ;;  %v6727_v30 = vpack.c.bf16 %v5328_v27, %v5324_v26  ;;  %v5332_v31 = vld [vmem:[#allocation16 + $0x6c8] sm:$0xff]  ;;  %v6729_v37 = vpack.c.bf16 %v5327_v29, %v5323_v38  ;;  %v5317_v41 = vld [vmem:[#allocation16 + $0x650] sm:$0xff]  ;;  %v5331_v22 = vld [vmem:[#allocation16 + $0x6c0] sm:$0xff]  ;;  %6754 = vmatpush1.bf16.msra.mxu1 %v6753_v51  ;;  %v6755_v24 = vpack.c.bf16 %v5322_v58, %v5318_v43  ;;  %s7281_s1 = scalar_lea.vmem (%p5293_p7), %s5550_s13, 2048  ;;  %p7286_p9 = scmp.lt.s32.totalorder (%p5293_p7), %s5550_s13, %s5550_s13 }
0x116a   : > { %v5336_v34 = vld [vmem:[#allocation16 + $0x6e8] sm:$0xff]  ;;  %v5335_v23 = vld [vmem:[#allocation16 + $0x6e0] sm:$0xff]  ;;  %v5321_v44 = vld [vmem:[#allocation16 + $0x670] sm:$0xff]  ;;  %p7282_p8 = scmp.ne.s32.totalorder (%p5293_p7), %s5550_s13, %s7281_s1  ;;  %p7287_p10 = scmp.lt.s32.totalorder (%p5293_p7), %s7281_s1, %s7281_s1 }
0x116b   : > { %v6731_v21 = vpack.c.bf16 %v5336_v34, %v5332_v31  ;;  %v5340_v45 = vld [vmem:[#allocation16 + $0x708] sm:$0xff]  ;;  %v6757_v53 = vpack.c.bf16 %v5321_v44, %v5317_v41  ;;  %v5326_v40 = vld [vmem:[#allocation16 + $0x698] sm:$0xff]  ;;  %6756 = vmatprep.subr.bf16.mxu1 %v6755_v24  ;;  %v5325_v63 = vld [vmem:[#allocation16 + $0x690] sm:$0xff]  ;;  %v6733_v2 = vpack.c.bf16 %v5335_v23, %v5331_v22 }
0x116c   : > { %6726 = vmatpush1.bf16.msra.mxu0 %v6725_v28  ;;  %v5344_v46 = vld [vmem:[#allocation16 + $0x728] sm:$0xff]  ;;  %v5330_v62 = vld [vmem:[#allocation16 + $0x6b8] sm:$0xff]  ;;  %v5329_v1 = vld [vmem:[#allocation16 + $0x6b0] sm:$0xff]  ;;  %p7288_p11 = por (%p5293_p7), %p7287_p10, %p7286_p9 }
0x116d   : > { %6728 = vmatprep.subr.bf16.mxu0 %v6727_v30  ;;  %v5339_v3 = vld [vmem:[#allocation16 + $0x700] sm:$0xff]  ;;  %v6759_v5 = vpack.c.bf16 %v5330_v62, %v5326_v40  ;;  %v6735_v7 = vpack.c.bf16 %v5344_v46, %v5340_v45  ;;  %6758 = vmatpush1.bf16.msra.mxu1 %v6757_v53  ;;  %v5348_v18 = vld [vmem:[#allocation16 + $0x748] sm:$0xff]  ;;  %v6761_v8 = vpack.c.bf16 %v5329_v1, %v5325_v63  ;;  %v5334_v9 = vld [vmem:[#allocation16 + $0x6d8] sm:$0xff] }
0x116e   : > { %v5343_v4 = vld [vmem:[#allocation16 + $0x720] sm:$0xff]  ;;  %v5338_v42 = vld [vmem:[#allocation16 + $0x6f8] sm:$0xff]  ;;  %v5352_v10 = vld [vmem:[#allocation16 + $0x768] sm:$0xff]  ;;  %p7289_p12 = pnand (%p5293_p7), %p7288_p11, %p7282_p8 }
0x116f   : > { %6760 = vmatprep.subr.bf16.mxu1 %v6759_v5  ;;  %v6763_v17 = vpack.c.bf16 %v5338_v42, %v5334_v9  ;;  %v5333_v11 = vld [vmem:[#allocation16 + $0x6d0] sm:$0xff]  ;;  %v6737_v48 = vpack.c.bf16 %v5343_v4, %v5339_v3  ;;  %v5342_v59 = vld [vmem:[#allocation16 + $0x718] sm:$0xff]  ;;  %v6739_v50 = vpack.c.bf16 %v5352_v10, %v5348_v18  ;;  %v5347_v16 = vld [vmem:[#allocation16 + $0x740] sm:$0xff] }
0x1170   : > { %6730 = vmatpush1.bf16.msra.mxu0 %v6729_v37  ;;  %v5337_v12 = vld [vmem:[#allocation16 + $0x6f0] sm:$0xff]  ;;  %v5346_v60 = vld [vmem:[#allocation16 + $0x738] sm:$0xff]  ;;  %v5351_v14 = vld [vmem:[#allocation16 + $0x760] sm:$0xff] }
0x1171   : > { %6732 = vmatprep.subr.bf16.mxu0 %v6731_v21  ;;  %6762 = vmatpush1.bf16.msra.mxu1 %v6761_v8  ;;  %v5356_v15 = vld [vmem:[#allocation16 + $0x788] sm:$0xff]  ;;  %v6765_v49 = vpack.c.bf16 %v5337_v12, %v5333_v11  ;;  %v6767_v61 = vpack.c.bf16 %v5346_v60, %v5342_v59  ;;  %v5341_v0 = vld [vmem:[#allocation16 + $0x710] sm:$0xff]  ;;  %v5350_v54 = vld [vmem:[#allocation16 + $0x758] sm:$0xff]  ;;  %v6741_v56 = vpack.c.bf16 %v5351_v14, %v5347_v16 }
0x1172   : > { %v5360_v39 = vld [vmem:[#allocation16 + $0x7a8] sm:$0xff]  ;;  %6764 = vmatprep.subr.bf16.mxu1 %v6763_v17  ;;  %v5345_v52 = vld [vmem:[#allocation16 + $0x730] sm:$0xff]  ;;  %v5354_v55 = vld [vmem:[#allocation16 + $0x778] sm:$0xff] }
0x1173   : > { %v6743_v57 = vpack.c.bf16 %v5360_v39, %v5356_v15  ;;  %v5355_v19 = vld [vmem:[#allocation16 + $0x780] sm:$0xff]  ;;  %v5364_v25 = vld [vmem:[#allocation16 + $0x7c8] sm:$0xff]  ;;  %v6769_v26 = vpack.c.bf16 %v5345_v52, %v5341_v0  ;;  %v6771_v28 = vpack.c.bf16 %v5354_v55, %v5350_v54  ;;  %v5349_v38 = vld [vmem:[#allocation16 + $0x750] sm:$0xff] }
0x1174   : > { %6734 = vmatpush1.bf16.msra.mxu0 %v6733_v2  ;;  %v5359_v20 = vld [vmem:[#allocation16 + $0x7a0] sm:$0xff]  ;;  %v5368_v27 = vld [vmem:[#allocation16 + $0x7e8] sm:$0xff]  ;;  %v5353_v29 = vld [vmem:[#allocation16 + $0x770] sm:$0xff] }
0x1175   : > { %6736 = vmatprep.subr.bf16.mxu0 %v6735_v7  ;;  %6766 = vmatpush1.bf16.msra.mxu1 %v6765_v49  ;;  %v5358_v30 = vld [vmem:[#allocation16 + $0x798] sm:$0xff]  ;;  %v6745_v32 = vpack.c.bf16 %v5359_v20, %v5355_v19  ;;  %v6747_v33 = vpack.c.bf16 %v5368_v27, %v5364_v25  ;;  %v5363_v34 = vld [vmem:[#allocation16 + $0x7c0] sm:$0xff]  ;;  %v6773_v36 = vpack.c.bf16 %v5353_v29, %v5349_v38  ;;  %v5357_v51 = vld [vmem:[#allocation16 + $0x790] sm:$0xff] }
0x1176   : > { %6768 = vmatprep.subr.bf16.mxu1 %v6767_v61  ;;  %v5362_v31 = vld [vmem:[#allocation16 + $0x7b8] sm:$0xff]  ;;  %v5367_v35 = vld [vmem:[#allocation16 + $0x7e0] sm:$0xff]  ;;  %v5361_v37 = vld [vmem:[#allocation16 + $0x7b0] sm:$0xff] }
0x1177   : > { %v6775_v13 = vpack.c.bf16 %v5362_v31, %v5358_v30  ;;  %v5366_v43 = vld [vmem:[#allocation16 + $0x7d8] sm:$0xff]  ;;  %v6749_v41 = vpack.c.bf16 %v5367_v35, %v5363_v34  ;;  %v6777_v21 = vpack.c.bf16 %v5361_v37, %v5357_v51  ;;  %v5365_v23 = vld [vmem:[#allocation16 + $0x7d0] sm:$0xff]  ;;  %v5304_v3 = vld [vmem:[%s5301_s29 + $0x10] sm:$0xff] }
0x1178   : > { %6738 = vmatpush1.bf16.msra.mxu0 %v6737_v48  ;;  %v5370_v58 = vld [vmem:[#allocation16 + $0x7f8] sm:$0xff]  ;;  %v5369_v24 = vld [vmem:[#allocation16 + $0x7f0] sm:$0xff]  ;;  %v5305_v18 = vld [vmem:[%s5301_s29 + $0x18] sm:$0xff] }
0x1179   : > { %6740 = vmatprep.subr.bf16.mxu0 %v6739_v50  ;;  %6770 = vmatpush1.bf16.msra.mxu1 %v6769_v26  ;;  %v6779_v22 = vpack.c.bf16 %v5370_v58, %v5366_v43  ;;  %v6781_v44 = vpack.c.bf16 %v5369_v24, %v5365_v23  ;;  %v5302_v45 = vld [vmem:[%s5301_s29] sm:$0xff]  ;;  %v5303_v46 = vld [vmem:[%s5301_s29 + $0x8] sm:$0xff] }
0x117a   : > { %6772 = vmatprep.subr.bf16.mxu1 %v6771_v28 }
0x117c   : > { %6742 = vmatpush1.bf16.msra.mxu0 %v6741_v56 }
0x117d   : > { %6744 = vmatprep.subr.bf16.mxu0 %v6743_v57  ;;  %6774 = vmatpush1.bf16.msra.mxu1 %v6773_v36 }
0x117e   : > { %6776 = vmatprep.subr.bf16.mxu1 %v6775_v13 }
0x1180   : > { %6746 = vmatpush1.bf16.msra.mxu0 %v6745_v32 }
0x1181   : > { %6748 = vmatprep.subr.bf16.mxu0 %v6747_v33  ;;  %6778 = vmatpush1.bf16.msra.mxu1 %v6777_v21 }
0x1182   : > { %6780 = vmatprep.subr.bf16.mxu1 %v6779_v22 }
0x1184   : > { %6750 = vmatpush1.bf16.msra.mxu0 %v6749_v41 }
0x1185   : > { %6782 = vmatpush1.bf16.msra.mxu1 %v6781_v44 }
0x1187   : > { %5436 = vmatmul.mubr.f32.vlgmr.msra.gmra.mrb[0].mxu0 %v7523_v47 }
0x1188   : > { %5507 = vmatmul.mubr.f32.vlgmr.msra.gmra.mrb[0].mxu1 %v7523_v47 }
0x125a   : > { %v5437_v53 = vpop.f32.mrb[0].mxu0 }
0x125b   : > { %v5513_v40 = vadd.f32 %v5437_v53, %v5302_v45  ;;  %v5439_v62 = vpop.f32.mrb[1].mxu0  ;;  %v5508_v4 = vpop.f32.mrb[0].mxu1 }
0x125c   : > { %v5514_v63 = vadd.f32 %v5439_v62, %v5303_v46  ;;  %v5510_v5 = vpop.f32.mrb[1].mxu1  ;;  %v5515_v7 = vadd.f32 %v5508_v4, %v5304_v3 }
0x125d   : > { %v5747_v1 = vmul.f32 -1.442695, %v5513_v40  ;;  %v5516_v9 = vadd.f32 %v5510_v5, %v5305_v18 }
0x125e   : > { %v5748_v2 = vmul.f32 -1.442695, %v5514_v63  ;;  %v5749_v8 = vmul.f32 -1.442695, %v5515_v7 }
0x125f   : > { %7111 = vpow2.f32 %v5747_v1 }
0x1260   : > { %7113 = vpow2.f32 %v5748_v2 }
0x1261   : > { %7115 = vpow2.f32 %v5749_v8 }
0x1262   : > { %7117 = vtanh.f32 %v5516_v9 }
0x1269   : > { %v7112_v47 = vpop.eup %7111 }
0x126a   : > { %v7114_v42 = vpop.eup %7113  ;;  %v5526_v10 = vadd.f32 1.0, %v7112_v47 }
0x126b   : > { %v5527_v17 = vadd.f32 1.0, %v7114_v42  ;;  %v7116_v11 = vpop.eup %7115 }
0x126c   : > { %7119 = vrcp.f32 %v5526_v10  ;;  %v7118_v12 = vpop.eup %7117  ;;  %v5528_v59 = vadd.f32 1.0, %v7116_v11 }
0x126d   : > { %7121 = vrcp.f32 %v5527_v17 }
0x126e   : > { %7123 = vrcp.f32 %v5528_v59 }
0x1276   : > { %v7120_v48 = vpop.eup %7119 }
0x1277   : > { %v7122_v60 = vpop.eup %7121  ;;  %v5537_v50 = vmul.f32 %v7120_v48, %v7118_v12 }
0x1278   : > { %v5536_v16 = vmul.f32 %v7519_v6, %v7122_v60  ;;  %v7124_v14 = vpop.eup %7123 }
0x127a   : > { %v5538_v6 = vadd.f32 %v5537_v50, %v5536_v16  }
0x127c   : > { %7125 = vtanh.f32 %v5538_v6 }
0x1283   :  { %5295 = sbr.rel (!%p5293_p7) target bundleno = 4451 (0x1163), region = 261 }
0x1286   : > { %v7126_v15 = vpop.eup %7125 }
0x1287   : > { %v5540_v47 = vmul.f32 %v7126_v15, %v7124_v14  }
0x1289   : > { %5543 = vst [vmem:[%s5542_s0] sm:$0xff] %v5540_v47 }
0x128a   :  { %7292 = shalt.err (!%p7289_p12)
}
0x128b   :  { %s7293_s14 = scalar_lea.hbm %s8682_s8, 2048 }
0x128c   :  { %p7294_p13 = scmp.ne.s32.totalorder %s8682_s8, %s7293_s14  ;;  %p7297_p0 = scmp.lt.u32.totalorder %s7293_s14, %s8682_s8 }
0x128e   :  { %p7299_p1 = pnand %p7297_p0, %p7294_p13 }
0x1290   :  { %7302 = shalt.err (!%p7299_p1)
}
0x1291   :  { %5555 = dma.vmem_to_hbm [thread:$0]  %s5550_s13, 2048, %s8682_s8, [#allocation7], %s7530_s19, %s7530_s19, %s7531_s20  }
0x1292   :  { %s7303_s22 = scalar_lea.vmem %s8637_s4, 1024  ;;  %p7308_p3 = scmp.lt.s32.totalorder %s8637_s4, %s8637_s4 }
0x1293   :  { %p7304_p2 = scmp.ne.s32.totalorder %s8637_s4, %s7303_s22  ;;  %p7309_p4 = scmp.lt.s32.totalorder %s7303_s22, %s7303_s22 }
0x1295   :  { %p7310_p5 = por %p7309_p4, %p7308_p3 }
0x1297   :  { %p7311_p6 = pnand %p7310_p5, %p7304_p2 }
0x1299   :  { %7314 = shalt.err (!%p7311_p6)
}
0x129a   :  { %s7315_s23 = scalar_lea.hbm %s8683_s9, 1024 }
0x129b   :  { %p7316_p7 = scmp.ne.s32.totalorder %s8683_s9, %s7315_s23  ;;  %p7319_p8 = scmp.lt.u32.totalorder %s7315_s23, %s8683_s9 }
0x129d   :  { %p7321_p9 = pnand %p7319_p8, %p7316_p7 }
0x129f   :  { %7324 = shalt.err (!%p7321_p9)
}
0x12a0   :  { %5567 = dma.vmem_to_hbm [thread:$0]  %s8637_s4, 1024, %s8683_s9, [#allocation19], %s7530_s19, %s7530_s19, %s7531_s20  }
0x12a1   :  { %7429 = dma.done.wait [#allocation7], 2048  }
0x12a2   :  { %7430 = vsyncadd [#allocation7], 4294965248 }
0x12a3   :  { %7431 = dma.done.wait [#allocation19], 1024  }
0x12a4   :  { %7432 = vsyncadd [#allocation19], 4294966272 }
0x12a5   :  { %5574 = vsyncpa [#allocation6], 1 }
0x12a6   :  { %5575 = vsyncpa [#allocation9], 1 }
0x12a7   :  { %5576 = vsyncpa [#allocation12], 1 }
0x12a8   :  { %5577 = vsyncpa [#allocation15], 1 }
0x12a9   :  { %5578 = vsyncpa [#allocation7], 1 }
0x12aa   :  { %5579 = vsyncpa [#allocation19], 1 }

</bundles_post_ra>
